<compile_context>
chip_gen: v7x
topology: tpu7x:2x2x1
jax: 0.10.0
libtpu: 0.0.40
codegen_flags: <defaults>
</compile_context>

<pallas_src>
import jax
import jax.numpy as jnp
from jax.experimental import pallas as pl
from jax.experimental.pallas import tpu as pltpu

HIDDEN = 32  # LSTM hidden size per direction (bidirectional -> 64 features out)


# --------------------------- in-kernel building blocks ------------------------

def _conv3_same(x, w_cat, b):
    """'same'-padded K=3 conv as one matmul.

    x: (Cin, L) channels-on-sublanes, length-on-lanes.
    w_cat: (Cout, 3*Cin) with columns ordered [tap k=0 | k=1 | k=2].
    b: (Cout, 1).
    """
    c, l = x.shape
    zero = jnp.zeros((c, 1), x.dtype)
    x_m1 = jnp.concatenate([zero, x[:, : l - 1]], axis=1)   # x[:, l-1], zero at l=0
    x_p1 = jnp.concatenate([x[:, 1:], zero], axis=1)        # x[:, l+1], zero at l=L-1
    x_cat = jnp.concatenate([x_m1, x, x_p1], axis=0)        # (3*Cin, L)
    return jnp.dot(w_cat, x_cat, preferred_element_type=jnp.float32) + b


def _pool_select(y, parity):
    """y[:, parity::2] expressed as a matmul against a 0/1 selection matrix."""
    l = y.shape[1]
    lp = l // 2
    rows = jax.lax.broadcasted_iota(jnp.int32, (l, lp), 0)
    cols = jax.lax.broadcasted_iota(jnp.int32, (l, lp), 1)
    sel = jnp.where(rows == 2 * cols + parity, 1.0, 0.0).astype(y.dtype)
    return jnp.dot(y, sel, preferred_element_type=jnp.float32)


def _maxpool2(y):
    # MaxPool1d(kernel=2, stride=2, ceil_mode=True); every length in this net is
    # even, so the ceil-mode padding never triggers.
    return jnp.maximum(_pool_select(y, 0), _pool_select(y, 1))


def _residual_block(x, w1, b1, w2, b2, ws, bs):
    h = jnp.maximum(_conv3_same(x, w1, b1), 0.0)                       # conv3 + relu
    sc = jnp.dot(ws, x, preferred_element_type=jnp.float32) + bs       # 1x1 shortcut
    y = jnp.maximum(_conv3_same(h, w2, b2) + sc, 0.0)                  # conv3 + add + relu
    return _maxpool2(y)


def _lstm_cell(gx_t, h, c, wh):
    """One LSTM step. gx_t already contains x_t @ W_ih + b (hoisted)."""
    H = HIDDEN
    gates = gx_t + jnp.dot(h, wh, preferred_element_type=jnp.float32)  # (1, 4H) = (1, 128)
    sg = jax.nn.sigmoid(gates)   # one full-vreg EUP pass
    tg = jnp.tanh(gates)         # one full-vreg EUP pass
    i = sg[:, 0:H]
    f = sg[:, H:2 * H]
    g = tg[:, 2 * H:3 * H]
    o = sg[:, 3 * H:4 * H]
    c_new = f * c + i * g
    h_new = o * jnp.tanh(c_new)
    return h_new, c_new


def _bilstm(x, wif, whf, bf, wir, whr, br):
    """Bidirectional single-layer LSTM (PyTorch gate order i,f,g,o). x: (T, F)."""
    T = x.shape[0]
    H = HIDDEN
    # Hoisted full-sequence input projections (both directions).
    gx_f = jnp.dot(x, wif, preferred_element_type=jnp.float32) + bf    # (T, 4H)
    gx_r = jnp.dot(x, wir, preferred_element_type=jnp.float32) + br    # (T, 4H)

    h = jnp.zeros((1, H), jnp.float32)
    c = jnp.zeros((1, H), jnp.float32)
    outs_f = []
    for t in range(T):                      # statically unrolled (T == batch == 2)
        h, c = _lstm_cell(gx_f[t:t + 1, :], h, c, whf)
        outs_f.append(h)

    h = jnp.zeros((1, H), jnp.float32)
    c = jnp.zeros((1, H), jnp.float32)
    outs_r = [None] * T
    for t in range(T - 1, -1, -1):
        h, c = _lstm_cell(gx_r[t:t + 1, :], h, c, whr)
        outs_r[t] = h

    fwd = jnp.concatenate(outs_f, axis=0)   # (T, H)
    rev = jnp.concatenate(outs_r, axis=0)   # (T, H)
    return jnp.concatenate([fwd, rev], axis=1)  # (T, 2H)


# --------------------------- Pallas kernels -----------------------------------

def _conv_stack_kernel(*refs):
    # refs = [x_ref, (w1,b1,w2,b2,ws,bs) * n_blocks, out_ref]
    x_ref = refs[0]
    out_ref = refs[-1]
    p = refs[1:-1]
    x = x_ref[...]                                   # (1, 832)
    for i in range(len(p) // 6):
        w1, b1, w2, b2, ws, bs = (r[...] for r in p[6 * i: 6 * i + 6])
        x = _residual_block(x, w1, b1, w2, b2, ws, bs)
    out_ref[...] = x                                 # (64, 13)


def _lstm_head_kernel(feat_ref, *rest):
    # rest = [(wif,whf,bf,wir,whr,br) * 3, linear_w, linear_b, enc_ref, out3_ref]
    *param_refs, lw_ref, lb_ref, enc_ref, out3_ref = rest
    h = feat_ref[...]                                # (T, 832)
    h2 = None
    for li in range(3):
        wif, whf, bf, wir, whr, br = (r[...] for r in param_refs[6 * li: 6 * li + 6])
        h = _bilstm(h, wif, whf, bf, wir, whr, br)   # (T, 64)
        if li == 1:
            h2 = h
    enc_ref[...] = jnp.dot(h2, lw_ref[...], preferred_element_type=jnp.float32) + lb_ref[...]
    out3_ref[...] = h


# --------------------------- wrappers ------------------------------------------

def conv_stack(x, blocks):
    """x: (B, 1, L) NCW -> (B, 64, L / 2**len(blocks)) via one fused pallas_call."""
    B, cin, L = x.shape
    cout_final = blocks[-1]['w1'].shape[0]
    L_final = L // (2 ** len(blocks))

    inputs = [x]
    in_specs = [pl.BlockSpec((None, cin, L), lambda b: (b, 0, 0))]
    for blk in blocks:
        for name in ('w1', 'b1', 'w2', 'b2', 'ws', 'bs'):
            arr = blk[name]
            inputs.append(arr)
            in_specs.append(pl.BlockSpec(arr.shape, lambda b: (0, 0)))  # all 2-D, grid-invariant

    return pl.pallas_call(
        _conv_stack_kernel,
        grid=(B,),
        in_specs=in_specs,
        out_specs=pl.BlockSpec((None, cout_final, L_final), lambda b: (b, 0, 0)),
        out_shape=jax.ShapeDtypeStruct((B, cout_final, L_final), jnp.float32),
        compiler_params=pltpu.CompilerParams(dimension_semantics=("parallel",)),
    )(*inputs)


def lstm_head(feat, lstm1, lstm2, lstm3, linear_w, linear_b):
    """feat: (T, 832) -> (encoder (T, 2), bilstm3_output (T, 64)) in one pallas_call."""
    T = feat.shape[0]
    args = [feat]
    for p in (lstm1, lstm2, lstm3):
        args += [p['wif'], p['whf'], p['bf'], p['wir'], p['whr'], p['br']]
    args += [linear_w, linear_b]
    out_shape = (jax.ShapeDtypeStruct((T, 2), jnp.float32),
                 jax.ShapeDtypeStruct((T, 2 * HIDDEN), jnp.float32))
    return pl.pallas_call(_lstm_head_kernel, out_shape=out_shape)(*args)


def ienet_forward(x, params):
    # x: (B, 1, 832) NCW
    feat = conv_stack(x, params['blocks'])             # (B, 64, 13)
    B = feat.shape[0]
    feat = feat.reshape(B, -1)                         # torch x.view(B, -1) -> (B, 832)
    # unsqueeze(0): LSTM batch=1, seq_len=B, feature=832 -> keep the (B, 832) seq matrix.
    enc, h3 = lstm_head(feat, params['lstm1'], params['lstm2'], params['lstm3'],
                        params['linear_w'], params['linear_b'])
    return enc[None], h3[None]                         # restore leading unsqueeze(0) dim


# --------------------------- deterministic params -------------------------------

def _uniform(key, shape, scale):
    return jax.random.uniform(key, shape, jnp.float32, -scale, scale)


def init_params(key):
    chans = [(1, 8), (8, 16), (16, 16), (16, 32), (32, 64), (64, 64)]
    keys = iter(jax.random.split(key, 64))
    blocks = []
    for cin, cout in chans:
        s1 = 1.0 / (cin * 3) ** 0.5
        s2 = 1.0 / (cout * 3) ** 0.5
        ss = 1.0 / cin ** 0.5
        blocks.append({
            # conv3 weights packed as (Cout, 3*Cin): columns = [tap k=0 | k=1 | k=2]
            'w1': _uniform(next(keys), (cout, 3 * cin), s1),
            'b1': _uniform(next(keys), (cout, 1), s1),
            'w2': _uniform(next(keys), (cout, 3 * cout), s2),
            'b2': _uniform(next(keys), (cout, 1), s2),
            'ws': _uniform(next(keys), (cout, cin), ss),        # 1x1 shortcut
            'bs': _uniform(next(keys), (cout, 1), ss),
        })

    def lstm_params(in_f):
        s = 1.0 / HIDDEN ** 0.5
        return {
            'wif': _uniform(next(keys), (in_f, 4 * HIDDEN), s),
            'whf': _uniform(next(keys), (HIDDEN, 4 * HIDDEN), s),
            'bf': _uniform(next(keys), (1, 4 * HIDDEN), s),     # b_ih + b_hh folded together
            'wir': _uniform(next(keys), (in_f, 4 * HIDDEN), s),
            'whr': _uniform(next(keys), (HIDDEN, 4 * HIDDEN), s),
            'br': _uniform(next(keys), (1, 4 * HIDDEN), s),
        }

    sl = 1.0 / 64 ** 0.5
    return {
        'blocks': blocks,
        'lstm1': lstm_params(832),
        'lstm2': lstm_params(64),
        'lstm3': lstm_params(64),
        'linear_w': _uniform(next(keys), (64, 2), sl),
        'linear_b': _uniform(next(keys), (1, 2), sl),
    }


# --------------------------- main -----------------------------------------------

if __name__ == "__main__":
    B, L = 2, 832
    x = jax.random.normal(jax.random.PRNGKey(0), (B, 1, L), jnp.float32)
    params = init_params(jax.random.PRNGKey(1))

    fwd = jax.jit(ienet_forward)
    encoder, bilstm3_out = fwd(x, params)
    jax.block_until_ready((encoder, bilstm3_out))

    assert encoder.shape == (1, B, 2), encoder.shape
    assert bilstm3_out.shape == (1, B, 64), bilstm3_out.shape
    assert jnp.all(jnp.isfinite(encoder)) and jnp.all(jnp.isfinite(bilstm3_out))
    print("KERNEL_OK")
</pallas_src>

<mosaic_0001>
module attributes {stable_mosaic.version = 11 : i64} {
  func.func @_lstm_head_kernel(%arg0: memref<2x832xf32, #tpu.memory_space<vmem>>, %arg1: memref<832x128xf32, #tpu.memory_space<vmem>>, %arg2: memref<32x128xf32, #tpu.memory_space<vmem>>, %arg3: memref<1x128xf32, #tpu.memory_space<vmem>>, %arg4: memref<832x128xf32, #tpu.memory_space<vmem>>, %arg5: memref<32x128xf32, #tpu.memory_space<vmem>>, %arg6: memref<1x128xf32, #tpu.memory_space<vmem>>, %arg7: memref<64x128xf32, #tpu.memory_space<vmem>>, %arg8: memref<32x128xf32, #tpu.memory_space<vmem>>, %arg9: memref<1x128xf32, #tpu.memory_space<vmem>>, %arg10: memref<64x128xf32, #tpu.memory_space<vmem>>, %arg11: memref<32x128xf32, #tpu.memory_space<vmem>>, %arg12: memref<1x128xf32, #tpu.memory_space<vmem>>, %arg13: memref<64x128xf32, #tpu.memory_space<vmem>>, %arg14: memref<32x128xf32, #tpu.memory_space<vmem>>, %arg15: memref<1x128xf32, #tpu.memory_space<vmem>>, %arg16: memref<64x128xf32, #tpu.memory_space<vmem>>, %arg17: memref<32x128xf32, #tpu.memory_space<vmem>>, %arg18: memref<1x128xf32, #tpu.memory_space<vmem>>, %arg19: memref<64x2xf32, #tpu.memory_space<vmem>>, %arg20: memref<1x2xf32, #tpu.memory_space<vmem>>, %arg21: memref<2x2xf32, #tpu.memory_space<vmem>>, %arg22: memref<2x64xf32, #tpu.memory_space<vmem>>) attributes {dimension_semantics = [], scalar_prefetch = 0 : i64, scratch_operands = 0 : i64, tpu.core_type = #tpu.core_type<tc>} {
    %c0 = arith.constant 0 : index
    %c0_0 = arith.constant 0 : index
    %0 = vector.load %arg0[%c0, %c0_0] : memref<2x832xf32, #tpu.memory_space<vmem>>, vector<2x832xf32>
    %c0_1 = arith.constant 0 : index
    %c0_2 = arith.constant 0 : index
    %1 = vector.load %arg1[%c0_1, %c0_2] : memref<832x128xf32, #tpu.memory_space<vmem>>, vector<832x128xf32>
    %c0_3 = arith.constant 0 : index
    %c0_4 = arith.constant 0 : index
    %2 = vector.load %arg2[%c0_3, %c0_4] : memref<32x128xf32, #tpu.memory_space<vmem>>, vector<32x128xf32>
    %c0_5 = arith.constant 0 : index
    %c0_6 = arith.constant 0 : index
    %3 = vector.load %arg3[%c0_5, %c0_6] : memref<1x128xf32, #tpu.memory_space<vmem>>, vector<1x128xf32>
    %c0_7 = arith.constant 0 : index
    %c0_8 = arith.constant 0 : index
    %4 = vector.load %arg4[%c0_7, %c0_8] : memref<832x128xf32, #tpu.memory_space<vmem>>, vector<832x128xf32>
    %c0_9 = arith.constant 0 : index
    %c0_10 = arith.constant 0 : index
    %5 = vector.load %arg5[%c0_9, %c0_10] : memref<32x128xf32, #tpu.memory_space<vmem>>, vector<32x128xf32>
    %c0_11 = arith.constant 0 : index
    %c0_12 = arith.constant 0 : index
    %6 = vector.load %arg6[%c0_11, %c0_12] : memref<1x128xf32, #tpu.memory_space<vmem>>, vector<1x128xf32>
    %cst = arith.constant dense<0.000000e+00> : vector<2x128xf32>
    %7 = tpu.matmul %0, %1, %cst {dimension_numbers = #tpu.dot_dimension_numbers<[1], [0], [0], [1], [0, 0, 1, 1], [], []>} : vector<2x832xf32>, vector<832x128xf32>, vector<2x128xf32> -> vector<2x128xf32>
    %8 = vector.broadcast %3 : vector<1x128xf32> to vector<2x128xf32>
    %9 = arith.addf %7, %8 : vector<2x128xf32>
    %cst_13 = arith.constant dense<0.000000e+00> : vector<2x128xf32>
    %10 = tpu.matmul %0, %4, %cst_13 {dimension_numbers = #tpu.dot_dimension_numbers<[1], [0], [0], [1], [0, 0, 1, 1], [], []>} : vector<2x832xf32>, vector<832x128xf32>, vector<2x128xf32> -> vector<2x128xf32>
    %11 = vector.broadcast %6 : vector<1x128xf32> to vector<2x128xf32>
    %12 = arith.addf %10, %11 : vector<2x128xf32>
    %cst_14 = arith.constant 0.000000e+00 : f32
    %13 = vector.broadcast %cst_14 : f32 to vector<1x32xf32>
    %cst_15 = arith.constant 0.000000e+00 : f32
    %14 = vector.broadcast %cst_15 : f32 to vector<1x32xf32>
    %15 = vector.extract_strided_slice %9 {offsets = [0, 0], sizes = [1, 128], strides = [1, 1]} : vector<2x128xf32> to vector<1x128xf32>
    %cst_16 = arith.constant dense<0.000000e+00> : vector<1x128xf32>
    %16 = tpu.matmul %13, %2, %cst_16 {dimension_numbers = #tpu.dot_dimension_numbers<[1], [0], [0], [1], [0, 0, 1, 1], [], []>} : vector<1x32xf32>, vector<32x128xf32>, vector<1x128xf32> -> vector<1x128xf32>
    %17 = arith.addf %15, %16 : vector<1x128xf32>
    %18 = arith.negf %17 : vector<1x128xf32>
    %19 = math.exp %18 : vector<1x128xf32>
    %cst_17 = arith.constant 1.000000e+00 : f32
    %20 = vector.broadcast %cst_17 : f32 to vector<1x128xf32>
    %21 = arith.addf %20, %19 : vector<1x128xf32>
    %22 = arith.divf %20, %21 : vector<1x128xf32>
    %23 = math.tanh %17 : vector<1x128xf32>
    %24 = vector.extract_strided_slice %22 {offsets = [0, 0], sizes = [1, 32], strides = [1, 1]} : vector<1x128xf32> to vector<1x32xf32>
    %25 = vector.extract_strided_slice %22 {offsets = [0, 32], sizes = [1, 32], strides = [1, 1]} : vector<1x128xf32> to vector<1x32xf32>
    %26 = vector.extract_strided_slice %23 {offsets = [0, 64], sizes = [1, 32], strides = [1, 1]} : vector<1x128xf32> to vector<1x32xf32>
    %27 = vector.extract_strided_slice %22 {offsets = [0, 96], sizes = [1, 32], strides = [1, 1]} : vector<1x128xf32> to vector<1x32xf32>
    %28 = arith.mulf %25, %14 : vector<1x32xf32>
    %29 = arith.mulf %24, %26 : vector<1x32xf32>
    %30 = arith.addf %28, %29 : vector<1x32xf32>
    %31 = math.tanh %30 : vector<1x32xf32>
    %32 = arith.mulf %27, %31 : vector<1x32xf32>
    %33 = vector.extract_strided_slice %9 {offsets = [1, 0], sizes = [1, 128], strides = [1, 1]} : vector<2x128xf32> to vector<1x128xf32>
    %cst_18 = arith.constant dense<0.000000e+00> : vector<1x128xf32>
    %34 = tpu.matmul %32, %2, %cst_18 {dimension_numbers = #tpu.dot_dimension_numbers<[1], [0], [0], [1], [0, 0, 1, 1], [], []>} : vector<1x32xf32>, vector<32x128xf32>, vector<1x128xf32> -> vector<1x128xf32>
    %35 = arith.addf %33, %34 : vector<1x128xf32>
    %36 = arith.negf %35 : vector<1x128xf32>
    %37 = math.exp %36 : vector<1x128xf32>
    %cst_19 = arith.constant 1.000000e+00 : f32
    %38 = vector.broadcast %cst_19 : f32 to vector<1x128xf32>
    %39 = arith.addf %38, %37 : vector<1x128xf32>
    %40 = arith.divf %38, %39 : vector<1x128xf32>
    %41 = math.tanh %35 : vector<1x128xf32>
    %42 = vector.extract_strided_slice %40 {offsets = [0, 0], sizes = [1, 32], strides = [1, 1]} : vector<1x128xf32> to vector<1x32xf32>
    %43 = vector.extract_strided_slice %40 {offsets = [0, 32], sizes = [1, 32], strides = [1, 1]} : vector<1x128xf32> to vector<1x32xf32>
    %44 = vector.extract_strided_slice %41 {offsets = [0, 64], sizes = [1, 32], strides = [1, 1]} : vector<1x128xf32> to vector<1x32xf32>
    %45 = vector.extract_strided_slice %40 {offsets = [0, 96], sizes = [1, 32], strides = [1, 1]} : vector<1x128xf32> to vector<1x32xf32>
    %46 = arith.mulf %43, %30 : vector<1x32xf32>
    %47 = arith.mulf %42, %44 : vector<1x32xf32>
    %48 = arith.addf %46, %47 : vector<1x32xf32>
    %49 = math.tanh %48 : vector<1x32xf32>
    %50 = arith.mulf %45, %49 : vector<1x32xf32>
    %cst_20 = arith.constant 0.000000e+00 : f32
    %51 = vector.broadcast %cst_20 : f32 to vector<1x32xf32>
    %cst_21 = arith.constant 0.000000e+00 : f32
    %52 = vector.broadcast %cst_21 : f32 to vector<1x32xf32>
    %53 = vector.extract_strided_slice %12 {offsets = [1, 0], sizes = [1, 128], strides = [1, 1]} : vector<2x128xf32> to vector<1x128xf32>
    %cst_22 = arith.constant dense<0.000000e+00> : vector<1x128xf32>
    %54 = tpu.matmul %51, %5, %cst_22 {dimension_numbers = #tpu.dot_dimension_numbers<[1], [0], [0], [1], [0, 0, 1, 1], [], []>} : vector<1x32xf32>, vector<32x128xf32>, vector<1x128xf32> -> vector<1x128xf32>
    %55 = arith.addf %53, %54 : vector<1x128xf32>
    %56 = arith.negf %55 : vector<1x128xf32>
    %57 = math.exp %56 : vector<1x128xf32>
    %cst_23 = arith.constant 1.000000e+00 : f32
    %58 = vector.broadcast %cst_23 : f32 to vector<1x128xf32>
    %59 = arith.addf %58, %57 : vector<1x128xf32>
    %60 = arith.divf %58, %59 : vector<1x128xf32>
    %61 = math.tanh %55 : vector<1x128xf32>
    %62 = vector.extract_strided_slice %60 {offsets = [0, 0], sizes = [1, 32], strides = [1, 1]} : vector<1x128xf32> to vector<1x32xf32>
    %63 = vector.extract_strided_slice %60 {offsets = [0, 32], sizes = [1, 32], strides = [1, 1]} : vector<1x128xf32> to vector<1x32xf32>
    %64 = vector.extract_strided_slice %61 {offsets = [0, 64], sizes = [1, 32], strides = [1, 1]} : vector<1x128xf32> to vector<1x32xf32>
    %65 = vector.extract_strided_slice %60 {offsets = [0, 96], sizes = [1, 32], strides = [1, 1]} : vector<1x128xf32> to vector<1x32xf32>
    %66 = arith.mulf %63, %52 : vector<1x32xf32>
    %67 = arith.mulf %62, %64 : vector<1x32xf32>
    %68 = arith.addf %66, %67 : vector<1x32xf32>
    %69 = math.tanh %68 : vector<1x32xf32>
    %70 = arith.mulf %65, %69 : vector<1x32xf32>
    %71 = vector.extract_strided_slice %12 {offsets = [0, 0], sizes = [1, 128], strides = [1, 1]} : vector<2x128xf32> to vector<1x128xf32>
    %cst_24 = arith.constant dense<0.000000e+00> : vector<1x128xf32>
    %72 = tpu.matmul %70, %5, %cst_24 {dimension_numbers = #tpu.dot_dimension_numbers<[1], [0], [0], [1], [0, 0, 1, 1], [], []>} : vector<1x32xf32>, vector<32x128xf32>, vector<1x128xf32> -> vector<1x128xf32>
    %73 = arith.addf %71, %72 : vector<1x128xf32>
    %74 = arith.negf %73 : vector<1x128xf32>
    %75 = math.exp %74 : vector<1x128xf32>
    %cst_25 = arith.constant 1.000000e+00 : f32
    %76 = vector.broadcast %cst_25 : f32 to vector<1x128xf32>
    %77 = arith.addf %76, %75 : vector<1x128xf32>
    %78 = arith.divf %76, %77 : vector<1x128xf32>
    %79 = math.tanh %73 : vector<1x128xf32>
    %80 = vector.extract_strided_slice %78 {offsets = [0, 0], sizes = [1, 32], strides = [1, 1]} : vector<1x128xf32> to vector<1x32xf32>
    %81 = vector.extract_strided_slice %78 {offsets = [0, 32], sizes = [1, 32], strides = [1, 1]} : vector<1x128xf32> to vector<1x32xf32>
    %82 = vector.extract_strided_slice %79 {offsets = [0, 64], sizes = [1, 32], strides = [1, 1]} : vector<1x128xf32> to vector<1x32xf32>
    %83 = vector.extract_strided_slice %78 {offsets = [0, 96], sizes = [1, 32], strides = [1, 1]} : vector<1x128xf32> to vector<1x32xf32>
    %84 = arith.mulf %81, %68 : vector<1x32xf32>
    %85 = arith.mulf %80, %82 : vector<1x32xf32>
    %86 = arith.addf %84, %85 : vector<1x32xf32>
    %87 = math.tanh %86 : vector<1x32xf32>
    %88 = arith.mulf %83, %87 : vector<1x32xf32>
    %89 = tpu.concatenate %32, %50 in 0 : vector<1x32xf32>, vector<1x32xf32> -> vector<2x32xf32>
    %90 = tpu.concatenate %88, %70 in 0 : vector<1x32xf32>, vector<1x32xf32> -> vector<2x32xf32>
    %91 = tpu.concatenate %89, %90 in 1 : vector<2x32xf32>, vector<2x32xf32> -> vector<2x64xf32>
    %c0_26 = arith.constant 0 : index
    %c0_27 = arith.constant 0 : index
    %92 = vector.load %arg7[%c0_26, %c0_27] : memref<64x128xf32, #tpu.memory_space<vmem>>, vector<64x128xf32>
    %c0_28 = arith.constant 0 : index
    %c0_29 = arith.constant 0 : index
    %93 = vector.load %arg8[%c0_28, %c0_29] : memref<32x128xf32, #tpu.memory_space<vmem>>, vector<32x128xf32>
    %c0_30 = arith.constant 0 : index
    %c0_31 = arith.constant 0 : index
    %94 = vector.load %arg9[%c0_30, %c0_31] : memref<1x128xf32, #tpu.memory_space<vmem>>, vector<1x128xf32>
    %c0_32 = arith.constant 0 : index
    %c0_33 = arith.constant 0 : index
    %95 = vector.load %arg10[%c0_32, %c0_33] : memref<64x128xf32, #tpu.memory_space<vmem>>, vector<64x128xf32>
    %c0_34 = arith.constant 0 : index
    %c0_35 = arith.constant 0 : index
    %96 = vector.load %arg11[%c0_34, %c0_35] : memref<32x128xf32, #tpu.memory_space<vmem>>, vector<32x128xf32>
    %c0_36 = arith.constant 0 : index
    %c0_37 = arith.constant 0 : index
    %97 = vector.load %arg12[%c0_36, %c0_37] : memref<1x128xf32, #tpu.memory_space<vmem>>, vector<1x128xf32>
    %cst_38 = arith.constant dense<0.000000e+00> : vector<2x128xf32>
    %98 = tpu.matmul %91, %92, %cst_38 {dimension_numbers = #tpu.dot_dimension_numbers<[1], [0], [0], [1], [0, 0, 1, 1], [], []>} : vector<2x64xf32>, vector<64x128xf32>, vector<2x128xf32> -> vector<2x128xf32>
    %99 = vector.broadcast %94 : vector<1x128xf32> to vector<2x128xf32>
    %100 = arith.addf %98, %99 : vector<2x128xf32>
    %cst_39 = arith.constant dense<0.000000e+00> : vector<2x128xf32>
    %101 = tpu.matmul %91, %95, %cst_39 {dimension_numbers = #tpu.dot_dimension_numbers<[1], [0], [0], [1], [0, 0, 1, 1], [], []>} : vector<2x64xf32>, vector<64x128xf32>, vector<2x128xf32> -> vector<2x128xf32>
    %102 = vector.broadcast %97 : vector<1x128xf32> to vector<2x128xf32>
    %103 = arith.addf %101, %102 : vector<2x128xf32>
    %cst_40 = arith.constant 0.000000e+00 : f32
    %104 = vector.broadcast %cst_40 : f32 to vector<1x32xf32>
    %cst_41 = arith.constant 0.000000e+00 : f32
    %105 = vector.broadcast %cst_41 : f32 to vector<1x32xf32>
    %106 = vector.extract_strided_slice %100 {offsets = [0, 0], sizes = [1, 128], strides = [1, 1]} : vector<2x128xf32> to vector<1x128xf32>
    %cst_42 = arith.constant dense<0.000000e+00> : vector<1x128xf32>
    %107 = tpu.matmul %104, %93, %cst_42 {dimension_numbers = #tpu.dot_dimension_numbers<[1], [0], [0], [1], [0, 0, 1, 1], [], []>} : vector<1x32xf32>, vector<32x128xf32>, vector<1x128xf32> -> vector<1x128xf32>
    %108 = arith.addf %106, %107 : vector<1x128xf32>
    %109 = arith.negf %108 : vector<1x128xf32>
    %110 = math.exp %109 : vector<1x128xf32>
    %cst_43 = arith.constant 1.000000e+00 : f32
    %111 = vector.broadcast %cst_43 : f32 to vector<1x128xf32>
    %112 = arith.addf %111, %110 : vector<1x128xf32>
    %113 = arith.divf %111, %112 : vector<1x128xf32>
    %114 = math.tanh %108 : vector<1x128xf32>
    %115 = vector.extract_strided_slice %113 {offsets = [0, 0], sizes = [1, 32], strides = [1, 1]} : vector<1x128xf32> to vector<1x32xf32>
    %116 = vector.extract_strided_slice %113 {offsets = [0, 32], sizes = [1, 32], strides = [1, 1]} : vector<1x128xf32> to vector<1x32xf32>
    %117 = vector.extract_strided_slice %114 {offsets = [0, 64], sizes = [1, 32], strides = [1, 1]} : vector<1x128xf32> to vector<1x32xf32>
    %118 = vector.extract_strided_slice %113 {offsets = [0, 96], sizes = [1, 32], strides = [1, 1]} : vector<1x128xf32> to vector<1x32xf32>
    %119 = arith.mulf %116, %105 : vector<1x32xf32>
    %120 = arith.mulf %115, %117 : vector<1x32xf32>
    %121 = arith.addf %119, %120 : vector<1x32xf32>
    %122 = math.tanh %121 : vector<1x32xf32>
    %123 = arith.mulf %118, %122 : vector<1x32xf32>
    %124 = vector.extract_strided_slice %100 {offsets = [1, 0], sizes = [1, 128], strides = [1, 1]} : vector<2x128xf32> to vector<1x128xf32>
    %cst_44 = arith.constant dense<0.000000e+00> : vector<1x128xf32>
    %125 = tpu.matmul %123, %93, %cst_44 {dimension_numbers = #tpu.dot_dimension_numbers<[1], [0], [0], [1], [0, 0, 1, 1], [], []>} : vector<1x32xf32>, vector<32x128xf32>, vector<1x128xf32> -> vector<1x128xf32>
    %126 = arith.addf %124, %125 : vector<1x128xf32>
    %127 = arith.negf %126 : vector<1x128xf32>
    %128 = math.exp %127 : vector<1x128xf32>
    %cst_45 = arith.constant 1.000000e+00 : f32
    %129 = vector.broadcast %cst_45 : f32 to vector<1x128xf32>
    %130 = arith.addf %129, %128 : vector<1x128xf32>
    %131 = arith.divf %129, %130 : vector<1x128xf32>
    %132 = math.tanh %126 : vector<1x128xf32>
    %133 = vector.extract_strided_slice %131 {offsets = [0, 0], sizes = [1, 32], strides = [1, 1]} : vector<1x128xf32> to vector<1x32xf32>
    %134 = vector.extract_strided_slice %131 {offsets = [0, 32], sizes = [1, 32], strides = [1, 1]} : vector<1x128xf32> to vector<1x32xf32>
    %135 = vector.extract_strided_slice %132 {offsets = [0, 64], sizes = [1, 32], strides = [1, 1]} : vector<1x128xf32> to vector<1x32xf32>
    %136 = vector.extract_strided_slice %131 {offsets = [0, 96], sizes = [1, 32], strides = [1, 1]} : vector<1x128xf32> to vector<1x32xf32>
    %137 = arith.mulf %134, %121 : vector<1x32xf32>
    %138 = arith.mulf %133, %135 : vector<1x32xf32>
    %139 = arith.addf %137, %138 : vector<1x32xf32>
    %140 = math.tanh %139 : vector<1x32xf32>
    %141 = arith.mulf %136, %140 : vector<1x32xf32>
    %cst_46 = arith.constant 0.000000e+00 : f32
    %142 = vector.broadcast %cst_46 : f32 to vector<1x32xf32>
    %cst_47 = arith.constant 0.000000e+00 : f32
    %143 = vector.broadcast %cst_47 : f32 to vector<1x32xf32>
    %144 = vector.extract_strided_slice %103 {offsets = [1, 0], sizes = [1, 128], strides = [1, 1]} : vector<2x128xf32> to vector<1x128xf32>
    %cst_48 = arith.constant dense<0.000000e+00> : vector<1x128xf32>
    %145 = tpu.matmul %142, %96, %cst_48 {dimension_numbers = #tpu.dot_dimension_numbers<[1], [0], [0], [1], [0, 0, 1, 1], [], []>} : vector<1x32xf32>, vector<32x128xf32>, vector<1x128xf32> -> vector<1x128xf32>
    %146 = arith.addf %144, %145 : vector<1x128xf32>
    %147 = arith.negf %146 : vector<1x128xf32>
    %148 = math.exp %147 : vector<1x128xf32>
    %cst_49 = arith.constant 1.000000e+00 : f32
    %149 = vector.broadcast %cst_49 : f32 to vector<1x128xf32>
    %150 = arith.addf %149, %148 : vector<1x128xf32>
    %151 = arith.divf %149, %150 : vector<1x128xf32>
    %152 = math.tanh %146 : vector<1x128xf32>
    %153 = vector.extract_strided_slice %151 {offsets = [0, 0], sizes = [1, 32], strides = [1, 1]} : vector<1x128xf32> to vector<1x32xf32>
    %154 = vector.extract_strided_slice %151 {offsets = [0, 32], sizes = [1, 32], strides = [1, 1]} : vector<1x128xf32> to vector<1x32xf32>
    %155 = vector.extract_strided_slice %152 {offsets = [0, 64], sizes = [1, 32], strides = [1, 1]} : vector<1x128xf32> to vector<1x32xf32>
    %156 = vector.extract_strided_slice %151 {offsets = [0, 96], sizes = [1, 32], strides = [1, 1]} : vector<1x128xf32> to vector<1x32xf32>
    %157 = arith.mulf %154, %143 : vector<1x32xf32>
    %158 = arith.mulf %153, %155 : vector<1x32xf32>
    %159 = arith.addf %157, %158 : vector<1x32xf32>
    %160 = math.tanh %159 : vector<1x32xf32>
    %161 = arith.mulf %156, %160 : vector<1x32xf32>
    %162 = vector.extract_strided_slice %103 {offsets = [0, 0], sizes = [1, 128], strides = [1, 1]} : vector<2x128xf32> to vector<1x128xf32>
    %cst_50 = arith.constant dense<0.000000e+00> : vector<1x128xf32>
    %163 = tpu.matmul %161, %96, %cst_50 {dimension_numbers = #tpu.dot_dimension_numbers<[1], [0], [0], [1], [0, 0, 1, 1], [], []>} : vector<1x32xf32>, vector<32x128xf32>, vector<1x128xf32> -> vector<1x128xf32>
    %164 = arith.addf %162, %163 : vector<1x128xf32>
    %165 = arith.negf %164 : vector<1x128xf32>
    %166 = math.exp %165 : vector<1x128xf32>
    %cst_51 = arith.constant 1.000000e+00 : f32
    %167 = vector.broadcast %cst_51 : f32 to vector<1x128xf32>
    %168 = arith.addf %167, %166 : vector<1x128xf32>
    %169 = arith.divf %167, %168 : vector<1x128xf32>
    %170 = math.tanh %164 : vector<1x128xf32>
    %171 = vector.extract_strided_slice %169 {offsets = [0, 0], sizes = [1, 32], strides = [1, 1]} : vector<1x128xf32> to vector<1x32xf32>
    %172 = vector.extract_strided_slice %169 {offsets = [0, 32], sizes = [1, 32], strides = [1, 1]} : vector<1x128xf32> to vector<1x32xf32>
    %173 = vector.extract_strided_slice %170 {offsets = [0, 64], sizes = [1, 32], strides = [1, 1]} : vector<1x128xf32> to vector<1x32xf32>
    %174 = vector.extract_strided_slice %169 {offsets = [0, 96], sizes = [1, 32], strides = [1, 1]} : vector<1x128xf32> to vector<1x32xf32>
    %175 = arith.mulf %172, %159 : vector<1x32xf32>
    %176 = arith.mulf %171, %173 : vector<1x32xf32>
    %177 = arith.addf %175, %176 : vector<1x32xf32>
    %178 = math.tanh %177 : vector<1x32xf32>
    %179 = arith.mulf %174, %178 : vector<1x32xf32>
    %180 = tpu.concatenate %123, %141 in 0 : vector<1x32xf32>, vector<1x32xf32> -> vector<2x32xf32>
    %181 = tpu.concatenate %179, %161 in 0 : vector<1x32xf32>, vector<1x32xf32> -> vector<2x32xf32>
    %182 = tpu.concatenate %180, %181 in 1 : vector<2x32xf32>, vector<2x32xf32> -> vector<2x64xf32>
    %c0_52 = arith.constant 0 : index
    %c0_53 = arith.constant 0 : index
    %183 = vector.load %arg13[%c0_52, %c0_53] : memref<64x128xf32, #tpu.memory_space<vmem>>, vector<64x128xf32>
    %c0_54 = arith.constant 0 : index
    %c0_55 = arith.constant 0 : index
    %184 = vector.load %arg14[%c0_54, %c0_55] : memref<32x128xf32, #tpu.memory_space<vmem>>, vector<32x128xf32>
    %c0_56 = arith.constant 0 : index
    %c0_57 = arith.constant 0 : index
    %185 = vector.load %arg15[%c0_56, %c0_57] : memref<1x128xf32, #tpu.memory_space<vmem>>, vector<1x128xf32>
    %c0_58 = arith.constant 0 : index
    %c0_59 = arith.constant 0 : index
    %186 = vector.load %arg16[%c0_58, %c0_59] : memref<64x128xf32, #tpu.memory_space<vmem>>, vector<64x128xf32>
    %c0_60 = arith.constant 0 : index
    %c0_61 = arith.constant 0 : index
    %187 = vector.load %arg17[%c0_60, %c0_61] : memref<32x128xf32, #tpu.memory_space<vmem>>, vector<32x128xf32>
    %c0_62 = arith.constant 0 : index
    %c0_63 = arith.constant 0 : index
    %188 = vector.load %arg18[%c0_62, %c0_63] : memref<1x128xf32, #tpu.memory_space<vmem>>, vector<1x128xf32>
    %cst_64 = arith.constant dense<0.000000e+00> : vector<2x128xf32>
    %189 = tpu.matmul %182, %183, %cst_64 {dimension_numbers = #tpu.dot_dimension_numbers<[1], [0], [0], [1], [0, 0, 1, 1], [], []>} : vector<2x64xf32>, vector<64x128xf32>, vector<2x128xf32> -> vector<2x128xf32>
    %190 = vector.broadcast %185 : vector<1x128xf32> to vector<2x128xf32>
    %191 = arith.addf %189, %190 : vector<2x128xf32>
    %cst_65 = arith.constant dense<0.000000e+00> : vector<2x128xf32>
    %192 = tpu.matmul %182, %186, %cst_65 {dimension_numbers = #tpu.dot_dimension_numbers<[1], [0], [0], [1], [0, 0, 1, 1], [], []>} : vector<2x64xf32>, vector<64x128xf32>, vector<2x128xf32> -> vector<2x128xf32>
    %193 = vector.broadcast %188 : vector<1x128xf32> to vector<2x128xf32>
    %194 = arith.addf %192, %193 : vector<2x128xf32>
    %cst_66 = arith.constant 0.000000e+00 : f32
    %195 = vector.broadcast %cst_66 : f32 to vector<1x32xf32>
    %cst_67 = arith.constant 0.000000e+00 : f32
    %196 = vector.broadcast %cst_67 : f32 to vector<1x32xf32>
    %197 = vector.extract_strided_slice %191 {offsets = [0, 0], sizes = [1, 128], strides = [1, 1]} : vector<2x128xf32> to vector<1x128xf32>
    %cst_68 = arith.constant dense<0.000000e+00> : vector<1x128xf32>
    %198 = tpu.matmul %195, %184, %cst_68 {dimension_numbers = #tpu.dot_dimension_numbers<[1], [0], [0], [1], [0, 0, 1, 1], [], []>} : vector<1x32xf32>, vector<32x128xf32>, vector<1x128xf32> -> vector<1x128xf32>
    %199 = arith.addf %197, %198 : vector<1x128xf32>
    %200 = arith.negf %199 : vector<1x128xf32>
    %201 = math.exp %200 : vector<1x128xf32>
    %cst_69 = arith.constant 1.000000e+00 : f32
    %202 = vector.broadcast %cst_69 : f32 to vector<1x128xf32>
    %203 = arith.addf %202, %201 : vector<1x128xf32>
    %204 = arith.divf %202, %203 : vector<1x128xf32>
    %205 = math.tanh %199 : vector<1x128xf32>
    %206 = vector.extract_strided_slice %204 {offsets = [0, 0], sizes = [1, 32], strides = [1, 1]} : vector<1x128xf32> to vector<1x32xf32>
    %207 = vector.extract_strided_slice %204 {offsets = [0, 32], sizes = [1, 32], strides = [1, 1]} : vector<1x128xf32> to vector<1x32xf32>
    %208 = vector.extract_strided_slice %205 {offsets = [0, 64], sizes = [1, 32], strides = [1, 1]} : vector<1x128xf32> to vector<1x32xf32>
    %209 = vector.extract_strided_slice %204 {offsets = [0, 96], sizes = [1, 32], strides = [1, 1]} : vector<1x128xf32> to vector<1x32xf32>
    %210 = arith.mulf %207, %196 : vector<1x32xf32>
    %211 = arith.mulf %206, %208 : vector<1x32xf32>
    %212 = arith.addf %210, %211 : vector<1x32xf32>
    %213 = math.tanh %212 : vector<1x32xf32>
    %214 = arith.mulf %209, %213 : vector<1x32xf32>
    %215 = vector.extract_strided_slice %191 {offsets = [1, 0], sizes = [1, 128], strides = [1, 1]} : vector<2x128xf32> to vector<1x128xf32>
    %cst_70 = arith.constant dense<0.000000e+00> : vector<1x128xf32>
    %216 = tpu.matmul %214, %184, %cst_70 {dimension_numbers = #tpu.dot_dimension_numbers<[1], [0], [0], [1], [0, 0, 1, 1], [], []>} : vector<1x32xf32>, vector<32x128xf32>, vector<1x128xf32> -> vector<1x128xf32>
    %217 = arith.addf %215, %216 : vector<1x128xf32>
    %218 = arith.negf %217 : vector<1x128xf32>
    %219 = math.exp %218 : vector<1x128xf32>
    %cst_71 = arith.constant 1.000000e+00 : f32
    %220 = vector.broadcast %cst_71 : f32 to vector<1x128xf32>
    %221 = arith.addf %220, %219 : vector<1x128xf32>
    %222 = arith.divf %220, %221 : vector<1x128xf32>
    %223 = math.tanh %217 : vector<1x128xf32>
    %224 = vector.extract_strided_slice %222 {offsets = [0, 0], sizes = [1, 32], strides = [1, 1]} : vector<1x128xf32> to vector<1x32xf32>
    %225 = vector.extract_strided_slice %222 {offsets = [0, 32], sizes = [1, 32], strides = [1, 1]} : vector<1x128xf32> to vector<1x32xf32>
    %226 = vector.extract_strided_slice %223 {offsets = [0, 64], sizes = [1, 32], strides = [1, 1]} : vector<1x128xf32> to vector<1x32xf32>
    %227 = vector.extract_strided_slice %222 {offsets = [0, 96], sizes = [1, 32], strides = [1, 1]} : vector<1x128xf32> to vector<1x32xf32>
    %228 = arith.mulf %225, %212 : vector<1x32xf32>
    %229 = arith.mulf %224, %226 : vector<1x32xf32>
    %230 = arith.addf %228, %229 : vector<1x32xf32>
    %231 = math.tanh %230 : vector<1x32xf32>
    %232 = arith.mulf %227, %231 : vector<1x32xf32>
    %cst_72 = arith.constant 0.000000e+00 : f32
    %233 = vector.broadcast %cst_72 : f32 to vector<1x32xf32>
    %cst_73 = arith.constant 0.000000e+00 : f32
    %234 = vector.broadcast %cst_73 : f32 to vector<1x32xf32>
    %235 = vector.extract_strided_slice %194 {offsets = [1, 0], sizes = [1, 128], strides = [1, 1]} : vector<2x128xf32> to vector<1x128xf32>
    %cst_74 = arith.constant dense<0.000000e+00> : vector<1x128xf32>
    %236 = tpu.matmul %233, %187, %cst_74 {dimension_numbers = #tpu.dot_dimension_numbers<[1], [0], [0], [1], [0, 0, 1, 1], [], []>} : vector<1x32xf32>, vector<32x128xf32>, vector<1x128xf32> -> vector<1x128xf32>
    %237 = arith.addf %235, %236 : vector<1x128xf32>
    %238 = arith.negf %237 : vector<1x128xf32>
    %239 = math.exp %238 : vector<1x128xf32>
    %cst_75 = arith.constant 1.000000e+00 : f32
    %240 = vector.broadcast %cst_75 : f32 to vector<1x128xf32>
    %241 = arith.addf %240, %239 : vector<1x128xf32>
    %242 = arith.divf %240, %241 : vector<1x128xf32>
    %243 = math.tanh %237 : vector<1x128xf32>
    %244 = vector.extract_strided_slice %242 {offsets = [0, 0], sizes = [1, 32], strides = [1, 1]} : vector<1x128xf32> to vector<1x32xf32>
    %245 = vector.extract_strided_slice %242 {offsets = [0, 32], sizes = [1, 32], strides = [1, 1]} : vector<1x128xf32> to vector<1x32xf32>
    %246 = vector.extract_strided_slice %243 {offsets = [0, 64], sizes = [1, 32], strides = [1, 1]} : vector<1x128xf32> to vector<1x32xf32>
    %247 = vector.extract_strided_slice %242 {offsets = [0, 96], sizes = [1, 32], strides = [1, 1]} : vector<1x128xf32> to vector<1x32xf32>
    %248 = arith.mulf %245, %234 : vector<1x32xf32>
    %249 = arith.mulf %244, %246 : vector<1x32xf32>
    %250 = arith.addf %248, %249 : vector<1x32xf32>
    %251 = math.tanh %250 : vector<1x32xf32>
    %252 = arith.mulf %247, %251 : vector<1x32xf32>
    %253 = vector.extract_strided_slice %194 {offsets = [0, 0], sizes = [1, 128], strides = [1, 1]} : vector<2x128xf32> to vector<1x128xf32>
    %cst_76 = arith.constant dense<0.000000e+00> : vector<1x128xf32>
    %254 = tpu.matmul %252, %187, %cst_76 {dimension_numbers = #tpu.dot_dimension_numbers<[1], [0], [0], [1], [0, 0, 1, 1], [], []>} : vector<1x32xf32>, vector<32x128xf32>, vector<1x128xf32> -> vector<1x128xf32>
    %255 = arith.addf %253, %254 : vector<1x128xf32>
    %256 = arith.negf %255 : vector<1x128xf32>
    %257 = math.exp %256 : vector<1x128xf32>
    %cst_77 = arith.constant 1.000000e+00 : f32
    %258 = vector.broadcast %cst_77 : f32 to vector<1x128xf32>
    %259 = arith.addf %258, %257 : vector<1x128xf32>
    %260 = arith.divf %258, %259 : vector<1x128xf32>
    %261 = math.tanh %255 : vector<1x128xf32>
    %262 = vector.extract_strided_slice %260 {offsets = [0, 0], sizes = [1, 32], strides = [1, 1]} : vector<1x128xf32> to vector<1x32xf32>
    %263 = vector.extract_strided_slice %260 {offsets = [0, 32], sizes = [1, 32], strides = [1, 1]} : vector<1x128xf32> to vector<1x32xf32>
    %264 = vector.extract_strided_slice %261 {offsets = [0, 64], sizes = [1, 32], strides = [1, 1]} : vector<1x128xf32> to vector<1x32xf32>
    %265 = vector.extract_strided_slice %260 {offsets = [0, 96], sizes = [1, 32], strides = [1, 1]} : vector<1x128xf32> to vector<1x32xf32>
    %266 = arith.mulf %263, %250 : vector<1x32xf32>
    %267 = arith.mulf %262, %264 : vector<1x32xf32>
    %268 = arith.addf %266, %267 : vector<1x32xf32>
    %269 = math.tanh %268 : vector<1x32xf32>
    %270 = arith.mulf %265, %269 : vector<1x32xf32>
    %271 = tpu.concatenate %214, %232 in 0 : vector<1x32xf32>, vector<1x32xf32> -> vector<2x32xf32>
    %272 = tpu.concatenate %270, %252 in 0 : vector<1x32xf32>, vector<1x32xf32> -> vector<2x32xf32>
    %273 = tpu.concatenate %271, %272 in 1 : vector<2x32xf32>, vector<2x32xf32> -> vector<2x64xf32>
    %c0_78 = arith.constant 0 : index
    %c0_79 = arith.constant 0 : index
    %274 = vector.load %arg19[%c0_78, %c0_79] : memref<64x2xf32, #tpu.memory_space<vmem>>, vector<64x2xf32>
    %cst_80 = arith.constant dense<0.000000e+00> : vector<2x2xf32>
    %275 = tpu.matmul %182, %274, %cst_80 {dimension_numbers = #tpu.dot_dimension_numbers<[1], [0], [0], [1], [0, 0, 1, 1], [], []>} : vector<2x64xf32>, vector<64x2xf32>, vector<2x2xf32> -> vector<2x2xf32>
    %c0_81 = arith.constant 0 : index
    %c0_82 = arith.constant 0 : index
    %276 = vector.load %arg20[%c0_81, %c0_82] : memref<1x2xf32, #tpu.memory_space<vmem>>, vector<1x2xf32>
    %277 = vector.broadcast %276 : vector<1x2xf32> to vector<2x2xf32>
    %278 = arith.addf %275, %277 : vector<2x2xf32>
    %c0_83 = arith.constant 0 : index
    %c0_84 = arith.constant 0 : index
    %279 = vector.load %arg21[%c0_83, %c0_84] : memref<2x2xf32, #tpu.memory_space<vmem>>, vector<2x2xf32>
    tpu.vector_store %arg21[%c0_83, %c0_84], %278 {strides = array<i32>} : memref<2x2xf32, #tpu.memory_space<vmem>>, vector<2x2xf32>,
    %c0_85 = arith.constant 0 : index
    %c0_86 = arith.constant 0 : index
    %280 = vector.load %arg22[%c0_85, %c0_86] : memref<2x64xf32, #tpu.memory_space<vmem>>, vector<2x64xf32>
    tpu.vector_store %arg22[%c0_85, %c0_86], %273 {strides = array<i32>} : memref<2x64xf32, #tpu.memory_space<vmem>>, vector<2x64xf32>,
    return
  }
}

module attributes {stable_mosaic.version = 11 : i64} {
  func.func @_conv_stack_kernel(%arg0: i32, %arg1: memref<1x1x832xf32, #tpu.memory_space<vmem>>, %arg2: memref<8x3xf32, #tpu.memory_space<vmem>>, %arg3: memref<8x1xf32, #tpu.memory_space<vmem>>, %arg4: memref<8x24xf32, #tpu.memory_space<vmem>>, %arg5: memref<8x1xf32, #tpu.memory_space<vmem>>, %arg6: memref<8x1xf32, #tpu.memory_space<vmem>>, %arg7: memref<8x1xf32, #tpu.memory_space<vmem>>, %arg8: memref<16x24xf32, #tpu.memory_space<vmem>>, %arg9: memref<16x1xf32, #tpu.memory_space<vmem>>, %arg10: memref<16x48xf32, #tpu.memory_space<vmem>>, %arg11: memref<16x1xf32, #tpu.memory_space<vmem>>, %arg12: memref<16x8xf32, #tpu.memory_space<vmem>>, %arg13: memref<16x1xf32, #tpu.memory_space<vmem>>, %arg14: memref<16x48xf32, #tpu.memory_space<vmem>>, %arg15: memref<16x1xf32, #tpu.memory_space<vmem>>, %arg16: memref<16x48xf32, #tpu.memory_space<vmem>>, %arg17: memref<16x1xf32, #tpu.memory_space<vmem>>, %arg18: memref<16x16xf32, #tpu.memory_space<vmem>>, %arg19: memref<16x1xf32, #tpu.memory_space<vmem>>, %arg20: memref<32x48xf32, #tpu.memory_space<vmem>>, %arg21: memref<32x1xf32, #tpu.memory_space<vmem>>, %arg22: memref<32x96xf32, #tpu.memory_space<vmem>>, %arg23: memref<32x1xf32, #tpu.memory_space<vmem>>, %arg24: memref<32x16xf32, #tpu.memory_space<vmem>>, %arg25: memref<32x1xf32, #tpu.memory_space<vmem>>, %arg26: memref<64x96xf32, #tpu.memory_space<vmem>>, %arg27: memref<64x1xf32, #tpu.memory_space<vmem>>, %arg28: memref<64x192xf32, #tpu.memory_space<vmem>>, %arg29: memref<64x1xf32, #tpu.memory_space<vmem>>, %arg30: memref<64x32xf32, #tpu.memory_space<vmem>>, %arg31: memref<64x1xf32, #tpu.memory_space<vmem>>, %arg32: memref<64x192xf32, #tpu.memory_space<vmem>>, %arg33: memref<64x1xf32, #tpu.memory_space<vmem>>, %arg34: memref<64x192xf32, #tpu.memory_space<vmem>>, %arg35: memref<64x1xf32, #tpu.memory_space<vmem>>, %arg36: memref<64x64xf32, #tpu.memory_space<vmem>>, %arg37: memref<64x1xf32, #tpu.memory_space<vmem>>, %arg38: memref<1x64x13xf32, #tpu.memory_space<vmem>>) attributes {dimension_semantics = [#tpu.dimension_semantics<parallel>], iteration_bounds = array<i64: 2>, scalar_prefetch = 0 : i64, scratch_operands = 0 : i64, tpu.core_type = #tpu.core_type<tc>, window_params = [{transform_indices = @transform_0, window_bounds = array<i64: 1, 1, 832>}, {pipeline_mode = #tpu.pipeline_mode<synchronous>, transform_indices = @transform_1, window_bounds = array<i64: 8, 3>}, {pipeline_mode = #tpu.pipeline_mode<synchronous>, transform_indices = @transform_2, window_bounds = array<i64: 8, 1>}, {pipeline_mode = #tpu.pipeline_mode<synchronous>, transform_indices = @transform_3, window_bounds = array<i64: 8, 24>}, {pipeline_mode = #tpu.pipeline_mode<synchronous>, transform_indices = @transform_4, window_bounds = array<i64: 8, 1>}, {pipeline_mode = #tpu.pipeline_mode<synchronous>, transform_indices = @transform_5, window_bounds = array<i64: 8, 1>}, {pipeline_mode = #tpu.pipeline_mode<synchronous>, transform_indices = @transform_6, window_bounds = array<i64: 8, 1>}, {pipeline_mode = #tpu.pipeline_mode<synchronous>, transform_indices = @transform_7, window_bounds = array<i64: 16, 24>}, {pipeline_mode = #tpu.pipeline_mode<synchronous>, transform_indices = @transform_8, window_bounds = array<i64: 16, 1>}, {pipeline_mode = #tpu.pipeline_mode<synchronous>, transform_indices = @transform_9, window_bounds = array<i64: 16, 48>}, {pipeline_mode = #tpu.pipeline_mode<synchronous>, transform_indices = @transform_10, window_bounds = array<i64: 16, 1>}, {pipeline_mode = #tpu.pipeline_mode<synchronous>, transform_indices = @transform_11, window_bounds = array<i64: 16, 8>}, {pipeline_mode = #tpu.pipeline_mode<synchronous>, transform_indices = @transform_12, window_bounds = array<i64: 16, 1>}, {pipeline_mode = #tpu.pipeline_mode<synchronous>, transform_indices = @transform_13, window_bounds = array<i64: 16, 48>}, {pipeline_mode = #tpu.pipeline_mode<synchronous>, transform_indices = @transform_14, window_bounds = array<i64: 16, 1>}, {pipeline_mode = #tpu.pipeline_mode<synchronous>, transform_indices = @transform_15, window_bounds = array<i64: 16, 48>}, {pipeline_mode = #tpu.pipeline_mode<synchronous>, transform_indices = @transform_16, window_bounds = array<i64: 16, 1>}, {pipeline_mode = #tpu.pipeline_mode<synchronous>, transform_indices = @transform_17, window_bounds = array<i64: 16, 16>}, {pipeline_mode = #tpu.pipeline_mode<synchronous>, transform_indices = @transform_18, window_bounds = array<i64: 16, 1>}, {pipeline_mode = #tpu.pipeline_mode<synchronous>, transform_indices = @transform_19, window_bounds = array<i64: 32, 48>}, {pipeline_mode = #tpu.pipeline_mode<synchronous>, transform_indices = @transform_20, window_bounds = array<i64: 32, 1>}, {pipeline_mode = #tpu.pipeline_mode<synchronous>, transform_indices = @transform_21, window_bounds = array<i64: 32, 96>}, {pipeline_mode = #tpu.pipeline_mode<synchronous>, transform_indices = @transform_22, window_bounds = array<i64: 32, 1>}, {pipeline_mode = #tpu.pipeline_mode<synchronous>, transform_indices = @transform_23, window_bounds = array<i64: 32, 16>}, {pipeline_mode = #tpu.pipeline_mode<synchronous>, transform_indices = @transform_24, window_bounds = array<i64: 32, 1>}, {pipeline_mode = #tpu.pipeline_mode<synchronous>, transform_indices = @transform_25, window_bounds = array<i64: 64, 96>}, {pipeline_mode = #tpu.pipeline_mode<synchronous>, transform_indices = @transform_26, window_bounds = array<i64: 64, 1>}, {pipeline_mode = #tpu.pipeline_mode<synchronous>, transform_indices = @transform_27, window_bounds = array<i64: 64, 192>}, {pipeline_mode = #tpu.pipeline_mode<synchronous>, transform_indices = @transform_28, window_bounds = array<i64: 64, 1>}, {pipeline_mode = #tpu.pipeline_mode<synchronous>, transform_indices = @transform_29, window_bounds = array<i64: 64, 32>}, {pipeline_mode = #tpu.pipeline_mode<synchronous>, transform_indices = @transform_30, window_bounds = array<i64: 64, 1>}, {pipeline_mode = #tpu.pipeline_mode<synchronous>, transform_indices = @transform_31, window_bounds = array<i64: 64, 192>}, {pipeline_mode = #tpu.pipeline_mode<synchronous>, transform_indices = @transform_32, window_bounds = array<i64: 64, 1>}, {pipeline_mode = #tpu.pipeline_mode<synchronous>, transform_indices = @transform_33, window_bounds = array<i64: 64, 192>}, {pipeline_mode = #tpu.pipeline_mode<synchronous>, transform_indices = @transform_34, window_bounds = array<i64: 64, 1>}, {pipeline_mode = #tpu.pipeline_mode<synchronous>, transform_indices = @transform_35, window_bounds = array<i64: 64, 64>}, {pipeline_mode = #tpu.pipeline_mode<synchronous>, transform_indices = @transform_36, window_bounds = array<i64: 64, 1>}, {transform_indices = @transform_37, window_bounds = array<i64: 1, 64, 13>}]} {
    %c0 = arith.constant 0 : index
    %c0_0 = arith.constant 0 : index
    %c0_1 = arith.constant 0 : index
    %0 = vector.load %arg1[%c0, %c0_0, %c0_1] : memref<1x1x832xf32, #tpu.memory_space<vmem>>, vector<1x1x832xf32>
    %1 = vector.shape_cast %0 : vector<1x1x832xf32> to vector<1x832xf32>
    %c0_2 = arith.constant 0 : index
    %c0_3 = arith.constant 0 : index
    %2 = vector.load %arg2[%c0_2, %c0_3] : memref<8x3xf32, #tpu.memory_space<vmem>>, vector<8x3xf32>
    %c0_4 = arith.constant 0 : index
    %c0_5 = arith.constant 0 : index
    %3 = vector.load %arg3[%c0_4, %c0_5] : memref<8x1xf32, #tpu.memory_space<vmem>>, vector<8x1xf32>
    %c0_6 = arith.constant 0 : index
    %c0_7 = arith.constant 0 : index
    %4 = vector.load %arg4[%c0_6, %c0_7] : memref<8x24xf32, #tpu.memory_space<vmem>>, vector<8x24xf32>
    %c0_8 = arith.constant 0 : index
    %c0_9 = arith.constant 0 : index
    %5 = vector.load %arg5[%c0_8, %c0_9] : memref<8x1xf32, #tpu.memory_space<vmem>>, vector<8x1xf32>
    %c0_10 = arith.constant 0 : index
    %c0_11 = arith.constant 0 : index
    %6 = vector.load %arg6[%c0_10, %c0_11] : memref<8x1xf32, #tpu.memory_space<vmem>>, vector<8x1xf32>
    %c0_12 = arith.constant 0 : index
    %c0_13 = arith.constant 0 : index
    %7 = vector.load %arg7[%c0_12, %c0_13] : memref<8x1xf32, #tpu.memory_space<vmem>>, vector<8x1xf32>
    %cst = arith.constant 0.000000e+00 : f32
    %8 = vector.broadcast %cst : f32 to vector<1x1xf32>
    %9 = vector.extract_strided_slice %1 {offsets = [0, 0], sizes = [1, 831], strides = [1, 1]} : vector<1x832xf32> to vector<1x831xf32>
    %10 = tpu.concatenate %8, %9 in 1 : vector<1x1xf32>, vector<1x831xf32> -> vector<1x832xf32>
    %11 = vector.extract_strided_slice %1 {offsets = [0, 1], sizes = [1, 831], strides = [1, 1]} : vector<1x832xf32> to vector<1x831xf32>
    %12 = tpu.concatenate %11, %8 in 1 : vector<1x831xf32>, vector<1x1xf32> -> vector<1x832xf32>
    %13 = tpu.concatenate %10, %1, %12 in 0 : vector<1x832xf32>, vector<1x832xf32>, vector<1x832xf32> -> vector<3x832xf32>
    %cst_14 = arith.constant dense<0.000000e+00> : vector<8x832xf32>
    %14 = tpu.matmul %2, %13, %cst_14 {dimension_numbers = #tpu.dot_dimension_numbers<[1], [0], [0], [1], [0, 0, 1, 1], [], []>} : vector<8x3xf32>, vector<3x832xf32>, vector<8x832xf32> -> vector<8x832xf32>
    %15 = vector.broadcast %3 : vector<8x1xf32> to vector<8x832xf32>
    %16 = arith.addf %14, %15 : vector<8x832xf32>
    %cst_15 = arith.constant 0.000000e+00 : f32
    %17 = vector.broadcast %cst_15 : f32 to vector<8x832xf32>
    %18 = arith.maximumf %16, %17 : vector<8x832xf32>
    %cst_16 = arith.constant dense<0.000000e+00> : vector<8x832xf32>
    %19 = tpu.matmul %6, %1, %cst_16 {dimension_numbers = #tpu.dot_dimension_numbers<[1], [0], [0], [1], [0, 0, 1, 1], [], []>} : vector<8x1xf32>, vector<1x832xf32>, vector<8x832xf32> -> vector<8x832xf32>
    %20 = vector.broadcast %7 : vector<8x1xf32> to vector<8x832xf32>
    %21 = arith.addf %19, %20 : vector<8x832xf32>
    %cst_17 = arith.constant 0.000000e+00 : f32
    %22 = vector.broadcast %cst_17 : f32 to vector<8x1xf32>
    %23 = vector.extract_strided_slice %18 {offsets = [0, 0], sizes = [8, 831], strides = [1, 1]} : vector<8x832xf32> to vector<8x831xf32>
    %24 = tpu.concatenate %22, %23 in 1 : vector<8x1xf32>, vector<8x831xf32> -> vector<8x832xf32>
    %25 = vector.extract_strided_slice %18 {offsets = [0, 1], sizes = [8, 831], strides = [1, 1]} : vector<8x832xf32> to vector<8x831xf32>
    %26 = tpu.concatenate %25, %22 in 1 : vector<8x831xf32>, vector<8x1xf32> -> vector<8x832xf32>
    %27 = tpu.concatenate %24, %18, %26 in 0 : vector<8x832xf32>, vector<8x832xf32>, vector<8x832xf32> -> vector<24x832xf32>
    %cst_18 = arith.constant dense<0.000000e+00> : vector<8x832xf32>
    %28 = tpu.matmul %4, %27, %cst_18 {dimension_numbers = #tpu.dot_dimension_numbers<[1], [0], [0], [1], [0, 0, 1, 1], [], []>} : vector<8x24xf32>, vector<24x832xf32>, vector<8x832xf32> -> vector<8x832xf32>
    %29 = vector.broadcast %5 : vector<8x1xf32> to vector<8x832xf32>
    %30 = arith.addf %28, %29 : vector<8x832xf32>
    %31 = arith.addf %30, %21 : vector<8x832xf32>
    %cst_19 = arith.constant 0.000000e+00 : f32
    %32 = vector.broadcast %cst_19 : f32 to vector<8x832xf32>
    %33 = arith.maximumf %31, %32 : vector<8x832xf32>
    %34 = tpu.iota {dimensions = array<i32: 0>} : vector<832x416xi32>
    %35 = tpu.iota {dimensions = array<i32: 1>} : vector<832x416xi32>
    %c2_i32 = arith.constant 2 : i32
    %36 = vector.broadcast %c2_i32 : i32 to vector<832x416xi32>
    %37 = arith.muli %36, %35 : vector<832x416xi32>
    %c0_i32 = arith.constant 0 : i32
    %38 = vector.broadcast %c0_i32 : i32 to vector<832x416xi32>
    %39 = arith.addi %37, %38 : vector<832x416xi32>
    %40 = arith.cmpi eq, %34, %39 : vector<832x416xi32>
    %cst_20 = arith.constant 1.000000e+00 : f32
    %cst_21 = arith.constant 0.000000e+00 : f32
    %41 = vector.broadcast %cst_20 : f32 to vector<832x416xf32>
    %42 = vector.broadcast %cst_21 : f32 to vector<832x416xf32>
    %43 = arith.select %40, %41, %42 : vector<832x416xi1>, vector<832x416xf32>
    %cst_22 = arith.constant dense<0.000000e+00> : vector<8x416xf32>
    %44 = tpu.matmul %33, %43, %cst_22 {dimension_numbers = #tpu.dot_dimension_numbers<[1], [0], [0], [1], [0, 0, 1, 1], [], []>} : vector<8x832xf32>, vector<832x416xf32>, vector<8x416xf32> -> vector<8x416xf32>
    %45 = tpu.iota {dimensions = array<i32: 0>} : vector<832x416xi32>
    %46 = tpu.iota {dimensions = array<i32: 1>} : vector<832x416xi32>
    %c2_i32_23 = arith.constant 2 : i32
    %47 = vector.broadcast %c2_i32_23 : i32 to vector<832x416xi32>
    %48 = arith.muli %47, %46 : vector<832x416xi32>
    %c1_i32 = arith.constant 1 : i32
    %49 = vector.broadcast %c1_i32 : i32 to vector<832x416xi32>
    %50 = arith.addi %48, %49 : vector<832x416xi32>
    %51 = arith.cmpi eq, %45, %50 : vector<832x416xi32>
    %cst_24 = arith.constant 1.000000e+00 : f32
    %cst_25 = arith.constant 0.000000e+00 : f32
    %52 = vector.broadcast %cst_24 : f32 to vector<832x416xf32>
    %53 = vector.broadcast %cst_25 : f32 to vector<832x416xf32>
    %54 = arith.select %51, %52, %53 : vector<832x416xi1>, vector<832x416xf32>
    %cst_26 = arith.constant dense<0.000000e+00> : vector<8x416xf32>
    %55 = tpu.matmul %33, %54, %cst_26 {dimension_numbers = #tpu.dot_dimension_numbers<[1], [0], [0], [1], [0, 0, 1, 1], [], []>} : vector<8x832xf32>, vector<832x416xf32>, vector<8x416xf32> -> vector<8x416xf32>
    %56 = arith.maximumf %44, %55 : vector<8x416xf32>
    %c0_27 = arith.constant 0 : index
    %c0_28 = arith.constant 0 : index
    %57 = vector.load %arg8[%c0_27, %c0_28] : memref<16x24xf32, #tpu.memory_space<vmem>>, vector<16x24xf32>
    %c0_29 = arith.constant 0 : index
    %c0_30 = arith.constant 0 : index
    %58 = vector.load %arg9[%c0_29, %c0_30] : memref<16x1xf32, #tpu.memory_space<vmem>>, vector<16x1xf32>
    %c0_31 = arith.constant 0 : index
    %c0_32 = arith.constant 0 : index
    %59 = vector.load %arg10[%c0_31, %c0_32] : memref<16x48xf32, #tpu.memory_space<vmem>>, vector<16x48xf32>
    %c0_33 = arith.constant 0 : index
    %c0_34 = arith.constant 0 : index
    %60 = vector.load %arg11[%c0_33, %c0_34] : memref<16x1xf32, #tpu.memory_space<vmem>>, vector<16x1xf32>
    %c0_35 = arith.constant 0 : index
    %c0_36 = arith.constant 0 : index
    %61 = vector.load %arg12[%c0_35, %c0_36] : memref<16x8xf32, #tpu.memory_space<vmem>>, vector<16x8xf32>
    %c0_37 = arith.constant 0 : index
    %c0_38 = arith.constant 0 : index
    %62 = vector.load %arg13[%c0_37, %c0_38] : memref<16x1xf32, #tpu.memory_space<vmem>>, vector<16x1xf32>
    %cst_39 = arith.constant 0.000000e+00 : f32
    %63 = vector.broadcast %cst_39 : f32 to vector<8x1xf32>
    %64 = vector.extract_strided_slice %56 {offsets = [0, 0], sizes = [8, 415], strides = [1, 1]} : vector<8x416xf32> to vector<8x415xf32>
    %65 = tpu.concatenate %63, %64 in 1 : vector<8x1xf32>, vector<8x415xf32> -> vector<8x416xf32>
    %66 = vector.extract_strided_slice %56 {offsets = [0, 1], sizes = [8, 415], strides = [1, 1]} : vector<8x416xf32> to vector<8x415xf32>
    %67 = tpu.concatenate %66, %63 in 1 : vector<8x415xf32>, vector<8x1xf32> -> vector<8x416xf32>
    %68 = tpu.concatenate %65, %56, %67 in 0 : vector<8x416xf32>, vector<8x416xf32>, vector<8x416xf32> -> vector<24x416xf32>
    %cst_40 = arith.constant dense<0.000000e+00> : vector<16x416xf32>
    %69 = tpu.matmul %57, %68, %cst_40 {dimension_numbers = #tpu.dot_dimension_numbers<[1], [0], [0], [1], [0, 0, 1, 1], [], []>} : vector<16x24xf32>, vector<24x416xf32>, vector<16x416xf32> -> vector<16x416xf32>
    %70 = vector.broadcast %58 : vector<16x1xf32> to vector<16x416xf32>
    %71 = arith.addf %69, %70 : vector<16x416xf32>
    %cst_41 = arith.constant 0.000000e+00 : f32
    %72 = vector.broadcast %cst_41 : f32 to vector<16x416xf32>
    %73 = arith.maximumf %71, %72 : vector<16x416xf32>
    %cst_42 = arith.constant dense<0.000000e+00> : vector<16x416xf32>
    %74 = tpu.matmul %61, %56, %cst_42 {dimension_numbers = #tpu.dot_dimension_numbers<[1], [0], [0], [1], [0, 0, 1, 1], [], []>} : vector<16x8xf32>, vector<8x416xf32>, vector<16x416xf32> -> vector<16x416xf32>
    %75 = vector.broadcast %62 : vector<16x1xf32> to vector<16x416xf32>
    %76 = arith.addf %74, %75 : vector<16x416xf32>
    %cst_43 = arith.constant 0.000000e+00 : f32
    %77 = vector.broadcast %cst_43 : f32 to vector<16x1xf32>
    %78 = vector.extract_strided_slice %73 {offsets = [0, 0], sizes = [16, 415], strides = [1, 1]} : vector<16x416xf32> to vector<16x415xf32>
    %79 = tpu.concatenate %77, %78 in 1 : vector<16x1xf32>, vector<16x415xf32> -> vector<16x416xf32>
    %80 = vector.extract_strided_slice %73 {offsets = [0, 1], sizes = [16, 415], strides = [1, 1]} : vector<16x416xf32> to vector<16x415xf32>
    %81 = tpu.concatenate %80, %77 in 1 : vector<16x415xf32>, vector<16x1xf32> -> vector<16x416xf32>
    %82 = tpu.concatenate %79, %73, %81 in 0 : vector<16x416xf32>, vector<16x416xf32>, vector<16x416xf32> -> vector<48x416xf32>
    %cst_44 = arith.constant dense<0.000000e+00> : vector<16x416xf32>
    %83 = tpu.matmul %59, %82, %cst_44 {dimension_numbers = #tpu.dot_dimension_numbers<[1], [0], [0], [1], [0, 0, 1, 1], [], []>} : vector<16x48xf32>, vector<48x416xf32>, vector<16x416xf32> -> vector<16x416xf32>
    %84 = vector.broadcast %60 : vector<16x1xf32> to vector<16x416xf32>
    %85 = arith.addf %83, %84 : vector<16x416xf32>
    %86 = arith.addf %85, %76 : vector<16x416xf32>
    %cst_45 = arith.constant 0.000000e+00 : f32
    %87 = vector.broadcast %cst_45 : f32 to vector<16x416xf32>
    %88 = arith.maximumf %86, %87 : vector<16x416xf32>
    %89 = tpu.iota {dimensions = array<i32: 0>} : vector<416x208xi32>
    %90 = tpu.iota {dimensions = array<i32: 1>} : vector<416x208xi32>
    %c2_i32_46 = arith.constant 2 : i32
    %91 = vector.broadcast %c2_i32_46 : i32 to vector<416x208xi32>
    %92 = arith.muli %91, %90 : vector<416x208xi32>
    %c0_i32_47 = arith.constant 0 : i32
    %93 = vector.broadcast %c0_i32_47 : i32 to vector<416x208xi32>
    %94 = arith.addi %92, %93 : vector<416x208xi32>
    %95 = arith.cmpi eq, %89, %94 : vector<416x208xi32>
    %cst_48 = arith.constant 1.000000e+00 : f32
    %cst_49 = arith.constant 0.000000e+00 : f32
    %96 = vector.broadcast %cst_48 : f32 to vector<416x208xf32>
    %97 = vector.broadcast %cst_49 : f32 to vector<416x208xf32>
    %98 = arith.select %95, %96, %97 : vector<416x208xi1>, vector<416x208xf32>
    %cst_50 = arith.constant dense<0.000000e+00> : vector<16x208xf32>
    %99 = tpu.matmul %88, %98, %cst_50 {dimension_numbers = #tpu.dot_dimension_numbers<[1], [0], [0], [1], [0, 0, 1, 1], [], []>} : vector<16x416xf32>, vector<416x208xf32>, vector<16x208xf32> -> vector<16x208xf32>
    %100 = tpu.iota {dimensions = array<i32: 0>} : vector<416x208xi32>
    %101 = tpu.iota {dimensions = array<i32: 1>} : vector<416x208xi32>
    %c2_i32_51 = arith.constant 2 : i32
    %102 = vector.broadcast %c2_i32_51 : i32 to vector<416x208xi32>
    %103 = arith.muli %102, %101 : vector<416x208xi32>
    %c1_i32_52 = arith.constant 1 : i32
    %104 = vector.broadcast %c1_i32_52 : i32 to vector<416x208xi32>
    %105 = arith.addi %103, %104 : vector<416x208xi32>
    %106 = arith.cmpi eq, %100, %105 : vector<416x208xi32>
    %cst_53 = arith.constant 1.000000e+00 : f32
    %cst_54 = arith.constant 0.000000e+00 : f32
    %107 = vector.broadcast %cst_53 : f32 to vector<416x208xf32>
    %108 = vector.broadcast %cst_54 : f32 to vector<416x208xf32>
    %109 = arith.select %106, %107, %108 : vector<416x208xi1>, vector<416x208xf32>
    %cst_55 = arith.constant dense<0.000000e+00> : vector<16x208xf32>
    %110 = tpu.matmul %88, %109, %cst_55 {dimension_numbers = #tpu.dot_dimension_numbers<[1], [0], [0], [1], [0, 0, 1, 1], [], []>} : vector<16x416xf32>, vector<416x208xf32>, vector<16x208xf32> -> vector<16x208xf32>
    %111 = arith.maximumf %99, %110 : vector<16x208xf32>
    %c0_56 = arith.constant 0 : index
    %c0_57 = arith.constant 0 : index
    %112 = vector.load %arg14[%c0_56, %c0_57] : memref<16x48xf32, #tpu.memory_space<vmem>>, vector<16x48xf32>
    %c0_58 = arith.constant 0 : index
    %c0_59 = arith.constant 0 : index
    %113 = vector.load %arg15[%c0_58, %c0_59] : memref<16x1xf32, #tpu.memory_space<vmem>>, vector<16x1xf32>
    %c0_60 = arith.constant 0 : index
    %c0_61 = arith.constant 0 : index
    %114 = vector.load %arg16[%c0_60, %c0_61] : memref<16x48xf32, #tpu.memory_space<vmem>>, vector<16x48xf32>
    %c0_62 = arith.constant 0 : index
    %c0_63 = arith.constant 0 : index
    %115 = vector.load %arg17[%c0_62, %c0_63] : memref<16x1xf32, #tpu.memory_space<vmem>>, vector<16x1xf32>
    %c0_64 = arith.constant 0 : index
    %c0_65 = arith.constant 0 : index
    %116 = vector.load %arg18[%c0_64, %c0_65] : memref<16x16xf32, #tpu.memory_space<vmem>>, vector<16x16xf32>
    %c0_66 = arith.constant 0 : index
    %c0_67 = arith.constant 0 : index
    %117 = vector.load %arg19[%c0_66, %c0_67] : memref<16x1xf32, #tpu.memory_space<vmem>>, vector<16x1xf32>
    %cst_68 = arith.constant 0.000000e+00 : f32
    %118 = vector.broadcast %cst_68 : f32 to vector<16x1xf32>
    %119 = vector.extract_strided_slice %111 {offsets = [0, 0], sizes = [16, 207], strides = [1, 1]} : vector<16x208xf32> to vector<16x207xf32>
    %120 = tpu.concatenate %118, %119 in 1 : vector<16x1xf32>, vector<16x207xf32> -> vector<16x208xf32>
    %121 = vector.extract_strided_slice %111 {offsets = [0, 1], sizes = [16, 207], strides = [1, 1]} : vector<16x208xf32> to vector<16x207xf32>
    %122 = tpu.concatenate %121, %118 in 1 : vector<16x207xf32>, vector<16x1xf32> -> vector<16x208xf32>
    %123 = tpu.concatenate %120, %111, %122 in 0 : vector<16x208xf32>, vector<16x208xf32>, vector<16x208xf32> -> vector<48x208xf32>
    %cst_69 = arith.constant dense<0.000000e+00> : vector<16x208xf32>
    %124 = tpu.matmul %112, %123, %cst_69 {dimension_numbers = #tpu.dot_dimension_numbers<[1], [0], [0], [1], [0, 0, 1, 1], [], []>} : vector<16x48xf32>, vector<48x208xf32>, vector<16x208xf32> -> vector<16x208xf32>
    %125 = vector.broadcast %113 : vector<16x1xf32> to vector<16x208xf32>
    %126 = arith.addf %124, %125 : vector<16x208xf32>
    %cst_70 = arith.constant 0.000000e+00 : f32
    %127 = vector.broadcast %cst_70 : f32 to vector<16x208xf32>
    %128 = arith.maximumf %126, %127 : vector<16x208xf32>
    %cst_71 = arith.constant dense<0.000000e+00> : vector<16x208xf32>
    %129 = tpu.matmul %116, %111, %cst_71 {dimension_numbers = #tpu.dot_dimension_numbers<[1], [0], [0], [1], [0, 0, 1, 1], [], []>} : vector<16x16xf32>, vector<16x208xf32>, vector<16x208xf32> -> vector<16x208xf32>
    %130 = vector.broadcast %117 : vector<16x1xf32> to vector<16x208xf32>
    %131 = arith.addf %129, %130 : vector<16x208xf32>
    %cst_72 = arith.constant 0.000000e+00 : f32
    %132 = vector.broadcast %cst_72 : f32 to vector<16x1xf32>
    %133 = vector.extract_strided_slice %128 {offsets = [0, 0], sizes = [16, 207], strides = [1, 1]} : vector<16x208xf32> to vector<16x207xf32>
    %134 = tpu.concatenate %132, %133 in 1 : vector<16x1xf32>, vector<16x207xf32> -> vector<16x208xf32>
    %135 = vector.extract_strided_slice %128 {offsets = [0, 1], sizes = [16, 207], strides = [1, 1]} : vector<16x208xf32> to vector<16x207xf32>
    %136 = tpu.concatenate %135, %132 in 1 : vector<16x207xf32>, vector<16x1xf32> -> vector<16x208xf32>
    %137 = tpu.concatenate %134, %128, %136 in 0 : vector<16x208xf32>, vector<16x208xf32>, vector<16x208xf32> -> vector<48x208xf32>
    %cst_73 = arith.constant dense<0.000000e+00> : vector<16x208xf32>
    %138 = tpu.matmul %114, %137, %cst_73 {dimension_numbers = #tpu.dot_dimension_numbers<[1], [0], [0], [1], [0, 0, 1, 1], [], []>} : vector<16x48xf32>, vector<48x208xf32>, vector<16x208xf32> -> vector<16x208xf32>
    %139 = vector.broadcast %115 : vector<16x1xf32> to vector<16x208xf32>
    %140 = arith.addf %138, %139 : vector<16x208xf32>
    %141 = arith.addf %140, %131 : vector<16x208xf32>
    %cst_74 = arith.constant 0.000000e+00 : f32
    %142 = vector.broadcast %cst_74 : f32 to vector<16x208xf32>
    %143 = arith.maximumf %141, %142 : vector<16x208xf32>
    %144 = tpu.iota {dimensions = array<i32: 0>} : vector<208x104xi32>
    %145 = tpu.iota {dimensions = array<i32: 1>} : vector<208x104xi32>
    %c2_i32_75 = arith.constant 2 : i32
    %146 = vector.broadcast %c2_i32_75 : i32 to vector<208x104xi32>
    %147 = arith.muli %146, %145 : vector<208x104xi32>
    %c0_i32_76 = arith.constant 0 : i32
    %148 = vector.broadcast %c0_i32_76 : i32 to vector<208x104xi32>
    %149 = arith.addi %147, %148 : vector<208x104xi32>
    %150 = arith.cmpi eq, %144, %149 : vector<208x104xi32>
    %cst_77 = arith.constant 1.000000e+00 : f32
    %cst_78 = arith.constant 0.000000e+00 : f32
    %151 = vector.broadcast %cst_77 : f32 to vector<208x104xf32>
    %152 = vector.broadcast %cst_78 : f32 to vector<208x104xf32>
    %153 = arith.select %150, %151, %152 : vector<208x104xi1>, vector<208x104xf32>
    %cst_79 = arith.constant dense<0.000000e+00> : vector<16x104xf32>
    %154 = tpu.matmul %143, %153, %cst_79 {dimension_numbers = #tpu.dot_dimension_numbers<[1], [0], [0], [1], [0, 0, 1, 1], [], []>} : vector<16x208xf32>, vector<208x104xf32>, vector<16x104xf32> -> vector<16x104xf32>
    %155 = tpu.iota {dimensions = array<i32: 0>} : vector<208x104xi32>
    %156 = tpu.iota {dimensions = array<i32: 1>} : vector<208x104xi32>
    %c2_i32_80 = arith.constant 2 : i32
    %157 = vector.broadcast %c2_i32_80 : i32 to vector<208x104xi32>
    %158 = arith.muli %157, %156 : vector<208x104xi32>
    %c1_i32_81 = arith.constant 1 : i32
    %159 = vector.broadcast %c1_i32_81 : i32 to vector<208x104xi32>
    %160 = arith.addi %158, %159 : vector<208x104xi32>
    %161 = arith.cmpi eq, %155, %160 : vector<208x104xi32>
    %cst_82 = arith.constant 1.000000e+00 : f32
    %cst_83 = arith.constant 0.000000e+00 : f32
    %162 = vector.broadcast %cst_82 : f32 to vector<208x104xf32>
    %163 = vector.broadcast %cst_83 : f32 to vector<208x104xf32>
    %164 = arith.select %161, %162, %163 : vector<208x104xi1>, vector<208x104xf32>
    %cst_84 = arith.constant dense<0.000000e+00> : vector<16x104xf32>
    %165 = tpu.matmul %143, %164, %cst_84 {dimension_numbers = #tpu.dot_dimension_numbers<[1], [0], [0], [1], [0, 0, 1, 1], [], []>} : vector<16x208xf32>, vector<208x104xf32>, vector<16x104xf32> -> vector<16x104xf32>
    %166 = arith.maximumf %154, %165 : vector<16x104xf32>
    %c0_85 = arith.constant 0 : index
    %c0_86 = arith.constant 0 : index
    %167 = vector.load %arg20[%c0_85, %c0_86] : memref<32x48xf32, #tpu.memory_space<vmem>>, vector<32x48xf32>
    %c0_87 = arith.constant 0 : index
    %c0_88 = arith.constant 0 : index
    %168 = vector.load %arg21[%c0_87, %c0_88] : memref<32x1xf32, #tpu.memory_space<vmem>>, vector<32x1xf32>
    %c0_89 = arith.constant 0 : index
    %c0_90 = arith.constant 0 : index
    %169 = vector.load %arg22[%c0_89, %c0_90] : memref<32x96xf32, #tpu.memory_space<vmem>>, vector<32x96xf32>
    %c0_91 = arith.constant 0 : index
    %c0_92 = arith.constant 0 : index
    %170 = vector.load %arg23[%c0_91, %c0_92] : memref<32x1xf32, #tpu.memory_space<vmem>>, vector<32x1xf32>
    %c0_93 = arith.constant 0 : index
    %c0_94 = arith.constant 0 : index
    %171 = vector.load %arg24[%c0_93, %c0_94] : memref<32x16xf32, #tpu.memory_space<vmem>>, vector<32x16xf32>
    %c0_95 = arith.constant 0 : index
    %c0_96 = arith.constant 0 : index
    %172 = vector.load %arg25[%c0_95, %c0_96] : memref<32x1xf32, #tpu.memory_space<vmem>>, vector<32x1xf32>
    %cst_97 = arith.constant 0.000000e+00 : f32
    %173 = vector.broadcast %cst_97 : f32 to vector<16x1xf32>
    %174 = vector.extract_strided_slice %166 {offsets = [0, 0], sizes = [16, 103], strides = [1, 1]} : vector<16x104xf32> to vector<16x103xf32>
    %175 = tpu.concatenate %173, %174 in 1 : vector<16x1xf32>, vector<16x103xf32> -> vector<16x104xf32>
    %176 = vector.extract_strided_slice %166 {offsets = [0, 1], sizes = [16, 103], strides = [1, 1]} : vector<16x104xf32> to vector<16x103xf32>
    %177 = tpu.concatenate %176, %173 in 1 : vector<16x103xf32>, vector<16x1xf32> -> vector<16x104xf32>
    %178 = tpu.concatenate %175, %166, %177 in 0 : vector<16x104xf32>, vector<16x104xf32>, vector<16x104xf32> -> vector<48x104xf32>
    %cst_98 = arith.constant dense<0.000000e+00> : vector<32x104xf32>
    %179 = tpu.matmul %167, %178, %cst_98 {dimension_numbers = #tpu.dot_dimension_numbers<[1], [0], [0], [1], [0, 0, 1, 1], [], []>} : vector<32x48xf32>, vector<48x104xf32>, vector<32x104xf32> -> vector<32x104xf32>
    %180 = vector.broadcast %168 : vector<32x1xf32> to vector<32x104xf32>
    %181 = arith.addf %179, %180 : vector<32x104xf32>
    %cst_99 = arith.constant 0.000000e+00 : f32
    %182 = vector.broadcast %cst_99 : f32 to vector<32x104xf32>
    %183 = arith.maximumf %181, %182 : vector<32x104xf32>
    %cst_100 = arith.constant dense<0.000000e+00> : vector<32x104xf32>
    %184 = tpu.matmul %171, %166, %cst_100 {dimension_numbers = #tpu.dot_dimension_numbers<[1], [0], [0], [1], [0, 0, 1, 1], [], []>} : vector<32x16xf32>, vector<16x104xf32>, vector<32x104xf32> -> vector<32x104xf32>
    %185 = vector.broadcast %172 : vector<32x1xf32> to vector<32x104xf32>
    %186 = arith.addf %184, %185 : vector<32x104xf32>
    %cst_101 = arith.constant 0.000000e+00 : f32
    %187 = vector.broadcast %cst_101 : f32 to vector<32x1xf32>
    %188 = vector.extract_strided_slice %183 {offsets = [0, 0], sizes = [32, 103], strides = [1, 1]} : vector<32x104xf32> to vector<32x103xf32>
    %189 = tpu.concatenate %187, %188 in 1 : vector<32x1xf32>, vector<32x103xf32> -> vector<32x104xf32>
    %190 = vector.extract_strided_slice %183 {offsets = [0, 1], sizes = [32, 103], strides = [1, 1]} : vector<32x104xf32> to vector<32x103xf32>
    %191 = tpu.concatenate %190, %187 in 1 : vector<32x103xf32>, vector<32x1xf32> -> vector<32x104xf32>
    %192 = tpu.concatenate %189, %183, %191 in 0 : vector<32x104xf32>, vector<32x104xf32>, vector<32x104xf32> -> vector<96x104xf32>
    %cst_102 = arith.constant dense<0.000000e+00> : vector<32x104xf32>
    %193 = tpu.matmul %169, %192, %cst_102 {dimension_numbers = #tpu.dot_dimension_numbers<[1], [0], [0], [1], [0, 0, 1, 1], [], []>} : vector<32x96xf32>, vector<96x104xf32>, vector<32x104xf32> -> vector<32x104xf32>
    %194 = vector.broadcast %170 : vector<32x1xf32> to vector<32x104xf32>
    %195 = arith.addf %193, %194 : vector<32x104xf32>
    %196 = arith.addf %195, %186 : vector<32x104xf32>
    %cst_103 = arith.constant 0.000000e+00 : f32
    %197 = vector.broadcast %cst_103 : f32 to vector<32x104xf32>
    %198 = arith.maximumf %196, %197 : vector<32x104xf32>
    %199 = tpu.iota {dimensions = array<i32: 0>} : vector<104x52xi32>
    %200 = tpu.iota {dimensions = array<i32: 1>} : vector<104x52xi32>
    %c2_i32_104 = arith.constant 2 : i32
    %201 = vector.broadcast %c2_i32_104 : i32 to vector<104x52xi32>
    %202 = arith.muli %201, %200 : vector<104x52xi32>
    %c0_i32_105 = arith.constant 0 : i32
    %203 = vector.broadcast %c0_i32_105 : i32 to vector<104x52xi32>
    %204 = arith.addi %202, %203 : vector<104x52xi32>
    %205 = arith.cmpi eq, %199, %204 : vector<104x52xi32>
    %cst_106 = arith.constant 1.000000e+00 : f32
    %cst_107 = arith.constant 0.000000e+00 : f32
    %206 = vector.broadcast %cst_106 : f32 to vector<104x52xf32>
    %207 = vector.broadcast %cst_107 : f32 to vector<104x52xf32>
    %208 = arith.select %205, %206, %207 : vector<104x52xi1>, vector<104x52xf32>
    %cst_108 = arith.constant dense<0.000000e+00> : vector<32x52xf32>
    %209 = tpu.matmul %198, %208, %cst_108 {dimension_numbers = #tpu.dot_dimension_numbers<[1], [0], [0], [1], [0, 0, 1, 1], [], []>} : vector<32x104xf32>, vector<104x52xf32>, vector<32x52xf32> -> vector<32x52xf32>
    %210 = tpu.iota {dimensions = array<i32: 0>} : vector<104x52xi32>
    %211 = tpu.iota {dimensions = array<i32: 1>} : vector<104x52xi32>
    %c2_i32_109 = arith.constant 2 : i32
    %212 = vector.broadcast %c2_i32_109 : i32 to vector<104x52xi32>
    %213 = arith.muli %212, %211 : vector<104x52xi32>
    %c1_i32_110 = arith.constant 1 : i32
    %214 = vector.broadcast %c1_i32_110 : i32 to vector<104x52xi32>
    %215 = arith.addi %213, %214 : vector<104x52xi32>
    %216 = arith.cmpi eq, %210, %215 : vector<104x52xi32>
    %cst_111 = arith.constant 1.000000e+00 : f32
    %cst_112 = arith.constant 0.000000e+00 : f32
    %217 = vector.broadcast %cst_111 : f32 to vector<104x52xf32>
    %218 = vector.broadcast %cst_112 : f32 to vector<104x52xf32>
    %219 = arith.select %216, %217, %218 : vector<104x52xi1>, vector<104x52xf32>
    %cst_113 = arith.constant dense<0.000000e+00> : vector<32x52xf32>
    %220 = tpu.matmul %198, %219, %cst_113 {dimension_numbers = #tpu.dot_dimension_numbers<[1], [0], [0], [1], [0, 0, 1, 1], [], []>} : vector<32x104xf32>, vector<104x52xf32>, vector<32x52xf32> -> vector<32x52xf32>
    %221 = arith.maximumf %209, %220 : vector<32x52xf32>
    %c0_114 = arith.constant 0 : index
    %c0_115 = arith.constant 0 : index
    %222 = vector.load %arg26[%c0_114, %c0_115] : memref<64x96xf32, #tpu.memory_space<vmem>>, vector<64x96xf32>
    %c0_116 = arith.constant 0 : index
    %c0_117 = arith.constant 0 : index
    %223 = vector.load %arg27[%c0_116, %c0_117] : memref<64x1xf32, #tpu.memory_space<vmem>>, vector<64x1xf32>
    %c0_118 = arith.constant 0 : index
    %c0_119 = arith.constant 0 : index
    %224 = vector.load %arg28[%c0_118, %c0_119] : memref<64x192xf32, #tpu.memory_space<vmem>>, vector<64x192xf32>
    %c0_120 = arith.constant 0 : index
    %c0_121 = arith.constant 0 : index
    %225 = vector.load %arg29[%c0_120, %c0_121] : memref<64x1xf32, #tpu.memory_space<vmem>>, vector<64x1xf32>
    %c0_122 = arith.constant 0 : index
    %c0_123 = arith.constant 0 : index
    %226 = vector.load %arg30[%c0_122, %c0_123] : memref<64x32xf32, #tpu.memory_space<vmem>>, vector<64x32xf32>
    %c0_124 = arith.constant 0 : index
    %c0_125 = arith.constant 0 : index
    %227 = vector.load %arg31[%c0_124, %c0_125] : memref<64x1xf32, #tpu.memory_space<vmem>>, vector<64x1xf32>
    %cst_126 = arith.constant 0.000000e+00 : f32
    %228 = vector.broadcast %cst_126 : f32 to vector<32x1xf32>
    %229 = vector.extract_strided_slice %221 {offsets = [0, 0], sizes = [32, 51], strides = [1, 1]} : vector<32x52xf32> to vector<32x51xf32>
    %230 = tpu.concatenate %228, %229 in 1 : vector<32x1xf32>, vector<32x51xf32> -> vector<32x52xf32>
    %231 = vector.extract_strided_slice %221 {offsets = [0, 1], sizes = [32, 51], strides = [1, 1]} : vector<32x52xf32> to vector<32x51xf32>
    %232 = tpu.concatenate %231, %228 in 1 : vector<32x51xf32>, vector<32x1xf32> -> vector<32x52xf32>
    %233 = tpu.concatenate %230, %221, %232 in 0 : vector<32x52xf32>, vector<32x52xf32>, vector<32x52xf32> -> vector<96x52xf32>
    %cst_127 = arith.constant dense<0.000000e+00> : vector<64x52xf32>
    %234 = tpu.matmul %222, %233, %cst_127 {dimension_numbers = #tpu.dot_dimension_numbers<[1], [0], [0], [1], [0, 0, 1, 1], [], []>} : vector<64x96xf32>, vector<96x52xf32>, vector<64x52xf32> -> vector<64x52xf32>
    %235 = vector.broadcast %223 : vector<64x1xf32> to vector<64x52xf32>
    %236 = arith.addf %234, %235 : vector<64x52xf32>
    %cst_128 = arith.constant 0.000000e+00 : f32
    %237 = vector.broadcast %cst_128 : f32 to vector<64x52xf32>
    %238 = arith.maximumf %236, %237 : vector<64x52xf32>
    %cst_129 = arith.constant dense<0.000000e+00> : vector<64x52xf32>
    %239 = tpu.matmul %226, %221, %cst_129 {dimension_numbers = #tpu.dot_dimension_numbers<[1], [0], [0], [1], [0, 0, 1, 1], [], []>} : vector<64x32xf32>, vector<32x52xf32>, vector<64x52xf32> -> vector<64x52xf32>
    %240 = vector.broadcast %227 : vector<64x1xf32> to vector<64x52xf32>
    %241 = arith.addf %239, %240 : vector<64x52xf32>
    %cst_130 = arith.constant 0.000000e+00 : f32
    %242 = vector.broadcast %cst_130 : f32 to vector<64x1xf32>
    %243 = vector.extract_strided_slice %238 {offsets = [0, 0], sizes = [64, 51], strides = [1, 1]} : vector<64x52xf32> to vector<64x51xf32>
    %244 = tpu.concatenate %242, %243 in 1 : vector<64x1xf32>, vector<64x51xf32> -> vector<64x52xf32>
    %245 = vector.extract_strided_slice %238 {offsets = [0, 1], sizes = [64, 51], strides = [1, 1]} : vector<64x52xf32> to vector<64x51xf32>
    %246 = tpu.concatenate %245, %242 in 1 : vector<64x51xf32>, vector<64x1xf32> -> vector<64x52xf32>
    %247 = tpu.concatenate %244, %238, %246 in 0 : vector<64x52xf32>, vector<64x52xf32>, vector<64x52xf32> -> vector<192x52xf32>
    %cst_131 = arith.constant dense<0.000000e+00> : vector<64x52xf32>
    %248 = tpu.matmul %224, %247, %cst_131 {dimension_numbers = #tpu.dot_dimension_numbers<[1], [0], [0], [1], [0, 0, 1, 1], [], []>} : vector<64x192xf32>, vector<192x52xf32>, vector<64x52xf32> -> vector<64x52xf32>
    %249 = vector.broadcast %225 : vector<64x1xf32> to vector<64x52xf32>
    %250 = arith.addf %248, %249 : vector<64x52xf32>
    %251 = arith.addf %250, %241 : vector<64x52xf32>
    %cst_132 = arith.constant 0.000000e+00 : f32
    %252 = vector.broadcast %cst_132 : f32 to vector<64x52xf32>
    %253 = arith.maximumf %251, %252 : vector<64x52xf32>
    %254 = tpu.iota {dimensions = array<i32: 0>} : vector<52x26xi32>
    %255 = tpu.iota {dimensions = array<i32: 1>} : vector<52x26xi32>
    %c2_i32_133 = arith.constant 2 : i32
    %256 = vector.broadcast %c2_i32_133 : i32 to vector<52x26xi32>
    %257 = arith.muli %256, %255 : vector<52x26xi32>
    %c0_i32_134 = arith.constant 0 : i32
    %258 = vector.broadcast %c0_i32_134 : i32 to vector<52x26xi32>
    %259 = arith.addi %257, %258 : vector<52x26xi32>
    %260 = arith.cmpi eq, %254, %259 : vector<52x26xi32>
    %cst_135 = arith.constant 1.000000e+00 : f32
    %cst_136 = arith.constant 0.000000e+00 : f32
    %261 = vector.broadcast %cst_135 : f32 to vector<52x26xf32>
    %262 = vector.broadcast %cst_136 : f32 to vector<52x26xf32>
    %263 = arith.select %260, %261, %262 : vector<52x26xi1>, vector<52x26xf32>
    %cst_137 = arith.constant dense<0.000000e+00> : vector<64x26xf32>
    %264 = tpu.matmul %253, %263, %cst_137 {dimension_numbers = #tpu.dot_dimension_numbers<[1], [0], [0], [1], [0, 0, 1, 1], [], []>} : vector<64x52xf32>, vector<52x26xf32>, vector<64x26xf32> -> vector<64x26xf32>
    %265 = tpu.iota {dimensions = array<i32: 0>} : vector<52x26xi32>
    %266 = tpu.iota {dimensions = array<i32: 1>} : vector<52x26xi32>
    %c2_i32_138 = arith.constant 2 : i32
    %267 = vector.broadcast %c2_i32_138 : i32 to vector<52x26xi32>
    %268 = arith.muli %267, %266 : vector<52x26xi32>
    %c1_i32_139 = arith.constant 1 : i32
    %269 = vector.broadcast %c1_i32_139 : i32 to vector<52x26xi32>
    %270 = arith.addi %268, %269 : vector<52x26xi32>
    %271 = arith.cmpi eq, %265, %270 : vector<52x26xi32>
    %cst_140 = arith.constant 1.000000e+00 : f32
    %cst_141 = arith.constant 0.000000e+00 : f32
    %272 = vector.broadcast %cst_140 : f32 to vector<52x26xf32>
    %273 = vector.broadcast %cst_141 : f32 to vector<52x26xf32>
    %274 = arith.select %271, %272, %273 : vector<52x26xi1>, vector<52x26xf32>
    %cst_142 = arith.constant dense<0.000000e+00> : vector<64x26xf32>
    %275 = tpu.matmul %253, %274, %cst_142 {dimension_numbers = #tpu.dot_dimension_numbers<[1], [0], [0], [1], [0, 0, 1, 1], [], []>} : vector<64x52xf32>, vector<52x26xf32>, vector<64x26xf32> -> vector<64x26xf32>
    %276 = arith.maximumf %264, %275 : vector<64x26xf32>
    %c0_143 = arith.constant 0 : index
    %c0_144 = arith.constant 0 : index
    %277 = vector.load %arg32[%c0_143, %c0_144] : memref<64x192xf32, #tpu.memory_space<vmem>>, vector<64x192xf32>
    %c0_145 = arith.constant 0 : index
    %c0_146 = arith.constant 0 : index
    %278 = vector.load %arg33[%c0_145, %c0_146] : memref<64x1xf32, #tpu.memory_space<vmem>>, vector<64x1xf32>
    %c0_147 = arith.constant 0 : index
    %c0_148 = arith.constant 0 : index
    %279 = vector.load %arg34[%c0_147, %c0_148] : memref<64x192xf32, #tpu.memory_space<vmem>>, vector<64x192xf32>
    %c0_149 = arith.constant 0 : index
    %c0_150 = arith.constant 0 : index
    %280 = vector.load %arg35[%c0_149, %c0_150] : memref<64x1xf32, #tpu.memory_space<vmem>>, vector<64x1xf32>
    %c0_151 = arith.constant 0 : index
    %c0_152 = arith.constant 0 : index
    %281 = vector.load %arg36[%c0_151, %c0_152] : memref<64x64xf32, #tpu.memory_space<vmem>>, vector<64x64xf32>
    %c0_153 = arith.constant 0 : index
    %c0_154 = arith.constant 0 : index
    %282 = vector.load %arg37[%c0_153, %c0_154] : memref<64x1xf32, #tpu.memory_space<vmem>>, vector<64x1xf32>
    %cst_155 = arith.constant 0.000000e+00 : f32
    %283 = vector.broadcast %cst_155 : f32 to vector<64x1xf32>
    %284 = vector.extract_strided_slice %276 {offsets = [0, 0], sizes = [64, 25], strides = [1, 1]} : vector<64x26xf32> to vector<64x25xf32>
    %285 = tpu.concatenate %283, %284 in 1 : vector<64x1xf32>, vector<64x25xf32> -> vector<64x26xf32>
    %286 = vector.extract_strided_slice %276 {offsets = [0, 1], sizes = [64, 25], strides = [1, 1]} : vector<64x26xf32> to vector<64x25xf32>
    %287 = tpu.concatenate %286, %283 in 1 : vector<64x25xf32>, vector<64x1xf32> -> vector<64x26xf32>
    %288 = tpu.concatenate %285, %276, %287 in 0 : vector<64x26xf32>, vector<64x26xf32>, vector<64x26xf32> -> vector<192x26xf32>
    %cst_156 = arith.constant dense<0.000000e+00> : vector<64x26xf32>
    %289 = tpu.matmul %277, %288, %cst_156 {dimension_numbers = #tpu.dot_dimension_numbers<[1], [0], [0], [1], [0, 0, 1, 1], [], []>} : vector<64x192xf32>, vector<192x26xf32>, vector<64x26xf32> -> vector<64x26xf32>
    %290 = vector.broadcast %278 : vector<64x1xf32> to vector<64x26xf32>
    %291 = arith.addf %289, %290 : vector<64x26xf32>
    %cst_157 = arith.constant 0.000000e+00 : f32
    %292 = vector.broadcast %cst_157 : f32 to vector<64x26xf32>
    %293 = arith.maximumf %291, %292 : vector<64x26xf32>
    %cst_158 = arith.constant dense<0.000000e+00> : vector<64x26xf32>
    %294 = tpu.matmul %281, %276, %cst_158 {dimension_numbers = #tpu.dot_dimension_numbers<[1], [0], [0], [1], [0, 0, 1, 1], [], []>} : vector<64x64xf32>, vector<64x26xf32>, vector<64x26xf32> -> vector<64x26xf32>
    %295 = vector.broadcast %282 : vector<64x1xf32> to vector<64x26xf32>
    %296 = arith.addf %294, %295 : vector<64x26xf32>
    %cst_159 = arith.constant 0.000000e+00 : f32
    %297 = vector.broadcast %cst_159 : f32 to vector<64x1xf32>
    %298 = vector.extract_strided_slice %293 {offsets = [0, 0], sizes = [64, 25], strides = [1, 1]} : vector<64x26xf32> to vector<64x25xf32>
    %299 = tpu.concatenate %297, %298 in 1 : vector<64x1xf32>, vector<64x25xf32> -> vector<64x26xf32>
    %300 = vector.extract_strided_slice %293 {offsets = [0, 1], sizes = [64, 25], strides = [1, 1]} : vector<64x26xf32> to vector<64x25xf32>
    %301 = tpu.concatenate %300, %297 in 1 : vector<64x25xf32>, vector<64x1xf32> -> vector<64x26xf32>
    %302 = tpu.concatenate %299, %293, %301 in 0 : vector<64x26xf32>, vector<64x26xf32>, vector<64x26xf32> -> vector<192x26xf32>
    %cst_160 = arith.constant dense<0.000000e+00> : vector<64x26xf32>
    %303 = tpu.matmul %279, %302, %cst_160 {dimension_numbers = #tpu.dot_dimension_numbers<[1], [0], [0], [1], [0, 0, 1, 1], [], []>} : vector<64x192xf32>, vector<192x26xf32>, vector<64x26xf32> -> vector<64x26xf32>
    %304 = vector.broadcast %280 : vector<64x1xf32> to vector<64x26xf32>
    %305 = arith.addf %303, %304 : vector<64x26xf32>
    %306 = arith.addf %305, %296 : vector<64x26xf32>
    %cst_161 = arith.constant 0.000000e+00 : f32
    %307 = vector.broadcast %cst_161 : f32 to vector<64x26xf32>
    %308 = arith.maximumf %306, %307 : vector<64x26xf32>
    %309 = tpu.iota {dimensions = array<i32: 0>} : vector<26x13xi32>
    %310 = tpu.iota {dimensions = array<i32: 1>} : vector<26x13xi32>
    %c2_i32_162 = arith.constant 2 : i32
    %311 = vector.broadcast %c2_i32_162 : i32 to vector<26x13xi32>
    %312 = arith.muli %311, %310 : vector<26x13xi32>
    %c0_i32_163 = arith.constant 0 : i32
    %313 = vector.broadcast %c0_i32_163 : i32 to vector<26x13xi32>
    %314 = arith.addi %312, %313 : vector<26x13xi32>
    %315 = arith.cmpi eq, %309, %314 : vector<26x13xi32>
    %cst_164 = arith.constant 1.000000e+00 : f32
    %cst_165 = arith.constant 0.000000e+00 : f32
    %316 = vector.broadcast %cst_164 : f32 to vector<26x13xf32>
    %317 = vector.broadcast %cst_165 : f32 to vector<26x13xf32>
    %318 = arith.select %315, %316, %317 : vector<26x13xi1>, vector<26x13xf32>
    %cst_166 = arith.constant dense<0.000000e+00> : vector<64x13xf32>
    %319 = tpu.matmul %308, %318, %cst_166 {dimension_numbers = #tpu.dot_dimension_numbers<[1], [0], [0], [1], [0, 0, 1, 1], [], []>} : vector<64x26xf32>, vector<26x13xf32>, vector<64x13xf32> -> vector<64x13xf32>
    %320 = tpu.iota {dimensions = array<i32: 0>} : vector<26x13xi32>
    %321 = tpu.iota {dimensions = array<i32: 1>} : vector<26x13xi32>
    %c2_i32_167 = arith.constant 2 : i32
    %322 = vector.broadcast %c2_i32_167 : i32 to vector<26x13xi32>
    %323 = arith.muli %322, %321 : vector<26x13xi32>
    %c1_i32_168 = arith.constant 1 : i32
    %324 = vector.broadcast %c1_i32_168 : i32 to vector<26x13xi32>
    %325 = arith.addi %323, %324 : vector<26x13xi32>
    %326 = arith.cmpi eq, %320, %325 : vector<26x13xi32>
    %cst_169 = arith.constant 1.000000e+00 : f32
    %cst_170 = arith.constant 0.000000e+00 : f32
    %327 = vector.broadcast %cst_169 : f32 to vector<26x13xf32>
    %328 = vector.broadcast %cst_170 : f32 to vector<26x13xf32>
    %329 = arith.select %326, %327, %328 : vector<26x13xi1>, vector<26x13xf32>
    %cst_171 = arith.constant dense<0.000000e+00> : vector<64x13xf32>
    %330 = tpu.matmul %308, %329, %cst_171 {dimension_numbers = #tpu.dot_dimension_numbers<[1], [0], [0], [1], [0, 0, 1, 1], [], []>} : vector<64x26xf32>, vector<26x13xf32>, vector<64x13xf32> -> vector<64x13xf32>
    %331 = arith.maximumf %319, %330 : vector<64x13xf32>
    %c0_172 = arith.constant 0 : index
    %c0_173 = arith.constant 0 : index
    %c0_174 = arith.constant 0 : index
    %332 = vector.load %arg38[%c0_172, %c0_173, %c0_174] : memref<1x64x13xf32, #tpu.memory_space<vmem>>, vector<1x64x13xf32>
    %333 = vector.shape_cast %332 : vector<1x64x13xf32> to vector<64x13xf32>
    %334 = vector.shape_cast %331 : vector<64x13xf32> to vector<1x64x13xf32>
    tpu.vector_store %arg38[%c0_172, %c0_173, %c0_174], %334 {strides = array<i32>} : memref<1x64x13xf32, #tpu.memory_space<vmem>>, vector<1x64x13xf32>,
    return
  }
  func.func @transform_0(%arg0: i32) -> (i32, i32, i32) {
    %c0_i32 = arith.constant 0 : i32
    %c0_i32_0 = arith.constant 0 : i32
    %c0_i32_1 = arith.constant 0 : i32
    return %arg0, %c0_i32, %c0_i32_0 : i32, i32, i32
  }
  func.func @transform_1(%arg0: i32) -> (i32, i32) {
    %c0_i32 = arith.constant 0 : i32
    %c0_i32_0 = arith.constant 0 : i32
    %c0_i32_1 = arith.constant 0 : i32
    return %c0_i32, %c0_i32_0 : i32, i32
  }
  func.func @transform_2(%arg0: i32) -> (i32, i32) {
    %c0_i32 = arith.constant 0 : i32
    %c0_i32_0 = arith.constant 0 : i32
    %c0_i32_1 = arith.constant 0 : i32
    return %c0_i32, %c0_i32_0 : i32, i32
  }
  func.func @transform_3(%arg0: i32) -> (i32, i32) {
    %c0_i32 = arith.constant 0 : i32
    %c0_i32_0 = arith.constant 0 : i32
    %c0_i32_1 = arith.constant 0 : i32
    return %c0_i32, %c0_i32_0 : i32, i32
  }
  func.func @transform_4(%arg0: i32) -> (i32, i32) {
    %c0_i32 = arith.constant 0 : i32
    %c0_i32_0 = arith.constant 0 : i32
    %c0_i32_1 = arith.constant 0 : i32
    return %c0_i32, %c0_i32_0 : i32, i32
  }
  func.func @transform_5(%arg0: i32) -> (i32, i32) {
    %c0_i32 = arith.constant 0 : i32
    %c0_i32_0 = arith.constant 0 : i32
    %c0_i32_1 = arith.constant 0 : i32
    return %c0_i32, %c0_i32_0 : i32, i32
  }
  func.func @transform_6(%arg0: i32) -> (i32, i32) {
    %c0_i32 = arith.constant 0 : i32
    %c0_i32_0 = arith.constant 0 : i32
    %c0_i32_1 = arith.constant 0 : i32
    return %c0_i32, %c0_i32_0 : i32, i32
  }
  func.func @transform_7(%arg0: i32) -> (i32, i32) {
    %c0_i32 = arith.constant 0 : i32
    %c0_i32_0 = arith.constant 0 : i32
    %c0_i32_1 = arith.constant 0 : i32
    return %c0_i32, %c0_i32_0 : i32, i32
  }
  func.func @transform_8(%arg0: i32) -> (i32, i32) {
    %c0_i32 = arith.constant 0 : i32
    %c0_i32_0 = arith.constant 0 : i32
    %c0_i32_1 = arith.constant 0 : i32
    return %c0_i32, %c0_i32_0 : i32, i32
  }
  func.func @transform_9(%arg0: i32) -> (i32, i32) {
    %c0_i32 = arith.constant 0 : i32
    %c0_i32_0 = arith.constant 0 : i32
    %c0_i32_1 = arith.constant 0 : i32
    return %c0_i32, %c0_i32_0 : i32, i32
  }
  func.func @transform_10(%arg0: i32) -> (i32, i32) {
    %c0_i32 = arith.constant 0 : i32
    %c0_i32_0 = arith.constant 0 : i32
    %c0_i32_1 = arith.constant 0 : i32
    return %c0_i32, %c0_i32_0 : i32, i32
  }
  func.func @transform_11(%arg0: i32) -> (i32, i32) {
    %c0_i32 = arith.constant 0 : i32
    %c0_i32_0 = arith.constant 0 : i32
    %c0_i32_1 = arith.constant 0 : i32
    return %c0_i32, %c0_i32_0 : i32, i32
  }
  func.func @transform_12(%arg0: i32) -> (i32, i32) {
    %c0_i32 = arith.constant 0 : i32
    %c0_i32_0 = arith.constant 0 : i32
    %c0_i32_1 = arith.constant 0 : i32
    return %c0_i32, %c0_i32_0 : i32, i32
  }
  func.func @transform_13(%arg0: i32) -> (i32, i32) {
    %c0_i32 = arith.constant 0 : i32
    %c0_i32_0 = arith.constant 0 : i32
    %c0_i32_1 = arith.constant 0 : i32
    return %c0_i32, %c0_i32_0 : i32, i32
  }
  func.func @transform_14(%arg0: i32) -> (i32, i32) {
    %c0_i32 = arith.constant 0 : i32
    %c0_i32_0 = arith.constant 0 : i32
    %c0_i32_1 = arith.constant 0 : i32
    return %c0_i32, %c0_i32_0 : i32, i32
  }
  func.func @transform_15(%arg0: i32) -> (i32, i32) {
    %c0_i32 = arith.constant 0 : i32
    %c0_i32_0 = arith.constant 0 : i32
    %c0_i32_1 = arith.constant 0 : i32
    return %c0_i32, %c0_i32_0 : i32, i32
  }
  func.func @transform_16(%arg0: i32) -> (i32, i32) {
    %c0_i32 = arith.constant 0 : i32
    %c0_i32_0 = arith.constant 0 : i32
    %c0_i32_1 = arith.constant 0 : i32
    return %c0_i32, %c0_i32_0 : i32, i32
  }
  func.func @transform_17(%arg0: i32) -> (i32, i32) {
    %c0_i32 = arith.constant 0 : i32
    %c0_i32_0 = arith.constant 0 : i32
    %c0_i32_1 = arith.constant 0 : i32
    return %c0_i32, %c0_i32_0 : i32, i32
  }
  func.func @transform_18(%arg0: i32) -> (i32, i32) {
    %c0_i32 = arith.constant 0 : i32
    %c0_i32_0 = arith.constant 0 : i32
    %c0_i32_1 = arith.constant 0 : i32
    return %c0_i32, %c0_i32_0 : i32, i32
  }
  func.func @transform_19(%arg0: i32) -> (i32, i32) {
    %c0_i32 = arith.constant 0 : i32
    %c0_i32_0 = arith.constant 0 : i32
    %c0_i32_1 = arith.constant 0 : i32
    return %c0_i32, %c0_i32_0 : i32, i32
  }
  func.func @transform_20(%arg0: i32) -> (i32, i32) {
    %c0_i32 = arith.constant 0 : i32
    %c0_i32_0 = arith.constant 0 : i32
    %c0_i32_1 = arith.constant 0 : i32
    return %c0_i32, %c0_i32_0 : i32, i32
  }
  func.func @transform_21(%arg0: i32) -> (i32, i32) {
    %c0_i32 = arith.constant 0 : i32
    %c0_i32_0 = arith.constant 0 : i32
    %c0_i32_1 = arith.constant 0 : i32
    return %c0_i32, %c0_i32_0 : i32, i32
  }
  func.func @transform_22(%arg0: i32) -> (i32, i32) {
    %c0_i32 = arith.constant 0 : i32
    %c0_i32_0 = arith.constant 0 : i32
    %c0_i32_1 = arith.constant 0 : i32
    return %c0_i32, %c0_i32_0 : i32, i32
  }
  func.func @transform_23(%arg0: i32) -> (i32, i32) {
    %c0_i32 = arith.constant 0 : i32
    %c0_i32_0 = arith.constant 0 : i32
    %c0_i32_1 = arith.constant 0 : i32
    return %c0_i32, %c0_i32_0 : i32, i32
  }
  func.func @transform_24(%arg0: i32) -> (i32, i32) {
    %c0_i32 = arith.constant 0 : i32
    %c0_i32_0 = arith.constant 0 : i32
    %c0_i32_1 = arith.constant 0 : i32
    return %c0_i32, %c0_i32_0 : i32, i32
  }
  func.func @transform_25(%arg0: i32) -> (i32, i32) {
    %c0_i32 = arith.constant 0 : i32
    %c0_i32_0 = arith.constant 0 : i32
    %c0_i32_1 = arith.constant 0 : i32
    return %c0_i32, %c0_i32_0 : i32, i32
  }
  func.func @transform_26(%arg0: i32) -> (i32, i32) {
    %c0_i32 = arith.constant 0 : i32
    %c0_i32_0 = arith.constant 0 : i32
    %c0_i32_1 = arith.constant 0 : i32
    return %c0_i32, %c0_i32_0 : i32, i32
  }
  func.func @transform_27(%arg0: i32) -> (i32, i32) {
    %c0_i32 = arith.constant 0 : i32
    %c0_i32_0 = arith.constant 0 : i32
    %c0_i32_1 = arith.constant 0 : i32
    return %c0_i32, %c0_i32_0 : i32, i32
  }
  func.func @transform_28(%arg0: i32) -> (i32, i32) {
    %c0_i32 = arith.constant 0 : i32
    %c0_i32_0 = arith.constant 0 : i32
    %c0_i32_1 = arith.constant 0 : i32
    return %c0_i32, %c0_i32_0 : i32, i32
  }
  func.func @transform_29(%arg0: i32) -> (i32, i32) {
    %c0_i32 = arith.constant 0 : i32
    %c0_i32_0 = arith.constant 0 : i32
    %c0_i32_1 = arith.constant 0 : i32
    return %c0_i32, %c0_i32_0 : i32, i32
  }
  func.func @transform_30(%arg0: i32) -> (i32, i32) {
    %c0_i32 = arith.constant 0 : i32
    %c0_i32_0 = arith.constant 0 : i32
    %c0_i32_1 = arith.constant 0 : i32
    return %c0_i32, %c0_i32_0 : i32, i32
  }
  func.func @transform_31(%arg0: i32) -> (i32, i32) {
    %c0_i32 = arith.constant 0 : i32
    %c0_i32_0 = arith.constant 0 : i32
    %c0_i32_1 = arith.constant 0 : i32
    return %c0_i32, %c0_i32_0 : i32, i32
  }
  func.func @transform_32(%arg0: i32) -> (i32, i32) {
    %c0_i32 = arith.constant 0 : i32
    %c0_i32_0 = arith.constant 0 : i32
    %c0_i32_1 = arith.constant 0 : i32
    return %c0_i32, %c0_i32_0 : i32, i32
  }
  func.func @transform_33(%arg0: i32) -> (i32, i32) {
    %c0_i32 = arith.constant 0 : i32
    %c0_i32_0 = arith.constant 0 : i32
    %c0_i32_1 = arith.constant 0 : i32
    return %c0_i32, %c0_i32_0 : i32, i32
  }
  func.func @transform_34(%arg0: i32) -> (i32, i32) {
    %c0_i32 = arith.constant 0 : i32
    %c0_i32_0 = arith.constant 0 : i32
    %c0_i32_1 = arith.constant 0 : i32
    return %c0_i32, %c0_i32_0 : i32, i32
  }
  func.func @transform_35(%arg0: i32) -> (i32, i32) {
    %c0_i32 = arith.constant 0 : i32
    %c0_i32_0 = arith.constant 0 : i32
    %c0_i32_1 = arith.constant 0 : i32
    return %c0_i32, %c0_i32_0 : i32, i32
  }
  func.func @transform_36(%arg0: i32) -> (i32, i32) {
    %c0_i32 = arith.constant 0 : i32
    %c0_i32_0 = arith.constant 0 : i32
    %c0_i32_1 = arith.constant 0 : i32
    return %c0_i32, %c0_i32_0 : i32, i32
  }
  func.func @transform_37(%arg0: i32) -> (i32, i32, i32) {
    %c0_i32 = arith.constant 0 : i32
    %c0_i32_0 = arith.constant 0 : i32
    %c0_i32_1 = arith.constant 0 : i32
    return %arg0, %c0_i32, %c0_i32_0 : i32, i32, i32
  }
}

</mosaic_0001>

<bundles_post_ra>
// kernel: ienet_forward.3
= control target key start
LH: loop header
LB: loop body
LE: loop exit
PB: predicated region body
PF: predicated region fallthrough
CT: control target
= control target key end

     0   :  { %s5055_s0 = inlined_call_operand.vmem [shape: f32[2,832], index: 0, kind: input, shape index: {}]   ;;  %s5056_s1 = inlined_call_operand.vmem [shape: f32[832,128], index: 1, kind: input, shape index: {}]   ;;  %s5057_s2 = inlined_call_operand.vmem [shape: f32[32,128], index: 2, kind: input, shape index: {}]   ;;  %s5058_s3 = inlined_call_operand.vmem [shape: f32[1,128], index: 3, kind: input, shape index: {}]   ;;  %s5059_s4 = inlined_call_operand.vmem [shape: f32[832,128], index: 4, kind: input, shape index: {}]   ;;  %s5060_s5 = inlined_call_operand.vmem [shape: f32[32,128], index: 5, kind: input, shape index: {}]   ;;  %s5061_s6 = inlined_call_operand.vmem [shape: f32[1,128], index: 6, kind: input, shape index: {}]   ;;  %s5062_s7 = inlined_call_operand.vmem [shape: f32[64,128], index: 7, kind: input, shape index: {}]   ;;  %s5063_s8 = inlined_call_operand.vmem [shape: f32[32,128], index: 8, kind: input, shape index: {}]   ;;  %s5064_s9 = inlined_call_operand.vmem [shape: f32[1,128], index: 9, kind: input, shape index: {}]   ;;  %s5065_s10 = inlined_call_operand.vmem [shape: f32[64,128], index: 10, kind: input, shape index: {}]   ;;  %s5066_s11 = inlined_call_operand.vmem [shape: f32[32,128], index: 11, kind: input, shape index: {}]   ;;  %s5067_s12 = inlined_call_operand.vmem [shape: f32[1,128], index: 12, kind: input, shape index: {}]   ;;  %s5068_s13 = inlined_call_operand.vmem [shape: f32[64,128], index: 13, kind: input, shape index: {}]   ;;  %s5069_s14 = inlined_call_operand.vmem [shape: f32[32,128], index: 14, kind: input, shape index: {}]   ;;  %s5070_s15 = inlined_call_operand.vmem [shape: f32[1,128], index: 15, kind: input, shape index: {}]   ;;  %s5071_s16 = inlined_call_operand.vmem [shape: f32[64,128], index: 16, kind: input, shape index: {}]   ;;  %s5072_s17 = inlined_call_operand.vmem [shape: f32[32,128], index: 17, kind: input, shape index: {}]   ;;  %s5073_s18 = inlined_call_operand.vmem [shape: f32[1,128], index: 18, kind: input, shape index: {}]   ;;  %s5074_s19 = inlined_call_operand.vmem [shape: f32[64,2], index: 19, kind: input, shape index: {}]   ;;  %s5075_s20 = inlined_call_operand.vmem [shape: f32[1,2], index: 20, kind: input, shape index: {}]   ;;  %s5076_s21 = inlined_call_operand.hbm [shape: f32[2,2], index: 21, kind: output, shape index: {0}]   ;;  %s5077_s22 = inlined_call_operand.hbm [shape: f32[2,64], index: 22, kind: output, shape index: {1}]  }
   0x1   :  { %5083 = sst [smem:[#allocation8_spill]] %s5055_s0 }
   0x2   :  { %5084 = sst [smem:[#allocation9_spill]] %s5056_s1 }
   0x3   :  { %5085 = sst [smem:[#allocation10_spill]] %s5057_s2 }
   0x4   :  { %5086 = sst [smem:[#allocation11_spill]] %s5058_s3 }
   0x5   :  { %5087 = sst [smem:[#allocation12_spill]] %s5059_s4 }
   0x6   :  { %5088 = sst [smem:[#allocation13_spill]] %s5060_s5 }
   0x7   :  { %5089 = sst [smem:[#allocation14_spill]] %s5061_s6 }
   0x8   :  { %28 = vsyncpa [#allocation3], 0  ;;  %s5090_s29 = sld [smem:[#allocation9_spill]]  ;;  %v3766_v47 = vmov 1983009808   ;;  %v304_v49 = vlaneseq  ;;  %s5091_s3 = sld [smem:[#allocation8_spill]] }
   0x9   :  { %v302_v48 = vunpack.c.l.s4 %v3766_v47  ;;  %vm3768_vm0 = vmmov 0   ;;  %s5092_s5 = sld [smem:[#allocation12_spill]]  ;;  %vm339_vm1 = vcmask 523264  }
   0xb   :  { %v303_v63 = vunpack.c.0.s8 %v302_v48 }
   0xe   :  { %v90_v0 = vld [vmem:[%s5090_s29 + $0x80] sm:$0xff]  ;;  %v91_v1 = vld [vmem:[%s5090_s29 + $0x88] sm:$0xff]  ;;  %v92_v11 = vld [vmem:[%s5090_s29 + $0x90] sm:$0xff] }
   0xf   :  { %v122_v2 = vld [vmem:[%s5090_s29 + $0x180] sm:$0xff]  ;;  %v3264_v3 = vpack.c.bf16 %v91_v1, %v90_v0  ;;  %v123_v4 = vld [vmem:[%s5090_s29 + $0x188] sm:$0xff]  ;;  %v93_v13 = vld [vmem:[%s5090_s29 + $0x98] sm:$0xff]  ;;  %v305_v0 = vshrl.u32 %v304_v49, 7 }
  0x10   :  { %v74_v5 = vld [vmem:[%s5090_s29] sm:$0xff]  ;;  %v75_v6 = vld [vmem:[%s5090_s29 + $0x8] sm:$0xff]  ;;  %v3296_v7 = vpack.c.bf16 %v123_v4, %v122_v2  ;;  %v124_v14 = vld [vmem:[%s5090_s29 + $0x190] sm:$0xff]  ;;  %v3268_v16 = vpack.c.bf16 %v93_v13, %v92_v11 }
  0x11   :  { %v3266_v8 = vpack.c.bf16 %v75_v6, %v74_v5  ;;  %v106_v9 = vld [vmem:[%s5090_s29 + $0x100] sm:$0xff]  ;;  %v107_v10 = vld [vmem:[%s5090_s29 + $0x108] sm:$0xff]  ;;  %3265 = vmatprep.subr.bf16.mxu0 %v3264_v3  ;;  %v125_v15 = vld [vmem:[%s5090_s29 + $0x198] sm:$0xff]  ;;  %v4039_v13 = vsub.s32 %v303_v63, %v305_v0 }
  0x12   :  { %v3298_v12 = vpack.c.bf16 %v107_v10, %v106_v9  ;;  %3297 = vmatprep.subr.bf16.mxu1 %v3296_v7  ;;  %v3300_v17 = vpack.c.bf16 %v125_v15, %v124_v14  ;;  %v76_v18 = vld [vmem:[%s5090_s29 + $0x10] sm:$0xff]  ;;  %v77_v19 = vld [vmem:[%s5090_s29 + $0x18] sm:$0xff]  ;;  %v94_v23 = vld [vmem:[%s5090_s29 + $0xa0] sm:$0xff] }
  0x13   :  { %3267 = vmatpush3.bf16.msra.mxu0 %v3266_v8  ;;  %v108_v20 = vld [vmem:[%s5090_s29 + $0x110] sm:$0xff]  ;;  %v3270_v21 = vpack.c.bf16 %v77_v19, %v76_v18  ;;  %v109_v22 = vld [vmem:[%s5090_s29 + $0x118] sm:$0xff]  ;;  %v95_v24 = vld [vmem:[%s5090_s29 + $0xa8] sm:$0xff] }
  0x14   :  { %3299 = vmatpush3.bf16.msra.mxu1 %v3298_v12  ;;  %3269 = vmatprep.subr.bf16.mxu0 %v3268_v16  ;;  %v3302_v25 = vpack.c.bf16 %v109_v22, %v108_v20  ;;  %v3272_v26 = vpack.c.bf16 %v95_v24, %v94_v23  ;;  %v126_v27 = vld [vmem:[%s5090_s29 + $0x1a0] sm:$0xff]  ;;  %v127_v28 = vld [vmem:[%s5090_s29 + $0x1a8] sm:$0xff]  ;;  %v96_v35 = vld [vmem:[%s5090_s29 + $0xb0] sm:$0xff] }
  0x15   :  { %3301 = vmatprep.subr.bf16.mxu1 %v3300_v17  ;;  %v78_v29 = vld [vmem:[%s5090_s29 + $0x20] sm:$0xff]  ;;  %v3304_v30 = vpack.c.bf16 %v127_v28, %v126_v27  ;;  %v79_v31 = vld [vmem:[%s5090_s29 + $0x28] sm:$0xff]  ;;  %v97_v36 = vld [vmem:[%s5090_s29 + $0xb8] sm:$0xff] }
  0x16   :  { %v110_v32 = vld [vmem:[%s5090_s29 + $0x120] sm:$0xff]  ;;  %v111_v33 = vld [vmem:[%s5090_s29 + $0x128] sm:$0xff]  ;;  %v3274_v34 = vpack.c.bf16 %v79_v31, %v78_v29  ;;  %v128_v37 = vld [vmem:[%s5090_s29 + $0x1b0] sm:$0xff]  ;;  %v3276_v39 = vpack.c.bf16 %v97_v36, %v96_v35 }
  0x17   :  { %3271 = vmatpush3.bf16.msra.mxu0 %v3270_v21  ;;  %v3306_v38 = vpack.c.bf16 %v111_v33, %v110_v32  ;;  %v129_v40 = vld [vmem:[%s5090_s29 + $0x1b8] sm:$0xff]  ;;  %v80_v41 = vld [vmem:[%s5090_s29 + $0x30] sm:$0xff]  ;;  %v98_v46 = vld [vmem:[%s5090_s29 + $0xc0] sm:$0xff] }
  0x18   :  { %3303 = vmatpush3.bf16.msra.mxu1 %v3302_v25  ;;  %3273 = vmatprep.subr.bf16.mxu0 %v3272_v26  ;;  %v81_v42 = vld [vmem:[%s5090_s29 + $0x38] sm:$0xff]  ;;  %v3308_v43 = vpack.c.bf16 %v129_v40, %v128_v37  ;;  %v112_v44 = vld [vmem:[%s5090_s29 + $0x130] sm:$0xff]  ;;  %v99_v50 = vld [vmem:[%s5090_s29 + $0xc8] sm:$0xff] }
  0x19   :  { %3305 = vmatprep.subr.bf16.mxu1 %v3304_v30  ;;  %v113_v45 = vld [vmem:[%s5090_s29 + $0x138] sm:$0xff]  ;;  %v130_v51 = vld [vmem:[%s5090_s29 + $0x1c0] sm:$0xff]  ;;  %v131_v52 = vld [vmem:[%s5090_s29 + $0x1c8] sm:$0xff]  ;;  %v3278_v53 = vpack.c.bf16 %v81_v42, %v80_v41  ;;  %v3280_v55 = vpack.c.bf16 %v99_v50, %v98_v46 }
  0x1a   :  { %v3310_v54 = vpack.c.bf16 %v113_v45, %v112_v44  ;;  %v82_v56 = vld [vmem:[%s5090_s29 + $0x40] sm:$0xff]  ;;  %v83_v57 = vld [vmem:[%s5090_s29 + $0x48] sm:$0xff]  ;;  %v3312_v59 = vpack.c.bf16 %v131_v52, %v130_v51  ;;  %v100_v61 = vld [vmem:[%s5090_s29 + $0xd0] sm:$0xff] }
  0x1b   :  { %3275 = vmatpush3.bf16.msra.mxu0 %v3274_v34  ;;  %v114_v58 = vld [vmem:[%s5090_s29 + $0x140] sm:$0xff]  ;;  %v115_v60 = vld [vmem:[%s5090_s29 + $0x148] sm:$0xff]  ;;  %v101_v62 = vld [vmem:[%s5090_s29 + $0xd8] sm:$0xff]  ;;  %v3282_v3 = vpack.c.bf16 %v83_v57, %v82_v56 }
  0x1c   :  { %3307 = vmatpush3.bf16.msra.mxu1 %v3306_v38  ;;  %3277 = vmatprep.subr.bf16.mxu0 %v3276_v39  ;;  %v132_v1 = vld [vmem:[%s5090_s29 + $0x1d0] sm:$0xff]  ;;  %v133_v2 = vld [vmem:[%s5090_s29 + $0x1d8] sm:$0xff]  ;;  %v3314_v4 = vpack.c.bf16 %v115_v60, %v114_v58  ;;  %v3284_v5 = vpack.c.bf16 %v101_v62, %v100_v61  ;;  %v102_v11 = vld [vmem:[%s5090_s29 + $0xe0] sm:$0xff]  ;;  %v3767_v61 = vmov 0.0|0.0  }
  0x1d   :  { %3309 = vmatprep.subr.bf16.mxu1 %v3308_v43  ;;  %v84_v6 = vld [vmem:[%s5090_s29 + $0x50] sm:$0xff]  ;;  %v85_v7 = vld [vmem:[%s5090_s29 + $0x58] sm:$0xff]  ;;  %v3316_v9 = vpack.c.bf16 %v133_v2, %v132_v1  ;;  %v103_v12 = vld [vmem:[%s5090_s29 + $0xe8] sm:$0xff] }
  0x1e   :  { %v116_v8 = vld [vmem:[%s5090_s29 + $0x150] sm:$0xff]  ;;  %v117_v10 = vld [vmem:[%s5090_s29 + $0x158] sm:$0xff]  ;;  %v134_v14 = vld [vmem:[%s5090_s29 + $0x1e0] sm:$0xff]  ;;  %v3286_v16 = vpack.c.bf16 %v85_v7, %v84_v6  ;;  %v3288_v19 = vpack.c.bf16 %v103_v12, %v102_v11  ;;  %v3769_v11 = vmov 0.0  }
  0x1f   :  { %3279 = vmatpush3.bf16.msra.mxu0 %v3278_v53  ;;  %v135_v15 = vld [vmem:[%s5090_s29 + $0x1e8] sm:$0xff]  ;;  %v86_v17 = vld [vmem:[%s5090_s29 + $0x60] sm:$0xff]  ;;  %v3318_v18 = vpack.c.bf16 %v117_v10, %v116_v8  ;;  %v104_v25 = vld [vmem:[%s5090_s29 + $0xf0] sm:$0xff] }
  0x20   :  { %3311 = vmatpush3.bf16.msra.mxu1 %v3310_v54  ;;  %3281 = vmatprep.subr.bf16.mxu0 %v3280_v55  ;;  %v87_v20 = vld [vmem:[%s5090_s29 + $0x68] sm:$0xff]  ;;  %v118_v21 = vld [vmem:[%s5090_s29 + $0x160] sm:$0xff]  ;;  %v3320_v23 = vpack.c.bf16 %v135_v15, %v134_v14  ;;  %v105_v26 = vld [vmem:[%s5090_s29 + $0xf8] sm:$0xff] }
  0x21   :  { %3313 = vmatprep.subr.bf16.mxu1 %v3312_v59  ;;  %v72_v22 = vld [vmem:[%s5091_s3] sm:$0xff]  ;;  %v119_v24 = vld [vmem:[%s5090_s29 + $0x168] sm:$0xff]  ;;  %v136_v29 = vld [vmem:[%s5090_s29 + $0x1f0] sm:$0xff]  ;;  %v3290_v31 = vpack.c.bf16 %v87_v20, %v86_v17  ;;  %v3292_v35 = vpack.c.bf16 %v105_v26, %v104_v25 }
  0x22   :  { %v4069_v27 = vrot.slane %v72_v22, %v4039_v13  ;;  %v300_v28 = vcombine.high %v72_v22, %v72_v22  ;;  %v137_v30 = vld [vmem:[%s5090_s29 + $0x1f8] sm:$0xff]  ;;  %v3322_v34 = vpack.c.bf16 %v119_v24, %v118_v21  ;;  %v88_v36 = vld [vmem:[%s5090_s29 + $0x70] sm:$0xff]  ;;  %v154_v42 = vld [vmem:[%s5090_s29 + $0x280] sm:$0xff] }
  0x23   :  { %3283 = vmatpush3.bf16.msra.mxu0 %v3282_v3  ;;  %v89_v37 = vld [vmem:[%s5090_s29 + $0x78] sm:$0xff]  ;;  %v120_v38 = vld [vmem:[%s5090_s29 + $0x170] sm:$0xff]  ;;  %v3324_v39 = vpack.c.bf16 %v137_v30, %v136_v29  ;;  %v155_v43 = vld [vmem:[%s5090_s29 + $0x288] sm:$0xff] }
  0x24   :  { %3315 = vmatpush3.bf16.msra.mxu1 %v3314_v4  ;;  %3285 = vmatprep.subr.bf16.mxu0 %v3284_v5  ;;  %v4079_v32 = vcombine.high %v4069_v27, %v4069_v27  ;;  %v4082_v33 = vrot.slane %v300_v28, %v4039_v13  ;;  %v121_v40 = vld [vmem:[%s5090_s29 + $0x178] sm:$0xff]  ;;  %v3294_v44 = vpack.c.bf16 %v89_v37, %v88_v36  ;;  %v138_v45 = vld [vmem:[%s5090_s29 + $0x200] sm:$0xff]  ;;  %v139_v48 = vld [vmem:[%s5090_s29 + $0x208] sm:$0xff] }
  0x25   :  { %3317 = vmatprep.subr.bf16.mxu1 %v3316_v9  ;;  %v3326_v46 = vpack.c.bf16 %v121_v40, %v120_v38  ;;  %v3328_v47 = vpack.c.bf16 %v155_v43, %v154_v42  ;;  %v170_v49 = vld [vmem:[%s5090_s29 + $0x300] sm:$0xff]  ;;  %v171_v50 = vld [vmem:[%s5090_s29 + $0x308] sm:$0xff]  ;;  %v156_v51 = vld [vmem:[%s5090_s29 + $0x290] sm:$0xff]  ;;  %v3330_v55 = vpack.c.bf16 %v139_v48, %v138_v45 }
  0x26   :  { %406 = vmatprep.mubr.f32.mxu0 %v4079_v32  ;;  %v4099_v41 = vcombine.high %v4082_v33, %v4082_v33  ;;  %v157_v52 = vld [vmem:[%s5090_s29 + $0x298] sm:$0xff]  ;;  %v4129_v53 = vld [vmem:[%s5091_s3 + $0x8] sm:$0x3f]  ;;  %v3361_v56 = vpack.c.bf16 %v171_v50, %v170_v49  ;;  %v140_v58 = vld [vmem:[%s5090_s29 + $0x210] sm:$0xff] }
  0x27   :  { %3287 = vmatpush3.bf16.msra.mxu0 %v3286_v16  ;;  %v4133_v54 = vrot.slane %v4129_v53, %v4039_v13  ;;  %v3332_v57 = vpack.c.bf16 %v157_v52, %v156_v51  ;;  %v141_v59 = vld [vmem:[%s5090_s29 + $0x218] sm:$0xff]  ;;  %v172_v60 = vld [vmem:[%s5090_s29 + $0x310] sm:$0xff]  ;;  %v158_v63 = vld [vmem:[%s5090_s29 + $0x2a0] sm:$0xff]  ;;  %v317_v25 = vcombine.high %v4129_v53, %v4129_v53 }
  0x28   :  { %3319 = vmatpush3.bf16.msra.mxu1 %v3318_v18  ;;  %3289 = vmatprep.subr.bf16.mxu0 %v3288_v19  ;;  %v173_v62 = vld [vmem:[%s5090_s29 + $0x318] sm:$0xff]  ;;  %v159_v0 = vld [vmem:[%s5090_s29 + $0x2a8] sm:$0xff]  ;;  %v3334_v2 = vpack.c.bf16 %v141_v59, %v140_v58  ;;  %v142_v5 = vld [vmem:[%s5090_s29 + $0x220] sm:$0xff] }
  0x29   :  { %3321 = vmatprep.subr.bf16.mxu1 %v3320_v23  ;;  %476 = vmatprep.mubr.f32.mxu1 %v4099_v41  ;;  %v4157_v1 = vcombine.high %v4133_v54, %v4133_v54  ;;  %v3364_v3 = vpack.c.bf16 %v173_v62, %v172_v60  ;;  %v3336_v4 = vpack.c.bf16 %v159_v0, %v158_v63  ;;  %v143_v6 = vld [vmem:[%s5090_s29 + $0x228] sm:$0xff]  ;;  %v174_v7 = vld [vmem:[%s5090_s29 + $0x320] sm:$0xff]  ;;  %v160_v9 = vld [vmem:[%s5090_s29 + $0x2b0] sm:$0xff] }
  0x2a   :  { %v175_v8 = vld [vmem:[%s5090_s29 + $0x328] sm:$0xff]  ;;  %v161_v10 = vld [vmem:[%s5090_s29 + $0x2b8] sm:$0xff]  ;;  %v3338_v12 = vpack.c.bf16 %v143_v6, %v142_v5  ;;  %v144_v16 = vld [vmem:[%s5090_s29 + $0x230] sm:$0xff]  ;;  %v4235_v40 = vrot.slane %v317_v25, %v4039_v13 }
  0x2b   :  { %3291 = vmatpush3.bf16.msra.mxu0 %v3290_v31  ;;  %v3367_v14 = vpack.c.bf16 %v175_v8, %v174_v7  ;;  %v3340_v15 = vpack.c.bf16 %v161_v10, %v160_v9  ;;  %v145_v17 = vld [vmem:[%s5090_s29 + $0x238] sm:$0xff]  ;;  %v176_v18 = vld [vmem:[%s5090_s29 + $0x330] sm:$0xff]  ;;  %v162_v20 = vld [vmem:[%s5090_s29 + $0x2c0] sm:$0xff] }
  0x2c   :  { %3323 = vmatpush3.bf16.msra.mxu1 %v3322_v34  ;;  %3293 = vmatprep.subr.bf16.mxu0 %v3292_v35  ;;  %v177_v19 = vld [vmem:[%s5090_s29 + $0x338] sm:$0xff]  ;;  %v163_v21 = vld [vmem:[%s5090_s29 + $0x2c8] sm:$0xff]  ;;  %v199_v22 = vld [vmem:[%s5092_s5 + $0x80] sm:$0xff]  ;;  %v3342_v24 = vpack.c.bf16 %v145_v17, %v144_v16 }
  0x2d   :  { %3325 = vmatprep.subr.bf16.mxu1 %v3324_v39  ;;  %v200_v23 = vld [vmem:[%s5092_s5 + $0x88] sm:$0xff]  ;;  %v3370_v26 = vpack.c.bf16 %v177_v19, %v176_v18  ;;  %v3344_v28 = vpack.c.bf16 %v163_v21, %v162_v20  ;;  %v146_v29 = vld [vmem:[%s5090_s29 + $0x240] sm:$0xff]  ;;  %v164_v36 = vld [vmem:[%s5090_s29 + $0x2d0] sm:$0xff] }
  0x2e   :  { %v147_v30 = vld [vmem:[%s5090_s29 + $0x248] sm:$0xff]  ;;  %v183_v31 = vld [vmem:[%s5092_s5] sm:$0xff]  ;;  %v3372_v34 = vpack.c.bf16 %v200_v23, %v199_v22  ;;  %v165_v37 = vld [vmem:[%s5090_s29 + $0x2d8] sm:$0xff] }
  0x2f   :  { %3295 = vmatpush3.bf16.msra.mxu0 %v3294_v44  ;;  %v184_v35 = vld [vmem:[%s5092_s5 + $0x8] sm:$0xff]  ;;  %v201_v38 = vld [vmem:[%s5092_s5 + $0x90] sm:$0xff]  ;;  %v202_v39 = vld [vmem:[%s5092_s5 + $0x98] sm:$0xff]  ;;  %v3346_v42 = vpack.c.bf16 %v147_v30, %v146_v29  ;;  %v3348_v44 = vpack.c.bf16 %v165_v37, %v164_v36 }
  0x30   :  { %3327 = vmatpush3.bf16.msra.mxu1 %v3326_v46  ;;  %3329 = vmatprep.subr.bf16.mxu0 %v3328_v47  ;;  %v3374_v43 = vpack.c.bf16 %v184_v35, %v183_v31  ;;  %v148_v45 = vld [vmem:[%s5090_s29 + $0x250] sm:$0xff]  ;;  %v149_v46 = vld [vmem:[%s5090_s29 + $0x258] sm:$0xff]  ;;  %v3376_v13 = vpack.c.bf16 %v202_v39, %v201_v38  ;;  %v166_v49 = vld [vmem:[%s5090_s29 + $0x2e0] sm:$0xff] }
  0x31   :  { %3360 = vmatprep.subr.bf16.mxu1 %v3767_v61  ;;  %v185_v47 = vld [vmem:[%s5092_s5 + $0x10] sm:$0xff]  ;;  %v186_v48 = vld [vmem:[%s5092_s5 + $0x18] sm:$0xff]  ;;  %v167_v50 = vld [vmem:[%s5090_s29 + $0x2e8] sm:$0xff]  ;;  %v3350_v53 = vpack.c.bf16 %v149_v46, %v148_v45 }
  0x32   :  { %407 = vmatmul.mubr.f32.vlgmr.msra.gmra.mrb[0].mxu0 %v4069_v27  ;;  %v203_v51 = vld [vmem:[%s5092_s5 + $0xa0] sm:$0xff]  ;;  %v204_v52 = vld [vmem:[%s5092_s5 + $0xa8] sm:$0xff]  ;;  %v168_v63 = vld [vmem:[%s5090_s29 + $0x2f0] sm:$0xff] }
  0x33   :  { %477 = vmatmul.mubr.f32.vlgmr.msra.gmra.mrb[0].mxu1 %v4082_v33  ;;  %3331 = vmatpush3.bf16.msra.mxu0 %v3330_v55  ;;  %v3378_v55 = vpack.c.bf16 %v186_v48, %v185_v47  ;;  %v151_v58 = vld [vmem:[%s5090_s29 + $0x268] sm:$0xff]  ;;  %v187_v59 = vld [vmem:[%s5092_s5 + $0x20] sm:$0xff]  ;;  %v3380_v60 = vpack.c.bf16 %v204_v52, %v203_v51  ;;  %v169_v0 = vld [vmem:[%s5090_s29 + $0x2f8] sm:$0xff] }
  0x34   :  { %3362 = vmatpush3.bf16.msra.mxu1 %v3361_v56  ;;  %3333 = vmatprep.subr.bf16.mxu0 %v3332_v57  ;;  %v3352_v56 = vpack.c.bf16 %v167_v50, %v166_v49  ;;  %v150_v57 = vld [vmem:[%s5090_s29 + $0x260] sm:$0xff]  ;;  %v188_v62 = vld [vmem:[%s5092_s5 + $0x28] sm:$0xff]  ;;  %v3356_v6 = vpack.c.bf16 %v169_v0, %v168_v63  ;;  %v152_v7 = vld [vmem:[%s5090_s29 + $0x270] sm:$0xff] }
  0x35   :  { %3363 = vmatprep.subr.bf16.mxu1 %v3767_v61  ;;  %3015 = vmatprep.mubr.msk.f32.mxu1 %vm3768_vm0, %v3769_v11  ;;  %v3382_v5 = vpack.c.bf16 %v188_v62, %v187_v59  ;;  %v189_v8 = vld [vmem:[%s5092_s5 + $0x30] sm:$0xff]  ;;  %v190_v10 = vld [vmem:[%s5092_s5 + $0x38] sm:$0xff]  ;;  %v208_v16 = vld [vmem:[%s5092_s5 + $0xc8] sm:$0xff] }
  0x36   :  { %546 = vmatprep.mubr.f32.mxu0 %v4157_v1  ;;  %v3386_v18 = vpack.c.bf16 %v190_v10, %v189_v8  ;;  %v191_v20 = vld [vmem:[%s5092_s5 + $0x40] sm:$0xff]  ;;  %v216_v22 = vld [vmem:[%s5092_s5 + $0x108] sm:$0xff]  ;;  %v233_v25 = vld [vmem:[%s5092_s5 + $0x190] sm:$0xff] }
  0x37   :  { %3335 = vmatpush3.bf16.msra.mxu0 %v3334_v2  ;;  %v205_v2 = vld [vmem:[%s5092_s5 + $0xb0] sm:$0xff]  ;;  %v215_v21 = vld [vmem:[%s5092_s5 + $0x100] sm:$0xff]  ;;  %v210_v29 = vld [vmem:[%s5092_s5 + $0xd8] sm:$0xff] }
  0x38   :  { %3365 = vmatpush3.bf16.msra.mxu1 %v3364_v3  ;;  %3337 = vmatprep.subr.bf16.mxu0 %v3336_v4  ;;  %v206_v3 = vld [vmem:[%s5092_s5 + $0xb8] sm:$0xff]  ;;  %v3354_v4 = vpack.c.bf16 %v151_v58, %v150_v57  ;;  %v3406_v30 = vpack.c.bf16 %v216_v22, %v215_v21  ;;  %v193_v35 = vld [vmem:[%s5092_s5 + $0x50] sm:$0xff]  ;;  %v212_v45 = vld [vmem:[%s5092_s5 + $0xe8] sm:$0xff] }
  0x39   :  { %3366 = vmatprep.subr.bf16.mxu1 %v3767_v61  ;;  %v3384_v9 = vpack.c.bf16 %v206_v3, %v205_v2  ;;  %v217_v36 = vld [vmem:[%s5092_s5 + $0x110] sm:$0xff]  ;;  %v218_v37 = vld [vmem:[%s5092_s5 + $0x118] sm:$0xff]  ;;  %v195_v48 = vld [vmem:[%s5092_s5 + $0x60] sm:$0xff] }
  0x3a   :  { %v194_v39 = vld [vmem:[%s5092_s5 + $0x58] sm:$0xff]  ;;  %v3410_v46 = vpack.c.bf16 %v218_v37, %v217_v36  ;;  %v219_v49 = vld [vmem:[%s5092_s5 + $0x120] sm:$0xff]  ;;  %v220_v50 = vld [vmem:[%s5092_s5 + $0x128] sm:$0xff] }
  0x3b   :  { %3339 = vmatpush3.bf16.msra.mxu0 %v3338_v12  ;;  %v231_v12 = vld [vmem:[%s5092_s5 + $0x180] sm:$0xff]  ;;  %v3394_v47 = vpack.c.bf16 %v194_v39, %v193_v35  ;;  %v237_v52 = vld [vmem:[%s5092_s5 + $0x1b0] sm:$0xff]  ;;  %v3414_v57 = vpack.c.bf16 %v220_v50, %v219_v49 }
  0x3c   :  { %3368 = vmatpush3.bf16.msra.mxu1 %v3367_v14  ;;  %3341 = vmatprep.subr.bf16.mxu0 %v3340_v15  ;;  %v232_v14 = vld [vmem:[%s5092_s5 + $0x188] sm:$0xff]  ;;  %v207_v15 = vld [vmem:[%s5092_s5 + $0xc0] sm:$0xff] }
  0x3d   :  { %3369 = vmatprep.subr.bf16.mxu1 %v3767_v61  ;;  %v3404_v19 = vpack.c.bf16 %v232_v14, %v231_v12  ;;  %v3388_v23 = vpack.c.bf16 %v208_v16, %v207_v15 }
  0x3f   :  { %3343 = vmatpush3.bf16.msra.mxu0 %v3342_v24  ;;  %v192_v24 = vld [vmem:[%s5092_s5 + $0x48] sm:$0xff] }
  0x40   :  { %3371 = vmatpush3.bf16.msra.mxu1 %v3370_v26  ;;  %3345 = vmatprep.subr.bf16.mxu0 %v3344_v28  ;;  %v234_v26 = vld [vmem:[%s5092_s5 + $0x198] sm:$0xff]  ;;  %v209_v28 = vld [vmem:[%s5092_s5 + $0xd0] sm:$0xff]  ;;  %v3390_v31 = vpack.c.bf16 %v192_v24, %v191_v20 }
  0x41   :  { %3373 = vmatprep.subr.bf16.mxu1 %v3372_v34  ;;  %v3408_v34 = vpack.c.bf16 %v234_v26, %v233_v25  ;;  %v3392_v38 = vpack.c.bf16 %v210_v29, %v209_v28 }
  0x43   :  { %3016 = vmatmul.mubr.msk.f32.vlgmr.msra.gmra.mrb[2].mxu1 %vm339_vm1, %v4235_v40  ;;  %3347 = vmatpush3.bf16.msra.mxu0 %v3346_v42  ;;  %v235_v42 = vld [vmem:[%s5092_s5 + $0x1a0] sm:$0xff] }
  0x44   :  { %3375 = vmatpush3.bf16.msra.mxu1 %v3374_v43  ;;  %3349 = vmatprep.subr.bf16.mxu0 %v3348_v44  ;;  %v236_v43 = vld [vmem:[%s5092_s5 + $0x1a8] sm:$0xff]  ;;  %v211_v44 = vld [vmem:[%s5092_s5 + $0xe0] sm:$0xff] }
  0x45   :  { %3377 = vmatprep.subr.bf16.mxu1 %v3376_v13  ;;  %692 = vmatprep.mubr.f32.mxu1 %v4079_v32  ;;  %v153_v32 = vld [vmem:[%s5090_s29 + $0x278] sm:$0xff]  ;;  %v3412_v13 = vpack.c.bf16 %v236_v43, %v235_v42  ;;  %v3396_v51 = vpack.c.bf16 %v212_v45, %v211_v44 }
  0x46   :  { %v3358_v17 = vpack.c.bf16 %v153_v32, %v152_v7 }
  0x47   :  { %3351 = vmatpush3.bf16.msra.mxu0 %v3350_v53  ;;  %v238_v53 = vld [vmem:[%s5092_s5 + $0x1b8] sm:$0xff] }
  0x48   :  { %3379 = vmatpush3.bf16.msra.mxu1 %v3378_v55  ;;  %3353 = vmatprep.subr.bf16.mxu0 %v3352_v56  ;;  %v213_v55 = vld [vmem:[%s5092_s5 + $0xf0] sm:$0xff]  ;;  %v214_v56 = vld [vmem:[%s5092_s5 + $0xf8] sm:$0xff] }
  0x49   :  { %3381 = vmatprep.subr.bf16.mxu1 %v3380_v60 }
  0x4b   :  { %3355 = vmatpush3.bf16.msra.mxu0 %v3354_v4 }
  0x4c   :  { %3383 = vmatpush3.bf16.msra.mxu1 %v3382_v5  ;;  %3357 = vmatprep.subr.bf16.mxu0 %v3356_v6 }
  0x4d   :  { %3385 = vmatprep.subr.bf16.mxu1 %v3384_v9 }
  0x4f   :  { %3359 = vmatpush3.bf16.msra.mxu0 %v3358_v17 }
  0x50   :  { %3387 = vmatpush3.bf16.msra.mxu1 %v3386_v18  ;;  %3405 = vmatprep.subr.bf16.mxu0 %v3404_v19 }
  0x51   :  { %3389 = vmatprep.subr.bf16.mxu1 %v3388_v23 }
  0x52   :  { %547 = vmatmul.mubr.f32.vlgmr.msra.gmra.mrb[2].mxu0 %v4133_v54 }
  0x53   :  { %3407 = vmatpush3.bf16.msra.mxu0 %v3406_v30  ;;  %762 = vmatprep.mubr.f32.mxu0 %v4099_v41  ;;  %v196_v41 = vld [vmem:[%s5092_s5 + $0x68] sm:$0xff] }
  0x54   :  { %3391 = vmatpush3.bf16.msra.mxu1 %v3390_v31  ;;  %3409 = vmatprep.subr.bf16.mxu0 %v3408_v34 }
  0x55   :  { %3393 = vmatprep.subr.bf16.mxu1 %v3392_v38 }
  0x57   :  { %3411 = vmatpush3.bf16.msra.mxu0 %v3410_v46 }
  0x58   :  { %29 = vsyncpa [#allocation5], 0  ;;  %3395 = vmatpush3.bf16.msra.mxu1 %v3394_v47  ;;  %3413 = vmatprep.subr.bf16.mxu0 %v3412_v13  ;;  %v3398_v58 = vpack.c.bf16 %v196_v41, %v195_v48  ;;  %v3416_v59 = vpack.c.bf16 %v238_v53, %v237_v52  ;;  %v197_v60 = vld [vmem:[%s5092_s5 + $0x70] sm:$0xff]  ;;  %v222_v63 = vld [vmem:[%s5092_s5 + $0x138] sm:$0xff]  ;;  %v3400_v0 = vpack.c.bf16 %v214_v56, %v213_v55  ;;  %s5093_s25 = sld [smem:[#allocation13_spill]]  ;;  %s5094_s3 = sld [smem:[#allocation10_spill]] }
  0x59   :  { %v221_v62 = vld [vmem:[%s5092_s5 + $0x130] sm:$0xff]  ;;  %3397 = vmatprep.subr.bf16.mxu1 %v3396_v51  ;;  %v198_v2 = vld [vmem:[%s5092_s5 + $0x78] sm:$0xff]  ;;  %v239_v3 = vld [vmem:[%s5092_s5 + $0x1c0] sm:$0xff]  ;;  %s5095_s27 = sld [smem:[#allocation11_spill]]  ;;  %s3770_s30 = smov 64   ;;  %vm908_vm2 = vcmask 261120  }
  0x5a   :  { %v240_v4 = vld [vmem:[%s5092_s5 + $0x1c8] sm:$0xff]  ;;  %v263_v5 = vld [vmem:[%s5092_s5 + $0x280] sm:$0xff]  ;;  %v3418_v7 = vpack.c.bf16 %v222_v63, %v221_v62  ;;  %v3402_v32 = vpack.c.bf16 %v198_v2, %v197_v60  ;;  %v241_v16 = vld [vmem:[%s5092_s5 + $0x1d0] sm:$0xff]  ;;  %s3771_s4 = smov 32   ;;  %vm1315_vm3 = vcmask 1040384   ;;  %vm2602_vm4 = vcmask 9216  }
  0x5b   :  { %v264_v6 = vld [vmem:[%s5092_s5 + $0x288] sm:$0xff]  ;;  %3415 = vmatpush3.bf16.msra.mxu0 %v3414_v57  ;;  %v3420_v8 = vpack.c.bf16 %v240_v4, %v239_v3  ;;  %v223_v9 = vld [vmem:[%s5092_s5 + $0x140] sm:$0xff]  ;;  %v242_v17 = vld [vmem:[%s5092_s5 + $0x1d8] sm:$0xff] }
  0x5c   :  { %3399 = vmatpush3.bf16.msra.mxu1 %v3398_v58  ;;  %3417 = vmatprep.subr.bf16.mxu0 %v3416_v59  ;;  %v224_v10 = vld [vmem:[%s5092_s5 + $0x148] sm:$0xff]  ;;  %v247_v12 = vld [vmem:[%s5092_s5 + $0x200] sm:$0xff]  ;;  %v3436_v14 = vpack.c.bf16 %v264_v6, %v263_v5  ;;  %v265_v18 = vld [vmem:[%s5092_s5 + $0x290] sm:$0xff]  ;;  %v3424_v22 = vpack.c.bf16 %v242_v17, %v241_v16 }
  0x5d   :  { %3401 = vmatprep.subr.bf16.mxu1 %v3400_v0  ;;  %v248_v15 = vld [vmem:[%s5092_s5 + $0x208] sm:$0xff]  ;;  %v266_v19 = vld [vmem:[%s5092_s5 + $0x298] sm:$0xff]  ;;  %v3422_v20 = vpack.c.bf16 %v224_v10, %v223_v9  ;;  %v225_v23 = vld [vmem:[%s5092_s5 + $0x150] sm:$0xff] }
  0x5e   :  { %v3438_v21 = vpack.c.bf16 %v248_v15, %v247_v12  ;;  %v226_v24 = vld [vmem:[%s5092_s5 + $0x158] sm:$0xff]  ;;  %v249_v25 = vld [vmem:[%s5092_s5 + $0x210] sm:$0xff]  ;;  %v3440_v26 = vpack.c.bf16 %v266_v19, %v265_v18  ;;  %v243_v29 = vld [vmem:[%s5092_s5 + $0x1e0] sm:$0xff] }
  0x5f   :  { %3419 = vmatpush3.bf16.msra.mxu0 %v3418_v7  ;;  %v250_v28 = vld [vmem:[%s5092_s5 + $0x218] sm:$0xff]  ;;  %v244_v30 = vld [vmem:[%s5092_s5 + $0x1e8] sm:$0xff]  ;;  %v267_v31 = vld [vmem:[%s5092_s5 + $0x2a0] sm:$0xff]  ;;  %v3426_v35 = vpack.c.bf16 %v226_v24, %v225_v23 }
  0x60   :  { %3403 = vmatpush3.bf16.msra.mxu1 %v3402_v32  ;;  %3421 = vmatprep.subr.bf16.mxu0 %v3420_v8  ;;  %v268_v34 = vld [vmem:[%s5092_s5 + $0x2a8] sm:$0xff]  ;;  %v3442_v36 = vpack.c.bf16 %v250_v28, %v249_v25  ;;  %v3428_v37 = vpack.c.bf16 %v244_v30, %v243_v29  ;;  %v227_v38 = vld [vmem:[%s5092_s5 + $0x160] sm:$0xff]  ;;  %v245_v44 = vld [vmem:[%s5092_s5 + $0x1f0] sm:$0xff] }
  0x61   :  { %3437 = vmatprep.subr.bf16.mxu1 %v3436_v14  ;;  %v228_v39 = vld [vmem:[%s5092_s5 + $0x168] sm:$0xff]  ;;  %v251_v42 = vld [vmem:[%s5092_s5 + $0x220] sm:$0xff]  ;;  %v246_v45 = vld [vmem:[%s5092_s5 + $0x1f8] sm:$0xff] }
  0x62   :  { %v252_v43 = vld [vmem:[%s5092_s5 + $0x228] sm:$0xff]  ;;  %v269_v46 = vld [vmem:[%s5092_s5 + $0x2b0] sm:$0xff]  ;;  %v270_v47 = vld [vmem:[%s5092_s5 + $0x2b8] sm:$0xff]  ;;  %v3430_v13 = vpack.c.bf16 %v228_v39, %v227_v38  ;;  %v3432_v49 = vpack.c.bf16 %v246_v45, %v245_v44 }
  0x63   :  { %693 = vmatmul.mubr.f32.vlgmr.msra.gmra.mrb[4].mxu1 %v4069_v27  ;;  %3423 = vmatpush3.bf16.msra.mxu0 %v3422_v20  ;;  %v3444_v27 = vpack.c.bf16 %v268_v34, %v267_v31  ;;  %v3446_v48 = vpack.c.bf16 %v252_v43, %v251_v42  ;;  %v229_v50 = vld [vmem:[%s5092_s5 + $0x170] sm:$0xff]  ;;  %v3448_v51 = vpack.c.bf16 %v270_v47, %v269_v46  ;;  %v254_v52 = vld [vmem:[%s5092_s5 + $0x238] sm:$0xff]  ;;  %v271_v53 = vld [vmem:[%s5092_s5 + $0x2c0] sm:$0xff] }
  0x64   :  { %3439 = vmatpush3.bf16.msra.mxu1 %v3438_v21  ;;  %3425 = vmatprep.subr.bf16.mxu0 %v3424_v22  ;;  %v253_v41 = vld [vmem:[%s5092_s5 + $0x230] sm:$0xff]  ;;  %v272_v55 = vld [vmem:[%s5092_s5 + $0x2c8] sm:$0xff]  ;;  %v279_v58 = vld [vmem:[%s5092_s5 + $0x300] sm:$0xff] }
  0x65   :  { %3441 = vmatprep.subr.bf16.mxu1 %v3440_v26  ;;  %832 = vmatprep.mubr.f32.mxu1 %v4157_v1  ;;  %v230_v1 = vld [vmem:[%s5092_s5 + $0x178] sm:$0xff]  ;;  %v3450_v57 = vpack.c.bf16 %v254_v52, %v253_v41  ;;  %v280_v59 = vld [vmem:[%s5092_s5 + $0x308] sm:$0xff]  ;;  %v3452_v60 = vpack.c.bf16 %v272_v55, %v271_v53  ;;  %v255_v62 = vld [vmem:[%s5092_s5 + $0x240] sm:$0xff] }
  0x66   :  { %v3434_v56 = vpack.c.bf16 %v230_v1, %v229_v50  ;;  %v256_v63 = vld [vmem:[%s5092_s5 + $0x248] sm:$0xff]  ;;  %v273_v0 = vld [vmem:[%s5092_s5 + $0x2d0] sm:$0xff]  ;;  %v274_v2 = vld [vmem:[%s5092_s5 + $0x2d8] sm:$0xff]  ;;  %v3469_v3 = vpack.c.bf16 %v280_v59, %v279_v58 }
  0x67   :  { %3427 = vmatpush3.bf16.msra.mxu0 %v3426_v35  ;;  %v3454_v4 = vpack.c.bf16 %v256_v63, %v255_v62  ;;  %v281_v5 = vld [vmem:[%s5092_s5 + $0x310] sm:$0xff]  ;;  %v282_v6 = vld [vmem:[%s5092_s5 + $0x318] sm:$0xff]  ;;  %v3456_v7 = vpack.c.bf16 %v274_v2, %v273_v0  ;;  %v275_v9 = vld [vmem:[%s5092_s5 + $0x2e0] sm:$0xff] }
  0x68   :  { %3443 = vmatpush3.bf16.msra.mxu1 %v3442_v36  ;;  %3429 = vmatprep.subr.bf16.mxu0 %v3428_v37  ;;  %v257_v32 = vld [vmem:[%s5092_s5 + $0x250] sm:$0xff]  ;;  %v258_v8 = vld [vmem:[%s5092_s5 + $0x258] sm:$0xff]  ;;  %v276_v10 = vld [vmem:[%s5092_s5 + $0x2e8] sm:$0xff]  ;;  %v3472_v12 = vpack.c.bf16 %v282_v6, %v281_v5 }
  0x69   :  { %3445 = vmatprep.subr.bf16.mxu1 %v3444_v27  ;;  %v3458_v14 = vpack.c.bf16 %v258_v8, %v257_v32  ;;  %v284_v15 = vld [vmem:[%s5092_s5 + $0x328] sm:$0xff]  ;;  %v3460_v16 = vpack.c.bf16 %v276_v10, %v275_v9  ;;  %v259_v17 = vld [vmem:[%s5092_s5 + $0x260] sm:$0xff]  ;;  %v277_v19 = vld [vmem:[%s5092_s5 + $0x2f0] sm:$0xff] }
  0x6a   :  { %v260_v18 = vld [vmem:[%s5092_s5 + $0x268] sm:$0xff]  ;;  %v278_v20 = vld [vmem:[%s5092_s5 + $0x2f8] sm:$0xff]  ;;  %v285_v23 = vld [vmem:[%s5092_s5 + $0x330] sm:$0xff] }
  0x6b   :  { %3431 = vmatpush3.bf16.msra.mxu0 %v3430_v13  ;;  %v3462_v22 = vpack.c.bf16 %v260_v18, %v259_v17  ;;  %v286_v24 = vld [vmem:[%s5092_s5 + $0x338] sm:$0xff]  ;;  %v3464_v25 = vpack.c.bf16 %v278_v20, %v277_v19  ;;  %v261_v26 = vld [vmem:[%s5092_s5 + $0x270] sm:$0xff]  ;;  %v287_v31 = vld [vmem:[%s5093_s25] sm:$0xff] }
  0x6c   :  { %3447 = vmatpush3.bf16.msra.mxu1 %v3446_v48  ;;  %3433 = vmatprep.subr.bf16.mxu0 %v3432_v49  ;;  %v262_v28 = vld [vmem:[%s5092_s5 + $0x278] sm:$0xff]  ;;  %v3478_v29 = vpack.c.bf16 %v286_v24, %v285_v23  ;;  %v288_v34 = vld [vmem:[%s5093_s25 + $0x8] sm:$0xff]  ;;  %v178_v35 = vld [vmem:[%s5094_s3] sm:$0xff] }
  0x6d   :  { %3449 = vmatprep.subr.bf16.mxu1 %v3448_v51  ;;  %v3466_v30 = vpack.c.bf16 %v262_v28, %v261_v26  ;;  %v179_v36 = vld [vmem:[%s5094_s3 + $0x8] sm:$0xff]  ;;  %v4587_v37 = vpack.c.bf16 %v288_v34, %v287_v31  ;;  %v289_v39 = vld [vmem:[%s5093_s25 + $0x10] sm:$0xff]  ;;  %v290_v42 = vld [vmem:[%s5093_s25 + $0x18] sm:$0xff] }
  0x6e   :  { %v3481_v38 = vpack.c.bf16 %v179_v36, %v178_v35  ;;  %v180_v27 = vld [vmem:[%s5094_s3 + $0x10] sm:$0xff]  ;;  %v181_v43 = vld [vmem:[%s5094_s3 + $0x18] sm:$0xff]  ;;  %v4607_v44 = vpack.c.bf16 %v290_v42, %v289_v39  ;;  %v2634_v46 = vld [vmem:[%s5095_s27] ss:$0 sm:$0xff] }
  0x6f   :  { %3435 = vmatpush3.bf16.msra.mxu0 %v3434_v56  ;;  %v3484_v45 = vpack.c.bf16 %v181_v43, %v180_v27 }
  0x70   :  { %3451 = vmatpush3.bf16.msra.mxu1 %v3450_v57  ;;  %3468 = vmatprep.subr.bf16.mxu0 %v3767_v61 }
  0x71   :  { %3453 = vmatprep.subr.bf16.mxu1 %v3452_v60 }
  0x72   :  { %763 = vmatmul.mubr.f32.vlgmr.msra.gmra.mrb[4].mxu0 %v4082_v33  ;;  %v283_v33 = vld [vmem:[%s5092_s5 + $0x320] sm:$0xff]  ;;  %s5096_s5 = sld [smem:[#allocation14_spill]] }
  0x73   :  { %3470 = vmatpush3.bf16.msra.mxu0 %v3469_v3  ;;  %3034 = vmatprep.mubr.msk.f32.mxu0 %vm3768_vm0, %v3769_v11  ;;  %v3475_v21 = vpack.c.bf16 %v284_v15, %v283_v33 }
  0x74   :  { %3455 = vmatpush3.bf16.msra.mxu1 %v3454_v4  ;;  %3471 = vmatprep.subr.bf16.mxu0 %v3767_v61 }
  0x75   :  { %3457 = vmatprep.subr.bf16.mxu1 %v3456_v7 }
  0x77   :  { %3473 = vmatpush3.bf16.msra.mxu0 %v3472_v12 }
  0x78   :  { %3459 = vmatpush3.bf16.msra.mxu1 %v3458_v14  ;;  %3474 = vmatprep.subr.bf16.mxu0 %v3767_v61  ;;  %v2636_v62 = vld [vmem:[%s5096_s5] ss:$0 sm:$0xff] }
  0x79   :  { %3461 = vmatprep.subr.bf16.mxu1 %v3460_v16 }
  0x7b   :  { %3476 = vmatpush3.bf16.msra.mxu0 %v3475_v21 }
  0x7c   :  { %3463 = vmatpush3.bf16.msra.mxu1 %v3462_v22  ;;  %3477 = vmatprep.subr.bf16.mxu0 %v3767_v61 }
  0x7d   :  { %3465 = vmatprep.subr.bf16.mxu1 %v3464_v25 }
  0x7f   :  { %3479 = vmatpush3.bf16.msra.mxu0 %v3478_v29 }
  0x80   :  { %3467 = vmatpush3.bf16.msra.mxu1 %v3466_v30  ;;  %3492 = vmatprep.subr.bf16.mxu0 %v3767_v61 }
  0x81   :  { %3480 = vmatprep.subr.bf16.mxu1 %v3767_v61 }
  0x82   :  { %3035 = vmatmul.mubr.msk.f32.vlgmr.msra.gmra.mrb[6].mxu0 %vm339_vm1, %v4235_v40 }
  0x83   :  { %833 = vmatmul.mubr.f32.vlgmr.msra.gmra.mrb[6].mxu1 %v4133_v54  ;;  %3494 = vmatpush3.bf16.msra.mxu0 %v4587_v37 }
  0x84   :  { %3482 = vmatpush3.bf16.msra.mxu1 %v3481_v38  ;;  %3495 = vmatprep.subr.bf16.mxu0 %v3767_v61 }
  0x85   :  { %3483 = vmatprep.subr.bf16.mxu1 %v3767_v61  ;;  %3045 = vmatprep.mubr.msk.f32.mxu1 %vm3768_vm0, %v3769_v11 }
  0x86   :  { %3067 = vmatprep.mubr.msk.f32.mxu0 %vm3768_vm0, %v3769_v11 }
  0x87   :  { %3497 = vmatpush3.bf16.msra.mxu0 %v4607_v44 }
  0x88   :  { %3485 = vmatpush3.bf16.msra.mxu1 %v3484_v45  ;;  %3504 = vmatprep.subr.bf16.mxu0 %v3767_v61 }
  0x89   :  { %3486 = vmatprep.subr.bf16.mxu1 %v3767_v61 }
  0x8a   :  { %3068 = vmatmul.mubr.f32.vlgmr.msra.gmra.mrb[8].mxu0 %v3769_v11 }
  0x8b   :  { %3046 = vmatmul.mubr.f32.vlgmr.msra.gmra.mrb[8].mxu1 %v3769_v11  ;;  %3097 = vmatprep.mubr.msk.f32.mxu0 %vm3768_vm0, %v3769_v11 }
  0x8c   :  { %3488 = vmatpush3.bf16.msra.mxu1 %v3481_v38  ;;  %3056 = vmatprep.mubr.msk.f32.mxu1 %vm3768_vm0, %v3769_v11 }
  0x8d   :  { %3489 = vmatprep.subr.bf16.mxu1 %v3767_v61 }
  0x90   :  { %3491 = vmatpush3.bf16.msra.mxu1 %v3484_v45 }
  0x91   :  { %3498 = vmatprep.subr.bf16.mxu1 %v3767_v61 }
 0x105   :  { %v2698_v54 = vpop.f32.mrb[0].mxu0 }
 0x106   :  { %v2733_v40 = vpop.f32.mrb[0].mxu1  ;;  %v2699_v47 = vpop.f32.mrb[1].mxu0 }
 0x107   :  { %v2700_v13 = vadd.f32 %v2699_v47, %v2698_v54  ;;  %v2734_v48 = vpop.f32.mrb[1].mxu1 }
 0x108   :  { %v2735_v49 = vadd.f32 %v2734_v48, %v2733_v40 }
 0x109   :  { %v409_v50 = vadd.f32 %v2700_v13, %v2634_v46 }
 0x10b   :  { %v479_v1 = vadd.f32 %v2735_v49, %v409_v50 }
 0x116   :  { %v618_v51 = vpop.f32.mrb[2].mxu1 }
 0x117   :  { %v3017_v41 = vpop.f32.mrb[3].mxu1 }
 0x125   :  { %v2768_v52 = vpop.f32.mrb[2].mxu0 }
 0x126   :  { %v2769_v53 = vpop.f32.mrb[3].mxu0 }
 0x127   :  { %v2770_v55 = vadd.f32 %v2769_v53, %v2768_v52 }
 0x129   :  { %v549_v56 = vadd.f32 %v2770_v55, %v479_v1 }
 0x12b   :  { %v4629_v57 = vadd.f32 %v618_v51, %v549_v56 }
 0x136   :  { %v2812_v58 = vpop.f32.mrb[4].mxu1 }
 0x137   :  { %v2813_v59 = vpop.f32.mrb[5].mxu1 }
 0x138   :  { %v2814_v60 = vadd.f32 %v2813_v59, %v2812_v58 }
 0x13a   :  { %v695_v2 = vadd.f32 %v2814_v60, %v2636_v62 }
 0x145   :  { %v2847_v63 = vpop.f32.mrb[4].mxu0 }
 0x146   :  { %v2848_v0 = vpop.f32.mrb[5].mxu0 }
 0x147   :  { %v2849_v3 = vadd.f32 %v2848_v0, %v2847_v63 }
 0x149   :  { %v765_v4 = vadd.f32 %v2849_v3, %v695_v2 }
 0x155   :  { %v904_v5 = vpop.f32.mrb[6].mxu0 }
 0x156   :  { %v2882_v6 = vpop.f32.mrb[6].mxu1  ;;  %v3036_v7 = vpop.f32.mrb[7].mxu0 }
 0x157   :  { %v2883_v32 = vpop.f32.mrb[7].mxu1 }
 0x158   :  { %v2884_v8 = vadd.f32 %v2883_v32, %v2882_v6 }
 0x15a   :  { %v835_v9 = vadd.f32 %v2884_v8, %v765_v4 }
 0x15c   :  { %v4634_v10 = vadd.f32 %v904_v5, %v835_v9 }
 0x15d   :  { %v1179_v12 = vpop.f32.mrb[8].mxu0 }
 0x15e   :  { %v978_v14 = vpop.f32.mrb[8].mxu1  ;;  %v1184_v33 = vrot.slane %v1179_v12, 7  ;;  %v3069_v15 = vpop.f32.mrb[9].mxu0 }
 0x15f   :  { %v982_v16 = vadd.f32 %v978_v14, %v4629_v57  ;;  %v3047_v17 = vpop.f32.mrb[9].mxu1  ;;  %v1327_v15 = vld [vmem:[%s5062_s7] sm:$0xff] }
 0x160   :  { %v1186_v18 = vadd.f32 %v1184_v33, %v4634_v10  ;;  %v1340_v17 = vld [vmem:[%s5065_s10] sm:$0xff] }
 0x161   :  { %3622 = vtanh.f32 %v982_v16  ;;  %v2638_v21 = vmul.f32 -1.442695, %v982_v16  ;;  %v1328_v16 = vld [vmem:[%s5062_s7 + $0x8] sm:$0xff] }
 0x162   :  { %3624 = vtanh.f32 %v1186_v18  ;;  %v2641_v22 = vmul.f32 -1.442695, %v1186_v18  ;;  %v3505_v18 = vpack.c.bf16 %v1328_v16, %v1327_v15 }
 0x163   :  { %3626 = vpow2.f32 %v2638_v21  ;;  %v1330_v21 = vld [vmem:[%s5062_s7 + $0x18] sm:$0xff] }
 0x164   :  { %3628 = vpow2.f32 %v2641_v22  ;;  %3506 = vmatpush3.bf16.msra.mxu0 %v3505_v18 }
 0x165   :  { %3507 = vmatprep.subr.bf16.mxu0 %v3767_v61 }
 0x16b   :  { %v3623_v19 = vpop.eup %3622 }
 0x16c   :  { %992 = vrot.lane.b32.xlu0 %v3623_v19, %s3770_s30  ;;  %v3625_v20 = vpop.eup %3624  ;;  %v1341_v19 = vld [vmem:[%s5065_s10 + $0x8] sm:$0xff] }
 0x16d   :  { %v3627_v23 = vpop.eup %3626  ;;  %v3517_v22 = vpack.c.bf16 %v1341_v19, %v1340_v17 }
 0x16e   :  { %v986_v24 = vadd.f32 1.0, %v3627_v23  ;;  %v3629_v25 = vpop.eup %3628  ;;  %v1342_v23 = vld [vmem:[%s5065_s10 + $0x10] sm:$0xff] }
 0x16f   :  { %v1190_v26 = vadd.f32 1.0, %v3629_v25 }
 0x170   :  { %1196 = vrot.lane.b32.xlu0 %v3625_v20, %s3770_s30  ;;  %3630 = vrcp.f32 %v986_v24  ;;  %v1329_v20 = vld [vmem:[%s5062_s7 + $0x10] sm:$0xff]  ;;  %v1343_v24 = vld [vmem:[%s5065_s10 + $0x18] sm:$0xff] }
 0x171   :  { %3632 = vrcp.f32 %v1190_v26  ;;  %v3508_v26 = vpack.c.bf16 %v1330_v21, %v1329_v20 }
 0x173   :  { %3509 = vmatpush3.bf16.msra.mxu0 %v3508_v26 }
 0x174   :  { %3510 = vmatprep.subr.bf16.mxu0 %v3767_v61 }
 0x17a   :  { %v3631_v28 = vpop.eup %3630 }
 0x17b   :  { %v3633_v31 = vpop.eup %3632  ;;  %v990_v36 = vmul.f32 0.0, %v3631_v28 }
 0x17c   :  { %v1194_v42 = vmul.f32 0.0, %v3633_v31 }
 0x1de   :  { %v993_v29 = vpop.permute.xlu0 %992 }
 0x1df   :  { %v995_v30 = vmul.f32 %v3631_v28, %v993_v29  ;;  %v1331_v29 = vld [vmem:[%s5062_s7 + $0x20] sm:$0xff] }
 0x1e1   :  { %997 = vrot.lane.b32.xlu1 %v995_v30, %s3771_s4  ;;  %v1332_v30 = vld [vmem:[%s5062_s7 + $0x28] sm:$0xff] }
 0x1e2   :  { %v1197_v34 = vpop.permute.xlu0 %1196 }
 0x1e3   :  { %v1199_v35 = vmul.f32 %v3633_v31, %v1197_v34  ;;  %v1345_v34 = vld [vmem:[%s5065_s10 + $0x28] sm:$0xff] }
 0x1e5   :  { %1201 = vrot.lane.b32.xlu1 %v1199_v35, %s3771_s4  ;;  %v3511_v35 = vpack.c.bf16 %v1332_v30, %v1331_v29 }
 0x1e7   :  { %3512 = vmatpush3.bf16.msra.mxu0 %v3511_v35 }
 0x1e8   :  { %3513 = vmatprep.subr.bf16.mxu0 %v3767_v61 }
 0x253   :  { %v998_v38 = vpop.permute.xlu1 %997 }
 0x254   :  { %v1000_v39 = vadd.f32 %v998_v38, %v990_v36 }
 0x256   :  { %3634 = vtanh.f32 %v1000_v39  ;;  %v1094_v7 = vrot.slane %v1000_v39, 7  ;;  %v1333_v39 = vld [vmem:[%s5062_s7 + $0x30] sm:$0xff] }
 0x257   :  { %v1202_v27 = vpop.permute.xlu1 %1201 }
 0x258   :  { %v1204_v43 = vadd.f32 %v1202_v27, %v1194_v42  ;;  %v1334_v42 = vld [vmem:[%s5062_s7 + $0x38] sm:$0xff]  ;;  %v1346_v27 = vld [vmem:[%s5065_s10 + $0x30] sm:$0xff] }
 0x25a   :  { %3636 = vtanh.f32 %v1204_v43 }
 0x260   :  { %v3635_v45 = vpop.eup %3634 }
 0x261   :  { %1003 = vrot.lane.b32.xlu0 %v3635_v45, %s3770_s30  ;;  %v1347_v45 = vld [vmem:[%s5065_s10 + $0x38] sm:$0xff] }
 0x264   :  { %v3637_v54 = vpop.eup %3636 }
 0x265   :  { %1207 = vrot.lane.b32.xlu1 %v3637_v54, %s3770_s30  ;;  %v3526_v54 = vpack.c.bf16 %v1347_v45, %v1346_v27 }
 0x2d3   :  { %v1004_v40 = vpop.permute.xlu0 %1003 }
 0x2d4   :  { %v4644_v46 = vmul.f32 %v3631_v28, %v1004_v40  ;;  %v3520_v28 = vpack.c.bf16 %v1343_v24, %v1342_v23 }
 0x2d6   :  { %1008 = vrot.lane.b32.xlu0 %v4644_v46, %s3771_s4 }
 0x2d7   :  { %v1208_v47 = vpop.permute.xlu1 %1207 }
 0x2d8   :  { %v4648_v13 = vmul.f32 %v3633_v31, %v1208_v47  ;;  %v1344_v31 = vld [vmem:[%s5065_s10 + $0x20] sm:$0xff] }
 0x2d9   :  { %v3523_v36 = vpack.c.bf16 %v1345_v34, %v1344_v31 }
 0x2da   :  { %v1212_v48 = vrot.slane %v4648_v13, 1 }
 0x2dc   :  { %1213 = vrot.lane.b32.xlu1 %v1212_v48, %s3771_s4 }
 0x348   :  { %v1009_v49 = vpop.permute.xlu0 %1008 }
 0x349   :  { %3057 = vmatmul.mubr.msk.f32.vlgmr.msra.gmra.mrb[10].mxu1 %vm908_vm2, %v1009_v49 }
 0x34a   :  { %3500 = vmatpush3.bf16.msra.mxu1 %v4587_v37  ;;  %3078 = vmatprep.mubr.msk.f32.mxu1 %vm3768_vm0, %v3769_v11 }
 0x34b   :  { %3501 = vmatprep.subr.bf16.mxu1 %v3767_v61 }
 0x34e   :  { %3503 = vmatpush3.bf16.msra.mxu1 %v4607_v44  ;;  %v1214_v50 = vpop.permute.xlu1 %1213 }
 0x34f   :  { %3516 = vmatprep.subr.bf16.mxu1 %v3767_v61 }
 0x351   :  { %3079 = vmatmul.mubr.msk.f32.vlgmr.msra.gmra.mrb[12].mxu1 %vm908_vm2, %v1214_v50 }
 0x352   :  { %3116 = vmatprep.mubr.msk.f32.mxu1 %vm3768_vm0, %v3769_v11  ;;  %3518 = vmatpush3.bf16.msra.mxu1 %v3517_v22 }
 0x353   :  { %3519 = vmatprep.subr.bf16.mxu1 %v3767_v61 }
 0x356   :  { %3521 = vmatpush3.bf16.msra.mxu1 %v3520_v28 }
 0x357   :  { %3522 = vmatprep.subr.bf16.mxu1 %v3767_v61 }
 0x35a   :  { %3524 = vmatpush3.bf16.msra.mxu1 %v3523_v36 }
 0x35b   :  { %3525 = vmatprep.subr.bf16.mxu1 %v3767_v61 }
 0x35e   :  { %3527 = vmatpush3.bf16.msra.mxu1 %v3526_v54 }
 0x35f   :  { %3534 = vmatprep.subr.bf16.mxu1 %v3767_v61 }
 0x41c   :  { %v1078_v1 = vpop.f32.mrb[10].mxu1 }
 0x41d   :  { %v1083_v51 = vrot.slane %v1078_v1, 7  ;;  %v3058_v41 = vpop.f32.mrb[11].mxu1 }
 0x41e   :  { %v1336_v41 = vld [vmem:[%s5063_s8 + $0x8] sm:$0xff] }
 0x41f   :  { %v1085_v37 = vadd.f32 %v1083_v51, %v4629_v57  ;;  %v1335_v51 = vld [vmem:[%s5063_s8] sm:$0xff] }
 0x421   :  { %3638 = vtanh.f32 %v1085_v37  ;;  %v2640_v58 = vmul.f32 -1.442695, %v1085_v37  ;;  %v3529_v37 = vpack.c.bf16 %v1336_v41, %v1335_v51 }
 0x424   :  { %v1283_v52 = vpop.f32.mrb[12].mxu1 }
 0x425   :  { %v1287_v53 = vadd.f32 %v1283_v52, %v4634_v10  ;;  %v3080_v55 = vpop.f32.mrb[13].mxu1  ;;  %v1296_v10 = vrot.slane %v1204_v43, 1  ;;  %v3514_v43 = vpack.c.bf16 %v1334_v42, %v1333_v39 }
 0x427   :  { %3640 = vtanh.f32 %v1287_v53  ;;  %v2643_v59 = vmul.f32 -1.442695, %v1287_v53  ;;  %3515 = vmatpush3.bf16.msra.mxu0 %v3514_v43  ;;  %v1337_v53 = vld [vmem:[%s5063_s8 + $0x10] sm:$0xff] }
 0x428   :  { %3642 = vpow2.f32 %v2640_v58  ;;  %3528 = vmatprep.subr.bf16.mxu0 %v3767_v61  ;;  %v1349_v58 = vld [vmem:[%s5066_s11 + $0x8] sm:$0xff] }
 0x429   :  { %3644 = vpow2.f32 %v2643_v59 }
 0x42b   :  { %v3639_v44 = vpop.eup %3638 }
 0x42c   :  { %1098 = vrot.lane.b32.xlu0 %v3639_v44, %s3770_s30 }
 0x431   :  { %v3641_v56 = vpop.eup %3640 }
 0x432   :  { %1300 = vrot.lane.b32.xlu1 %v3641_v56, %s3770_s30  ;;  %v3643_v60 = vpop.eup %3642  ;;  %v1348_v56 = vld [vmem:[%s5066_s11] sm:$0xff] }
 0x433   :  { %v1089_v62 = vadd.f32 1.0, %v3643_v60  ;;  %v3645_v63 = vpop.eup %3644  ;;  %v4769_v59 = vpack.c.bf16 %v1349_v58, %v1348_v56  ;;  %v1350_v60 = vld [vmem:[%s5066_s11 + $0x10] sm:$0xff] }
 0x434   :  { %v1291_v57 = vadd.f32 1.0, %v3645_v63 }
 0x435   :  { %3646 = vrcp.f32 %v1089_v62  ;;  %v1351_v62 = vld [vmem:[%s5066_s11 + $0x18] sm:$0xff] }
 0x436   :  { %3648 = vrcp.f32 %v1291_v57  ;;  %v4781_v63 = vpack.c.bf16 %v1351_v62, %v1350_v60 }
 0x43f   :  { %v4666_v0 = vpop.eup %3646 }
 0x440   :  { %v4670_v4 = vpop.eup %3648  ;;  %v1096_v32 = vmul.f32 %v4666_v0, %v1094_v7 }
 0x441   :  { %v1298_v12 = vmul.f32 %v4670_v4, %v1296_v10 }
 0x49e   :  { %v1099_v2 = vpop.permute.xlu0 %1098 }
 0x49f   :  { %v1101_v3 = vmul.f32 %v4666_v0, %v1099_v2 }
 0x4a1   :  { %1103 = vrot.lane.b32.xlu0 %v1101_v3, %s3771_s4 }
 0x4a4   :  { %v1301_v5 = vpop.permute.xlu1 %1300 }
 0x4a5   :  { %v1303_v6 = vmul.f32 %v4670_v4, %v1301_v5 }
 0x4a7   :  { %1305 = vrot.lane.b32.xlu1 %v1303_v6, %s3771_s4 }
 0x513   :  { %v1104_v8 = vpop.permute.xlu0 %1103 }
 0x514   :  { %v1106_v9 = vadd.f32 %v1104_v8, %v1096_v32  ;;  %v2646_v8 = vld [vmem:[%s5067_s12] ss:$0 sm:$0xff] }
 0x516   :  { %3650 = vtanh.f32 %v1106_v9 }
 0x519   :  { %v1306_v14 = vpop.permute.xlu1 %1305 }
 0x51a   :  { %v1308_v33 = vadd.f32 %v1306_v14, %v1298_v12 }
 0x51c   :  { %3652 = vtanh.f32 %v1308_v33 }
 0x520   :  { %v3651_v25 = vpop.eup %3650 }
 0x521   :  { %1109 = vrot.lane.b32.xlu0 %v3651_v25, %s3770_s30 }
 0x526   :  { %v3653_v38 = vpop.eup %3652 }
 0x527   :  { %1311 = vrot.lane.b32.xlu1 %v3653_v38, %s3770_s30 }
 0x593   :  { %v1110_v40 = vpop.permute.xlu0 %1109 }
 0x594   :  { %v1112_v47 = vmul.f32 %v4666_v0, %v1110_v40 }
 0x596   :  { %v1316_v48 = vsel %vm1315_vm3, %v4644_v46, %v1112_v47 }
 0x597   :  { %1319 = vrot.lane.b32.xlu0 %v1316_v48, %s3771_s4 }
 0x599   :  { %v1312_v49 = vpop.permute.xlu1 %1311 }
 0x59a   :  { %v1314_v50 = vmul.f32 %v4670_v4, %v1312_v49  ;;  %v2644_v4 = vld [vmem:[%s5064_s9] ss:$0 sm:$0xff] }
 0x59c   :  { %v1317_v1 = vsel %vm1315_vm3, %v1314_v50, %v4648_v13  ;;  %v1338_v13 = vld [vmem:[%s5063_s8 + $0x18] sm:$0xff] }
 0x59d   :  { %1323 = vrot.lane.b32.xlu1 %v1317_v1, %s3770_s30  ;;  %v3532_v44 = vpack.c.bf16 %v1338_v13, %v1337_v53 }
 0x609   :  { %v1320_v46 = vpop.permute.xlu0 %1319 }
 0x60f   :  { %v1324_v52 = vpop.permute.xlu1 %1323 }
 0x610   :  { %v1326_v55 = vsel %vm908_vm2, %v1320_v46, %v1324_v52 }
 0x611   :  { %3098 = vmatmul.mubr.msk.f32.vlgmr.msra.gmra.mrb[10].mxu0 %vm339_vm1, %v1326_v55  ;;  %3117 = vmatmul.mubr.msk.f32.vlgmr.msra.gmra.mrb[14].mxu1 %vm339_vm1, %v1326_v55 }
 0x612   :  { %3530 = vmatpush3.bf16.msra.mxu0 %v3529_v37  ;;  %3127 = vmatprep.mubr.msk.f32.mxu0 %vm3768_vm0, %v3769_v11 }
 0x613   :  { %3531 = vmatprep.subr.bf16.mxu0 %v3767_v61  ;;  %3536 = vmatpush3.bf16.msra.mxu1 %v3529_v37 }
 0x614   :  { %3537 = vmatprep.subr.bf16.mxu1 %v3767_v61  ;;  %3138 = vmatprep.mubr.msk.f32.mxu1 %vm3768_vm0, %v3769_v11 }
 0x616   :  { %3533 = vmatpush3.bf16.msra.mxu0 %v3532_v44 }
 0x617   :  { %3540 = vmatprep.subr.bf16.mxu0 %v3767_v61  ;;  %3539 = vmatpush3.bf16.msra.mxu1 %v3532_v44 }
 0x618   :  { %3546 = vmatprep.subr.bf16.mxu1 %v3767_v61 }
 0x619   :  { %3128 = vmatmul.mubr.f32.vlgmr.msra.gmra.mrb[12].mxu0 %v3769_v11 }
 0x61a   :  { %3542 = vmatpush3.bf16.msra.mxu0 %v4769_v59  ;;  %3149 = vmatprep.mubr.msk.f32.mxu0 %vm3768_vm0, %v3769_v11 }
 0x61b   :  { %3543 = vmatprep.subr.bf16.mxu0 %v3767_v61 }
 0x61e   :  { %3545 = vmatpush3.bf16.msra.mxu0 %v4781_v63 }
 0x61f   :  { %3552 = vmatprep.subr.bf16.mxu0 %v3767_v61 }
 0x621   :  { %3150 = vmatmul.mubr.f32.vlgmr.msra.gmra.mrb[14].mxu0 %v3769_v11 }
 0x622   :  { %3179 = vmatprep.mubr.msk.f32.mxu0 %vm3768_vm0, %v3769_v11 }
 0x6e4   :  { %v1428_v57 = vpop.f32.mrb[10].mxu0  ;;  %v1504_v0 = vpop.f32.mrb[14].mxu1 }
 0x6e5   :  { %v3099_v2 = vpop.f32.mrb[11].mxu0  ;;  %v3118_v3 = vpop.f32.mrb[15].mxu1  ;;  %v4794_v5 = vadd.f32 %v2644_v4, %v1428_v57  ;;  %v1505_v10 = vadd.f32 %v2646_v8, %v1504_v0 }
 0x6ec   :  { %v1574_v6 = vpop.f32.mrb[12].mxu0 }
 0x6ed   :  { %v1578_v7 = vadd.f32 %v1574_v6, %v4794_v5  ;;  %v3129_v32 = vpop.f32.mrb[13].mxu0 }
 0x6ef   :  { %3654 = vtanh.f32 %v1578_v7  ;;  %v2648_v17 = vmul.f32 -1.442695, %v1578_v7 }
 0x6f4   :  { %v1775_v9 = vpop.f32.mrb[14].mxu0 }
 0x6f5   :  { %v1780_v12 = vrot.slane %v1775_v9, 7  ;;  %v3151_v14 = vpop.f32.mrb[15].mxu0 }
 0x6f6   :  { %v1923_v14 = vld [vmem:[%s5068_s13 + $0x8] sm:$0xff] }
 0x6f7   :  { %v1782_v33 = vadd.f32 %v1780_v12, %v1505_v10  ;;  %v1922_v12 = vld [vmem:[%s5068_s13] sm:$0xff] }
 0x6f9   :  { %v3655_v15 = vpop.eup %3654  ;;  %3656 = vtanh.f32 %v1782_v33  ;;  %v2651_v18 = vmul.f32 -1.442695, %v1782_v33  ;;  %v1935_v33 = vld [vmem:[%s5071_s16] sm:$0xff] }
 0x6fa   :  { %1588 = vrot.lane.b32.xlu0 %v3655_v15, %s3770_s30  ;;  %3658 = vpow2.f32 %v2648_v17  ;;  %v3553_v15 = vpack.c.bf16 %v1923_v14, %v1922_v12  ;;  %v1924_v17 = vld [vmem:[%s5068_s13 + $0x10] sm:$0xff]  ;;  %v2654_v12 = vld [vmem:[%s5070_s15] ss:$0 sm:$0xff] }
 0x6fb   :  { %3660 = vpow2.f32 %v2651_v18  ;;  %v1925_v18 = vld [vmem:[%s5068_s13 + $0x18] sm:$0xff] }
 0x6fc   :  { %3554 = vmatpush3.bf16.msra.mxu0 %v3553_v15 }
 0x6fd   :  { %3555 = vmatprep.subr.bf16.mxu0 %v3767_v61 }
 0x703   :  { %v3657_v16 = vpop.eup %3656 }
 0x704   :  { %1792 = vrot.lane.b32.xlu1 %v3657_v16, %s3770_s30  ;;  %v3659_v19 = vpop.eup %3658  ;;  %v1936_v16 = vld [vmem:[%s5071_s16 + $0x8] sm:$0xff] }
 0x705   :  { %v1582_v20 = vadd.f32 1.0, %v3659_v19  ;;  %v3661_v21 = vpop.eup %3660  ;;  %v3565_v19 = vpack.c.bf16 %v1936_v16, %v1935_v33 }
 0x706   :  { %v1786_v22 = vadd.f32 1.0, %v3661_v21 }
 0x707   :  { %3662 = vrcp.f32 %v1582_v20  ;;  %v3556_v20 = vpack.c.bf16 %v1925_v18, %v1924_v17  ;;  %v2656_v17 = vld [vmem:[%s5073_s18] ss:$0 sm:$0xff]  ;;  %s3772_s18 = smov [#allocation2]  }
 0x708   :  { %3664 = vrcp.f32 %v1786_v22  ;;  %v1937_v22 = vld [vmem:[%s5071_s16 + $0x10] sm:$0xff] }
 0x709   :  { %3557 = vmatpush3.bf16.msra.mxu0 %v3556_v20 }
 0x70a   :  { %3558 = vmatprep.subr.bf16.mxu0 %v3767_v61 }
 0x711   :  { %v3663_v23 = vpop.eup %3662 }
 0x712   :  { %v3665_v26 = vpop.eup %3664  ;;  %v1586_v30 = vmul.f32 0.0, %v3663_v23 }
 0x713   :  { %v1790_v35 = vmul.f32 0.0, %v3665_v26 }
 0x76c   :  { %v1589_v24 = vpop.permute.xlu0 %1588 }
 0x76d   :  { %v1591_v25 = vmul.f32 %v3663_v23, %v1589_v24 }
 0x76f   :  { %1593 = vrot.lane.b32.xlu0 %v1591_v25, %s3771_s4  ;;  %v1926_v25 = vld [vmem:[%s5068_s13 + $0x20] sm:$0xff] }
 0x776   :  { %v1793_v28 = vpop.permute.xlu1 %1792 }
 0x777   :  { %v1795_v29 = vmul.f32 %v3665_v26, %v1793_v28  ;;  %v1939_v28 = vld [vmem:[%s5071_s16 + $0x20] sm:$0xff] }
 0x779   :  { %1797 = vrot.lane.b32.xlu1 %v1795_v29, %s3771_s4 }
 0x7e1   :  { %v1594_v31 = vpop.permute.xlu0 %1593 }
 0x7e2   :  { %v1596_v34 = vadd.f32 %v1594_v31, %v1586_v30  ;;  %v1940_v30 = vld [vmem:[%s5071_s16 + $0x28] sm:$0xff]  ;;  %v1928_v31 = vld [vmem:[%s5068_s13 + $0x30] sm:$0xff] }
 0x7e4   :  { %3666 = vtanh.f32 %v1596_v34  ;;  %v1690_v3 = vrot.slane %v1596_v34, 7  ;;  %v1929_v34 = vld [vmem:[%s5068_s13 + $0x38] sm:$0xff] }
 0x7eb   :  { %v1798_v36 = vpop.permute.xlu1 %1797 }
 0x7ec   :  { %v1800_v38 = vadd.f32 %v1798_v36, %v1790_v35  ;;  %v3571_v35 = vpack.c.bf16 %v1940_v30, %v1939_v28  ;;  %v1941_v36 = vld [vmem:[%s5071_s16 + $0x30] sm:$0xff] }
 0x7ee   :  { %v3667_v39 = vpop.eup %3666  ;;  %3668 = vtanh.f32 %v1800_v38  ;;  %v1892_v7 = vrot.slane %v1800_v38, 1  ;;  %v1942_v38 = vld [vmem:[%s5071_s16 + $0x38] sm:$0xff] }
 0x7ef   :  { %1599 = vrot.lane.b32.xlu0 %v3667_v39, %s3770_s30  ;;  %v3562_v39 = vpack.c.bf16 %v1929_v34, %v1928_v31 }
 0x7f8   :  { %v3669_v42 = vpop.eup %3668 }
 0x7f9   :  { %1803 = vrot.lane.b32.xlu1 %v3669_v42, %s3770_s30  ;;  %v3574_v42 = vpack.c.bf16 %v1942_v38, %v1941_v36 }
 0x861   :  { %v1600_v27 = vpop.permute.xlu0 %1599 }
 0x862   :  { %v4806_v43 = vmul.f32 %v3663_v23, %v1600_v27  ;;  %v1938_v23 = vld [vmem:[%s5071_s16 + $0x18] sm:$0xff] }
 0x863   :  { %v3568_v24 = vpack.c.bf16 %v1938_v23, %v1937_v22 }
 0x864   :  { %1604 = vrot.lane.b32.xlu0 %v4806_v43, %s3771_s4 }
 0x86b   :  { %v1804_v45 = vpop.permute.xlu1 %1803 }
 0x86c   :  { %v4810_v54 = vmul.f32 %v3665_v26, %v1804_v45  ;;  %v1927_v26 = vld [vmem:[%s5068_s13 + $0x28] sm:$0xff] }
 0x86d   :  { %v3559_v29 = vpack.c.bf16 %v1927_v26, %v1926_v25 }
 0x86e   :  { %v1808_v40 = vrot.slane %v4810_v54, 1 }
 0x86f   :  { %3560 = vmatpush3.bf16.msra.mxu0 %v3559_v29 }
 0x870   :  { %1809 = vrot.lane.b32.xlu1 %v1808_v40, %s3771_s4  ;;  %3561 = vmatprep.subr.bf16.mxu0 %v3767_v61 }
 0x873   :  { %3563 = vmatpush3.bf16.msra.mxu0 %v3562_v39 }
 0x874   :  { %3576 = vmatprep.subr.bf16.mxu0 %v3767_v61 }
 0x8d6   :  { %v1605_v47 = vpop.permute.xlu0 %1604 }
 0x8d7   :  { %3139 = vmatmul.mubr.msk.f32.vlgmr.msra.gmra.mrb[16].mxu1 %vm908_vm2, %v1605_v47 }
 0x8d8   :  { %3548 = vmatpush3.bf16.msra.mxu1 %v4769_v59  ;;  %3160 = vmatprep.mubr.msk.f32.mxu1 %vm3768_vm0, %v3769_v11 }
 0x8d9   :  { %3549 = vmatprep.subr.bf16.mxu1 %v3767_v61 }
 0x8dc   :  { %3551 = vmatpush3.bf16.msra.mxu1 %v4781_v63 }
 0x8dd   :  { %3564 = vmatprep.subr.bf16.mxu1 %v3767_v61 }
 0x8e2   :  { %v1810_v48 = vpop.permute.xlu1 %1809 }
 0x8e3   :  { %3161 = vmatmul.mubr.msk.f32.vlgmr.msra.gmra.mrb[18].mxu1 %vm908_vm2, %v1810_v48 }
 0x8e4   :  { %3198 = vmatprep.mubr.msk.f32.mxu1 %vm3768_vm0, %v3769_v11  ;;  %3566 = vmatpush3.bf16.msra.mxu1 %v3565_v19 }
 0x8e5   :  { %3567 = vmatprep.subr.bf16.mxu1 %v3767_v61 }
 0x8e8   :  { %3569 = vmatpush3.bf16.msra.mxu1 %v3568_v24  ;;  %v2664_v24 = vld [vmem:[%s5075_s20] ss:$0 sm:$0xff]  ;;  %s2612_s20 = sshll.u32 %s3772_s18, 4  ;;  %s2613_s20 = int_to_ptr.vmem [resolvable:$true] %s2612_s20 }
 0x8e9   :  { %3570 = vmatprep.subr.bf16.mxu1 %v3767_v61  ;;  %s3718_s27 = scalar_lea.vmem %s2613_s20, 32  ;;  %p3723_p1 = scmp.lt.s32.totalorder %s2613_s20, %s2613_s20 }
 0x8ea   :  { %p3719_p0 = scmp.ne.s32.totalorder %s2613_s20, %s3718_s27  ;;  %p3724_p2 = scmp.lt.s32.totalorder %s3718_s27, %s3718_s27 }
 0x8ec   :  { %3572 = vmatpush3.bf16.msra.mxu1 %v3571_v35  ;;  %p3725_p3 = por %p3724_p2, %p3723_p1 }
 0x8ed   :  { %3573 = vmatprep.subr.bf16.mxu1 %v3767_v61 }
 0x8ee   :  { %p3726_p4 = pnand %p3725_p3, %p3719_p0 }
 0x8f0   :  { %3575 = vmatpush3.bf16.msra.mxu1 %v3574_v42 }
 0x8f1   :  { %3582 = vmatprep.subr.bf16.mxu1 %v3767_v61 }
 0x9aa   :  { %v1674_v49 = vpop.f32.mrb[16].mxu1 }
 0x9ab   :  { %v1679_v50 = vrot.slane %v1674_v49, 7  ;;  %v3140_v1 = vpop.f32.mrb[17].mxu1 }
 0x9ac   :  { %v1931_v1 = vld [vmem:[%s5069_s14 + $0x8] sm:$0xff] }
 0x9ad   :  { %v1681_v51 = vadd.f32 %v1679_v50, %v4794_v5  ;;  %v1930_v50 = vld [vmem:[%s5069_s14] sm:$0xff] }
 0x9af   :  { %3670 = vtanh.f32 %v1681_v51  ;;  %v2650_v13 = vmul.f32 -1.442695, %v1681_v51  ;;  %v3577_v51 = vpack.c.bf16 %v1931_v1, %v1930_v50 }
 0x9b6   :  { %v1879_v41 = vpop.f32.mrb[18].mxu1 }
 0x9b7   :  { %v1883_v37 = vadd.f32 %v1879_v41, %v1505_v10  ;;  %v3162_v46 = vpop.f32.mrb[19].mxu1 }
 0x9b9   :  { %v3671_v52 = vpop.eup %3670  ;;  %3672 = vtanh.f32 %v1883_v37  ;;  %v2653_v55 = vmul.f32 -1.442695, %v1883_v37  ;;  %v1932_v37 = vld [vmem:[%s5069_s14 + $0x10] sm:$0xff] }
 0x9ba   :  { %1694 = vrot.lane.b32.xlu0 %v3671_v52, %s3770_s30  ;;  %3674 = vpow2.f32 %v2650_v13  ;;  %v1944_v13 = vld [vmem:[%s5072_s17 + $0x8] sm:$0xff] }
 0x9bb   :  { %3676 = vpow2.f32 %v2653_v55 }
 0x9c3   :  { %v3673_v53 = vpop.eup %3672 }
 0x9c4   :  { %1896 = vrot.lane.b32.xlu1 %v3673_v53, %s3770_s30  ;;  %v3675_v44 = vpop.eup %3674  ;;  %v1943_v53 = vld [vmem:[%s5072_s17] sm:$0xff] }
 0x9c5   :  { %v1685_v56 = vadd.f32 1.0, %v3675_v44  ;;  %v3677_v58 = vpop.eup %3676  ;;  %v4930_v55 = vpack.c.bf16 %v1944_v13, %v1943_v53  ;;  %v1945_v44 = vld [vmem:[%s5072_s17 + $0x10] sm:$0xff] }
 0x9c6   :  { %v1887_v59 = vadd.f32 1.0, %v3677_v58 }
 0x9c7   :  { %3678 = vrcp.f32 %v1685_v56  ;;  %v1946_v56 = vld [vmem:[%s5072_s17 + $0x18] sm:$0xff] }
 0x9c8   :  { %3680 = vrcp.f32 %v1887_v59  ;;  %v4942_v58 = vpack.c.bf16 %v1946_v56, %v1945_v44  ;;  %v2517_v59 = vld [vmem:[%s5074_s19] sm:$0xff] }
 0x9d1   :  { %v4827_v60 = vpop.eup %3678 }
 0x9d2   :  { %v4831_v57 = vpop.eup %3680  ;;  %v1692_v4 = vmul.f32 %v4827_v60, %v1690_v3  ;;  %v2522_v3 = vld [vmem:[%s5074_s19 + $0x28] sm:$0xff] }
 0x9d3   :  { %v1894_v32 = vmul.f32 %v4831_v57, %v1892_v7 }
 0xa2c   :  { %v1695_v62 = vpop.permute.xlu0 %1694 }
 0xa2d   :  { %v1697_v63 = vmul.f32 %v4827_v60, %v1695_v62 }
 0xa2f   :  { %1699 = vrot.lane.b32.xlu0 %v1697_v63, %s3771_s4  ;;  %v2519_v63 = vld [vmem:[%s5074_s19 + $0x10] sm:$0xff] }
 0xa36   :  { %v1897_v0 = vpop.permute.xlu1 %1896 }
 0xa37   :  { %v1899_v2 = vmul.f32 %v4831_v57, %v1897_v0 }
 0xa39   :  { %1901 = vrot.lane.b32.xlu1 %v1899_v2, %s3771_s4  ;;  %v2521_v2 = vld [vmem:[%s5074_s19 + $0x20] sm:$0xff] }
 0xaa1   :  { %v1700_v5 = vpop.permute.xlu0 %1699 }
 0xaa2   :  { %v1702_v6 = vadd.f32 %v1700_v5, %v1692_v4  ;;  %v3607_v4 = vpack.c.bf16 %v2522_v3, %v2521_v2  ;;  %v2523_v5 = vld [vmem:[%s5074_s19 + $0x30] sm:$0xff] }
 0xaa4   :  { %3682 = vtanh.f32 %v1702_v6  ;;  %v2524_v6 = vld [vmem:[%s5074_s19 + $0x38] sm:$0xff] }
 0xaa5   :  { %v3610_v7 = vpack.c.bf16 %v2524_v6, %v2523_v5 }
 0xaab   :  { %v1902_v8 = vpop.permute.xlu1 %1901 }
 0xaac   :  { %v1904_v9 = vadd.f32 %v1902_v8, %v1894_v32 }
 0xaae   :  { %v3683_v10 = vpop.eup %3682  ;;  %3684 = vtanh.f32 %v1904_v9 }
 0xaaf   :  { %1705 = vrot.lane.b32.xlu0 %v3683_v10, %s3770_s30 }
 0xab8   :  { %v3685_v21 = vpop.eup %3684 }
 0xab9   :  { %1907 = vrot.lane.b32.xlu1 %v3685_v21, %s3770_s30 }
 0xb21   :  { %v1706_v27 = vpop.permute.xlu0 %1705 }
 0xb22   :  { %v1708_v45 = vmul.f32 %v4827_v60, %v1706_v27  ;;  %v2518_v60 = vld [vmem:[%s5074_s19 + $0x8] sm:$0xff] }
 0xb23   :  { %v3601_v62 = vpack.c.bf16 %v2518_v60, %v2517_v59 }
 0xb24   :  { %v1911_v40 = vsel %vm1315_vm3, %v4806_v43, %v1708_v45 }
 0xb25   :  { %1914 = vrot.lane.b32.xlu0 %v1911_v40, %s3771_s4 }
 0xb2b   :  { %v1908_v47 = vpop.permute.xlu1 %1907 }
 0xb2c   :  { %v1910_v48 = vmul.f32 %v4831_v57, %v1908_v47  ;;  %v2520_v57 = vld [vmem:[%s5074_s19 + $0x18] sm:$0xff] }
 0xb2d   :  { %v3604_v0 = vpack.c.bf16 %v2520_v57, %v2519_v63 }
 0xb2e   :  { %v1912_v49 = vsel %vm1315_vm3, %v1910_v48, %v4810_v54  ;;  %v1933_v54 = vld [vmem:[%s5069_s14 + $0x18] sm:$0xff] }
 0xb2f   :  { %1918 = vrot.lane.b32.xlu1 %v1912_v49, %s3770_s30  ;;  %v3580_v52 = vpack.c.bf16 %v1933_v54, %v1932_v37 }
 0xb97   :  { %v1915_v43 = vpop.permute.xlu0 %1914 }
 0xba1   :  { %v1919_v41 = vpop.permute.xlu1 %1918 }
 0xba2   :  { %v1921_v46 = vsel %vm908_vm2, %v1915_v43, %v1919_v41 }
 0xba3   :  { %3180 = vmatmul.mubr.msk.f32.vlgmr.msra.gmra.mrb[16].mxu0 %vm339_vm1, %v1921_v46  ;;  %3199 = vmatmul.mubr.msk.f32.vlgmr.msra.gmra.mrb[20].mxu1 %vm339_vm1, %v1921_v46 }
 0xba4   :  { %3578 = vmatpush3.bf16.msra.mxu0 %v3577_v51  ;;  %3209 = vmatprep.mubr.msk.f32.mxu0 %vm3768_vm0, %v3769_v11 }
 0xba5   :  { %3579 = vmatprep.subr.bf16.mxu0 %v3767_v61  ;;  %3584 = vmatpush3.bf16.msra.mxu1 %v3577_v51 }
 0xba6   :  { %3585 = vmatprep.subr.bf16.mxu1 %v3767_v61  ;;  %3220 = vmatprep.mubr.msk.f32.mxu1 %vm3768_vm0, %v3769_v11 }
 0xba8   :  { %3581 = vmatpush3.bf16.msra.mxu0 %v3580_v52 }
 0xba9   :  { %3588 = vmatprep.subr.bf16.mxu0 %v3767_v61  ;;  %3587 = vmatpush3.bf16.msra.mxu1 %v3580_v52 }
 0xbaa   :  { %3594 = vmatprep.subr.bf16.mxu1 %v3767_v61 }
 0xbab   :  { %3210 = vmatmul.mubr.f32.vlgmr.msra.gmra.mrb[18].mxu0 %v3769_v11 }
 0xbac   :  { %3590 = vmatpush3.bf16.msra.mxu0 %v4930_v55  ;;  %3231 = vmatprep.mubr.msk.f32.mxu0 %vm3768_vm0, %v3769_v11 }
 0xbad   :  { %3591 = vmatprep.subr.bf16.mxu0 %v3767_v61 }
 0xbb0   :  { %3593 = vmatpush3.bf16.msra.mxu0 %v4942_v58 }
 0xbb1   :  { %3600 = vmatprep.subr.bf16.mxu0 %v3767_v61 }
 0xbb3   :  { %3232 = vmatmul.mubr.f32.vlgmr.msra.gmra.mrb[20].mxu0 %v3769_v11 }
 0xbb4   :  { %3602 = vmatpush3.bf16.msra.mxu0 %v3601_v62  ;;  %3261 = vmatprep.mubr.msk.f32.mxu0 %vm3768_vm0, %v3769_v11 }
 0xbb5   :  { %3603 = vmatprep.subr.bf16.mxu0 %v3767_v61 }
 0xbb8   :  { %3605 = vmatpush3.bf16.msra.mxu0 %v3604_v0 }
 0xbb9   :  { %3606 = vmatprep.subr.bf16.mxu0 %v3767_v61 }
 0xbbc   :  { %3608 = vmatpush3.bf16.msra.mxu0 %v3607_v4 }
 0xbbd   :  { %3609 = vmatprep.subr.bf16.mxu0 %v3767_v61 }
 0xbc0   :  { %3611 = vmatpush3.bf16.msra.mxu0 %v3610_v7 }
 0xbc3   :  { %3262 = vmatmul.mubr.msk.f32.vlgmr.msra.gmra.mrb[22].mxu0 %vm339_vm1, %v1921_v46 }
 0xc76   :  { %v2023_v32 = vpop.f32.mrb[16].mxu0  ;;  %v2099_v8 = vpop.f32.mrb[20].mxu1 }
 0xc77   :  { %v3181_v9 = vpop.f32.mrb[17].mxu0  ;;  %v3200_v10 = vpop.f32.mrb[21].mxu1  ;;  %v4983_v14 = vadd.f32 %v2654_v12, %v2023_v32  ;;  %v4989_v19 = vadd.f32 %v2656_v17, %v2099_v8 }
 0xc7e   :  { %v2169_v33 = vpop.f32.mrb[18].mxu0 }
 0xc7f   :  { %v2173_v15 = vadd.f32 %v2169_v33, %v4983_v14  ;;  %v3211_v16 = vpop.f32.mrb[19].mxu0 }
 0xc81   :  { %3686 = vtanh.f32 %v2173_v15  ;;  %v2658_v30 = vmul.f32 -1.442695, %v2173_v15 }
 0xc86   :  { %v2370_v18 = vpop.f32.mrb[20].mxu0 }
 0xc87   :  { %v2375_v20 = vrot.slane %v2370_v18, 7  ;;  %v3233_v21 = vpop.f32.mrb[21].mxu0 }
 0xc89   :  { %v2377_v22 = vadd.f32 %v2375_v20, %v4989_v19 }
 0xc8b   :  { %v3687_v23 = vpop.eup %3686  ;;  %3688 = vtanh.f32 %v2377_v22  ;;  %v2661_v31 = vmul.f32 -1.442695, %v2377_v22 }
 0xc8c   :  { %2183 = vrot.lane.b32.xlu0 %v3687_v23, %s3770_s30  ;;  %3690 = vpow2.f32 %v2658_v30 }
 0xc8d   :  { %3692 = vpow2.f32 %v2661_v31 }
 0xc95   :  { %v3689_v25 = vpop.eup %3688 }
 0xc96   :  { %v2598_v26 = vpop.f32.mrb[22].mxu0  ;;  %2387 = vrot.lane.b32.xlu1 %v3689_v25, %s3770_s30  ;;  %v3691_v34 = vpop.eup %3690 }
 0xc97   :  { %v2599_v28 = vadd.f32 %v2664_v24, %v2598_v26  ;;  %v3263_v29 = vpop.f32.mrb[23].mxu0  ;;  %v2177_v35 = vadd.f32 1.0, %v3691_v34  ;;  %v3693_v36 = vpop.eup %3692 }
 0xc98   :  { %v2381_v38 = vadd.f32 1.0, %v3693_v36 }
 0xc99   :  { %2603 = vst.msk [vmem:[#allocation2] sm:$0x3] %vm2602_vm4, %v2599_v28  ;;  %3694 = vrcp.f32 %v2177_v35 }
 0xc9a   :  { %3696 = vrcp.f32 %v2381_v38 }
 0xca3   :  { %v3695_v39 = vpop.eup %3694 }
 0xca4   :  { %v3697_v45 = vpop.eup %3696  ;;  %v2181_v48 = vmul.f32 0.0, %v3695_v39 }
 0xca5   :  { %v2385_v1 = vmul.f32 0.0, %v3697_v45 }
 0xcfe   :  { %v2184_v42 = vpop.permute.xlu0 %2183 }
 0xcff   :  { %v2186_v27 = vmul.f32 %v3695_v39, %v2184_v42 }
 0xd01   :  { %2188 = vrot.lane.b32.xlu0 %v2186_v27, %s3771_s4 }
 0xd08   :  { %v2388_v40 = vpop.permute.xlu1 %2387 }
 0xd09   :  { %v2390_v47 = vmul.f32 %v3697_v45, %v2388_v40 }
 0xd0b   :  { %2392 = vrot.lane.b32.xlu1 %v2390_v47, %s3771_s4 }
 0xd73   :  { %v2189_v49 = vpop.permute.xlu0 %2188 }
 0xd74   :  { %v2191_v50 = vadd.f32 %v2189_v49, %v2181_v48 }
 0xd76   :  { %3698 = vtanh.f32 %v2191_v50 }
 0xd7d   :  { %v2393_v51 = vpop.permute.xlu1 %2392 }
 0xd7e   :  { %v2395_v43 = vadd.f32 %v2393_v51, %v2385_v1 }
 0xd80   :  { %v3699_v41 = vpop.eup %3698  ;;  %3700 = vtanh.f32 %v2395_v43  ;;  %v2487_v17 = vrot.slane %v2395_v43, 1 }
 0xd81   :  { %2194 = vrot.lane.b32.xlu0 %v3699_v41, %s3770_s30 }
 0xd8a   :  { %v3701_v37 = vpop.eup %3700 }
 0xd8b   :  { %2398 = vrot.lane.b32.xlu1 %v3701_v37, %s3770_s30 }
 0xdf3   :  { %v2195_v54 = vpop.permute.xlu0 %2194 }
 0xdf4   :  { %v5001_v46 = vmul.f32 %v3695_v39, %v2195_v54 }
 0xdf6   :  { %2199 = vrot.lane.b32.xlu0 %v5001_v46, %s3771_s4 }
 0xdfd   :  { %v2399_v52 = vpop.permute.xlu1 %2398 }
 0xdfe   :  { %v5005_v53 = vmul.f32 %v3697_v45, %v2399_v52 }
 0xe00   :  { %v2403_v13 = vrot.slane %v5005_v53, 1 }
 0xe02   :  { %2404 = vrot.lane.b32.xlu1 %v2403_v13, %s3771_s4 }
 0xe68   :  { %v2200_v44 = vpop.permute.xlu0 %2199 }
 0xe69   :  { %3221 = vmatmul.mubr.msk.f32.vlgmr.msra.gmra.mrb[22].mxu1 %vm908_vm2, %v2200_v44 }
 0xe6a   :  { %3596 = vmatpush3.bf16.msra.mxu1 %v4930_v55  ;;  %3242 = vmatprep.mubr.msk.f32.mxu1 %vm3768_vm0, %v3769_v11 }
 0xe6b   :  { %3597 = vmatprep.subr.bf16.mxu1 %v3767_v61 }
 0xe6e   :  { %3599 = vmatpush3.bf16.msra.mxu1 %v4942_v58 }
 0xe74   :  { %v2405_v56 = vpop.permute.xlu1 %2404 }
 0xe75   :  { %3243 = vmatmul.mubr.msk.f32.vlgmr.msra.gmra.mrb[24].mxu1 %vm908_vm2, %v2405_v56 }
 0xf3c   :  { %v2269_v59 = vpop.f32.mrb[22].mxu1 }
 0xf3d   :  { %v2274_v60 = vrot.slane %v2269_v59, 7  ;;  %v3222_v62 = vpop.f32.mrb[23].mxu1 }
 0xf3f   :  { %v2276_v63 = vadd.f32 %v2274_v60, %v4983_v14  ;;  %v2285_v14 = vrot.slane %v2191_v50, 7 }
 0xf41   :  { %3702 = vtanh.f32 %v2276_v63  ;;  %v2660_v11 = vmul.f32 -1.442695, %v2276_v63 }
 0xf48   :  { %v2474_v57 = vpop.f32.mrb[24].mxu1 }
 0xf49   :  { %v2478_v0 = vadd.f32 %v2474_v57, %v4989_v19  ;;  %v3244_v55 = vpop.f32.mrb[25].mxu1 }
 0xf4b   :  { %v3703_v2 = vpop.eup %3702  ;;  %3704 = vtanh.f32 %v2478_v0  ;;  %v2663_v58 = vmul.f32 -1.442695, %v2478_v0 }
 0xf4c   :  { %2289 = vrot.lane.b32.xlu0 %v3703_v2, %s3770_s30  ;;  %3706 = vpow2.f32 %v2660_v11 }
 0xf4d   :  { %3708 = vpow2.f32 %v2663_v58 }
 0xf55   :  { %v3705_v61 = vpop.eup %3704 }
 0xf56   :  { %2491 = vrot.lane.b32.xlu1 %v3705_v61, %s3770_s30  ;;  %v3707_v3 = vpop.eup %3706 }
 0xf57   :  { %v2280_v4 = vadd.f32 1.0, %v3707_v3  ;;  %v3709_v5 = vpop.eup %3708 }
 0xf58   :  { %v2482_v6 = vadd.f32 1.0, %v3709_v5 }
 0xf59   :  { %3710 = vrcp.f32 %v2280_v4 }
 0xf5a   :  { %3712 = vrcp.f32 %v2482_v6 }
 0xf63   :  { %v3711_v7 = vpop.eup %3710 }
 0xf64   :  { %v3713_v9 = vpop.eup %3712  ;;  %v2287_v33 = vmul.f32 %v3711_v7, %v2285_v14 }
 0xf65   :  { %v2489_v18 = vmul.f32 %v3713_v9, %v2487_v17 }
 0xfbe   :  { %v2290_v32 = vpop.permute.xlu0 %2289 }
 0xfbf   :  { %v2292_v8 = vmul.f32 %v3711_v7, %v2290_v32 }
 0xfc1   :  { %2294 = vrot.lane.b32.xlu0 %v2292_v8, %s3771_s4 }
 0xfc8   :  { %v2492_v10 = vpop.permute.xlu1 %2491 }
 0xfc9   :  { %v2494_v12 = vmul.f32 %v3713_v9, %v2492_v10 }
 0xfcb   :  { %2496 = vrot.lane.b32.xlu1 %v2494_v12, %s3771_s4 }
0x1033   :  { %v2295_v15 = vpop.permute.xlu0 %2294 }
0x1034   :  { %v2297_v16 = vadd.f32 %v2295_v15, %v2287_v33 }
0x1036   :  { %3714 = vtanh.f32 %v2297_v16 }
0x103d   :  { %v2497_v19 = vpop.permute.xlu1 %2496 }
0x103e   :  { %v2499_v20 = vadd.f32 %v2497_v19, %v2489_v18 }
0x1040   :  { %v3715_v21 = vpop.eup %3714  ;;  %3716 = vtanh.f32 %v2499_v20 }
0x1041   :  { %2300 = vrot.lane.b32.xlu0 %v3715_v21, %s3770_s30 }
0x104a   :  { %v3717_v22 = vpop.eup %3716 }
0x104b   :  { %2502 = vrot.lane.b32.xlu1 %v3717_v22, %s3770_s30 }
0x10b3   :  { %v2301_v23 = vpop.permute.xlu0 %2300 }
0x10b4   :  { %v2303_v24 = vmul.f32 %v3711_v7, %v2301_v23 }
0x10b6   :  { %v2506_v25 = vsel %vm1315_vm3, %v5001_v46, %v2303_v24 }
0x10b7   :  { %3729 = shalt.err (!%p3726_p4)
}
0x10b8   :  { %s3730_s5 = scalar_lea.hbm %s5076_s21, 32 }
0x10b9   :  { %p3731_p5 = scmp.ne.s32.totalorder %s5076_s21, %s3730_s5  ;;  %p3734_p6 = scmp.lt.u32.totalorder %s3730_s5, %s5076_s21 }
0x10bb   :  { %p3736_p7 = pnand %p3734_p6, %p3731_p5 }
0x10bd   :  { %3739 = shalt.err (!%p3736_p7)
}
0x10be   :  { %2615 = dma.vmem_to_hbm [thread:$0]  %s2613_s20, 32, %s5076_s21, [#allocation3]   ;;  %2509 = vrot.lane.b32.xlu0 %v2506_v25, %s3771_s4  ;;  %v2503_v26 = vpop.permute.xlu1 %2502  ;;  %vm2604_vm5 = vcmask 517120  }
0x10bf   :  { %v2505_v28 = vmul.f32 %v3713_v9, %v2503_v26  ;;  %s3773_s13 = smov [#allocation4]  }
0x10c0   :  { %s2622_s16 = sshll.u32 %s3773_s13, 4  ;;  %s2623_s16 = int_to_ptr.vmem [resolvable:$true] %s2622_s16 }
0x10c1   :  { %v2507_v29 = vsel %vm1315_vm3, %v2505_v28, %v5005_v53  ;;  %s3740_s24 = scalar_lea.vmem %s2623_s16, 32  ;;  %p3745_p9 = scmp.lt.s32.totalorder %s2623_s16, %s2623_s16 }
0x10c2   :  { %2513 = vrot.lane.b32.xlu1 %v2507_v29, %s3770_s30  ;;  %p3741_p8 = scmp.ne.s32.totalorder %s2623_s16, %s3740_s24  ;;  %p3746_p10 = scmp.lt.s32.totalorder %s3740_s24, %s3740_s24 }
0x10c4   :  { %p3747_p11 = por %p3746_p10, %p3745_p9 }
0x10c6   :  { %p3748_p12 = pnand %p3747_p11, %p3741_p8 }
0x1130   :  { %v2510_v30 = vpop.permute.xlu0 %2509 }
0x1134   :  { %v2514_v31 = vpop.permute.xlu1 %2513 }
0x1135   :  { %v2516_v34 = vsel %vm908_vm2, %v2510_v30, %v2514_v31 }
0x1136   :  { %2605 = vst.msk [vmem:[#allocation4] sm:$0x3] %vm2604_vm5, %v2516_v34 }
0x1137   :  { %3751 = shalt.err (!%p3748_p12)
}
0x1138   :  { %s3752_s30 = scalar_lea.hbm %s5077_s22, 32 }
0x1139   :  { %p3753_p13 = scmp.ne.s32.totalorder %s5077_s22, %s3752_s30  ;;  %p3756_p0 = scmp.lt.u32.totalorder %s3752_s30, %s5077_s22 }
0x113b   :  { %p3758_p1 = pnand %p3756_p0, %p3753_p13 }
0x113d   :  { %3761 = shalt.err (!%p3758_p1)
}
0x113e   :  { %2625 = dma.vmem_to_hbm [thread:$0]  %s2623_s16, 32, %s5077_s22, [#allocation5]  }
0x113f   :  { %3762 = dma.done.wait [#allocation3], 32  }
0x1140   :  { %3763 = vsyncadd [#allocation3], 4294967264 }
0x1141   :  { %3764 = dma.done.wait [#allocation5], 32  }
0x1142   :  { %3765 = vsyncadd [#allocation5], 4294967264 }
0x1143   :  { %2632 = vsyncpa [#allocation3], 1 }
0x1144   :  { %2633 = vsyncpa [#allocation5], 1 }

// kernel: ienet_forward.2
= control target key start
LH: loop header
LB: loop body
LE: loop exit
PB: predicated region body
PF: predicated region fallthrough
CT: control target
= control target key end

     0   :  { %s13903_s6 = smov 1   ;;  %s13904_s10 = smov 2   ;;  %s19708_s0 = inlined_call_operand.smem [shape: u32[38], index: -1, kind: input, shape index: {}] }
   0x1   :  { %s13968_s5 = sld [smem:[%s19708_s0]]   ;;  %s13905_s14 = smov 3  }
   0x2   :  { %s13973_s9 = sld [smem:[%s19708_s0 + %s13903_s6]]   ;;  %s13906_s18 = smov 4  }
   0x3   :  { %s13978_s13 = sld [smem:[%s19708_s0 + %s13904_s10]]   ;;  %s13907_s22 = smov 5  }
   0x4   :  { %s13983_s17 = sld [smem:[%s19708_s0 + %s13905_s14]]   ;;  %s13908_s26 = smov 6  }
   0x5   :  { %s13988_s21 = sld [smem:[%s19708_s0 + %s13906_s18]]   ;;  %s13909_s30 = smov 7  }
   0x6   :  { %s13993_s25 = sld [smem:[%s19708_s0 + %s13907_s22]]   ;;  %s13910_s4 = smov 8  }
   0x7   :  { %s13998_s29 = sld [smem:[%s19708_s0 + %s13908_s26]]   ;;  %s13911_s10 = smov 9  }
   0x8   :  { %s14003_s3 = sld [smem:[%s19708_s0 + %s13909_s30]]   ;;  %s13912_s15 = smov 10  }
   0x9   :  { %s14008_s8 = sld [smem:[%s19708_s0 + %s13910_s4]]   ;;  %s13913_s20 = smov 11  }
   0xa   :  { %20123 = sst [smem:[#allocation21_spill]] %s13983_s17  ;;  %s13914_s26 = smov 12  }
   0xb   :  { %s14013_s14 = sld [smem:[%s19708_s0 + %s13911_s10]]   ;;  %s13915_s1 = smov 13  }
   0xc   :  { %s14018_s19 = sld [smem:[%s19708_s0 + %s13912_s15]]   ;;  %s13916_s7 = smov 14  }
   0xd   :  { %s14023_s24 = sld [smem:[%s19708_s0 + %s13913_s20]]   ;;  %s13917_s15 = smov 15  }
   0xe   :  { %20124 = sst [smem:[#allocation22_spill]] %s14003_s3  ;;  %s13918_s22 = smov 16  }
   0xf   :  { %20125 = sst [smem:[#allocation23_spill]] %s14008_s8  ;;  %s13919_s28 = smov 17  }
  0x10   :  { %s14028_s30 = sld [smem:[%s19708_s0 + %s13914_s26]]  }
  0x11   :  { %20126 = sst [smem:[#allocation24_spill]] %s14013_s14 }
  0x12   :  { %20127 = sst [smem:[#allocation25_spill]] %s14018_s19 }
  0x13   :  { %20128 = sst [smem:[#allocation26_spill]] %s14023_s24 }
  0x14   :  { %s14033_s6 = sld [smem:[%s19708_s0 + %s13915_s1]]  }
  0x15   :  { %s14038_s12 = sld [smem:[%s19708_s0 + %s13916_s7]]   ;;  %s13920_s7 = smov 18  }
  0x16   :  { %20129 = sst [smem:[#allocation27_spill]] %s14028_s30 }
  0x17   :  { %s14043_s20 = sld [smem:[%s19708_s0 + %s13917_s15]]   ;;  %s13921_s15 = smov 19  }
  0x18   :  { %s14048_s27 = sld [smem:[%s19708_s0 + %s13918_s22]]   ;;  %s13922_s22 = smov 20  }
  0x19   :  { %s14053_s4 = sld [smem:[%s19708_s0 + %s13919_s28]]   ;;  %s13923_s28 = smov 21  }
  0x1a   :  { %s14063_s19 = sld [smem:[%s19708_s0 + %s13921_s15]]   ;;  %s13925_s15 = smov 23  }
  0x1b   :  { %20130 = sst [smem:[#allocation28_spill]] %s14038_s12 }
  0x1c   :  { %s14058_s12 = sld [smem:[%s19708_s0 + %s13920_s7]]   ;;  %s13924_s7 = smov 22  }
  0x1d   :  { %s14073_s30 = sld [smem:[%s19708_s0 + %s13923_s28]]   ;;  %s13927_s28 = smov 25  }
  0x1e   :  { %20131 = sst [smem:[#allocation29_spill]] %s14048_s27 }
  0x1f   :  { %20132 = sst [smem:[#allocation30_spill]] %s14053_s4 }
  0x20   :  { %s14068_s27 = sld [smem:[%s19708_s0 + %s13922_s22]]   ;;  %s13926_s22 = smov 24  }
  0x21   :  { %s14083_s24 = sld [smem:[%s19708_s0 + %s13925_s15]]   ;;  %s13929_s15 = smov 27  }
  0x22   :  { %20133 = sst [smem:[#allocation31_spill]] %s14058_s12 }
  0x23   :  { %s14078_s12 = sld [smem:[%s19708_s0 + %s13924_s7]]   ;;  %s13928_s7 = smov 26  }
  0x24   :  { %s14093_s8 = sld [smem:[%s19708_s0 + %s13927_s28]]   ;;  %s13931_s28 = smov 29  }
  0x26   :  { %20134 = sst [smem:[#allocation32_spill]] %s14068_s27 }
  0x27   :  { %20136 = sst [smem:[#allocation34_spill]] %s14083_s24 }
  0x28   :  { %s14088_s27 = sld [smem:[%s19708_s0 + %s13926_s22]]   ;;  %s13930_s22 = smov 28  }
  0x29   :  { %20135 = sst [smem:[#allocation33_spill]] %s14078_s12 }
  0x2a   :  { %20138 = sst [smem:[#allocation36_spill]] %s14093_s8 }
  0x2b   :  { %s14098_s12 = sld [smem:[%s19708_s0 + %s13928_s7]]   ;;  %s13932_s7 = smov 30  }
  0x2c   :  { %s14103_s24 = sld [smem:[%s19708_s0 + %s13929_s15]]   ;;  %s13933_s15 = smov 31  }
  0x2d   :  { %s14113_s8 = sld [smem:[%s19708_s0 + %s13931_s28]]   ;;  %s13935_s28 = smov 33  }
  0x2e   :  { %20137 = sst [smem:[#allocation35_spill]] %s14088_s27 }
  0x2f   :  { %s14108_s27 = sld [smem:[%s19708_s0 + %s13930_s22]]   ;;  %s13934_s22 = smov 32  }
  0x31   :  { %20139 = sst [smem:[#allocation37_spill]] %s14098_s12 }
  0x32   :  { %20140 = sst [smem:[#allocation38_spill]] %s14103_s24 }
  0x33   :  { %20142 = sst [smem:[#allocation40_spill]] %s14113_s8 }
  0x34   :  { %s14118_s12 = sld [smem:[%s19708_s0 + %s13932_s7]]   ;;  %s13936_s7 = smov 34  }
  0x35   :  { %20141 = sst [smem:[#allocation39_spill]] %s14108_s27 }
  0x36   :  { %s14123_s24 = sld [smem:[%s19708_s0 + %s13933_s15]]   ;;  %s13937_s15 = smov 35  }
  0x37   :  { %s14128_s27 = sld [smem:[%s19708_s0 + %s13934_s22]]   ;;  %s13938_s22 = smov 36  }
  0x38   :  { %s14133_s8 = sld [smem:[%s19708_s0 + %s13935_s28]]   ;;  %s13939_s28 = smov 37  }
  0x3a   :  { %20143 = sst [smem:[#allocation41_spill]] %s14118_s12 }
  0x3b   :  { %s14138_s12 = sld [smem:[%s19708_s0 + %s13936_s7]]  }
  0x3c   :  { %20144 = sst [smem:[#allocation42_spill]] %s14123_s24 }
  0x3d   :  { %20145 = sst [smem:[#allocation43_spill]] %s14128_s27 }
  0x3e   :  { %20146 = sst [smem:[#allocation44_spill]] %s14133_s8 }
  0x3f   :  { %s14143_s24 = sld [smem:[%s19708_s0 + %s13937_s15]]  }
  0x40   :  { %s14148_s27 = sld [smem:[%s19708_s0 + %s13938_s22]]  }
  0x41   :  { %20147 = sst [smem:[#allocation45_spill]] %s14138_s12 }
  0x42   :  { %s14153_s8 = sld [smem:[%s19708_s0 + %s13939_s28]]  }
  0x48   :  { %20148 = sst [smem:[#allocation46_spill]] %s14153_s8 }
  0x49   :  { %80 = vsyncpa [#allocation3], 0 }
  0x4a   :  { %82 = vsyncpa [#allocation3 + $0x1], 0 }
  0x4b   :  { %83 = vsyncpa [#allocation5], 0 }
  0x4c   :  { %84 = vsyncpa [#allocation8], 0 }
  0x4d   :  { %85 = vsyncpa [#allocation11], 0 }
  0x4e   :  { %86 = vsyncpa [#allocation14], 0  ;;  %s14155_s7 = smov 0   ;;  %s14157_s10 = smov 0  }
  0x4f   :  { %s14159_s11 = smov 0   ;;  %s14161_s15 = smov 0  }
  0x50 LB: > { %s20149_s4 = sld [smem:[#allocation30_spill]]  ;;  %s20151_s17 = sld [smem:[#allocation21_spill]]  ;;  %s13901_s15 = sphi %s14161_s15, %s21127_s15   ;;  %s13897_s11 = sphi %s14159_s11, %s21126_s11   ;;  %s13893_s10 = sphi %s14157_s10, %s21125_s10   ;;  %s13889_s7 = sphi %s14155_s7, %s21124_s7  }
  0x51   : > { %s20150_s3 = sld [smem:[#allocation22_spill]]  ;;  %s20152_s14 = sld [smem:[#allocation24_spill]] }
  0x52   : > { %s13940_s0 = smov [#allocation4]   ;;  %s14176_s18 = sadd.s32 4294967295, %s13901_s15  }
  0x53   : > { %s924_s16 = sshll.u32 %s13940_s0, 4  ;;  %p9574_p0 = scmp.ge.s32.totalorder %s13901_s15, 1  ;;  %s925_s16 = int_to_ptr.vmem [resolvable:$true] %s924_s16 }
  0x54   : > { %p19729_p1 = scmp.eq.s32.totalorder %s14176_s18, 0  ;;  %p905_p2 = scmp.lt.s32.totalorder %s13901_s15, 3 }
  0x55   : > { %s13941_s23 = smov [#allocation7]   ;;  %s13942_s1 = smov [#allocation10]  }
  0x56   : > { %p14181_p3 = pnand %p9574_p0, %p905_p2  ;;  %s959_s26 = sshll.u32 %s13941_s23, 4  ;;  %s14193_s26 = int_to_ptr.vmem [resolvable:$true] %s959_s26 }
  0x57   : > { %s997_s2 = sshll.u32 %s13942_s1, 4  ;;  %s13597_s0 = scalar_lea.hbm %s20151_s17, 128  ;;  %s14195_s2 = int_to_ptr.vmem [resolvable:$true] %s997_s2 }
  0x58   : > { %s20153_s22 = scalar_select %p14181_p3, 1, 0 }
  0x59   : > { %p13186_p4 = pneg %p14181_p3  ;;  %p13598_p6 = scmp.ne.s32.totalorder %s20151_s17, %s13597_s0 }
  0x5a   : > { %p13604_p10 = scmp.lt.u32.totalorder %s13597_s0, %s20151_s17 }
  0x5b   : > { %p14189_p5 = pnand %p13186_p4, %p19729_p1 }
  0x5d   : > { %p14201_p7 = pneg %p14189_p5 }
  0x5f   : > { %p13600_p8 = pnand %p14201_p7, %p13598_p6 }
  0x61   : > { %p13601_p9 = pneg %p13600_p8 }
  0x63   : > { %p13606_p11 = pnand %p13604_p10, %p13601_p9 }
  0x65   : > { %13609 = shalt.err (!%p13606_p11)
}
  0x66   : > { %s13610_s23 = scalar_lea.vmem %s925_s16, 128  ;;  %p13618_p2 = scmp.lt.s32.totalorder %s925_s16, %s925_s16 }
  0x67   : > { %p13611_p12 = scmp.ne.s32.totalorder %s925_s16, %s13610_s23  ;;  %p13619_p4 = scmp.lt.s32.totalorder %s13610_s23, %s13610_s23 }
  0x69   : > { %p13613_p13 = pnand %p13611_p12, %p14201_p7  ;;  %p13620_p1 = por %p13619_p4, %p13618_p2 }
  0x6b   : > { %p13614_p0 = pneg %p13613_p13 }
  0x6d   : > { %p13621_p3 = pnand %p13620_p1, %p13614_p0 }
  0x6f   : > { %13624 = shalt.err (!%p13621_p3)
}
  0x70   : > { %13189 = dma.hbm_to_vmem [thread:$0]  (!%p14189_p5), %s20151_s17, 128, %s925_s16, [#allocation5]  }
  0x71   : > { %s13625_s1 = scalar_lea.hbm %s20152_s14, 256 }
  0x72   : > { %p13626_p6 = scmp.ne.s32.totalorder %s20152_s14, %s13625_s1  ;;  %p13632_p10 = scmp.lt.u32.totalorder %s13625_s1, %s20152_s14 }
  0x74   : > { %p13628_p8 = pnand %p13626_p6, %p14201_p7 }
  0x76   : > { %p13629_p9 = pneg %p13628_p8 }
  0x78   : > { %p13634_p11 = pnand %p13632_p10, %p13629_p9 }
  0x7a   : > { %13637 = shalt.err (!%p13634_p11)
}
  0x7b   : > { %s13638_s0 = scalar_lea.vmem %s14193_s26, 256  ;;  %p13646_p13 = scmp.lt.s32.totalorder %s14193_s26, %s14193_s26 }
  0x7c   : > { %p13639_p1 = scmp.ne.s32.totalorder %s14193_s26, %s13638_s0  ;;  %p13647_p0 = scmp.lt.s32.totalorder %s13638_s0, %s13638_s0 }
  0x7e   : > { %p13641_p3 = pnand %p13639_p1, %p14201_p7  ;;  %p13648_p2 = por %p13647_p0, %p13646_p13 }
  0x80   : > { %p13642_p12 = pneg %p13641_p3 }
  0x82   : > { %p13649_p4 = pnand %p13648_p2, %p13642_p12 }
  0x84   : > { %13652 = shalt.err (!%p13649_p4)
}
  0x85   : > { %s13943_s16 = smov 128   ;;  %s13944_s23 = smov 8  }
  0x86   : > { %13195 = dma.hbm_to_vmem [thread:$0]  (!%p14189_p5), %s20152_s14, 256, %s14193_s26, [#allocation8], %s13943_s16, %s13943_s16, %s13944_s23  }
  0x87   : > { %s13653_s1 = scalar_lea.hbm %s14043_s20, 256 }
  0x88   : > { %p13654_p6 = scmp.ne.s32.totalorder %s14043_s20, %s13653_s1  ;;  %p13660_p10 = scmp.lt.u32.totalorder %s13653_s1, %s14043_s20 }
  0x8a   : > { %p13656_p8 = pnand %p13654_p6, %p14201_p7 }
  0x8c   : > { %p13657_p9 = pneg %p13656_p8 }
  0x8e   : > { %p13662_p11 = pnand %p13660_p10, %p13657_p9 }
  0x90   : > { %13665 = shalt.err (!%p13662_p11)
}
  0x91   : > { %s13666_s0 = scalar_lea.vmem %s14195_s2, 256  ;;  %p13674_p13 = scmp.lt.s32.totalorder %s14195_s2, %s14195_s2 }
  0x92   : > { %p13667_p1 = scmp.ne.s32.totalorder %s14195_s2, %s13666_s0  ;;  %p13675_p0 = scmp.lt.s32.totalorder %s13666_s0, %s13666_s0 }
  0x94   : > { %p13669_p3 = pnand %p13667_p1, %p14201_p7  ;;  %p13676_p2 = por %p13675_p0, %p13674_p13 }
  0x96   : > { %p13670_p12 = pneg %p13669_p3 }
  0x98   : > { %p13677_p4 = pnand %p13676_p2, %p13670_p12 }
  0x9a   : > { %13680 = shalt.err (!%p13677_p4)
}
  0x9b   : > { %13201 = dma.hbm_to_vmem [thread:$0]  (!%p14189_p5), %s14043_s20, 256, %s14195_s2, [#allocation11], %s13943_s16, %s13943_s16, %s13944_s23  }
  0x9c   : > { %s13945_s26 = smov [#allocation13]   ;;  %s13946_s14 = smov [#allocation6]  }
  0x9d   : > { %s1029_s1 = sshll.u32 %s13945_s26, 4  ;;  %s943_s0 = sshll.u32 %s13946_s14, 4  ;;  %s1030_s1 = int_to_ptr.vmem [resolvable:$true] %s1029_s1  ;;  %s944_s0 = int_to_ptr.vmem [resolvable:$true] %s943_s0 }
  0x9e   : > { %s13681_s17 = scalar_lea.hbm %s14063_s19, 512 }
  0x9f   : > { %p13682_p6 = scmp.ne.s32.totalorder %s14063_s19, %s13681_s17  ;;  %p13688_p10 = scmp.lt.u32.totalorder %s13681_s17, %s14063_s19 }
  0xa1   : > { %p13684_p8 = pnand %p13682_p6, %p14201_p7 }
  0xa3   : > { %p13685_p9 = pneg %p13684_p8 }
  0xa5   : > { %p13690_p11 = pnand %p13688_p10, %p13685_p9 }
  0xa7   : > { %13693 = shalt.err (!%p13690_p11)
}
  0xa8   : > { %s13694_s12 = scalar_lea.vmem %s1030_s1, 512  ;;  %p13702_p13 = scmp.lt.s32.totalorder %s1030_s1, %s1030_s1 }
  0xa9   : > { %p13695_p1 = scmp.ne.s32.totalorder %s1030_s1, %s13694_s12  ;;  %p13703_p0 = scmp.lt.s32.totalorder %s13694_s12, %s13694_s12 }
  0xab   : > { %p13697_p3 = pnand %p13695_p1, %p14201_p7  ;;  %p13704_p2 = por %p13703_p0, %p13702_p13 }
  0xad   : > { %p13698_p12 = pneg %p13697_p3 }
  0xaf   : > { %p13705_p4 = pnand %p13704_p2, %p13698_p12 }
  0xb1   : > { %13708 = shalt.err (!%p13705_p4)
}
  0xb2   : > { %13207 = dma.hbm_to_vmem [thread:$0]  (!%p14189_p5), %s14063_s19, 512, %s1030_s1, [#allocation14], %s13943_s16, %s13943_s16, %s13944_s23  }
  0xb3   : > { %s13709_s17 = scalar_lea.hbm %s20150_s3, 256 }
  0xb4   : > { %p13710_p6 = scmp.ne.s32.totalorder %s20150_s3, %s13709_s17  ;;  %p13716_p10 = scmp.lt.u32.totalorder %s13709_s17, %s20150_s3 }
  0xb6   : > { %p13712_p8 = pnand %p13710_p6, %p14201_p7 }
  0xb8   : > { %p13713_p9 = pneg %p13712_p8 }
  0xba   : > { %p13718_p11 = pnand %p13716_p10, %p13713_p9 }
  0xbc   : > { %13721 = shalt.err (!%p13718_p11)
}
  0xbd   : > { %s13722_s14 = scalar_lea.vmem %s944_s0, 256  ;;  %p13730_p13 = scmp.lt.s32.totalorder %s944_s0, %s944_s0 }
  0xbe   : > { %p13723_p1 = scmp.ne.s32.totalorder %s944_s0, %s13722_s14  ;;  %p13731_p0 = scmp.lt.s32.totalorder %s13722_s14, %s13722_s14 }
  0xc0   : > { %p13725_p3 = pnand %p13723_p1, %p14201_p7  ;;  %p13732_p2 = por %p13731_p0, %p13730_p13 }
  0xc2   : > { %p13726_p12 = pneg %p13725_p3 }
  0xc4   : > { %p13733_p4 = pnand %p13732_p2, %p13726_p12 }
  0xc6   : > { %13736 = shalt.err (!%p13733_p4)
}
  0xc7   : > { %13192 = dma.hbm_to_vmem [thread:$0]  (!%p14189_p5), %s20150_s3, 256, %s944_s0, [#allocation5], %s13943_s16, %s13943_s16, %s13944_s23  }
  0xc8   : > { %s13947_s12 = smov [#allocation9]   ;;  %s13948_s26 = smov [#allocation12]  }
  0xc9   : > { %s981_s2 = sshll.u32 %s13947_s12, 4  ;;  %s1013_s1 = sshll.u32 %s13948_s26, 4  ;;  %s982_s2 = int_to_ptr.vmem [resolvable:$true] %s981_s2  ;;  %s1014_s1 = int_to_ptr.vmem [resolvable:$true] %s1013_s1 }
  0xca   : > { %s13737_s17 = scalar_lea.hbm %s14033_s6, 256 }
  0xcb   : > { %p13738_p6 = scmp.ne.s32.totalorder %s14033_s6, %s13737_s17  ;;  %p13744_p10 = scmp.lt.u32.totalorder %s13737_s17, %s14033_s6 }
  0xcd   : > { %p13740_p8 = pnand %p13738_p6, %p14201_p7 }
  0xcf   : > { %p13741_p9 = pneg %p13740_p8 }
  0xd1   : > { %p13746_p11 = pnand %p13744_p10, %p13741_p9 }
  0xd3   : > { %13749 = shalt.err (!%p13746_p11)
}
  0xd4   : > { %s13750_s14 = scalar_lea.vmem %s982_s2, 256  ;;  %p13758_p13 = scmp.lt.s32.totalorder %s982_s2, %s982_s2 }
  0xd5   : > { %p13751_p1 = scmp.ne.s32.totalorder %s982_s2, %s13750_s14  ;;  %p13759_p0 = scmp.lt.s32.totalorder %s13750_s14, %s13750_s14 }
  0xd7   : > { %p13753_p3 = pnand %p13751_p1, %p14201_p7  ;;  %p13760_p2 = por %p13759_p0, %p13758_p13 }
  0xd9   : > { %p13754_p12 = pneg %p13753_p3 }
  0xdb   : > { %p13761_p4 = pnand %p13760_p2, %p13754_p12 }
  0xdd   : > { %13764 = shalt.err (!%p13761_p4)
}
  0xde   : > { %13198 = dma.hbm_to_vmem [thread:$0]  (!%p14189_p5), %s14033_s6, 256, %s982_s2, [#allocation8], %s13943_s16, %s13943_s16, %s13944_s23  }
  0xdf   : > { %s13765_s0 = scalar_lea.hbm %s20149_s4, 256 }
  0xe0   : > { %p13766_p6 = scmp.ne.s32.totalorder %s20149_s4, %s13765_s0  ;;  %p13772_p10 = scmp.lt.u32.totalorder %s13765_s0, %s20149_s4 }
  0xe2   : > { %p13768_p8 = pnand %p13766_p6, %p14201_p7 }
  0xe4   : > { %p13769_p9 = pneg %p13768_p8 }
  0xe6   : > { %p13774_p11 = pnand %p13772_p10, %p13769_p9 }
  0xe8   : > { %13777 = shalt.err (!%p13774_p11)
}
  0xe9   : > { %s13778_s12 = scalar_lea.vmem %s1014_s1, 256  ;;  %p13786_p13 = scmp.lt.s32.totalorder %s1014_s1, %s1014_s1 }
  0xea   : > { %p13779_p1 = scmp.ne.s32.totalorder %s1014_s1, %s13778_s12  ;;  %p13787_p0 = scmp.lt.s32.totalorder %s13778_s12, %s13778_s12 }
  0xec   : > { %p13781_p3 = pnand %p13779_p1, %p14201_p7  ;;  %p13788_p2 = por %p13787_p0, %p13786_p13 }
  0xee   : > { %p13782_p12 = pneg %p13781_p3 }
  0xf0   : > { %p13789_p4 = pnand %p13788_p2, %p13782_p12 }
  0xf2   : > { %13792 = shalt.err (!%p13789_p4)
}
  0xf3   : > { %13204 = dma.hbm_to_vmem [thread:$0]  (!%p14189_p5), %s20149_s4, 256, %s1014_s1, [#allocation11], %s13943_s16, %s13943_s16, %s13944_s23  }
  0xf4   : > { %s13949_s2 = smov [#allocation15]   ;;  %s13793_s17 = scalar_lea.hbm %s14073_s30, 512 }
  0xf5   : > { %s1045_s26 = sshll.u32 %s13949_s2, 4  ;;  %p13794_p6 = scmp.ne.s32.totalorder %s14073_s30, %s13793_s17  ;;  %s1046_s26 = int_to_ptr.vmem [resolvable:$true] %s1045_s26 }
  0xf6   : > { %p13800_p10 = scmp.lt.u32.totalorder %s13793_s17, %s14073_s30 }
  0xf7   : > { %p13796_p8 = pnand %p13794_p6, %p14201_p7 }
  0xf9   : > { %p13797_p9 = pneg %p13796_p8 }
  0xfb   : > { %p13802_p11 = pnand %p13800_p10, %p13797_p9 }
  0xfd   : > { %13805 = shalt.err (!%p13802_p11)
}
  0xfe   : > { %s13806_s14 = scalar_lea.vmem %s1046_s26, 512  ;;  %p13814_p13 = scmp.lt.s32.totalorder %s1046_s26, %s1046_s26 }
  0xff   : > { %p13807_p1 = scmp.ne.s32.totalorder %s1046_s26, %s13806_s14  ;;  %p13815_p0 = scmp.lt.s32.totalorder %s13806_s14, %s13806_s14 }
 0x101   : > { %p13809_p3 = pnand %p13807_p1, %p14201_p7  ;;  %p13816_p2 = por %p13815_p0, %p13814_p13 }
 0x103   : > { %p13810_p12 = pneg %p13809_p3 }
 0x105   : > { %p13817_p4 = pnand %p13816_p2, %p13810_p12 }
 0x107   : > { %13820 = shalt.err (!%p13817_p4)
}
 0x108   : > { %13210 = dma.hbm_to_vmem [thread:$0]  (!%p14189_p5), %s14073_s30, 512, %s1046_s26, [#allocation14], %s13943_s16, %s13943_s16, %s13944_s23  }
 0x109   : > { %s14315_s8 = sadd.s32 1, %s13901_s15   ;;  %s99_s28 = sadd.s32 1, %s13897_s11 }
 0x10a   : > { %s96_s1 = ssub.s32 %s13901_s15, %s14315_s8  ;;  %p106_p7 = scmp.ne.s32.totalorder %s13897_s11, %s13893_s10 }
 0x10b   : > { %p97_p6 = scmp.eq.s32.totalorder %s96_s1, 0  ;;  %p107_p8 = scmp.eq.s32.totalorder %s13901_s15, 0 }
 0x10c   : > { %p112_p9 = scmp.ne.s32.totalorder %s13893_s10, %s13889_s7  ;;  %p13223_p10 = scmp.lt.s32.totalorder %s13901_s15, 2 }
 0x10d   : > { %s14327_s0 = scalar_select %p97_p6, %s13897_s11, %s99_s28  }
 0x10e   : > { %p108_p11 = por %p107_p8, %p106_p7  ;;  %p20156_p1 = scmp.eq.s32.totalorder %s14176_s18, 0 }
 0x10f   : > { %s1104_s16 = sand.u32 1, %s13897_s11   ;;  %s13150_s23 = smul.u32 112, %s13901_s15 }
 0x110   : > { %p14331_p3 = por %p20156_p1, %p112_p9  ;;  %s13149_s2 = smul.u32 7, %s1104_s16 }
 0x111   : > { %p14337_p5 = pnand %p13223_p10, %p108_p11  ;;  %s14342_s7 = scalar_lea.hbm %s13968_s5, %s13150_s23 }
 0x112   : > { %s20157_s12 = scalar_select %p14331_p3, 1, 0 }
 0x113   : > { %s1108_s17 = scalar_lea.vmem [#allocation2], %s13149_s2  ;;  %s1105_s28 = scalar_lea.sflag [#allocation3], %s1104_s16 }
 0x114   : > { %s1116_s14 = sshll.u32 %s1108_s17, 4  ;;  %s13821_s1 = scalar_lea.hbm %s14342_s7, 112  ;;  %s14344_s14 = int_to_ptr.vmem [resolvable:$true] %s1116_s14 }
 0x115   : > { %p13822_p12 = scmp.ne.s32.totalorder %s14342_s7, %s13821_s1  ;;  %p13823_p13 = pneg %p14337_p5 }
 0x116   : > { %s13826_s15 = scalar_lea.hbm %s13968_s5, 224  ;;  %p13827_p4 = scmp.lt.u32.totalorder %s14342_s7, %s13968_s5 }
 0x117   : > { %p13824_p0 = pnand %p13823_p13, %p13822_p12  ;;  %p13828_p7 = scmp.lt.u32.totalorder %s13826_s15, %s13821_s1 }
 0x118   : > { %p13830_p8 = scmp.lt.u32.totalorder %s13821_s1, %s14342_s7 }
 0x119   : > { %p13825_p2 = pneg %p13824_p0  ;;  %p13829_p6 = por %p13828_p7, %p13827_p4 }
 0x11b   : > { %p13831_p9 = por %p13830_p8, %p13829_p6 }
 0x11d   : > { %p13832_p10 = pnand %p13831_p9, %p13825_p2 }
 0x11f   : > { %13835 = shalt.err (!%p13832_p10)
}
 0x120   : > { %s13836_s16 = scalar_lea.vmem %s14344_s14, 112  ;;  %s13950_s23 = smov [#allocation2]  }
 0x121   : > { %p13837_p11 = scmp.ne.s32.totalorder %s14344_s14, %s13836_s16  ;;  %s13841_s2 = sshll.u32 %s13950_s23, 4  ;;  %s13842_s2 = int_to_ptr.vmem [resolvable:$false] %s13841_s2 }
 0x122   : > { %s13843_s17 = scalar_lea.vmem %s13842_s2, 224  ;;  %p13844_p12 = scmp.lt.s32.totalorder %s14344_s14, %s13842_s2 }
 0x123   : > { %p13839_p1 = pnand %p13837_p11, %p13823_p13  ;;  %p13845_p0 = scmp.lt.s32.totalorder %s13843_s17, %s13836_s16 }
 0x125   : > { %p13840_p3 = pneg %p13839_p1  ;;  %p13846_p4 = por %p13845_p0, %p13844_p12 }
 0x127   : > { %p13847_p7 = pnand %p13846_p4, %p13840_p3 }
 0x129   : > { %13850 = shalt.err (!%p13847_p7)
}
 0x12a   : > { %13214 = dma.hbm_to_vmem [thread:$0]  (!%p14337_p5), %s14342_s7, 112, %s14344_s14, %s1105_s28  }
 0x12b   : > { %p20159_p2 = scmp.ne.s32.totalorder %s20153_s22, 0 }
 0x12d   : > { %1125 = sbr.rel (%p20159_p2) target bundleno = 6471 (0x1947), region = 168 }
 0x134   : > { %s1127_s1 = sand.u32 1, %s13893_s10   ;;  %p20160_p13 = scmp.ne.s32.totalorder %s20157_s12, 0 }
 0x135   : > { %s13151_s15 = smul.u32 7, %s1127_s1  ;;  %s1128_s23 = scalar_lea.sflag [#allocation3], %s1127_s1 }
 0x137   : > { %s1131_s3 = scalar_lea.vmem [#allocation2], %s13151_s15 }
 0x138   : > { %13868 = dma.done.wait (%p20160_p13), %s1128_s23, 112  }
 0x139   : > { %13870 = vsyncadd (%p20160_p13), %s1128_s23, 4294967184  ;;  %p20161_p3 = scmp.eq.s32.totalorder %s14176_s18, 0 }
 0x13b   : > { %13872 = dma.done.wait (%p20161_p3), [#allocation5], 384   ;;  %p20162_p6 = pmov %p20161_p3 }
 0x13c   : > { %p20163_p5 = pmov %p20161_p3 }
 0x13d   : > { %13874 = vsyncadd (%p20162_p6), [#allocation5], 4294966912 }
 0x13e   : > { %13876 = dma.done.wait (%p20163_p5), [#allocation8], 512   ;;  %p20164_p8 = pmov %p20161_p3 }
 0x13f   : > { %p20165_p9 = pmov %p20161_p3 }
 0x140   : > { %13878 = vsyncadd (%p20164_p8), [#allocation8], 4294966784 }
 0x141   : > { %13880 = dma.done.wait (%p20165_p9), [#allocation11], 512   ;;  %p20166_p10 = pmov %p20161_p3 }
 0x142   : > { %p20167_p11 = pmov %p20161_p3 }
 0x143   : > { %13882 = vsyncadd (%p20166_p10), [#allocation11], 4294966784 }
 0x144   : > { %13884 = dma.done.wait (%p20167_p11), [#allocation14], 1024   ;;  %p20168_p1 = pmov %p20161_p3 }
 0x145   : > { %v1267_v0 = vlaneseq  ;;  %v1259_v5 = vld [vmem:[%s1131_s3] sm:$0x7f]  ;;  %s20108_s22 = smov 127   ;;  %s20110_s12 = smov 1   ;;  %v19781_v10 = vmov 0.0   ;;  %vm13954_vm0 = vmmov 0  }
 0x146   : > { %13886 = vsyncadd (%p20168_p1), [#allocation14], 4294966272  ;;  %1481 = vmatprep.mubr.f32.mxu0 %v19781_v10  ;;  %11197 = vmatprep.subr.mxu1 %v19781_v10  ;;  %v13955_v18 = vmov 0   ;;  %v1261_v19 = vld [vmem:[%s13978_s13] sm:$0xff]  ;;  %vm19737_vm1 = vcmask 7168   ;;  %vm19739_vm2 = vcmask 1039360  }
 0x147   : > { %v14391_v1 = vshrl.u32 %v1267_v0, 7  ;;  %11199 = vmatprep.mubr.msk.f32.mxu1 %vm13954_vm0, %v19781_v10  ;;  %13320 = vset.pattern.permute.xlu0 %v13955_v18  ;;  %vm1370_vm3 = vcmask 1040384   ;;  %vm19736_vm4 = vcmask 1041408   ;;  %vm1395_vm5 = vcmask 1042432   ;;  %v1260_v35 = vld [vmem:[%s13973_s9] sm:$0xff]  ;;  %vm14553_vm8 = vmneg %vm19737_vm1  ;;  %s20780_s3 = sld [smem:[#allocation23_spill]] }
 0x148   : > { %13336 = vset.pattern.permute.xlu1 %v13955_v18  ;;  %vm1391_vm6 = vcmask 23552   ;;  %vm19738_vm7 = vcmask 515072   ;;  %vm13956_vm9 = vmmov 1   ;;  %vm19740_vm11 = vcmask 195584   ;;  %s20792_s26 = sld [smem:[#allocation26_spill]]  ;;  %s20794_s7 = sld [smem:[#allocation27_spill]] }
 0x149   : > { %v1273_v2 = vsub.s32 1, %v14391_v1  ;;  %v1269_v3 = vsub.s32 0, %v14391_v1  ;;  %v1277_v4 = vsub.s32 2, %v14391_v1  ;;  %v1281_v9 = vsub.s32 3, %v14391_v1  ;;  %vm14560_vm10 = vmpackc.low %vm13956_vm9, %vm14553_vm8  ;;  %s20796_s28 = sld [smem:[#allocation25_spill]]  ;;  %s20993_s16 = sld [smem:[#allocation28_spill]] }
 0x14a   : > { %v1285_v12 = vsub.s32 4, %v14391_v1  ;;  %v1289_v14 = vsub.s32 5, %v14391_v1  ;;  %v1293_v16 = vsub.s32 6, %v14391_v1  ;;  %s21008_s2 = sld [smem:[#allocation31_spill]]  ;;  %s21009_s17 = sld [smem:[#allocation29_spill]] }
 0x14b   : > { %v14396_v6 = vrot.slane %v1259_v5, %v1273_v2  ;;  %v14398_v7 = vrot.slane %v1259_v5, %v1269_v3  ;;  %v14404_v8 = vrot.slane %v1259_v5, %v1277_v4  ;;  %v14413_v11 = vrot.slane %v1259_v5, %v1281_v9  ;;  %s21029_s1 = sld [smem:[#allocation32_spill]]  ;;  %s21034_s15 = sld [smem:[#allocation34_spill]] }
 0x14c   : > { %v14420_v13 = vrot.slane %v1259_v5, %v1285_v12  ;;  %v14427_v15 = vrot.slane %v1259_v5, %v1289_v14  ;;  %v14436_v17 = vrot.slane %v1259_v5, %v1293_v16  ;;  %v1264_v14 = vld [vmem:[%s13993_s25] sm:$0xff]  ;;  %s21057_s4 = sld [smem:[#allocation40_spill]]  ;;  %p1254_p12 = scmp.lt.s32.totalorder %s14176_s18, 1 }
 0x14d   : > { %1326 = vrot.lane.b32.xlu0 %v14396_v6, %s20108_s22  ;;  %1295 = vrot.lane.b32.xlu1 %v14398_v7, %s20110_s12 }
 0x14e   : > { %s20795_s14 = smov %s20794_s7  ;;  %s21129_s18 = smov (!%p1254_p12, %s14176_s18), 1 }
 0x151   : > { %1328 = vrot.lane.b32.xlu0 %v14404_v8, %s20108_s22  ;;  %1297 = vrot.lane.b32.xlu1 %v14396_v6, %s20110_s12  ;;  %s21035_s23 = smov %s21034_s15 }
 0x155   : > { %1324 = vrot.lane.b32.xlu0 %v14398_v7, %s20108_s22  ;;  %1330 = vrot.lane.b32.xlu1 %v14413_v11, %s20108_s22 }
 0x159   : > { %1332 = vrot.lane.b32.xlu0 %v14420_v13, %s20108_s22  ;;  %1299 = vrot.lane.b32.xlu1 %v14404_v8, %s20110_s12 }
 0x15d   : > { %1301 = vrot.lane.b32.xlu0 %v14413_v11, %s20110_s12  ;;  %1334 = vrot.lane.b32.xlu1 %v14427_v15, %s20108_s22 }
 0x161   : > { %1336 = vrot.lane.b32.xlu0 %v14436_v17, %s20108_s22  ;;  %1303 = vrot.lane.b32.xlu1 %v14420_v13, %s20110_s12 }
 0x165   : > { %1305 = vrot.lane.b32.xlu0 %v14427_v15, %s20110_s12  ;;  %1307 = vrot.lane.b32.xlu1 %v14436_v17, %s20110_s12 }
 0x169   : > { %1388 = vperm.xlu0 %13320, %v1261_v19  }
 0x1bf   : > { %v1327_v20 = vpop.permute.xlu0 %1326  ;;  %v1296_v21 = vpop.permute.xlu1 %1295 }
 0x1c0   : > { %v1323_v28 = vsel %vm19737_vm1, 0.0, %v1296_v21 }
 0x1c1   : > { %v1371_v34 = vsel %vm1370_vm3, %v1323_v28, %v14398_v7 }
 0x1c3   : > { %v1329_v22 = vpop.permute.xlu0 %1328  ;;  %v1298_v23 = vpop.permute.xlu1 %1297 }
 0x1c4   : > { %v1340_v24 = vsel %vm19739_vm2, %v1327_v20, %v1329_v22  ;;  %v1310_v25 = vsel %vm19737_vm1, %v1296_v21, %v1298_v23 }
 0x1c5   : > { %v1357_v26 = vrot.slane %v1340_v24, 6  ;;  %v1372_v27 = vsel %vm1370_vm3, %v1310_v25, %v14396_v6 }
 0x1c7   : > { %v1325_v29 = vpop.permute.xlu0 %1324  ;;  %v1331_v30 = vpop.permute.xlu1 %1330  ;;  %v1380_v31 = vsel %vm19736_vm4, %v1372_v27, %v1357_v26 }
 0x1c8   : > { %v1339_v32 = vsel %vm19739_vm2, %v1325_v29, %v1327_v20  ;;  %9596 = vmatprep.subr.msk.mxu0 %vm1395_vm5, %v1380_v31  ;;  %v1341_v41 = vsel %vm19739_vm2, %v1329_v22, %v1331_v30 }
 0x1c9   : > { %v1356_v33 = vrot.slane %v1339_v32, 6  ;;  %v1358_v47 = vrot.slane %v1341_v41, 6  ;;  %v20169_v41 = vmov 0 }
 0x1ca   : > { %v20170_v41 = vsel %vm14553_vm8, 4294967295, %v20169_v41 }
 0x1cb   : > { %v1333_v36 = vpop.permute.xlu0 %1332  ;;  %v1300_v37 = vpop.permute.xlu1 %1299  ;;  %v1379_v38 = vsel %vm19736_vm4, %v1371_v34, %v1356_v33  ;;  %20171 = vst [vmem:[#allocation47_spill] sm:$0xff] %v20170_v41  ;;  %v15552_v41 = vadd.s32 360, %v14391_v1 }
 0x1cc   : > { %v1342_v39 = vsel %vm19739_vm2, %v1331_v30, %v1333_v36  ;;  %9597 = vmatpush1.msk.msra.mxu0 %vm1395_vm5, %v1379_v38  ;;  %v1311_v40 = vsel %vm19737_vm1, %v1298_v23, %v1300_v37 }
 0x1cd   : > { %9598 = vmatmul.mubr.msk.f32.vlgmr.msra.gmra.mrb[0].mxu0 %vm1391_vm6, %v1260_v35  ;;  %v1359_v42 = vrot.slane %v1342_v39, 6  ;;  %v1373_v45 = vsel %vm1370_vm3, %v1311_v40, %v14404_v8  ;;  %20337 = vst [vmem:[#allocation98_spill] sm:$0xff] %v15552_v41 }
 0x1ce   : > { %1552 = vmatprep.mubr.f32.mxu0 %v19781_v10  ;;  %v1381_v52 = vsel %vm19736_vm4, %v1373_v45, %v1358_v47  ;;  %v20172_v45 = vmov 0 }
 0x1cf   : > { %v1302_v43 = vpop.permute.xlu0 %1301  ;;  %v1335_v44 = vpop.permute.xlu1 %1334  ;;  %v20173_v45 = vsel %vm14560_vm10, 4294967295, %v20172_v45 }
 0x1d0   : > { %v1312_v46 = vsel %vm19737_vm1, %v1300_v37, %v1302_v43  ;;  %v1343_v56 = vsel %vm19739_vm2, %v1333_v36, %v1335_v44  ;;  %v1265_v36 = vld [vmem:[%s13998_s29] sm:$0xff]  ;;  %20174 = vst [vmem:[#allocation48_spill] sm:$0xff] %v20173_v45  ;;  %v20339_v45 = vmov 0 }
 0x1d1   : > { %v1374_v48 = vsel %vm1370_vm3, %v1312_v46, %v14413_v11  ;;  %v1360_v2 = vrot.slane %v1343_v56, 6  ;;  %v1263_v37 = vld [vmem:[%s13988_s21] sm:$0xff] }
 0x1d2   : > { %v1382_v49 = vsel %vm19736_vm4, %v1374_v48, %v1359_v42 }
 0x1d3   : > { %v1337_v50 = vpop.permute.xlu0 %1336  ;;  %9599 = vmatprep.subr.msk.mxu0 %vm1395_vm5, %v1382_v49  ;;  %v1304_v51 = vpop.permute.xlu1 %1303 }
 0x1d4   : > { %v1344_v53 = vsel %vm19739_vm2, %v1335_v44, %v1337_v50  ;;  %v1347_v54 = vsel %vm19738_vm7, %v1337_v50, 0.0  ;;  %9600 = vmatpush1.msk.msra.mxu0 %vm1395_vm5, %v1381_v52  ;;  %v1313_v55 = vsel %vm19737_vm1, %v1302_v43, %v1304_v51  ;;  %v14568_v52 = vld [vmem:[#allocation4] sm:$0xff] }
 0x1d5   : > { %9601 = vmatmul.mubr.msk.f32.vlgmr.msra.gmra.mrb[2].mxu0 %vm1391_vm6, %v1260_v35  ;;  %v1361_v57 = vrot.slane %v1344_v53, 6  ;;  %v1362_v58 = vrot.slane %v1347_v54, 6  ;;  %v1375_v61 = vsel %vm1370_vm3, %v1313_v55, %v14420_v13  ;;  %v2487_v55 = vand.u32 127, %v1267_v0 }
 0x1d6   : > { %1623 = vmatprep.mubr.f32.mxu0 %v19781_v10  ;;  %v1383_v12 = vsel %vm19736_vm4, %v1375_v61, %v1360_v2 }
 0x1d7   : > { %v1306_v59 = vpop.permute.xlu0 %1305  ;;  %v1308_v60 = vpop.permute.xlu1 %1307 }
 0x1d8   : > { %v1314_v62 = vsel %vm19737_vm1, %v1304_v51, %v1306_v59  ;;  %v1315_v63 = vsel %vm19737_vm1, %v1306_v59, %v1308_v60 }
 0x1d9   : > { %v1376_v3 = vsel %vm1370_vm3, %v1314_v62, %v14427_v15  ;;  %v1377_v4 = vsel %vm1370_vm3, %v1315_v63, %v14436_v17  ;;  %v2488_v62 = vadd.s32 128, %v2487_v55  ;;  %v2490_v63 = vadd.s32 384, %v2487_v55 }
 0x1da   : > { %v1384_v5 = vsel %vm19736_vm4, %v1376_v3, %v1361_v57  ;;  %v1385_v9 = vsel %vm19736_vm4, %v1377_v4, %v1362_v58  ;;  %v2489_v3 = vadd.s32 256, %v2487_v55 }
 0x1db   : > { %9602 = vmatprep.subr.msk.mxu0 %vm1395_vm5, %v1384_v5  ;;  %11198 = vmatpush3.msk.msra.mxu1 %vm1395_vm5, %v1385_v9 }
 0x1dc   : > { %9603 = vmatpush1.msk.msra.mxu0 %vm1395_vm5, %v1383_v12  ;;  %11200 = vmatmul.mubr.msk.f32.vlgmr.msra.gmra.mrb[0].mxu1 %vm1391_vm6, %v1260_v35  ;;  %v14579_v12 = vadd.s32 8, %v14391_v1 }
 0x1dd   : > { %9604 = vmatmul.mubr.msk.f32.vlgmr.msra.gmra.mrb[4].mxu0 %vm1391_vm6, %v1260_v35  ;;  %9607 = vmatprep.subr.msk.mxu0 %vm1370_vm3, %v14396_v6 }
 0x1de   : > { %9608 = vmatpush1.msk.msra.mxu0 %vm1370_vm3, %v14398_v7  ;;  %1793 = vmatprep.mubr.f32.mxu0 %v19781_v10 }
 0x1df   : > { %9613 = vmatprep.subr.msk.mxu0 %vm1370_vm3, %v14427_v15  ;;  %9610 = vmatprep.subr.msk.mxu1 %vm1370_vm3, %v14413_v11 }
 0x1e0   : > { %9611 = vmatpush1.msk.msra.mxu1 %vm1370_vm3, %v14404_v8  ;;  %1864 = vmatprep.mubr.f32.mxu1 %v19781_v10 }
 0x1e1   : > { %11202 = vmatprep.subr.mxu1 %v19781_v10  ;;  %9609 = vmatmul.mubr.msk.f32.vlgmr.msra.gmra.mrb[6].mxu0 %vm19737_vm1, %v1264_v14 }
 0x1e2   : > { %9612 = vmatmul.mubr.msk.f32.vlgmr.msra.gmra.mrb[2].mxu1 %vm19737_vm1, %v1264_v14  ;;  %9614 = vmatpush1.msk.msra.mxu0 %vm1370_vm3, %v14420_v13 }
 0x1e3   : > { %1935 = vmatprep.mubr.f32.mxu0 %v19781_v10  ;;  %11203 = vmatpush3.msk.msra.mxu1 %vm1370_vm3, %v14436_v17 }
 0x1e4   : > { %11204 = vmatprep.mubr.msk.f32.mxu1 %vm13954_vm0, %v19781_v10 }
 0x1e5   : > { %9615 = vmatmul.mubr.msk.f32.vlgmr.msra.gmra.mrb[8].mxu0 %vm19737_vm1, %v1264_v14 }
 0x1e6   : > { %11205 = vmatmul.mubr.msk.f32.vlgmr.msra.gmra.mrb[4].mxu1 %vm19737_vm1, %v1264_v14  ;;  %2148 = vmatprep.mubr.f32.mxu0 %v19781_v10  ;;  %v14581_v14 = vmul.u32 2, %v2487_v55  ;;  %v20220_v55 = vmov 0 }
 0x1e7   : > { %2219 = vmatprep.mubr.f32.mxu1 %v19781_v10 }
 0x1e8   : > { %v1389_v6 = vpop.permute.xlu0 %1388  ;;  %20175 = vst [vmem:[#allocation49_spill] sm:$0xff] %v14581_v14  ;;  %vm2495_vm12 = vcmp.eq.s32.totalorder %v14391_v1, %v14581_v14  ;;  %vm2499_vm13 = vcmp.eq.s32.totalorder %v14579_v12, %v14581_v14 }
 0x2a0   : > { %v1483_v7 = vpop.f32.mrb[0].mxu0 }
 0x2a1   : > { %v1484_v8 = vadd.f32 %v1483_v7, %v1389_v6  ;;  %v1485_v11 = vpop.f32.mrb[1].mxu0 }
 0x2a2   : > { %v1486_v15 = vadd.f32 %v1485_v11, %v1389_v6 }
 0x2a3   : > { %v1700_v13 = vmax.f32 %v1484_v8, 0.0 }
 0x2a4   : > { %v1701_v16 = vmax.f32 %v1486_v15, 0.0  ;;  %v14588_v15 = vmul.u32 2, %v2490_v63  ;;  %v20232_v63 = vmov 0 }
 0x2a6   : > { %v13321_v18 = vpack.i.bf16 %v1701_v16, %v1700_v13  ;;  %vm2498_vm3 = vcmp.eq.s32.totalorder %v14391_v1, %v14588_v15  ;;  %vm2502_vm5 = vcmp.eq.s32.totalorder %v14579_v12, %v14588_v15 }
 0x2a8   : > { %13322 = vrot.lane.b32.xlu1 %v13321_v18, %s20110_s12  ;;  %v1554_v17 = vpop.f32.mrb[2].mxu0 }
 0x2a9   : > { %v1555_v19 = vadd.f32 %v1554_v17, %v1389_v6  ;;  %v1556_v20 = vpop.f32.mrb[3].mxu0  ;;  %v14592_v17 = vmul.u32 2, %v2489_v3  ;;  %v14978_v3 = vadd.s32 168, %v14391_v1 }
 0x2aa   : > { %v1557_v21 = vadd.f32 %v1556_v20, %v1389_v6  ;;  %v19779_v20 = vmov 0.0|0.0  }
 0x2ab   : > { %v14524_v22 = vmax.f32 %v1555_v19, 0.0  ;;  %vm2497_vm6 = vcmp.eq.s32.totalorder %v14391_v1, %v14592_v17  ;;  %vm2501_vm9 = vcmp.eq.s32.totalorder %v14579_v12, %v14592_v17 }
 0x2ac   : > { %v1703_v23 = vmax.f32 %v1557_v21, 0.0  ;;  %2049 = vrot.lane.b32.xlu1 %v1701_v16, %s20108_s22  ;;  %v14602_v21 = vadd.s32 16, %v14391_v1  ;;  %vm14655_vm7 = vmpackc.low %vm2501_vm9, %vm2497_vm6 }
 0x2ad   : > { %2051 = vrot.lane.b32.xlu0 %v14524_v22, %s20108_s22 }
 0x2ae   : > { %v13326_v24 = vpack.i.bf16 %v1703_v23, %v14524_v22  ;;  %20176 = vst [vmem:[#allocation50_spill] sm:$0xff] %v14602_v21 }
 0x2af   : > { %v1696_v25 = vpop.f32.mrb[0].mxu1 }
 0x2b0   : > { %2047 = vrot.lane.b32.xlu1 %v1700_v13, %s20108_s22  ;;  %v1625_v26 = vpop.f32.mrb[4].mxu0  ;;  %v11201_v27 = vpop.f32.mrb[1].mxu1  ;;  %v1697_v33 = vadd.f32 %v1696_v25, %v1389_v6 }
 0x2b1   : > { %v1626_v28 = vadd.f32 %v1625_v26, %v1389_v6  ;;  %13327 = vrot.lane.b32.xlu0 %v13326_v24, %s20110_s12  ;;  %v1627_v29 = vpop.f32.mrb[5].mxu0  ;;  %v20178_v26 = vmov 0  ;;  %v14632_v27 = vadd.s32 32, %v14391_v1 }
 0x2b2   : > { %v1628_v30 = vadd.f32 %v1627_v29, %v1389_v6  ;;  %v14544_v35 = vmax.f32 %v1697_v33, 0.0  ;;  %v14583_v6 = vmul.u32 2, %v2488_v62  ;;  %v20181_v29 = vmov 0 }
 0x2b3   : > { %v14532_v31 = vmax.f32 %v1626_v28, 0.0  ;;  %v14635_v28 = vadd.s32 40, %v14391_v1  ;;  %v19793_v33 = vmov 1.0|1.0   ;;  %v14940_v62 = vadd.s32 152, %v14391_v1 }
 0x2b4   : > { %v14534_v32 = vmax.f32 %v1628_v30, 0.0  ;;  %2053 = vrot.lane.b32.xlu1 %v1703_v23, %s20108_s22  ;;  %vm2496_vm14 = vcmp.eq.s32.totalorder %v14391_v1, %v14583_v6  ;;  %vm2500_vm15 = vcmp.eq.s32.totalorder %v14579_v12, %v14583_v6  ;;  %vm2512_vm6 = vcmp.eq.s32.totalorder %v14632_v27, %v14583_v6 }
 0x2b5   : > { %2055 = vrot.lane.b32.xlu0 %v14532_v31, %s20108_s22  ;;  %vm14637_vm4 = vmpackc.low %vm2500_vm15, %vm2496_vm14  ;;  %vm2506_vm14 = vcmp.eq.s32.totalorder %v14602_v21, %v14588_v15 }
 0x2b6   : > { %v13331_v34 = vpack.i.bf16 %v14534_v32, %v14532_v31  ;;  %v20182_v29 = vsel %vm14637_vm4, 4294967295, %v20181_v29 }
 0x2b7   : > { %20183 = vst [vmem:[#allocation53_spill] sm:$0xff] %v20182_v29  ;;  %v20331_v29 = vmov 0 }
 0x2b8   : > { %13332 = vrot.lane.b32.xlu1 %v13331_v34, %s20110_s12  ;;  %v20188_v34 = vmov 0 }
 0x2b9   : > { %2057 = vrot.lane.b32.xlu0 %v14534_v32, %s20108_s22 }
 0x2bc   : > { %2059 = vrot.lane.b32.xlu1 %v14544_v35, %s20108_s22 }
 0x2bd   : > { %2031 = vrot.lane.b32.xlu0 %v14544_v35, %s20110_s12 }
 0x2c0   : > { %1709 = vperm.xlu1 %13336, %v1265_v36   ;;  %v14680_v36 = vadd.s32 56, %v14391_v1 }
 0x2c1   : > { %2077 = vperm.xlu0 %13320, %v1263_v37   ;;  %v20194_v37 = vmov 0 }
 0x31a   : > { %v13323_v38 = vpop.permute.xlu1 %13322 }
 0x31b   : > { %v13325_v39 = vunpack.i.h.bf16 %v13323_v38  ;;  %v13324_v40 = vunpack.i.l.bf16 %v13323_v38  ;;  %v20198_v38 = vmov 0 }
 0x31d   : > { %v2033_v42 = vsel %vm19737_vm1, %v13324_v40, %v13325_v39  ;;  %v11516_v46 = vpack.c.bf16 %v1700_v13, %v13324_v40  ;;  %v14744_v40 = vadd.s32 72, %v14391_v1 }
 0x31e   : > { %v2050_v43 = vpop.permute.xlu1 %2049  ;;  %v11514_v44 = vpack.c.bf16 %v1701_v16, %v2033_v42  ;;  %v20201_v42 = vmov 0 }
 0x31f   : > { %v2052_v47 = vpop.permute.xlu0 %2051  ;;  %vm2532_vm8 = vcmp.eq.s32.totalorder %v14744_v40, %v14583_v6 }
 0x320   : > { %11515 = vmatprep.subr.bf16.mxu0 %v11514_v44  ;;  %v2062_v48 = vsel %vm19739_vm2, %v2050_v43, %v2052_v47  ;;  %v14779_v44 = vadd.s32 80, %v14391_v1 }
 0x321   : > { %11518 = vmatpush1.bf16.msk.msra.mxu0 %vm14560_vm10, %v11516_v46  ;;  %v14782_v46 = vadd.s32 88, %v14391_v1 }
 0x322   : > { %v2048_v49 = vpop.permute.xlu1 %2047  ;;  %2088 = vmatprep.subr.mxu0 %v2062_v48  ;;  %v20210_v48 = vmov 0 }
 0x323   : > { %v2061_v50 = vsel %vm19739_vm2, %v2048_v49, %v2050_v43  ;;  %v13328_v51 = vpop.permute.xlu0 %13327  ;;  %v20204_v43 = vmov 0  ;;  %v14820_v49 = vadd.s32 96, %v14391_v1 }
 0x324   : > { %v13330_v53 = vunpack.i.h.bf16 %v13328_v51  ;;  %v13329_v54 = vunpack.i.l.bf16 %v13328_v51  ;;  %v20214_v51 = vmov 0 }
 0x325   : > { %2089 = vmatpush1.msra.mxu0 %v2061_v50  ;;  %20213 = vst [vmem:[#allocation62_spill] sm:$0xff] %v14820_v49  ;;  %v14823_v50 = vadd.s32 104, %v14391_v1 }
 0x326   : > { %v2034_v56 = vsel %vm19737_vm1, %v13325_v39, %v13329_v54  ;;  %v2054_v57 = vpop.permute.xlu1 %2053  ;;  %9620 = vmatmul.mubr.msk.f32.vlgmr.msra.gmra.mrb[6].mxu0 %vm19740_vm11, %v14568_v52  ;;  %v2035_v58 = vsel %vm19737_vm1, %v13329_v54, %v13330_v53  ;;  %v14741_v39 = vadd.s32 64, %v14391_v1  ;;  %v14861_v54 = vadd.s32 120, %v14391_v1 }
 0x327   : > { %v2056_v59 = vpop.permute.xlu0 %2055  ;;  %v11519_v60 = vpack.c.bf16 %v1703_v23, %v2035_v58  ;;  %v11521_v61 = vpack.c.bf16 %v14524_v22, %v2034_v56  ;;  %2290 = vmatprep.mubr.f32.mxu0 %v19781_v10  ;;  %v2063_v8 = vsel %vm19739_vm2, %v2052_v47, %v2054_v57  ;;  %v14605_v22 = vadd.s32 24, %v14391_v1 }
 0x328   : > { %v2064_v0 = vsel %vm19739_vm2, %v2054_v57, %v2056_v59  ;;  %v20207_v47 = vmov 0  ;;  %v20223_v56 = vmov 0  ;;  %v14896_v57 = vadd.s32 128, %v14391_v1 }
 0x329   : > { %11520 = vmatprep.subr.bf16.mxu1 %v11519_v60  ;;  %20177 = vst [vmem:[#allocation51_spill] sm:$0xff] %v14605_v22  ;;  %vm2510_vm15 = vcmp.eq.s32.totalorder %v14605_v22, %v14588_v15  ;;  %vm2509_vm9 = vcmp.eq.s32.totalorder %v14605_v22, %v14592_v17  ;;  %v14899_v58 = vadd.s32 136, %v14391_v1  ;;  %v20229_v60 = vmov 0 }
 0x32a   : > { %v13333_v2 = vpop.permute.xlu1 %13332  ;;  %11522 = vmatpush1.bf16.msra.mxu1 %v11521_v61  ;;  %v14937_v61 = vadd.s32 144, %v14391_v1 }
 0x32b   : > { %v13335_v4 = vunpack.i.h.bf16 %v13333_v2  ;;  %v13334_v5 = vunpack.i.l.bf16 %v13333_v2  ;;  %v2058_v9 = vpop.permute.xlu0 %2057  ;;  %2159 = vmatprep.subr.mxu1 %v2064_v0  ;;  %v20235_v2 = vmov 0  ;;  %v14975_v0 = vadd.s32 160, %v14391_v1 }
 0x32c   : > { %v2065_v30 = vsel %vm19739_vm2, %v2056_v59, %v2058_v9  ;;  %v20226_v59 = vmov 0 }
 0x32d   : > { %v2036_v7 = vsel %vm19737_vm1, %v13330_v53, %v13334_v5  ;;  %v2037_v11 = vsel %vm19737_vm1, %v13334_v5, %v13335_v4  ;;  %v14858_v53 = vadd.s32 112, %v14391_v1  ;;  %v20241_v5 = vmov 0 }
 0x32e   : > { %v2060_v13 = vpop.permute.xlu1 %2059  ;;  %2160 = vmatpush1.msra.mxu1 %v2063_v8  ;;  %v11523_v16 = vpack.c.bf16 %v14534_v32, %v2037_v11  ;;  %v11525_v18 = vpack.c.bf16 %v14532_v31, %v2036_v7  ;;  %v15016_v7 = vadd.s32 184, %v14391_v1  ;;  %v20244_v8 = vmov 0 }
 0x32f   : > { %v2032_v19 = vpop.permute.xlu0 %2031  ;;  %9621 = vmatmul.mubr.msk.f32.vlgmr.msra.gmra.mrb[2].mxu1 %vm19740_vm11, %v14568_v52  ;;  %11527 = vmatprep.subr.bf16.mxu1 %v19779_v20  ;;  %v2066_v25 = vsel %vm19739_vm2, %v2058_v9, %v2060_v13  ;;  %vm19741_vm2 = vcmp.eq.s32.totalorder %v14602_v21, %v14581_v14  ;;  %v15013_v9 = vadd.s32 176, %v14391_v1  ;;  %v20247_v11 = vmov 0 }
 0x330   : > { %v2038_v23 = vsel %vm19737_vm1, %v13335_v4, %v2032_v19  ;;  %11524 = vmatprep.subr.bf16.mxu0 %v11523_v16  ;;  %11213 = vmatprep.mubr.msk.f32.mxu1 %vm13954_vm0, %v19781_v10  ;;  %vm14623_vm0 = vmpackc.low %vm2499_vm13, %vm2495_vm12  ;;  %vm2504_vm12 = vcmp.eq.s32.totalorder %v14602_v21, %v14583_v6  ;;  %vm2508_vm13 = vcmp.eq.s32.totalorder %v14605_v22, %v14583_v6  ;;  %v20238_v4 = vmov 0 }
 0x331   : > { %v11528_v24 = vpack.c.bf16 %v14544_v35, %v2038_v23  ;;  %11526 = vmatpush1.bf16.msra.mxu0 %v11525_v18  ;;  %v20179_v26 = vsel %vm14623_vm0, 4294967295, %v20178_v26  ;;  %vm14647_vm1 = vmpackc.low %vm2502_vm5, %vm2498_vm3  ;;  %v14677_v35 = vadd.s32 48, %v14391_v1  ;;  %vm20192_vm3 = vcmask 515072  }
 0x332   : > { %2230 = vmatprep.subr.mxu0 %v2066_v25  ;;  %20180 = vst [vmem:[#allocation52_spill] sm:$0xff] %v20179_v26  ;;  %vm14668_vm5 = vmpackc.low %vm2508_vm13, %vm2504_vm12  ;;  %vm2505_vm13 = vcmp.eq.s32.totalorder %v14602_v21, %v14592_v17  ;;  %v15054_v16 = vadd.s32 200, %v14391_v1  ;;  %v20250_v18 = vmov 0  ;;  %v20253_v19 = vmov 0 }
 0x333   : > { %11529 = vmatpush3.bf16.msra.mxu1 %v11528_v24  ;;  %v20189_v34 = vsel %vm14668_vm5, 4294967295, %v20188_v34  ;;  %20191 = vst [vmem:[#allocation55_spill] sm:$0xff] %v14677_v35  ;;  %vm11742_vm12 = vmpackc.low %vm2510_vm15, %vm2506_vm14  ;;  %vm2514_vm15 = vcmp.eq.s32.totalorder %v14632_v27, %v14588_v15  ;;  %v15089_v23 = vadd.s32 208, %v14391_v1  ;;  %v15092_v24 = vadd.s32 216, %v14391_v1 }
 0x334   : > { %11211 = vmatprep.subr.mxu1 %v19781_v10  ;;  %20190 = vst [vmem:[#allocation54_spill] sm:$0xff] %v20189_v34  ;;  %v20256_v25 = vmov 0  ;;  %v15127_v31 = vadd.s32 224, %v14391_v1  ;;  %v15130_v32 = vadd.s32 232, %v14391_v1  ;;  %v20262_v20 = vmov 0 }
 0x335   : > { %2231 = vmatpush1.msra.mxu0 %v2065_v30  ;;  %v20259_v30 = vmov 0  ;;  %v20265_v10 = vmov 0  ;;  %v20348_v26 = vmov 0 }
 0x336   : > { %9622 = vmatmul.mubr.msk.f32.vlgmr.msra.gmra.mrb[8].mxu0 %vm19740_vm11, %v14568_v52  ;;  %11531 = vmatprep.subr.msk.bf16.mxu0 %vm14637_vm4, %v19793_v33  ;;  %vm2524_vm4 = vcmp.eq.s32.totalorder %v14680_v36, %v14583_v6 }
 0x337   : > { %11212 = vmatpush3.msk.msra.mxu1 %vm20192_vm3, %v2060_v13  ;;  %11533 = vmatpush1.bf16.msk.msra.mxu0 %vm14623_vm0, %v19793_v33  ;;  %vm20193_vm3 = vcmp.eq.s32.totalorder %v14605_v22, %v14581_v14  ;;  %vm11744_vm0 = vmpackc.low %vm2509_vm9, %vm2505_vm13  ;;  %vm2513_vm9 = vcmp.eq.s32.totalorder %v14632_v27, %v14592_v17  ;;  %v15051_v13 = vadd.s32 192, %v14391_v1 }
 0x338   : > { %11214 = vmatmul.mubr.msk.f32.vlgmr.msra.gmra.mrb[4].mxu1 %vm19740_vm11, %v14568_v52  ;;  %11739 = vmatprep.subr.msk.bf16.mxu1 %vm14647_vm1, %v19793_v33  ;;  %vm14707_vm14 = vmpackc.low %vm20193_vm3, %vm19741_vm2  ;;  %vm2518_vm11 = vcmp.eq.s32.totalorder %v14635_v28, %v14588_v15  ;;  %vm20197_vm1 = vcmp.eq.s32.totalorder %v14635_v28, %v14583_v6  ;;  %vm2511_vm2 = vcmp.eq.s32.totalorder %v14632_v27, %v14581_v14  ;;  %v20217_v52 = vmov 0 }
 0x339   : > { %v20195_v37 = vsel %vm14707_vm14, 4294967295, %v20194_v37  ;;  %11741 = vmatpush1.bf16.msk.msra.mxu1 %vm14655_vm7, %v19793_v33  ;;  %11535 = vmatprep.subr.msk.bf16.mxu0 %vm14668_vm5, %v19793_v33  ;;  %vm14727_vm3 = vmpackc.low %vm20197_vm1, %vm2512_vm6  ;;  %vm2515_vm7 = vcmp.eq.s32.totalorder %v14635_v28, %v14581_v14  ;;  %vm2520_vm5 = vcmp.eq.s32.totalorder %v14677_v35, %v14583_v6  ;;  %vm2522_vm1 = vcmp.eq.s32.totalorder %v14677_v35, %v14588_v15 }
 0x33a   : > { %20196 = vst [vmem:[#allocation56_spill] sm:$0xff] %v20195_v37  ;;  %v20199_v38 = vsel %vm14727_vm3, 4294967295, %v20198_v38  ;;  %11743 = vmatprep.subr.msk.bf16.mxu1 %vm11742_vm12, %v19793_v33  ;;  %vm11746_vm6 = vmpackc.low %vm2518_vm11, %vm2514_vm15  ;;  %vm2517_vm12 = vcmp.eq.s32.totalorder %v14635_v28, %v14592_v17  ;;  %vm2526_vm11 = vcmp.eq.s32.totalorder %v14680_v36, %v14588_v15  ;;  %v20325_v37 = vmov 0 }
 0x33b   : > { %20200 = vst [vmem:[#allocation57_spill] sm:$0xff] %v20199_v38  ;;  %11537 = vmatpush1.bf16.msk.msra.mxu0 %vm14707_vm14, %v19793_v33  ;;  %vm14756_vm13 = vmpackc.low %vm2515_vm7, %vm2511_vm2  ;;  %vm19750_vm14 = vcmp.eq.s32.totalorder %v14677_v35, %v14581_v14  ;;  %vm2523_vm2 = vcmp.eq.s32.totalorder %v14680_v36, %v14581_v14 }
 0x33c   : > { %11539 = vmatprep.subr.msk.bf16.mxu0 %vm14727_vm3, %v19793_v33  ;;  %v20202_v42 = vsel %vm14756_vm13, 4294967295, %v20201_v42  ;;  %vm14765_vm15 = vmpackc.low %vm2524_vm4, %vm2520_vm5  ;;  %vm2528_vm3 = vcmp.eq.s32.totalorder %v14741_v39, %v14583_v6  ;;  %vm2525_vm5 = vcmp.eq.s32.totalorder %v14680_v36, %v14592_v17 }
 0x33d   : > { %20203 = vst [vmem:[#allocation58_spill] sm:$0xff] %v20202_v42  ;;  %11745 = vmatpush1.bf16.msk.msra.mxu1 %vm11744_vm0, %v19793_v33  ;;  %v20205_v43 = vsel %vm14765_vm15, 4294967295, %v20204_v43  ;;  %vm11748_vm7 = vmpackc.low %vm2517_vm12, %vm2513_vm9  ;;  %vm2521_vm0 = vcmp.eq.s32.totalorder %v14677_v35, %v14592_v17  ;;  %vm2530_vm9 = vcmp.eq.s32.totalorder %v14741_v39, %v14588_v15  ;;  %vm2534_vm12 = vcmp.eq.s32.totalorder %v14744_v40, %v14588_v15 }
 0x33e   : > { %20206 = vst [vmem:[#allocation59_spill] sm:$0xff] %v20205_v43  ;;  %11747 = vmatprep.subr.msk.bf16.mxu1 %vm11746_vm6, %v19793_v33  ;;  %vm11750_vm4 = vmpackc.low %vm2526_vm11, %vm2522_vm1  ;;  %vm2527_vm11 = vcmp.eq.s32.totalorder %v14741_v39, %v14581_v14  ;;  %v15414_v43 = vadd.s32 328, %v14391_v1  ;;  %v20310_v42 = vmov 0 }
 0x33f   : > { %11541 = vmatpush1.bf16.msk.msra.mxu0 %vm14756_vm13, %v19793_v33  ;;  %vm14797_vm6 = vmpackc.low %vm2523_vm2, %vm19750_vm14  ;;  %vm2531_vm2 = vcmp.eq.s32.totalorder %v14744_v40, %v14581_v14  ;;  %vm2540_vm13 = vcmp.eq.s32.totalorder %v14782_v46, %v14583_v6 }
 0x340   : > { %11543 = vmatprep.subr.msk.bf16.mxu0 %vm14765_vm15, %v19793_v33  ;;  %v20208_v47 = vsel %vm14797_vm6, 4294967295, %v20207_v47  ;;  %vm14806_vm1 = vmpackc.low %vm2532_vm8, %vm2528_vm3  ;;  %vm2536_vm15 = vcmp.eq.s32.totalorder %v14779_v44, %v14583_v6  ;;  %vm2529_vm3 = vcmp.eq.s32.totalorder %v14741_v39, %v14592_v17 }
 0x341   : > { %20209 = vst [vmem:[#allocation60_spill] sm:$0xff] %v20208_v47  ;;  %11749 = vmatpush1.bf16.msk.msra.mxu1 %vm11748_vm7, %v19793_v33  ;;  %v20211_v48 = vsel %vm14806_vm1, 4294967295, %v20210_v48  ;;  %vm11752_vm14 = vmpackc.low %vm2525_vm5, %vm2521_vm0  ;;  %vm2533_vm7 = vcmp.eq.s32.totalorder %v14744_v40, %v14592_v17  ;;  %vm2538_vm0 = vcmp.eq.s32.totalorder %v14779_v44, %v14588_v15  ;;  %vm2542_vm5 = vcmp.eq.s32.totalorder %v14782_v46, %v14588_v15 }
 0x342   : > { %20212 = vst [vmem:[#allocation61_spill] sm:$0xff] %v20211_v48  ;;  %11751 = vmatprep.subr.msk.bf16.mxu1 %vm11750_vm4, %v19793_v33  ;;  %vm11754_vm8 = vmpackc.low %vm2534_vm12, %vm2530_vm9  ;;  %vm2535_vm12 = vcmp.eq.s32.totalorder %v14779_v44, %v14581_v14  ;;  %v15411_v47 = vadd.s32 320, %v14391_v1  ;;  %v20318_v48 = vmov 0 }
 0x343   : > { %11545 = vmatpush1.bf16.msk.msra.mxu0 %vm14797_vm6, %v19793_v33  ;;  %vm14835_vm4 = vmpackc.low %vm2531_vm2, %vm2527_vm11  ;;  %vm2539_vm11 = vcmp.eq.s32.totalorder %v14782_v46, %v14581_v14  ;;  %vm2548_vm6 = vcmp.eq.s32.totalorder %v14823_v50, %v14583_v6 }
 0x344   : > { %11547 = vmatprep.subr.msk.bf16.mxu0 %vm14806_vm1, %v19793_v33  ;;  %v20215_v51 = vsel %vm14835_vm4, 4294967295, %v20214_v51  ;;  %vm14844_vm9 = vmpackc.low %vm2540_vm13, %vm2536_vm15  ;;  %vm2544_vm1 = vcmp.eq.s32.totalorder %v14820_v49, %v14583_v6  ;;  %vm2537_vm13 = vcmp.eq.s32.totalorder %v14779_v44, %v14592_v17  ;;  %vm2541_vm15 = vcmp.eq.s32.totalorder %v14782_v46, %v14592_v17 }
 0x345   : > { %20216 = vst [vmem:[#allocation63_spill] sm:$0xff] %v20215_v51  ;;  %11753 = vmatpush1.bf16.msk.msra.mxu1 %vm11752_vm14, %v19793_v33  ;;  %v20218_v52 = vsel %vm14844_vm9, 4294967295, %v20217_v52  ;;  %vm11756_vm2 = vmpackc.low %vm2533_vm7, %vm2529_vm3  ;;  %vm2546_vm3 = vcmp.eq.s32.totalorder %v14820_v49, %v14588_v15  ;;  %vm2550_vm7 = vcmp.eq.s32.totalorder %v14823_v50, %v14588_v15  ;;  %v20298_v51 = vmov 0 }
 0x346   : > { %20219 = vst [vmem:[#allocation64_spill] sm:$0xff] %v20218_v52  ;;  %11755 = vmatprep.subr.msk.bf16.mxu1 %vm11754_vm8, %v19793_v33  ;;  %vm11758_vm14 = vmpackc.low %vm2542_vm5, %vm2538_vm0  ;;  %vm19760_vm5 = vcmp.eq.s32.totalorder %v14820_v49, %v14581_v14  ;;  %v15342_v52 = vadd.s32 312, %v14391_v1 }
 0x347   : > { %11549 = vmatpush1.bf16.msk.msra.mxu0 %vm14835_vm4, %v19793_v33  ;;  %vm14873_vm8 = vmpackc.low %vm2539_vm11, %vm2535_vm12  ;;  %vm2547_vm12 = vcmp.eq.s32.totalorder %v14823_v50, %v14581_v14  ;;  %vm2556_vm4 = vcmp.eq.s32.totalorder %v14861_v54, %v14583_v6 }
 0x348   : > { %11551 = vmatprep.subr.msk.bf16.mxu0 %vm14844_vm9, %v19793_v33  ;;  %v20221_v55 = vsel %vm14873_vm8, 4294967295, %v20220_v55  ;;  %vm14882_vm0 = vmpackc.low %vm2548_vm6, %vm2544_vm1  ;;  %vm2552_vm9 = vcmp.eq.s32.totalorder %v14858_v53, %v14583_v6  ;;  %vm2545_vm1 = vcmp.eq.s32.totalorder %v14820_v49, %v14592_v17  ;;  %20297 = vst [vmem:[#allocation89_spill] sm:$0xff] %v15342_v52 }
 0x349   : > { %20222 = vst [vmem:[#allocation65_spill] sm:$0xff] %v20221_v55  ;;  %11757 = vmatpush1.bf16.msk.msra.mxu1 %vm11756_vm2, %v19793_v33  ;;  %v20224_v56 = vsel %vm14882_vm0, 4294967295, %v20223_v56  ;;  %vm11760_vm11 = vmpackc.low %vm2541_vm15, %vm2537_vm13  ;;  %vm2549_vm2 = vcmp.eq.s32.totalorder %v14823_v50, %v14592_v17  ;;  %vm2554_vm13 = vcmp.eq.s32.totalorder %v14858_v53, %v14588_v15  ;;  %vm2558_vm15 = vcmp.eq.s32.totalorder %v14861_v54, %v14588_v15 }
 0x34a   : > { %20225 = vst [vmem:[#allocation66_spill] sm:$0xff] %v20224_v56  ;;  %11759 = vmatprep.subr.msk.bf16.mxu1 %vm11758_vm14, %v19793_v33  ;;  %vm11762_vm6 = vmpackc.low %vm2550_vm7, %vm2546_vm3  ;;  %vm2551_vm7 = vcmp.eq.s32.totalorder %v14858_v53, %v14581_v14  ;;  %v20292_v55 = vmov 0 }
 0x34b   : > { %11553 = vmatpush1.bf16.msk.msra.mxu0 %vm14873_vm8, %v19793_v33  ;;  %vm14914_vm14 = vmpackc.low %vm2547_vm12, %vm19760_vm5  ;;  %vm2555_vm12 = vcmp.eq.s32.totalorder %v14861_v54, %v14581_v14  ;;  %vm2564_vm8 = vcmp.eq.s32.totalorder %v14899_v58, %v14583_v6 }
 0x34c   : > { %11555 = vmatprep.subr.msk.bf16.mxu0 %vm14882_vm0, %v19793_v33  ;;  %v20227_v59 = vsel %vm14914_vm14, 4294967295, %v20226_v59  ;;  %vm14923_vm3 = vmpackc.low %vm2556_vm4, %vm2552_vm9  ;;  %vm2560_vm0 = vcmp.eq.s32.totalorder %v14896_v57, %v14583_v6  ;;  %vm2553_vm9 = vcmp.eq.s32.totalorder %v14858_v53, %v14592_v17 }
 0x34d   : > { %20228 = vst [vmem:[#allocation67_spill] sm:$0xff] %v20227_v59  ;;  %11761 = vmatpush1.bf16.msk.msra.mxu1 %vm11760_vm11, %v19793_v33  ;;  %v20230_v60 = vsel %vm14923_vm3, 4294967295, %v20229_v60  ;;  %vm11764_vm5 = vmpackc.low %vm2549_vm2, %vm2545_vm1  ;;  %vm2557_vm11 = vcmp.eq.s32.totalorder %v14861_v54, %v14592_v17  ;;  %vm2562_vm1 = vcmp.eq.s32.totalorder %v14896_v57, %v14588_v15  ;;  %vm2566_vm2 = vcmp.eq.s32.totalorder %v14899_v58, %v14588_v15 }
 0x34e   : > { %20231 = vst [vmem:[#allocation68_spill] sm:$0xff] %v20230_v60  ;;  %11763 = vmatprep.subr.msk.bf16.mxu1 %vm11762_vm6, %v19793_v33  ;;  %vm11766_vm4 = vmpackc.low %vm2558_vm15, %vm2554_vm13  ;;  %vm2559_vm15 = vcmp.eq.s32.totalorder %v14896_v57, %v14581_v14  ;;  %v20287_v60 = vmov 0  ;;  %v20304_v59 = vmov 0 }
 0x34f   : > { %11557 = vmatpush1.bf16.msk.msra.mxu0 %vm14914_vm14, %v19793_v33  ;;  %vm14952_vm6 = vmpackc.low %vm2555_vm12, %vm2551_vm7  ;;  %vm2563_vm7 = vcmp.eq.s32.totalorder %v14899_v58, %v14581_v14  ;;  %vm2572_vm14 = vcmp.eq.s32.totalorder %v14940_v62, %v14583_v6 }
 0x350   : > { %11559 = vmatprep.subr.msk.bf16.mxu0 %vm14923_vm3, %v19793_v33  ;;  %v20233_v63 = vsel %vm14952_vm6, 4294967295, %v20232_v63  ;;  %vm14961_vm13 = vmpackc.low %vm2564_vm8, %vm2560_vm0  ;;  %vm2568_vm3 = vcmp.eq.s32.totalorder %v14937_v61, %v14583_v6  ;;  %vm2561_vm0 = vcmp.eq.s32.totalorder %v14896_v57, %v14592_v17 }
 0x351   : > { %20234 = vst [vmem:[#allocation69_spill] sm:$0xff] %v20233_v63  ;;  %11765 = vmatpush1.bf16.msk.msra.mxu1 %vm11764_vm5, %v19793_v33  ;;  %v20236_v2 = vsel %vm14961_vm13, 4294967295, %v20235_v2  ;;  %vm11768_vm12 = vmpackc.low %vm2557_vm11, %vm2553_vm9  ;;  %vm2565_vm5 = vcmp.eq.s32.totalorder %v14899_v58, %v14592_v17  ;;  %vm2570_vm9 = vcmp.eq.s32.totalorder %v14937_v61, %v14588_v15  ;;  %vm2574_vm11 = vcmp.eq.s32.totalorder %v14940_v62, %v14588_v15 }
 0x352   : > { %20237 = vst [vmem:[#allocation70_spill] sm:$0xff] %v20236_v2  ;;  %11767 = vmatprep.subr.msk.bf16.mxu1 %vm11766_vm4, %v19793_v33  ;;  %vm11770_vm8 = vmpackc.low %vm2566_vm2, %vm2562_vm1  ;;  %vm2567_vm2 = vcmp.eq.s32.totalorder %v14937_v61, %v14581_v14 }
 0x353   : > { %11561 = vmatpush1.bf16.msk.msra.mxu0 %vm14952_vm6, %v19793_v33  ;;  %vm14990_vm4 = vmpackc.low %vm2563_vm7, %vm2559_vm15  ;;  %vm2571_vm15 = vcmp.eq.s32.totalorder %v14940_v62, %v14581_v14  ;;  %vm2580_vm6 = vcmp.eq.s32.totalorder %v14978_v3, %v14583_v6 }
 0x354   : > { %11563 = vmatprep.subr.msk.bf16.mxu0 %vm14961_vm13, %v19793_v33  ;;  %v20239_v4 = vsel %vm14990_vm4, 4294967295, %v20238_v4  ;;  %vm14999_vm1 = vmpackc.low %vm2572_vm14, %vm2568_vm3  ;;  %vm2576_vm13 = vcmp.eq.s32.totalorder %v14975_v0, %v14583_v6  ;;  %vm2569_vm3 = vcmp.eq.s32.totalorder %v14937_v61, %v14592_v17 }
 0x355   : > { %20240 = vst [vmem:[#allocation71_spill] sm:$0xff] %v20239_v4  ;;  %11769 = vmatpush1.bf16.msk.msra.mxu1 %vm11768_vm12, %v19793_v33  ;;  %v20242_v5 = vsel %vm14999_vm1, 4294967295, %v20241_v5  ;;  %vm11772_vm7 = vmpackc.low %vm2565_vm5, %vm2561_vm0  ;;  %vm2573_vm12 = vcmp.eq.s32.totalorder %v14940_v62, %v14592_v17  ;;  %vm2578_vm0 = vcmp.eq.s32.totalorder %v14975_v0, %v14588_v15  ;;  %vm2582_vm5 = vcmp.eq.s32.totalorder %v14978_v3, %v14588_v15 }
 0x356   : > { %20243 = vst [vmem:[#allocation72_spill] sm:$0xff] %v20242_v5  ;;  %11771 = vmatprep.subr.msk.bf16.mxu1 %vm11770_vm8, %v19793_v33  ;;  %vm11774_vm14 = vmpackc.low %vm2574_vm11, %vm2570_vm9  ;;  %vm2575_vm11 = vcmp.eq.s32.totalorder %v14975_v0, %v14581_v14  ;;  %v15276_v5 = vadd.s32 280, %v14391_v1 }
 0x357   : > { %11565 = vmatpush1.bf16.msk.msra.mxu0 %vm14990_vm4, %v19793_v33  ;;  %vm15028_vm8 = vmpackc.low %vm2571_vm15, %vm2567_vm2  ;;  %vm2579_vm2 = vcmp.eq.s32.totalorder %v14978_v3, %v14581_v14  ;;  %vm2588_vm4 = vcmp.eq.s32.totalorder %v15016_v7, %v14583_v6 }
 0x358   : > { %11567 = vmatprep.subr.msk.bf16.mxu0 %vm14999_vm1, %v19793_v33  ;;  %v20245_v8 = vsel %vm15028_vm8, 4294967295, %v20244_v8  ;;  %vm15037_vm9 = vmpackc.low %vm2580_vm6, %vm2576_vm13  ;;  %vm2584_vm1 = vcmp.eq.s32.totalorder %v15013_v9, %v14583_v6  ;;  %vm2577_vm13 = vcmp.eq.s32.totalorder %v14975_v0, %v14592_v17 }
 0x359   : > { %20246 = vst [vmem:[#allocation73_spill] sm:$0xff] %v20245_v8  ;;  %11773 = vmatpush1.bf16.msk.msra.mxu1 %vm11772_vm7, %v19793_v33  ;;  %v20248_v11 = vsel %vm15037_vm9, 4294967295, %v20247_v11  ;;  %vm11776_vm15 = vmpackc.low %vm2573_vm12, %vm2569_vm3  ;;  %vm2581_vm7 = vcmp.eq.s32.totalorder %v14978_v3, %v14592_v17  ;;  %vm2586_vm3 = vcmp.eq.s32.totalorder %v15013_v9, %v14588_v15  ;;  %vm2590_vm12 = vcmp.eq.s32.totalorder %v15016_v7, %v14588_v15 }
 0x35a   : > { %20249 = vst [vmem:[#allocation74_spill] sm:$0xff] %v20248_v11  ;;  %11775 = vmatprep.subr.msk.bf16.mxu1 %vm11774_vm14, %v19793_v33  ;;  %vm11778_vm6 = vmpackc.low %vm2582_vm5, %vm2578_vm0  ;;  %vm2583_vm5 = vcmp.eq.s32.totalorder %v15013_v9, %v14581_v14  ;;  %v1710_v11 = vpop.permute.xlu1 %1709  ;;  %v15273_v8 = vadd.s32 272, %v14391_v1 }
 0x35b   : > { %11569 = vmatpush1.bf16.msk.msra.mxu0 %vm15028_vm8, %v19793_v33  ;;  %vm15066_vm14 = vmpackc.low %vm2579_vm2, %vm2575_vm11  ;;  %vm2587_vm11 = vcmp.eq.s32.totalorder %v15016_v7, %v14581_v14  ;;  %vm2596_vm8 = vcmp.eq.s32.totalorder %v15054_v16, %v14583_v6 }
 0x35c   : > { %11571 = vmatprep.subr.msk.bf16.mxu0 %vm15037_vm9, %v19793_v33  ;;  %v20251_v18 = vsel %vm15066_vm14, 4294967295, %v20250_v18  ;;  %vm15075_vm0 = vmpackc.low %vm2588_vm4, %vm2584_vm1  ;;  %vm2592_vm9 = vcmp.eq.s32.totalorder %v15051_v13, %v14583_v6  ;;  %vm2585_vm1 = vcmp.eq.s32.totalorder %v15013_v9, %v14592_v17 }
 0x35d   : > { %20252 = vst [vmem:[#allocation75_spill] sm:$0xff] %v20251_v18  ;;  %11777 = vmatpush1.bf16.msk.msra.mxu1 %vm11776_vm15, %v19793_v33  ;;  %v20254_v19 = vsel %vm15075_vm0, 4294967295, %v20253_v19  ;;  %vm11780_vm2 = vmpackc.low %vm2581_vm7, %vm2577_vm13  ;;  %vm2589_vm15 = vcmp.eq.s32.totalorder %v15016_v7, %v14592_v17  ;;  %vm2594_vm13 = vcmp.eq.s32.totalorder %v15051_v13, %v14588_v15  ;;  %vm2598_vm7 = vcmp.eq.s32.totalorder %v15054_v16, %v14588_v15 }
 0x35e   : > { %20255 = vst [vmem:[#allocation76_spill] sm:$0xff] %v20254_v19  ;;  %11779 = vmatprep.subr.msk.bf16.mxu1 %vm11778_vm6, %v19793_v33  ;;  %vm11782_vm4 = vmpackc.low %vm2590_vm12, %vm2586_vm3  ;;  %vm2591_vm12 = vcmp.eq.s32.totalorder %v15051_v13, %v14581_v14  ;;  %v15245_v19 = vadd.s32 264, %v14391_v1  ;;  %v20281_v18 = vmov 0 }
 0x35f   : > { %11573 = vmatpush1.bf16.msk.msra.mxu0 %vm15066_vm14, %v19793_v33  ;;  %vm15104_vm6 = vmpackc.low %vm2587_vm11, %vm2583_vm5  ;;  %vm2595_vm5 = vcmp.eq.s32.totalorder %v15054_v16, %v14581_v14  ;;  %vm2604_vm14 = vcmp.eq.s32.totalorder %v15092_v24, %v14583_v6 }
 0x360   : > { %11575 = vmatprep.subr.msk.bf16.mxu0 %vm15075_vm0, %v19793_v33  ;;  %v20257_v25 = vsel %vm15104_vm6, 4294967295, %v20256_v25  ;;  %vm15113_vm3 = vmpackc.low %vm2596_vm8, %vm2592_vm9  ;;  %vm2600_vm0 = vcmp.eq.s32.totalorder %v15089_v23, %v14583_v6  ;;  %vm2593_vm9 = vcmp.eq.s32.totalorder %v15051_v13, %v14592_v17 }
 0x361   : > { %20258 = vst [vmem:[#allocation77_spill] sm:$0xff] %v20257_v25  ;;  %11781 = vmatpush1.bf16.msk.msra.mxu1 %vm11780_vm2, %v19793_v33  ;;  %v20260_v30 = vsel %vm15113_vm3, 4294967295, %v20259_v30  ;;  %vm11784_vm11 = vmpackc.low %vm2589_vm15, %vm2585_vm1  ;;  %vm2597_vm2 = vcmp.eq.s32.totalorder %v15054_v16, %v14592_v17  ;;  %vm2602_vm1 = vcmp.eq.s32.totalorder %v15089_v23, %v14588_v15  ;;  %vm2606_vm15 = vcmp.eq.s32.totalorder %v15092_v24, %v14588_v15 }
 0x362   : > { %20261 = vst [vmem:[#allocation78_spill] sm:$0xff] %v20260_v30  ;;  %11783 = vmatprep.subr.msk.bf16.mxu1 %vm11782_vm4, %v19793_v33  ;;  %vm11786_vm8 = vmpackc.low %vm2598_vm7, %vm2594_vm13  ;;  %vm2599_vm7 = vcmp.eq.s32.totalorder %v15089_v23, %v14581_v14  ;;  %v20268_v30 = vmov 0  ;;  %v15242_v25 = vadd.s32 256, %v14391_v1 }
 0x363   : > { %11577 = vmatpush1.bf16.msk.msra.mxu0 %vm15104_vm6, %v19793_v33  ;;  %vm15142_vm4 = vmpackc.low %vm2595_vm5, %vm2591_vm12  ;;  %vm2603_vm12 = vcmp.eq.s32.totalorder %v15092_v24, %v14581_v14  ;;  %vm2612_vm6 = vcmp.eq.s32.totalorder %v15130_v32, %v14583_v6 }
 0x364   : > { %11579 = vmatprep.subr.msk.bf16.mxu0 %vm15113_vm3, %v19793_v33  ;;  %v20263_v20 = vsel %vm15142_vm4, 4294967295, %v20262_v20  ;;  %vm15151_vm13 = vmpackc.low %vm2604_vm14, %vm2600_vm0  ;;  %vm2608_vm3 = vcmp.eq.s32.totalorder %v15127_v31, %v14583_v6  ;;  %vm2601_vm0 = vcmp.eq.s32.totalorder %v15089_v23, %v14592_v17 }
 0x365   : > { %20264 = vst [vmem:[#allocation79_spill] sm:$0xff] %v20263_v20  ;;  %11785 = vmatpush1.bf16.msk.msra.mxu1 %vm11784_vm11, %v19793_v33  ;;  %v20266_v10 = vsel %vm15151_vm13, 4294967295, %v20265_v10  ;;  %vm11788_vm5 = vmpackc.low %vm2597_vm2, %vm2593_vm9  ;;  %vm2605_vm11 = vcmp.eq.s32.totalorder %v15092_v24, %v14592_v17  ;;  %vm2610_vm9 = vcmp.eq.s32.totalorder %v15127_v31, %v14588_v15  ;;  %vm2614_vm2 = vcmp.eq.s32.totalorder %v15130_v32, %v14588_v15 }
 0x366   : > { %20267 = vst [vmem:[#allocation80_spill] sm:$0xff] %v20266_v10  ;;  %11787 = vmatprep.subr.msk.bf16.mxu1 %vm11786_vm8, %v19793_v33  ;;  %vm11790_vm14 = vmpackc.low %vm2606_vm15, %vm2602_vm1  ;;  %v20271_v20 = vmov 0  ;;  %vm2607_vm15 = vcmp.eq.s32.totalorder %v15127_v31, %v14581_v14  ;;  %v20274_v10 = vmov 0 }
 0x367   : > { %11581 = vmatpush1.bf16.msk.msra.mxu0 %vm15142_vm4, %v19793_v33  ;;  %vm15174_vm8 = vmpackc.low %vm2603_vm12, %vm2599_vm7  ;;  %vm2611_vm7 = vcmp.eq.s32.totalorder %v15130_v32, %v14581_v14 }
 0x368   : > { %11583 = vmatprep.subr.msk.bf16.mxu0 %vm15151_vm13, %v19793_v33  ;;  %v20269_v30 = vsel %vm15174_vm8, 4294967295, %v20268_v30  ;;  %vm15183_vm1 = vmpackc.low %vm2612_vm6, %vm2608_vm3  ;;  %vm2609_vm6 = vcmp.eq.s32.totalorder %v15127_v31, %v14592_v17  ;;  %vm2613_vm3 = vcmp.eq.s32.totalorder %v15130_v32, %v14592_v17 }
 0x369   : > { %20270 = vst [vmem:[#allocation81_spill] sm:$0xff] %v20269_v30  ;;  %11789 = vmatpush1.bf16.msk.msra.mxu1 %vm11788_vm5, %v19793_v33  ;;  %v20272_v20 = vsel %vm15183_vm1, 4294967295, %v20271_v20  ;;  %vm11792_vm12 = vmpackc.low %vm2605_vm11, %vm2601_vm0  ;;  %v15213_v30 = vadd.s32 240, %v14391_v1 }
 0x36a   : > { %20273 = vst [vmem:[#allocation82_spill] sm:$0xff] %v20272_v20  ;;  %11791 = vmatprep.subr.msk.bf16.mxu1 %vm11790_vm14, %v19793_v33  ;;  %vm11794_vm13 = vmpackc.low %vm2614_vm2, %vm2610_vm9  ;;  %v15216_v20 = vadd.s32 248, %v14391_v1 }
 0x36b   : > { %11585 = vmatpush1.bf16.msk.msra.mxu0 %vm15174_vm8, %v19793_v33  ;;  %vm15202_vm5 = vmpackc.low %vm2611_vm7, %vm2607_vm15  ;;  %vm2616_vm0 = vcmp.eq.s32.totalorder %v15213_v30, %v14583_v6  ;;  %vm2615_vm15 = vcmp.eq.s32.totalorder %v15213_v30, %v14581_v14 }
 0x36c   : > { %11587 = vmatprep.subr.msk.bf16.mxu0 %vm15183_vm1, %v19793_v33  ;;  %v20275_v10 = vsel %vm15202_vm5, 4294967295, %v20274_v10  ;;  %vm11796_vm14 = vmpackc.low %vm2613_vm3, %vm2609_vm6  ;;  %vm2620_vm11 = vcmp.eq.s32.totalorder %v15216_v20, %v14583_v6  ;;  %vm2622_vm9 = vcmp.eq.s32.totalorder %v15216_v20, %v14588_v15  ;;  %vm2619_vm7 = vcmp.eq.s32.totalorder %v15216_v20, %v14581_v14 }
 0x36d   : > { %20276 = vst [vmem:[#allocation83_spill] sm:$0xff] %v20275_v10  ;;  %11793 = vmatpush1.bf16.msk.msra.mxu1 %vm11792_vm12, %v19793_v33  ;;  %vm15226_vm2 = vmpackc.low %vm2620_vm11, %vm2616_vm0  ;;  %vm2617_vm12 = vcmp.eq.s32.totalorder %v15213_v30, %v14592_v17  ;;  %vm2621_vm6 = vcmp.eq.s32.totalorder %v15216_v20, %v14592_v17  ;;  %v20280_v10 = vmov 1.0|1.0   ;;  %vm2624_vm11 = vcmp.eq.s32.totalorder %v15242_v25, %v14583_v6 }
 0x36e   : > { %11795 = vmatprep.subr.msk.bf16.mxu1 %vm11794_vm13, %v19793_v33  ;;  %vm2618_vm13 = vcmp.eq.s32.totalorder %v15213_v30, %v14588_v15  ;;  %vm11800_vm0 = vmpackc.low %vm2621_vm6, %vm2617_vm12  ;;  %vm2623_vm6 = vcmp.eq.s32.totalorder %v15242_v25, %v14581_v14 }
 0x36f   : > { %11589 = vmatpush1.bf16.msk.msra.mxu0 %vm15202_vm5, %v19793_v33  ;;  %vm11798_vm3 = vmpackc.low %vm2622_vm9, %vm2618_vm13  ;;  %vm2628_vm13 = vcmp.eq.s32.totalorder %v15245_v19, %v14583_v6  ;;  %vm2626_vm9 = vcmp.eq.s32.totalorder %v15242_v25, %v14588_v15  ;;  %vm2633_vm5 = vcmp.eq.s32.totalorder %v15273_v8, %v14592_v17 }
 0x370   : > { %11591 = vmatprep.subr.msk.bf16.mxu0 %vm15226_vm2, %v20280_v10 }
 0x371   : > { %11797 = vmatpush1.bf16.msk.msra.mxu1 %vm11796_vm14, %v19793_v33  ;;  %v20277_v33 = vmov 0  ;;  %vm15248_vm14 = vmpackc.low %vm2619_vm7, %vm2615_vm15  ;;  %vm2630_vm15 = vcmp.eq.s32.totalorder %v15245_v19, %v14588_v15 }
 0x372   : > { %v20278_v33 = vsel %vm15226_vm2, 4294967295, %v20277_v33  ;;  %11799 = vmatprep.subr.msk.bf16.mxu1 %vm11798_vm3, %v20280_v10  ;;  %v20282_v18 = vsel %vm15248_vm14, 4294967295, %v20281_v18  ;;  %vm15264_vm7 = vmpackc.low %vm2628_vm13, %vm2624_vm11  ;;  %vm2627_vm3 = vcmp.eq.s32.totalorder %v15245_v19, %v14581_v14  ;;  %vm2629_vm11 = vcmp.eq.s32.totalorder %v15245_v19, %v14592_v17 }
 0x373   : > { %20279 = vst [vmem:[#allocation84_spill] sm:$0xff] %v20278_v33  ;;  %20283 = vst [vmem:[#allocation85_spill] sm:$0xff] %v20282_v18  ;;  %11593 = vmatpush1.bf16.msk.msra.mxu0 %vm15248_vm14, %v20280_v10  ;;  %v20284_v33 = vmov 0  ;;  %v2078_v18 = vpop.permute.xlu0 %2077  ;;  %vm2632_vm13 = vcmp.eq.s32.totalorder %v15273_v8, %v14583_v6  ;;  %vm2631_vm2 = vcmp.eq.s32.totalorder %v15273_v8, %v14581_v14 }
 0x374   : > { %v20285_v33 = vsel %vm15264_vm7, 4294967295, %v20284_v33  ;;  %11595 = vmatprep.subr.msk.bf16.mxu0 %vm15264_vm7, %v20280_v10  ;;  %vm11802_vm12 = vmpackc.low %vm2630_vm15, %vm2626_vm9  ;;  %v15278_v4 = vadd.f32 %v2078_v18, %v1710_v11  ;;  %vm2636_vm9 = vcmp.eq.s32.totalorder %v15276_v5, %v14583_v6  ;;  %v15295_v18 = vadd.s32 288, %v14391_v1 }
 0x375   : > { %11801 = vmatpush1.bf16.msk.msra.mxu1 %vm11800_vm0, %v20280_v10  ;;  %20286 = vst [vmem:[#allocation86_spill] sm:$0xff] %v20285_v33  ;;  %vm2625_vm0 = vcmp.eq.s32.totalorder %v15242_v25, %v14592_v17  ;;  %vm15300_vm15 = vmpackc.low %vm2627_vm3, %vm2623_vm6  ;;  %vm2638_vm7 = vcmp.eq.s32.totalorder %v15276_v5, %v14588_v15  ;;  %vm2635_vm6 = vcmp.eq.s32.totalorder %v15276_v5, %v14581_v14 }
 0x376   : > { %11803 = vmatprep.subr.msk.bf16.mxu1 %vm11802_vm12, %v20280_v10  ;;  %v20288_v60 = vsel %vm15300_vm15, 4294967295, %v20287_v60  ;;  %vm2634_vm12 = vcmp.eq.s32.totalorder %v15273_v8, %v14588_v15  ;;  %vm15310_vm14 = vmpackc.low %vm2629_vm11, %vm2625_vm0  ;;  %vm2637_vm0 = vcmp.eq.s32.totalorder %v15276_v5, %v14592_v17 }
 0x377   : > { %20289 = vst [vmem:[#allocation87_spill] sm:$0xff] %v20288_v60  ;;  %vm15320_vm3 = vmpackc.low %vm2636_vm9, %vm2632_vm13  ;;  %vm2640_vm13 = vcmp.eq.s32.totalorder %v15295_v18, %v14583_v6 }
 0x378   : > { %v20293_v55 = vsel %vm15320_vm3, 4294967295, %v20292_v55  ;;  %vm15333_vm11 = vmpackc.low %vm2638_vm7, %vm2634_vm12  ;;  %vm2642_vm12 = vcmp.eq.s32.totalorder %v15295_v18, %v14588_v15 }
 0x379   : > { %20294 = vst [vmem:[#allocation88_spill] sm:$0xff] %v20293_v55  ;;  %vm15349_vm7 = vmpackc.low %vm2635_vm6, %vm2631_vm2  ;;  %vm20308_vm6 = vcmp.eq.s32.totalorder %v15295_v18, %v14581_v14 }
 0x37a   : > { %v20299_v51 = vsel %vm15349_vm7, 4294967295, %v20298_v51  ;;  %vm15369_vm2 = vmpackc.low %vm2637_vm0, %vm2633_vm5 }
 0x37b   : > { %20300 = vst [vmem:[#allocation90_spill] sm:$0xff] %v20299_v51  ;;  %v15480_v51 = vadd.s32 344, %v14391_v1 }
 0x37d   : > { %20323 = vst [vmem:[#allocation94_spill] sm:$0xff] %v15480_v51  ;;  %vm2669_vm1 = vcmp.eq.s32.totalorder %v15480_v51, %v14592_v17 }
 0x3f9   : > { %v2150_v2 = vpop.f32.mrb[6].mxu0 }
 0x3fa   : > { %v13048_v33 = vadd.f32 %v15278_v4, %v2150_v2  ;;  %v2152_v63 = vpop.f32.mrb[7].mxu0  ;;  %v15298_v2 = vadd.s32 296, %v14391_v1 }
 0x3fb   : > { %v13050_v11 = vadd.f32 %v15278_v4, %v2152_v63 }
 0x3fc   : > { %v15318_v56 = vmax.f32 %v13048_v33, 0.0  ;;  %vm20303_vm5 = vcmp.eq.s32.totalorder %v15298_v2, %v14583_v6  ;;  %vm2645_vm9 = vcmp.eq.s32.totalorder %v15298_v2, %v14592_v17  ;;  %vm20309_vm0 = vcmp.eq.s32.totalorder %v15298_v2, %v14581_v14 }
 0x3fd   : > { %v15308_v63 = vmax.f32 %v13050_v11, 0.0  ;;  %v15329_v11 = vadd.s32 304, %v14391_v1 }
 0x3ff   : > { %3395 = vmatprep.mubr.f32.mxu0 %v15308_v63  ;;  %3679 = vmatprep.mubr.f32.mxu1 %v15308_v63 }
 0x400   : > { %3396 = vmatmul.mubr.f32.vlgmr.msra.gmra.mrb[10].mxu0 %v15318_v56  ;;  %3680 = vmatmul.mubr.f32.vlgmr.msra.gmra.mrb[6].mxu1 %v15318_v56 }
 0x401   : > { %11597 = vmatpush1.bf16.msk.msra.mxu0 %vm15300_vm15, %v20280_v10  ;;  %11805 = vmatpush1.bf16.msk.msra.mxu1 %vm15310_vm14, %v20280_v10  ;;  %vm15389_vm14 = vmpackc.low %vm20303_vm5, %vm2640_vm13  ;;  %vm2651_vm15 = vcmp.eq.s32.totalorder %v15342_v52, %v14581_v14  ;;  %vm2649_vm5 = vcmp.eq.s32.totalorder %v15329_v11, %v14592_v17 }
 0x402   : > { %v2221_v60 = vpop.f32.mrb[2].mxu1  ;;  %11599 = vmatprep.subr.msk.bf16.mxu0 %vm15320_vm3, %v20280_v10  ;;  %11807 = vmatprep.subr.msk.bf16.mxu1 %vm15333_vm11, %v20280_v10  ;;  %v20305_v59 = vsel %vm15389_vm14, 4294967295, %v20304_v59  ;;  %vm20307_vm11 = vcmp.eq.s32.totalorder %v15298_v2, %v14588_v15  ;;  %vm15423_vm3 = vmpackc.low %vm20309_vm0, %vm20308_vm6  ;;  %vm20313_vm6 = vcmp.eq.s32.totalorder %v15295_v18, %v14592_v17 }
 0x403   : > { %20306 = vst [vmem:[#allocation91_spill] sm:$0xff] %v20305_v59  ;;  %v15400_v33 = vadd.f32 %v15278_v4, %v2221_v60  ;;  %v2223_v55 = vpop.f32.mrb[3].mxu1  ;;  %vm11810_vm13 = vmpackc.low %vm20307_vm11, %vm2642_vm12  ;;  %v20311_v42 = vsel %vm15423_vm3, 4294967295, %v20310_v42  ;;  %vm2650_vm12 = vcmp.eq.s32.totalorder %v15329_v11, %v14588_v15  ;;  %vm2654_vm11 = vcmp.eq.s32.totalorder %v15342_v52, %v14588_v15 }
 0x404   : > { %v13054_v60 = vadd.f32 %v15278_v4, %v2223_v55  ;;  %20312 = vst [vmem:[#allocation92_spill] sm:$0xff] %v20311_v42  ;;  %vm15440_vm0 = vmpackc.low %vm2645_vm9, %vm20313_vm6  ;;  %vm20316_vm9 = vcmp.eq.s32.totalorder %v15329_v11, %v14583_v6 }
 0x405   : > { %11601 = vmatpush1.bf16.msk.msra.mxu0 %vm15349_vm7, %v20280_v10  ;;  %11809 = vmatpush1.bf16.msk.msra.mxu1 %vm15369_vm2, %v20280_v10  ;;  %vm20317_vm2 = vcmp.eq.s32.totalorder %v15342_v52, %v14583_v6  ;;  %vm2653_vm7 = vcmp.eq.s32.totalorder %v15342_v52, %v14592_v17 }
 0x406   : > { %v15448_v38 = vmax.f32 %v13054_v60, 0.0  ;;  %11603 = vmatprep.subr.msk.bf16.mxu0 %vm15389_vm14, %v20280_v10  ;;  %11811 = vmatprep.subr.msk.bf16.mxu1 %vm11810_vm13, %v20280_v10  ;;  %vm15460_vm6 = vmpackc.low %vm20317_vm2, %vm20316_vm9  ;;  %v15469_v60 = vadd.s32 336, %v14391_v1  ;;  %vm2656_vm14 = vcmp.eq.s32.totalorder %v15411_v47, %v14583_v6  ;;  %vm20324_vm2 = vcmp.eq.s32.totalorder %v15329_v11, %v14581_v14 }
 0x407   : > { %v20319_v48 = vsel %vm15460_vm6, 4294967295, %v20318_v48  ;;  %vm15471_vm13 = vmpackc.low %vm2654_vm11, %vm2650_vm12  ;;  %vm20335_vm9 = vcmp.eq.s32.totalorder %v15414_v43, %v14588_v15  ;;  %vm20338_vm11 = vcmp.eq.s32.totalorder %v15414_v43, %v14581_v14 }
 0x408   : > { %20320 = vst [vmem:[#allocation93_spill] sm:$0xff] %v20319_v48  ;;  %3466 = vmatprep.mubr.f32.mxu0 %v15448_v38  ;;  %3750 = vmatprep.mubr.f32.mxu1 %v15448_v38  ;;  %vm15487_vm12 = vmpackc.low %vm2651_vm15, %vm20324_vm2  ;;  %vm2655_vm2 = vcmp.eq.s32.totalorder %v15411_v47, %v14581_v14  ;;  %v15549_v48 = vadd.s32 352, %v14391_v1 }
 0x409   : > { %v20326_v37 = vsel %vm15487_vm12, 4294967295, %v20325_v37  ;;  %11605 = vmatpush1.bf16.msk.msra.mxu0 %vm15423_vm3, %v20280_v10  ;;  %11813 = vmatpush1.bf16.msk.msra.mxu1 %vm15440_vm0, %v20280_v10  ;;  %v2292_v34 = vpop.f32.mrb[8].mxu0  ;;  %vm15504_vm15 = vmpackc.low %vm2653_vm7, %vm2649_vm5  ;;  %vm20330_vm7 = vcmp.eq.s32.totalorder %v15414_v43, %v14583_v6  ;;  %vm2665_vm3 = vcmp.eq.s32.totalorder %v15469_v60, %v14592_v17 }
 0x40a   : > { %20327 = vst [vmem:[#allocation95_spill] sm:$0xff] %v20326_v37  ;;  %v15515_v55 = vadd.f32 %v15278_v4, %v2292_v34  ;;  %v2294_v42 = vpop.f32.mrb[9].mxu0  ;;  %11607 = vmatprep.subr.msk.bf16.mxu0 %vm15460_vm6, %v20280_v10  ;;  %11815 = vmatprep.subr.msk.bf16.mxu1 %vm15471_vm13, %v20280_v10  ;;  %vm15529_vm5 = vmpackc.low %vm20330_vm7, %vm2656_vm14  ;;  %vm20334_vm13 = vcmp.eq.s32.totalorder %v15411_v47, %v14588_v15  ;;  %v15702_v37 = vadd.s32 400, %v14391_v1 }
 0x40b   : > { %v20332_v29 = vsel %vm15529_vm5, 4294967295, %v20331_v29  ;;  %v15538_v34 = vadd.f32 %v15278_v4, %v2294_v42  ;;  %v2363_v59 = vpop.f32.mrb[4].mxu1  ;;  %vm11818_vm14 = vmpackc.low %vm20335_vm9, %vm20334_vm13  ;;  %20336 = vst [vmem:[#allocation97_spill] sm:$0xff] %v15549_v48  ;;  %vm2666_vm9 = vcmp.eq.s32.totalorder %v15469_v60, %v14588_v15  ;;  %vm2670_vm13 = vcmp.eq.s32.totalorder %v15480_v51, %v14588_v15 }
 0x40c   : > { %20333 = vst [vmem:[#allocation96_spill] sm:$0xff] %v20332_v29  ;;  %v15555_v42 = vadd.f32 %v15278_v4, %v2363_v59  ;;  %vm15563_vm0 = vmpackc.low %vm20338_vm11, %vm2655_vm2  ;;  %v11215_v52 = vpop.f32.mrb[5].mxu1  ;;  %vm20342_vm11 = vcmp.eq.s32.totalorder %v15411_v47, %v14592_v17  ;;  %vm20343_vm2 = vcmp.eq.s32.totalorder %v15414_v43, %v14592_v17  ;;  %vm2663_vm6 = vcmp.eq.s32.totalorder %v15469_v60, %v14581_v14 }
 0x40d   : > { %v20340_v45 = vsel %vm15563_vm0, 4294967295, %v20339_v45  ;;  %11609 = vmatpush1.bf16.msk.msra.mxu0 %vm15487_vm12, %v20280_v10  ;;  %11817 = vmatpush1.bf16.msk.msra.mxu1 %vm15504_vm15, %v20280_v10  ;;  %vm15583_vm7 = vmpackc.low %vm20343_vm2, %vm20342_vm11  ;;  %vm2667_vm12 = vcmp.eq.s32.totalorder %v15480_v51, %v14581_v14  ;;  %vm20346_vm15 = vcmp.eq.s32.totalorder %v15469_v60, %v14583_v6  ;;  %vm20347_vm11 = vcmp.eq.s32.totalorder %v15480_v51, %v14583_v6 }
 0x40e   : > { %20341 = vst [vmem:[#allocation99_spill] sm:$0xff] %v20340_v45  ;;  %11611 = vmatprep.subr.msk.bf16.mxu0 %vm15529_vm5, %v20280_v10  ;;  %11819 = vmatprep.subr.msk.bf16.mxu1 %vm11818_vm14, %v20280_v10  ;;  %vm15601_vm2 = vmpackc.low %vm20347_vm11, %vm20346_vm15  ;;  %vm2672_vm14 = vcmp.eq.s32.totalorder %v15549_v48, %v14583_v6  ;;  %vm2676_vm5 = vcmp.eq.s32.totalorder %v15552_v41, %v14583_v6  ;;  %v15614_v52 = vadd.s32 368, %v14391_v1  ;;  %v15617_v59 = vadd.s32 376, %v14391_v1 }
 0x40f   : > { %v20349_v26 = vsel %vm15601_vm2, 4294967295, %v20348_v26  ;;  %vm11822_vm8 = vmpackc.low %vm2670_vm13, %vm2666_vm9  ;;  %v20353_v29 = vmov 0  ;;  %vm2674_vm11 = vcmp.eq.s32.totalorder %v15549_v48, %v14588_v15  ;;  %vm2678_vm9 = vcmp.eq.s32.totalorder %v15552_v41, %v14588_v15  ;;  %20371 = vst [vmem:[#allocation109_spill] sm:$0xff] %v15702_v37 }
 0x410   : > { %20350 = vst [vmem:[#allocation100_spill] sm:$0xff] %v20349_v26  ;;  %20351 = vst [vmem:[#allocation101_spill] sm:$0xff] %v15614_v52  ;;  %v20358_v45 = vmov 0  ;;  %vm2680_vm4 = vcmp.eq.s32.totalorder %v15614_v52, %v14583_v6  ;;  %vm2684_vm10 = vcmp.eq.s32.totalorder %v15617_v59, %v14583_v6  ;;  %v15658_v4 = vadd.s32 384, %v14391_v1 }
 0x411   : > { %20352 = vst [vmem:[#allocation102_spill] sm:$0xff] %v15617_v59  ;;  %vm15619_vm15 = vmpackc.low %vm2667_vm12, %vm2663_vm6  ;;  %11613 = vmatpush1.bf16.msk.msra.mxu0 %vm15563_vm0, %v20280_v10  ;;  %11821 = vmatpush1.bf16.msk.msra.mxu1 %vm15583_vm7, %v20280_v10  ;;  %vm2671_vm6 = vcmp.eq.s32.totalorder %v15549_v48, %v14581_v14  ;;  %vm2675_vm12 = vcmp.eq.s32.totalorder %v15552_v41, %v14581_v14  ;;  %v15661_v26 = vadd.s32 392, %v14391_v1  ;;  %v20363_v51 = vmov 0 }
 0x412   : > { %v20354_v29 = vsel %vm15619_vm15, 4294967295, %v20353_v29  ;;  %vm15633_vm13 = vmpackc.low %vm2669_vm1, %vm2665_vm3  ;;  %11615 = vmatprep.subr.msk.bf16.mxu0 %vm15601_vm2, %v20280_v10  ;;  %11823 = vmatprep.subr.msk.bf16.mxu1 %vm11822_vm8, %v20280_v10  ;;  %vm2673_vm1 = vcmp.eq.s32.totalorder %v15549_v48, %v14592_v17  ;;  %vm2677_vm3 = vcmp.eq.s32.totalorder %v15552_v41, %v14592_v17  ;;  %20361 = vst [vmem:[#allocation105_spill] sm:$0xff] %v15658_v4  ;;  %v20373_v48 = vmov 0 }
 0x413   : > { %20355 = vst [vmem:[#allocation103_spill] sm:$0xff] %v20354_v29  ;;  %vm15645_vm0 = vmpackc.low %vm2676_vm5, %vm2672_vm14  ;;  %vm2682_vm5 = vcmp.eq.s32.totalorder %v15614_v52, %v14588_v15  ;;  %vm2686_vm14 = vcmp.eq.s32.totalorder %v15617_v59, %v14588_v15  ;;  %v20368_v29 = vmov 0  ;;  %vm2692_vm2 = vcmp.eq.s32.totalorder %v15661_v26, %v14583_v6 }
 0x414   : > { %v20359_v45 = vsel %vm15645_vm0, 4294967295, %v20358_v45  ;;  %vm11826_vm7 = vmpackc.low %vm2678_vm9, %vm2674_vm11  ;;  %20362 = vst [vmem:[#allocation106_spill] sm:$0xff] %v15661_v26  ;;  %vm2679_vm9 = vcmp.eq.s32.totalorder %v15614_v52, %v14581_v14  ;;  %v15746_v41 = vadd.s32 416, %v14391_v1 }
 0x415   : > { %20360 = vst [vmem:[#allocation104_spill] sm:$0xff] %v20359_v45  ;;  %vm15663_vm8 = vmpackc.low %vm2675_vm12, %vm2671_vm6  ;;  %11617 = vmatpush1.bf16.msk.msra.mxu0 %vm15619_vm15, %v20280_v10  ;;  %11825 = vmatpush1.bf16.msk.msra.mxu1 %vm15633_vm13, %v20280_v10  ;;  %vm2683_vm6 = vcmp.eq.s32.totalorder %v15617_v59, %v14581_v14  ;;  %vm2681_vm13 = vcmp.eq.s32.totalorder %v15614_v52, %v14592_v17  ;;  %v15705_v45 = vadd.s32 408, %v14391_v1  ;;  %v20383_v52 = vmov 0 }
 0x416   : > { %v20364_v51 = vsel %vm15663_vm8, 4294967295, %v20363_v51  ;;  %vm15677_vm11 = vmpackc.low %vm2677_vm3, %vm2673_vm1  ;;  %11619 = vmatprep.subr.msk.bf16.mxu0 %vm15645_vm0, %v20280_v10  ;;  %11827 = vmatprep.subr.msk.bf16.mxu1 %vm11826_vm7, %v20280_v10  ;;  %vm2685_vm1 = vcmp.eq.s32.totalorder %v15617_v59, %v14592_v17  ;;  %vm2688_vm15 = vcmp.eq.s32.totalorder %v15658_v4, %v14583_v6  ;;  %vm2694_vm7 = vcmp.eq.s32.totalorder %v15661_v26, %v14588_v15 }
 0x417   : > { %20365 = vst [vmem:[#allocation107_spill] sm:$0xff] %v20364_v51  ;;  %vm15689_vm12 = vmpackc.low %vm2684_vm10, %vm2680_vm4  ;;  %vm2690_vm4 = vcmp.eq.s32.totalorder %v15658_v4, %v14588_v15  ;;  %v20378_v51 = vmov 0  ;;  %vm2700_vm0 = vcmp.eq.s32.totalorder %v15705_v45, %v14583_v6  ;;  %v15790_v59 = vadd.s32 432, %v14391_v1 }
 0x418   : > { %v20369_v29 = vsel %vm15689_vm12, 4294967295, %v20368_v29  ;;  %vm11830_vm3 = vmpackc.low %vm2686_vm14, %vm2682_vm5  ;;  %20372 = vst [vmem:[#allocation110_spill] sm:$0xff] %v15705_v45  ;;  %vm2687_vm14 = vcmp.eq.s32.totalorder %v15658_v4, %v14581_v14 }
 0x419   : > { %20370 = vst [vmem:[#allocation108_spill] sm:$0xff] %v20369_v29  ;;  %vm15707_vm10 = vmpackc.low %vm2683_vm6, %vm2679_vm9  ;;  %11621 = vmatpush1.bf16.msk.msra.mxu0 %vm15663_vm8, %v20280_v10  ;;  %11829 = vmatpush1.bf16.msk.msra.mxu1 %vm15677_vm11, %v20280_v10  ;;  %vm2691_vm9 = vcmp.eq.s32.totalorder %v15661_v26, %v14581_v14  ;;  %vm2689_vm11 = vcmp.eq.s32.totalorder %v15658_v4, %v14592_v17  ;;  %v15749_v29 = vadd.s32 424, %v14391_v1  ;;  %v20393_v4 = vmov 0 }
 0x41a   : > { %v20374_v48 = vsel %vm15707_vm10, 4294967295, %v20373_v48  ;;  %vm15721_vm5 = vmpackc.low %vm2685_vm1, %vm2681_vm13  ;;  %11623 = vmatprep.subr.msk.bf16.mxu0 %vm15689_vm12, %v20280_v10  ;;  %11831 = vmatprep.subr.msk.bf16.mxu1 %vm11830_vm3, %v20280_v10  ;;  %vm2693_vm13 = vcmp.eq.s32.totalorder %v15661_v26, %v14592_v17  ;;  %vm2696_vm8 = vcmp.eq.s32.totalorder %v15702_v37, %v14583_v6  ;;  %20381 = vst [vmem:[#allocation113_spill] sm:$0xff] %v15746_v41  ;;  %v15834_v26 = vadd.s32 448, %v14391_v1 }
 0x41b   : > { %20375 = vst [vmem:[#allocation111_spill] sm:$0xff] %v20374_v48  ;;  %vm15733_vm6 = vmpackc.low %vm2692_vm2, %vm2688_vm15  ;;  %vm2698_vm15 = vcmp.eq.s32.totalorder %v15702_v37, %v14588_v15  ;;  %vm2702_vm3 = vcmp.eq.s32.totalorder %v15705_v45, %v14588_v15  ;;  %v20388_v48 = vmov 0  ;;  %vm2708_vm12 = vcmp.eq.s32.totalorder %v15749_v29, %v14583_v6 }
 0x41c   : > { %v20379_v51 = vsel %vm15733_vm6, 4294967295, %v20378_v51  ;;  %vm11834_vm1 = vmpackc.low %vm2694_vm7, %vm2690_vm4  ;;  %20382 = vst [vmem:[#allocation114_spill] sm:$0xff] %v15749_v29  ;;  %vm2695_vm7 = vcmp.eq.s32.totalorder %v15702_v37, %v14581_v14 }
 0x41d   : > { %20380 = vst [vmem:[#allocation112_spill] sm:$0xff] %v20379_v51  ;;  %vm15751_vm2 = vmpackc.low %vm2691_vm9, %vm2687_vm14  ;;  %11625 = vmatpush1.bf16.msk.msra.mxu0 %vm15707_vm10, %v20280_v10  ;;  %11833 = vmatpush1.bf16.msk.msra.mxu1 %vm15721_vm5, %v20280_v10  ;;  %vm2699_vm14 = vcmp.eq.s32.totalorder %v15705_v45, %v14581_v14  ;;  %vm2697_vm5 = vcmp.eq.s32.totalorder %v15702_v37, %v14592_v17  ;;  %v15793_v51 = vadd.s32 440, %v14391_v1  ;;  %v15969_v37 = vadd.s32 504, %v14391_v1 }
 0x41e   : > { %v20384_v52 = vsel %vm15751_vm2, 4294967295, %v20383_v52  ;;  %vm15765_vm4 = vmpackc.low %vm2693_vm13, %vm2689_vm11  ;;  %11627 = vmatprep.subr.msk.bf16.mxu0 %vm15733_vm6, %v20280_v10  ;;  %11835 = vmatprep.subr.msk.bf16.mxu1 %vm11834_vm1, %v20280_v10  ;;  %vm2701_vm11 = vcmp.eq.s32.totalorder %v15705_v45, %v14592_v17  ;;  %vm2704_vm10 = vcmp.eq.s32.totalorder %v15746_v41, %v14583_v6  ;;  %20391 = vst [vmem:[#allocation117_spill] sm:$0xff] %v15790_v59  ;;  %v15878_v45 = vadd.s32 464, %v14391_v1 }
 0x41f   : > { %20385 = vst [vmem:[#allocation115_spill] sm:$0xff] %v20384_v52  ;;  %vm15777_vm9 = vmpackc.low %vm2700_vm0, %vm2696_vm8  ;;  %vm2706_vm8 = vcmp.eq.s32.totalorder %v15746_v41, %v14588_v15  ;;  %vm2710_vm1 = vcmp.eq.s32.totalorder %v15749_v29, %v14588_v15  ;;  %vm2716_vm6 = vcmp.eq.s32.totalorder %v15793_v51, %v14583_v6  ;;  %v15881_v52 = vadd.s32 472, %v14391_v1 }
 0x420   : > { %v20389_v48 = vsel %vm15777_vm9, 4294967295, %v20388_v48  ;;  %vm11838_vm13 = vmpackc.low %vm2702_vm3, %vm2698_vm15  ;;  %20392 = vst [vmem:[#allocation118_spill] sm:$0xff] %v15793_v51  ;;  %vm2703_vm3 = vcmp.eq.s32.totalorder %v15746_v41, %v14581_v14 }
 0x421   : > { %20390 = vst [vmem:[#allocation116_spill] sm:$0xff] %v20389_v48  ;;  %vm15795_vm0 = vmpackc.low %vm2699_vm14, %vm2695_vm7  ;;  %11629 = vmatpush1.bf16.msk.msra.mxu0 %vm15751_vm2, %v20280_v10  ;;  %11837 = vmatpush1.bf16.msk.msra.mxu1 %vm15765_vm4, %v20280_v10  ;;  %vm2707_vm7 = vcmp.eq.s32.totalorder %v15749_v29, %v14581_v14  ;;  %vm2705_vm4 = vcmp.eq.s32.totalorder %v15746_v41, %v14592_v17  ;;  %v15837_v48 = vadd.s32 456, %v14391_v1  ;;  %v16013_v41 = vadd.s32 520, %v14391_v1 }
 0x422   : > { %v20394_v4 = vsel %vm15795_vm0, 4294967295, %v20393_v4  ;;  %vm15809_vm15 = vmpackc.low %vm2701_vm11, %vm2697_vm5  ;;  %11631 = vmatprep.subr.msk.bf16.mxu0 %vm15777_vm9, %v20280_v10  ;;  %11839 = vmatprep.subr.msk.bf16.mxu1 %vm11838_vm13, %v20280_v10  ;;  %vm2709_vm5 = vcmp.eq.s32.totalorder %v15749_v29, %v14592_v17  ;;  %vm2712_vm2 = vcmp.eq.s32.totalorder %v15790_v59, %v14583_v6  ;;  %20400 = vst [vmem:[#allocation120_spill] sm:$0xff] %v15834_v26  ;;  %v15922_v29 = vadd.s32 480, %v14391_v1 }
 0x423   : > { %20395 = vst [vmem:[#allocation119_spill] sm:$0xff] %v20394_v4  ;;  %vm15821_vm14 = vmpackc.low %vm2708_vm12, %vm2704_vm10  ;;  %vm2714_vm10 = vcmp.eq.s32.totalorder %v15790_v59, %v14588_v15  ;;  %vm2718_vm13 = vcmp.eq.s32.totalorder %v15793_v51, %v14588_v15  ;;  %vm2724_vm9 = vcmp.eq.s32.totalorder %v15837_v48, %v14583_v6  ;;  %v15925_v4 = vadd.s32 488, %v14391_v1 }
 0x424   : > { %vm11842_vm11 = vmpackc.low %vm2710_vm1, %vm2706_vm8  ;;  %20401 = vst [vmem:[#allocation121_spill] sm:$0xff] %v15837_v48  ;;  %vm2711_vm1 = vcmp.eq.s32.totalorder %v15790_v59, %v14581_v14 }
 0x425   : > { %vm15839_vm12 = vmpackc.low %vm2707_vm7, %vm2703_vm3  ;;  %11633 = vmatpush1.bf16.msk.msra.mxu0 %vm15795_vm0, %v20280_v10  ;;  %11841 = vmatpush1.bf16.msk.msra.mxu1 %vm15809_vm15, %v20280_v10  ;;  %vm2715_vm3 = vcmp.eq.s32.totalorder %v15793_v51, %v14581_v14  ;;  %vm2713_vm15 = vcmp.eq.s32.totalorder %v15790_v59, %v14592_v17  ;;  %vm2720_vm0 = vcmp.eq.s32.totalorder %v15834_v26, %v14583_v6  ;;  %v16061_v59 = vadd.s32 536, %v14391_v1 }
 0x426   : > { %vm15853_vm8 = vmpackc.low %vm2709_vm5, %vm2705_vm4  ;;  %11635 = vmatprep.subr.msk.bf16.mxu0 %vm15821_vm14, %v20280_v10  ;;  %11843 = vmatprep.subr.msk.bf16.mxu1 %vm11842_vm11, %v20280_v10  ;;  %vm2717_vm4 = vcmp.eq.s32.totalorder %v15793_v51, %v14592_v17  ;;  %20408 = vst [vmem:[#allocation122_spill] sm:$0xff] %v15878_v45  ;;  %vm2726_vm14 = vcmp.eq.s32.totalorder %v15837_v48, %v14588_v15  ;;  %v15966_v51 = vadd.s32 496, %v14391_v1 }
 0x427   : > { %vm15865_vm7 = vmpackc.low %vm2716_vm6, %vm2712_vm2  ;;  %20409 = vst [vmem:[#allocation123_spill] sm:$0xff] %v15881_v52  ;;  %vm2722_vm2 = vcmp.eq.s32.totalorder %v15834_v26, %v14588_v15 }
 0x428   : > { %vm11846_vm5 = vmpackc.low %vm2718_vm13, %vm2714_vm10  ;;  %vm2719_vm10 = vcmp.eq.s32.totalorder %v15834_v26, %v14581_v14  ;;  %vm2723_vm13 = vcmp.eq.s32.totalorder %v15837_v48, %v14581_v14  ;;  %20416 = vst [vmem:[#allocation124_spill] sm:$0xff] %v15922_v29 }
 0x429   : > { %vm15883_vm6 = vmpackc.low %vm2715_vm3, %vm2711_vm1  ;;  %11637 = vmatpush1.bf16.msk.msra.mxu0 %vm15839_vm12, %v20280_v10  ;;  %11845 = vmatpush1.bf16.msk.msra.mxu1 %vm15853_vm8, %v20280_v10  ;;  %vm2721_vm8 = vcmp.eq.s32.totalorder %v15834_v26, %v14592_v17  ;;  %vm2725_vm1 = vcmp.eq.s32.totalorder %v15837_v48, %v14592_v17  ;;  %20417 = vst [vmem:[#allocation125_spill] sm:$0xff] %v15925_v4  ;;  %v16010_v48 = vadd.s32 512, %v14391_v1  ;;  %v16207_v26 = vadd.s32 576, %v14391_v1 }
 0x42a   : > { %vm15897_vm11 = vmpackc.low %vm2717_vm4, %vm2713_vm15  ;;  %11639 = vmatprep.subr.msk.bf16.mxu0 %vm15865_vm7, %v20280_v10  ;;  %11847 = vmatprep.subr.msk.bf16.mxu1 %vm11846_vm5, %v20280_v10  ;;  %vm2728_vm15 = vcmp.eq.s32.totalorder %v15878_v45, %v14583_v6  ;;  %vm2732_vm4 = vcmp.eq.s32.totalorder %v15881_v52, %v14583_v6  ;;  %vm2734_vm7 = vcmp.eq.s32.totalorder %v15881_v52, %v14588_v15 }
 0x42b   : > { %vm15909_vm12 = vmpackc.low %vm2724_vm9, %vm2720_vm0  ;;  %vm2730_vm0 = vcmp.eq.s32.totalorder %v15878_v45, %v14588_v15  ;;  %20424 = vst [vmem:[#allocation126_spill] sm:$0xff] %v15966_v51 }
 0x42c   : > { %vm11850_vm3 = vmpackc.low %vm2726_vm14, %vm2722_vm2  ;;  %vm2727_vm2 = vcmp.eq.s32.totalorder %v15878_v45, %v14581_v14  ;;  %vm2731_vm14 = vcmp.eq.s32.totalorder %v15881_v52, %v14581_v14  ;;  %20425 = vst [vmem:[#allocation127_spill] sm:$0xff] %v15969_v37 }
 0x42d   : > { %vm15927_vm9 = vmpackc.low %vm2723_vm13, %vm2719_vm10  ;;  %11641 = vmatpush1.bf16.msk.msra.mxu0 %vm15883_vm6, %v20280_v10  ;;  %11849 = vmatpush1.bf16.msk.msra.mxu1 %vm15897_vm11, %v20280_v10  ;;  %vm2729_vm11 = vcmp.eq.s32.totalorder %v15878_v45, %v14592_v17  ;;  %vm2733_vm10 = vcmp.eq.s32.totalorder %v15881_v52, %v14592_v17  ;;  %20432 = vst [vmem:[#allocation128_spill] sm:$0xff] %v16010_v48  ;;  %v16058_v52 = vadd.s32 528, %v14391_v1  ;;  %v16088_v45 = vadd.s32 544, %v14391_v1 }
 0x42e   : > { %vm15941_vm5 = vmpackc.low %vm2725_vm1, %vm2721_vm8  ;;  %11643 = vmatprep.subr.msk.bf16.mxu0 %vm15909_vm12, %v20280_v10  ;;  %11851 = vmatprep.subr.msk.bf16.mxu1 %vm11850_vm3, %v20280_v10  ;;  %vm2736_vm8 = vcmp.eq.s32.totalorder %v15922_v29, %v14583_v6  ;;  %vm2740_vm1 = vcmp.eq.s32.totalorder %v15925_v4, %v14583_v6  ;;  %vm2738_vm3 = vcmp.eq.s32.totalorder %v15922_v29, %v14588_v15 }
 0x42f   : > { %vm15953_vm6 = vmpackc.low %vm2732_vm4, %vm2728_vm15  ;;  %vm2742_vm15 = vcmp.eq.s32.totalorder %v15925_v4, %v14588_v15  ;;  %20433 = vst [vmem:[#allocation129_spill] sm:$0xff] %v16013_v41 }
 0x430   : > { %vm11854_vm13 = vmpackc.low %vm2734_vm7, %vm2730_vm0  ;;  %vm2735_vm0 = vcmp.eq.s32.totalorder %v15922_v29, %v14581_v14  ;;  %vm2739_vm7 = vcmp.eq.s32.totalorder %v15925_v4, %v14581_v14  ;;  %20460 = vst [vmem:[#allocation135_spill] sm:$0xff] %v16207_v26 }
 0x431   : > { %vm15971_vm12 = vmpackc.low %vm2731_vm14, %vm2727_vm2  ;;  %11645 = vmatpush1.bf16.msk.msra.mxu0 %vm15927_vm9, %v20280_v10  ;;  %11853 = vmatpush1.bf16.msk.msra.mxu1 %vm15941_vm5, %v20280_v10  ;;  %vm2737_vm5 = vcmp.eq.s32.totalorder %v15922_v29, %v14592_v17  ;;  %vm2741_vm2 = vcmp.eq.s32.totalorder %v15925_v4, %v14592_v17  ;;  %v20436_v4 = vmov 0  ;;  %v16151_v29 = vadd.s32 568, %v14391_v1 }
 0x432   : > { %vm15985_vm4 = vmpackc.low %vm2733_vm10, %vm2729_vm11  ;;  %11647 = vmatprep.subr.msk.bf16.mxu0 %vm15953_vm6, %v20280_v10  ;;  %11855 = vmatprep.subr.msk.bf16.mxu1 %vm11854_vm13, %v20280_v10  ;;  %vm2744_vm11 = vcmp.eq.s32.totalorder %v15966_v51, %v14583_v6  ;;  %vm2748_vm10 = vcmp.eq.s32.totalorder %v15969_v37, %v14583_v6  ;;  %vm2746_vm13 = vcmp.eq.s32.totalorder %v15966_v51, %v14588_v15 }
 0x433   : > { %vm15997_vm9 = vmpackc.low %vm2740_vm1, %vm2736_vm8  ;;  %vm2750_vm8 = vcmp.eq.s32.totalorder %v15969_v37, %v14588_v15  ;;  %20455 = vst [vmem:[#allocation134_spill] sm:$0xff] %v16151_v29 }
 0x434   : > { %vm11858_vm14 = vmpackc.low %vm2742_vm15, %vm2738_vm3  ;;  %vm2743_vm3 = vcmp.eq.s32.totalorder %v15966_v51, %v14581_v14  ;;  %vm2747_vm15 = vcmp.eq.s32.totalorder %v15969_v37, %v14581_v14 }
 0x435   : > { %vm16015_vm6 = vmpackc.low %vm2739_vm7, %vm2735_vm0  ;;  %11649 = vmatpush1.bf16.msk.msra.mxu0 %vm15971_vm12, %v20280_v10  ;;  %11857 = vmatpush1.bf16.msk.msra.mxu1 %vm15985_vm4, %v20280_v10  ;;  %vm2745_vm4 = vcmp.eq.s32.totalorder %v15966_v51, %v14592_v17  ;;  %vm2749_vm0 = vcmp.eq.s32.totalorder %v15969_v37, %v14592_v17  ;;  %v16121_v51 = vmax.f32 %v15538_v34, 0.0  ;;  %v16148_v37 = vadd.s32 560, %v14391_v1 }
 0x436   : > { %vm16029_vm1 = vmpackc.low %vm2741_vm2, %vm2737_vm5  ;;  %11651 = vmatprep.subr.msk.bf16.mxu0 %vm15997_vm9, %v20280_v10  ;;  %11859 = vmatprep.subr.msk.bf16.mxu1 %vm11858_vm14, %v20280_v10  ;;  %vm2752_vm5 = vcmp.eq.s32.totalorder %v16010_v48, %v14583_v6  ;;  %vm2756_vm2 = vcmp.eq.s32.totalorder %v16013_v41, %v14583_v6  ;;  %vm2754_vm9 = vcmp.eq.s32.totalorder %v16010_v48, %v14588_v15  ;;  %v16286_v34 = vadd.s32 616, %v14391_v1 }
 0x437   : > { %v20437_v4 = vsel %vm16029_vm1, 4294967295, %v20436_v4  ;;  %vm11654_vm12 = vmpackc.low %vm2748_vm10, %vm2744_vm11  ;;  %vm2758_vm14 = vcmp.eq.s32.totalorder %v16013_v41, %v14588_v15  ;;  %20449 = vst [vmem:[#allocation132_spill] sm:$0xff] %v16121_v51 }
 0x438   : > { %vm11862_vm7 = vmpackc.low %vm2750_vm8, %vm2746_vm13  ;;  %vm20440_vm11 = vnez %v20437_v4  ;;  %vm2751_vm8 = vcmp.eq.s32.totalorder %v16010_v48, %v14581_v14  ;;  %v16091_v4 = vadd.s32 552, %v14391_v1  ;;  %20454 = vst [vmem:[#allocation133_spill] sm:$0xff] %v16148_v37 }
 0x439   : > { %vm16049_vm1 = vmpackc.low %vm2747_vm15, %vm2743_vm3  ;;  %11653 = vmatpush1.bf16.msk.msra.mxu0 %vm16015_vm6, %v20280_v10  ;;  %11861 = vmatpush1.bf16.msk.msra.mxu1 %vm20440_vm11, %v20280_v10  ;;  %vm2755_vm3 = vcmp.eq.s32.totalorder %v16013_v41, %v14581_v14  ;;  %vm2753_vm15 = vcmp.eq.s32.totalorder %v16010_v48, %v14592_v17  ;;  %v16106_v48 = vmax.f32 %v15400_v33, 0.0  ;;  %v16210_v33 = vadd.s32 584, %v14391_v1  ;;  %20473 = vst [vmem:[#allocation140_spill] sm:$0xff] %v16286_v34 }
 0x43a   : > { %vm11864_vm10 = vmpackc.low %vm2749_vm0, %vm2745_vm4  ;;  %11655 = vmatprep.subr.msk.bf16.mxu0 %vm11654_vm12, %v20280_v10  ;;  %11863 = vmatprep.subr.msk.bf16.mxu1 %vm11862_vm7, %v20280_v10  ;;  %vm2757_vm4 = vcmp.eq.s32.totalorder %v16013_v41, %v14592_v17  ;;  %vm2760_vm12 = vcmp.eq.s32.totalorder %v16058_v52, %v14583_v6  ;;  %vm2764_vm0 = vcmp.eq.s32.totalorder %v16061_v59, %v14583_v6  ;;  %v16248_v41 = vadd.s32 600, %v14391_v1 }
 0x43b   : > { %vm16071_vm13 = vmpackc.low %vm2756_vm2, %vm2752_vm5  ;;  %20443 = vst [vmem:[#allocation130_spill] sm:$0xff] %v16091_v4  ;;  %vm2762_vm5 = vcmp.eq.s32.totalorder %v16058_v52, %v14588_v15  ;;  %vm2766_vm2 = vcmp.eq.s32.totalorder %v16061_v59, %v14588_v15 }
 0x43c   : > { %vm11866_vm6 = vmpackc.low %vm2758_vm14, %vm2754_vm9  ;;  %20446 = vst [vmem:[#allocation131_spill] sm:$0xff] %v16106_v48  ;;  %vm2759_vm9 = vcmp.eq.s32.totalorder %v16058_v52, %v14581_v14  ;;  %vm2763_vm14 = vcmp.eq.s32.totalorder %v16061_v59, %v14581_v14 }
 0x43d   : > { %11657 = vmatpush1.bf16.msk.msra.mxu0 %vm16049_vm1, %v20280_v10  ;;  %11865 = vmatpush1.bf16.msk.msra.mxu1 %vm11864_vm10, %v20280_v10  ;;  %vm16097_vm7 = vmpackc.low %vm2755_vm3, %vm2751_vm8  ;;  %vm2761_vm10 = vcmp.eq.s32.totalorder %v16058_v52, %v14592_v17  ;;  %vm2768_vm3 = vcmp.eq.s32.totalorder %v16088_v45, %v14583_v6  ;;  %20461 = vst [vmem:[#allocation136_spill] sm:$0xff] %v16210_v33 }
 0x43e   : > { %11659 = vmatprep.subr.msk.bf16.mxu0 %vm16071_vm13, %v20280_v10  ;;  %11867 = vmatprep.subr.msk.bf16.mxu1 %vm11866_vm6, %v20280_v10  ;;  %vm16112_vm1 = vmpackc.low %vm2757_vm4, %vm2753_vm15  ;;  %vm2765_vm13 = vcmp.eq.s32.totalorder %v16061_v59, %v14592_v17  ;;  %vm2772_vm6 = vcmp.eq.s32.totalorder %v16091_v4, %v14583_v6  ;;  %vm2770_vm4 = vcmp.eq.s32.totalorder %v16088_v45, %v14588_v15 }
 0x43f   : > { %vm16129_vm11 = vmpackc.low %vm2764_vm0, %vm2760_vm12  ;;  %vm2774_vm12 = vcmp.eq.s32.totalorder %v16091_v4, %v14588_v15  ;;  %20467 = vst [vmem:[#allocation138_spill] sm:$0xff] %v16248_v41 }
 0x440   : > { %3467 = vmatmul.mubr.f32.vlgmr.msra.gmra.mrb[10].mxu0 %v16106_v48  ;;  %3751 = vmatmul.mubr.f32.vlgmr.msra.gmra.mrb[6].mxu1 %v16106_v48  ;;  %vm16139_vm8 = vmpackc.low %vm2766_vm2, %vm2762_vm5  ;;  %vm2771_vm5 = vcmp.eq.s32.totalorder %v16091_v4, %v14581_v14  ;;  %v16245_v48 = vadd.s32 592, %v14391_v1 }
 0x441   : > { %11661 = vmatpush1.bf16.msk.msra.mxu0 %vm16097_vm7, %v20280_v10  ;;  %3537 = vmatprep.mubr.f32.mxu0 %v16121_v51  ;;  %vm16160_vm15 = vmpackc.low %vm2763_vm14, %vm2759_vm9  ;;  %vm2767_vm7 = vcmp.eq.s32.totalorder %v16088_v45, %v14581_v14  ;;  %vm2773_vm9 = vcmp.eq.s32.totalorder %v16091_v4, %v14592_v17  ;;  %v16849_v4 = vadd.s32 1, %v14588_v15 }
 0x442   : > { %11869 = vmatpush1.bf16.msk.msra.mxu1 %vm16112_vm1, %v20280_v10  ;;  %3821 = vmatprep.mubr.f32.mxu1 %v16121_v51  ;;  %vm16178_vm0 = vmpackc.low %vm2765_vm13, %vm2761_vm10  ;;  %vm2769_vm1 = vcmp.eq.s32.totalorder %v16088_v45, %v14592_v17  ;;  %vm2780_vm10 = vcmp.eq.s32.totalorder %v16151_v29, %v14583_v6  ;;  %20466 = vst [vmem:[#allocation137_spill] sm:$0xff] %v16245_v48  ;;  %v16283_v51 = vadd.s32 608, %v14391_v1 }
 0x443   : > { %11663 = vmatprep.subr.msk.bf16.mxu0 %vm16129_vm11, %v20280_v10  ;;  %11871 = vmatprep.subr.msk.bf16.mxu1 %vm16139_vm8, %v20280_v10  ;;  %vm11666_vm2 = vmpackc.low %vm2772_vm6, %vm2768_vm3  ;;  %vm2776_vm11 = vcmp.eq.s32.totalorder %v16148_v37, %v14583_v6  ;;  %vm2778_vm8 = vcmp.eq.s32.totalorder %v16148_v37, %v14588_v15  ;;  %vm2782_vm3 = vcmp.eq.s32.totalorder %v16151_v29, %v14588_v15 }
 0x444   : > { %vm11874_vm14 = vmpackc.low %vm2774_vm12, %vm2770_vm4  ;;  %vm2779_vm4 = vcmp.eq.s32.totalorder %v16151_v29, %v14581_v14  ;;  %20472 = vst [vmem:[#allocation139_spill] sm:$0xff] %v16283_v51 }
 0x445   : > { %11665 = vmatpush1.bf16.msk.msra.mxu0 %vm16160_vm15, %v20280_v10  ;;  %vm16215_vm13 = vmpackc.low %vm2771_vm5, %vm2767_vm7  ;;  %vm2775_vm15 = vcmp.eq.s32.totalorder %v16148_v37, %v14581_v14  ;;  %vm2777_vm7 = vcmp.eq.s32.totalorder %v16148_v37, %v14592_v17  ;;  %v16324_v37 = vadd.s32 632, %v14391_v1 }
 0x446   : > { %11873 = vmatpush1.bf16.msk.msra.mxu1 %vm16178_vm0, %v20280_v10  ;;  %11667 = vmatprep.subr.msk.bf16.mxu0 %vm11666_vm2, %v20280_v10  ;;  %vm16227_vm6 = vmpackc.low %vm2773_vm9, %vm2769_vm1  ;;  %vm2781_vm0 = vcmp.eq.s32.totalorder %v16151_v29, %v14592_v17  ;;  %vm2784_vm2 = vcmp.eq.s32.totalorder %v16207_v26, %v14583_v6  ;;  %vm2788_vm1 = vcmp.eq.s32.totalorder %v16210_v33, %v14583_v6  ;;  %v16321_v29 = vadd.s32 624, %v14391_v1 }
 0x447   : > { %11875 = vmatprep.subr.msk.bf16.mxu1 %vm11874_vm14, %v20280_v10  ;;  %vm11670_vm12 = vmpackc.low %vm2780_vm10, %vm2776_vm11  ;;  %vm2786_vm14 = vcmp.eq.s32.totalorder %v16207_v26, %v14588_v15  ;;  %vm2790_vm11 = vcmp.eq.s32.totalorder %v16210_v33, %v14588_v15  ;;  %20479 = vst [vmem:[#allocation142_spill] sm:$0xff] %v16324_v37 }
 0x448   : > { %vm11878_vm5 = vmpackc.low %vm2782_vm3, %vm2778_vm8  ;;  %vm2787_vm8 = vcmp.eq.s32.totalorder %v16210_v33, %v14581_v14  ;;  %20478 = vst [vmem:[#allocation141_spill] sm:$0xff] %v16321_v29 }
 0x449   : > { %11669 = vmatpush1.bf16.msk.msra.mxu0 %vm16215_vm13, %v20280_v10  ;;  %vm16253_vm9 = vmpackc.low %vm2779_vm4, %vm2775_vm15  ;;  %vm2783_vm13 = vcmp.eq.s32.totalorder %v16207_v26, %v14581_v14  ;;  %vm2785_vm15 = vcmp.eq.s32.totalorder %v16207_v26, %v14592_v17  ;;  %v16359_v26 = vadd.s32 640, %v14391_v1 }
 0x44a   : > { %11877 = vmatpush1.bf16.msk.msra.mxu1 %vm16227_vm6, %v20280_v10  ;;  %11671 = vmatprep.subr.msk.bf16.mxu0 %vm11670_vm12, %v20280_v10  ;;  %vm16265_vm10 = vmpackc.low %vm2781_vm0, %vm2777_vm7  ;;  %vm2789_vm6 = vcmp.eq.s32.totalorder %v16210_v33, %v14592_v17  ;;  %vm2792_vm12 = vcmp.eq.s32.totalorder %v16245_v48, %v14583_v6  ;;  %vm2796_vm7 = vcmp.eq.s32.totalorder %v16248_v41, %v14583_v6  ;;  %v16362_v33 = vadd.s32 648, %v14391_v1 }
 0x44b   : > { %11879 = vmatprep.subr.msk.bf16.mxu1 %vm11878_vm5, %v20280_v10  ;;  %vm11674_vm3 = vmpackc.low %vm2788_vm1, %vm2784_vm2  ;;  %vm2794_vm5 = vcmp.eq.s32.totalorder %v16245_v48, %v14588_v15  ;;  %vm2798_vm2 = vcmp.eq.s32.totalorder %v16248_v41, %v14588_v15  ;;  %20484 = vst [vmem:[#allocation143_spill] sm:$0xff] %v16359_v26 }
 0x44c   : > { %vm11882_vm4 = vmpackc.low %vm2790_vm11, %vm2786_vm14  ;;  %vm2795_vm14 = vcmp.eq.s32.totalorder %v16248_v41, %v14581_v14  ;;  %20485 = vst [vmem:[#allocation144_spill] sm:$0xff] %v16362_v33 }
 0x44d   : > { %11673 = vmatpush1.bf16.msk.msra.mxu0 %vm16253_vm9, %v20280_v10  ;;  %vm16291_vm0 = vmpackc.low %vm2787_vm8, %vm2783_vm13  ;;  %vm2791_vm9 = vcmp.eq.s32.totalorder %v16245_v48, %v14581_v14  ;;  %vm2793_vm13 = vcmp.eq.s32.totalorder %v16245_v48, %v14592_v17  ;;  %v16397_v48 = vadd.s32 656, %v14391_v1 }
 0x44e   : > { %11881 = vmatpush1.bf16.msk.msra.mxu1 %vm16265_vm10, %v20280_v10  ;;  %11675 = vmatprep.subr.msk.bf16.mxu0 %vm11674_vm3, %v20280_v10  ;;  %vm16303_vm1 = vmpackc.low %vm2789_vm6, %vm2785_vm15  ;;  %vm2797_vm10 = vcmp.eq.s32.totalorder %v16248_v41, %v14592_v17  ;;  %vm2800_vm3 = vcmp.eq.s32.totalorder %v16283_v51, %v14583_v6  ;;  %vm2804_vm15 = vcmp.eq.s32.totalorder %v16286_v34, %v14583_v6  ;;  %v16400_v41 = vadd.s32 664, %v14391_v1 }
 0x44f   : > { %11883 = vmatprep.subr.msk.bf16.mxu1 %vm11882_vm4, %v20280_v10  ;;  %vm11678_vm11 = vmpackc.low %vm2796_vm7, %vm2792_vm12  ;;  %vm2802_vm4 = vcmp.eq.s32.totalorder %v16283_v51, %v14588_v15  ;;  %vm2806_vm12 = vcmp.eq.s32.totalorder %v16286_v34, %v14588_v15  ;;  %20490 = vst [vmem:[#allocation145_spill] sm:$0xff] %v16397_v48 }
 0x450   : > { %vm11886_vm8 = vmpackc.low %vm2798_vm2, %vm2794_vm5  ;;  %vm2803_vm5 = vcmp.eq.s32.totalorder %v16286_v34, %v14581_v14  ;;  %20491 = vst [vmem:[#allocation146_spill] sm:$0xff] %v16400_v41 }
 0x451   : > { %11677 = vmatpush1.bf16.msk.msra.mxu0 %vm16291_vm0, %v20280_v10  ;;  %vm16329_vm6 = vmpackc.low %vm2795_vm14, %vm2791_vm9  ;;  %vm2799_vm0 = vcmp.eq.s32.totalorder %v16283_v51, %v14581_v14  ;;  %vm2801_vm9 = vcmp.eq.s32.totalorder %v16283_v51, %v14592_v17  ;;  %v16435_v51 = vadd.s32 672, %v14391_v1 }
 0x452   : > { %11885 = vmatpush1.bf16.msk.msra.mxu1 %vm16303_vm1, %v20280_v10  ;;  %11679 = vmatprep.subr.msk.bf16.mxu0 %vm11678_vm11, %v20280_v10  ;;  %vm16341_vm7 = vmpackc.low %vm2797_vm10, %vm2793_vm13  ;;  %vm2805_vm1 = vcmp.eq.s32.totalorder %v16286_v34, %v14592_v17  ;;  %vm2808_vm11 = vcmp.eq.s32.totalorder %v16321_v29, %v14583_v6  ;;  %vm2812_vm13 = vcmp.eq.s32.totalorder %v16324_v37, %v14583_v6  ;;  %v16438_v34 = vadd.s32 680, %v14391_v1 }
 0x453   : > { %11887 = vmatprep.subr.msk.bf16.mxu1 %vm11886_vm8, %v20280_v10  ;;  %vm11682_vm2 = vmpackc.low %vm2804_vm15, %vm2800_vm3  ;;  %vm2810_vm8 = vcmp.eq.s32.totalorder %v16321_v29, %v14588_v15  ;;  %vm2814_vm3 = vcmp.eq.s32.totalorder %v16324_v37, %v14588_v15  ;;  %20496 = vst [vmem:[#allocation147_spill] sm:$0xff] %v16435_v51 }
 0x454   : > { %vm11890_vm14 = vmpackc.low %vm2806_vm12, %vm2802_vm4  ;;  %vm2811_vm4 = vcmp.eq.s32.totalorder %v16324_v37, %v14581_v14  ;;  %20497 = vst [vmem:[#allocation148_spill] sm:$0xff] %v16438_v34 }
 0x455   : > { %11681 = vmatpush1.bf16.msk.msra.mxu0 %vm16329_vm6, %v20280_v10  ;;  %vm16367_vm10 = vmpackc.low %vm2803_vm5, %vm2799_vm0  ;;  %vm2807_vm6 = vcmp.eq.s32.totalorder %v16321_v29, %v14581_v14  ;;  %vm2809_vm0 = vcmp.eq.s32.totalorder %v16321_v29, %v14592_v17  ;;  %v16473_v29 = vadd.s32 688, %v14391_v1 }
 0x456   : > { %11889 = vmatpush1.bf16.msk.msra.mxu1 %vm16341_vm7, %v20280_v10  ;;  %11683 = vmatprep.subr.msk.bf16.mxu0 %vm11682_vm2, %v20280_v10  ;;  %vm16379_vm15 = vmpackc.low %vm2805_vm1, %vm2801_vm9  ;;  %vm2813_vm7 = vcmp.eq.s32.totalorder %v16324_v37, %v14592_v17  ;;  %vm2816_vm2 = vcmp.eq.s32.totalorder %v16359_v26, %v14583_v6  ;;  %vm2820_vm9 = vcmp.eq.s32.totalorder %v16362_v33, %v14583_v6  ;;  %v16476_v37 = vadd.s32 696, %v14391_v1 }
 0x457   : > { %11891 = vmatprep.subr.msk.bf16.mxu1 %vm11890_vm14, %v20280_v10  ;;  %vm11686_vm12 = vmpackc.low %vm2812_vm13, %vm2808_vm11  ;;  %vm2818_vm14 = vcmp.eq.s32.totalorder %v16359_v26, %v14588_v15  ;;  %vm2822_vm11 = vcmp.eq.s32.totalorder %v16362_v33, %v14588_v15  ;;  %20502 = vst [vmem:[#allocation149_spill] sm:$0xff] %v16473_v29 }
 0x458   : > { %vm11894_vm5 = vmpackc.low %vm2814_vm3, %vm2810_vm8  ;;  %vm2819_vm8 = vcmp.eq.s32.totalorder %v16362_v33, %v14581_v14  ;;  %20503 = vst [vmem:[#allocation150_spill] sm:$0xff] %v16476_v37 }
 0x459   : > { %11685 = vmatpush1.bf16.msk.msra.mxu0 %vm16367_vm10, %v20280_v10  ;;  %vm16405_vm1 = vmpackc.low %vm2811_vm4, %vm2807_vm6  ;;  %vm2815_vm10 = vcmp.eq.s32.totalorder %v16359_v26, %v14581_v14  ;;  %vm2817_vm6 = vcmp.eq.s32.totalorder %v16359_v26, %v14592_v17  ;;  %v16511_v26 = vadd.s32 704, %v14391_v1 }
 0x45a   : > { %11893 = vmatpush1.bf16.msk.msra.mxu1 %vm16379_vm15, %v20280_v10  ;;  %11687 = vmatprep.subr.msk.bf16.mxu0 %vm11686_vm12, %v20280_v10  ;;  %vm16417_vm13 = vmpackc.low %vm2813_vm7, %vm2809_vm0  ;;  %vm2821_vm15 = vcmp.eq.s32.totalorder %v16362_v33, %v14592_v17  ;;  %vm2824_vm12 = vcmp.eq.s32.totalorder %v16397_v48, %v14583_v6  ;;  %vm2828_vm0 = vcmp.eq.s32.totalorder %v16400_v41, %v14583_v6  ;;  %v16514_v33 = vadd.s32 712, %v14391_v1 }
 0x45b   : > { %11895 = vmatprep.subr.msk.bf16.mxu1 %vm11894_vm5, %v20280_v10  ;;  %vm11690_vm3 = vmpackc.low %vm2820_vm9, %vm2816_vm2  ;;  %vm2826_vm5 = vcmp.eq.s32.totalorder %v16397_v48, %v14588_v15  ;;  %vm2830_vm2 = vcmp.eq.s32.totalorder %v16400_v41, %v14588_v15  ;;  %20508 = vst [vmem:[#allocation151_spill] sm:$0xff] %v16511_v26 }
 0x45c   : > { %vm11898_vm4 = vmpackc.low %vm2822_vm11, %vm2818_vm14  ;;  %vm2827_vm14 = vcmp.eq.s32.totalorder %v16400_v41, %v14581_v14  ;;  %20509 = vst [vmem:[#allocation152_spill] sm:$0xff] %v16514_v33 }
 0x45d   : > { %11689 = vmatpush1.bf16.msk.msra.mxu0 %vm16405_vm1, %v20280_v10  ;;  %vm16443_vm7 = vmpackc.low %vm2819_vm8, %vm2815_vm10  ;;  %vm2823_vm1 = vcmp.eq.s32.totalorder %v16397_v48, %v14581_v14  ;;  %vm2825_vm10 = vcmp.eq.s32.totalorder %v16397_v48, %v14592_v17  ;;  %v16549_v48 = vadd.s32 720, %v14391_v1 }
 0x45e   : > { %11897 = vmatpush1.bf16.msk.msra.mxu1 %vm16417_vm13, %v20280_v10  ;;  %11691 = vmatprep.subr.msk.bf16.mxu0 %vm11690_vm3, %v20280_v10  ;;  %vm16455_vm9 = vmpackc.low %vm2821_vm15, %vm2817_vm6  ;;  %vm2829_vm13 = vcmp.eq.s32.totalorder %v16400_v41, %v14592_v17  ;;  %vm2832_vm3 = vcmp.eq.s32.totalorder %v16435_v51, %v14583_v6  ;;  %vm2836_vm6 = vcmp.eq.s32.totalorder %v16438_v34, %v14583_v6  ;;  %v16552_v41 = vadd.s32 728, %v14391_v1 }
 0x45f   : > { %11899 = vmatprep.subr.msk.bf16.mxu1 %vm11898_vm4, %v20280_v10  ;;  %vm11694_vm11 = vmpackc.low %vm2828_vm0, %vm2824_vm12  ;;  %vm2834_vm4 = vcmp.eq.s32.totalorder %v16435_v51, %v14588_v15  ;;  %vm2838_vm12 = vcmp.eq.s32.totalorder %v16438_v34, %v14588_v15  ;;  %20514 = vst [vmem:[#allocation153_spill] sm:$0xff] %v16549_v48 }
 0x460   : > { %vm11902_vm8 = vmpackc.low %vm2830_vm2, %vm2826_vm5  ;;  %vm2835_vm5 = vcmp.eq.s32.totalorder %v16438_v34, %v14581_v14  ;;  %20515 = vst [vmem:[#allocation154_spill] sm:$0xff] %v16552_v41 }
 0x461   : > { %11693 = vmatpush1.bf16.msk.msra.mxu0 %vm16443_vm7, %v20280_v10  ;;  %vm16481_vm15 = vmpackc.low %vm2827_vm14, %vm2823_vm1  ;;  %vm2831_vm7 = vcmp.eq.s32.totalorder %v16435_v51, %v14581_v14  ;;  %vm2833_vm1 = vcmp.eq.s32.totalorder %v16435_v51, %v14592_v17  ;;  %v16587_v51 = vadd.s32 736, %v14391_v1 }
 0x462   : > { %11901 = vmatpush1.bf16.msk.msra.mxu1 %vm16455_vm9, %v20280_v10  ;;  %11695 = vmatprep.subr.msk.bf16.mxu0 %vm11694_vm11, %v20280_v10  ;;  %vm16493_vm0 = vmpackc.low %vm2829_vm13, %vm2825_vm10  ;;  %vm2837_vm9 = vcmp.eq.s32.totalorder %v16438_v34, %v14592_v17  ;;  %vm2840_vm11 = vcmp.eq.s32.totalorder %v16473_v29, %v14583_v6  ;;  %vm2844_vm10 = vcmp.eq.s32.totalorder %v16476_v37, %v14583_v6  ;;  %v16590_v34 = vadd.s32 744, %v14391_v1 }
 0x463   : > { %11903 = vmatprep.subr.msk.bf16.mxu1 %vm11902_vm8, %v20280_v10  ;;  %vm11698_vm2 = vmpackc.low %vm2836_vm6, %vm2832_vm3  ;;  %vm2842_vm8 = vcmp.eq.s32.totalorder %v16473_v29, %v14588_v15  ;;  %vm2846_vm3 = vcmp.eq.s32.totalorder %v16476_v37, %v14588_v15  ;;  %20520 = vst [vmem:[#allocation155_spill] sm:$0xff] %v16587_v51 }
 0x464   : > { %vm11906_vm14 = vmpackc.low %vm2838_vm12, %vm2834_vm4  ;;  %vm2843_vm4 = vcmp.eq.s32.totalorder %v16476_v37, %v14581_v14  ;;  %20521 = vst [vmem:[#allocation156_spill] sm:$0xff] %v16590_v34 }
 0x465   : > { %11697 = vmatpush1.bf16.msk.msra.mxu0 %vm16481_vm15, %v20280_v10  ;;  %vm16519_vm13 = vmpackc.low %vm2835_vm5, %vm2831_vm7  ;;  %vm2839_vm15 = vcmp.eq.s32.totalorder %v16473_v29, %v14581_v14  ;;  %vm2841_vm7 = vcmp.eq.s32.totalorder %v16473_v29, %v14592_v17  ;;  %v16625_v29 = vadd.s32 752, %v14391_v1 }
 0x466   : > { %11905 = vmatpush1.bf16.msk.msra.mxu1 %vm16493_vm0, %v20280_v10  ;;  %11699 = vmatprep.subr.msk.bf16.mxu0 %vm11698_vm2, %v20280_v10  ;;  %vm16531_vm6 = vmpackc.low %vm2837_vm9, %vm2833_vm1  ;;  %vm2845_vm0 = vcmp.eq.s32.totalorder %v16476_v37, %v14592_v17  ;;  %vm2848_vm2 = vcmp.eq.s32.totalorder %v16511_v26, %v14583_v6  ;;  %vm2852_vm1 = vcmp.eq.s32.totalorder %v16514_v33, %v14583_v6  ;;  %v16628_v37 = vadd.s32 760, %v14391_v1 }
 0x467   : > { %11907 = vmatprep.subr.msk.bf16.mxu1 %vm11906_vm14, %v20280_v10  ;;  %vm11702_vm12 = vmpackc.low %vm2844_vm10, %vm2840_vm11  ;;  %vm2850_vm14 = vcmp.eq.s32.totalorder %v16511_v26, %v14588_v15  ;;  %vm2854_vm11 = vcmp.eq.s32.totalorder %v16514_v33, %v14588_v15  ;;  %20526 = vst [vmem:[#allocation157_spill] sm:$0xff] %v16625_v29 }
 0x468   : > { %vm11910_vm5 = vmpackc.low %vm2846_vm3, %vm2842_vm8  ;;  %vm2851_vm8 = vcmp.eq.s32.totalorder %v16514_v33, %v14581_v14  ;;  %20527 = vst [vmem:[#allocation158_spill] sm:$0xff] %v16628_v37 }
 0x469   : > { %11701 = vmatpush1.bf16.msk.msra.mxu0 %vm16519_vm13, %v20280_v10  ;;  %vm16557_vm9 = vmpackc.low %vm2843_vm4, %vm2839_vm15  ;;  %vm2847_vm13 = vcmp.eq.s32.totalorder %v16511_v26, %v14581_v14  ;;  %vm2849_vm15 = vcmp.eq.s32.totalorder %v16511_v26, %v14592_v17  ;;  %v16663_v26 = vadd.s32 768, %v14391_v1 }
 0x46a   : > { %11909 = vmatpush1.bf16.msk.msra.mxu1 %vm16531_vm6, %v20280_v10  ;;  %11703 = vmatprep.subr.msk.bf16.mxu0 %vm11702_vm12, %v20280_v10  ;;  %vm16569_vm10 = vmpackc.low %vm2845_vm0, %vm2841_vm7  ;;  %vm2853_vm6 = vcmp.eq.s32.totalorder %v16514_v33, %v14592_v17  ;;  %vm2856_vm12 = vcmp.eq.s32.totalorder %v16549_v48, %v14583_v6  ;;  %vm2860_vm7 = vcmp.eq.s32.totalorder %v16552_v41, %v14583_v6  ;;  %v16666_v33 = vadd.s32 776, %v14391_v1 }
 0x46b   : > { %11911 = vmatprep.subr.msk.bf16.mxu1 %vm11910_vm5, %v20280_v10  ;;  %vm11706_vm3 = vmpackc.low %vm2852_vm1, %vm2848_vm2  ;;  %vm2858_vm5 = vcmp.eq.s32.totalorder %v16549_v48, %v14588_v15  ;;  %vm2862_vm2 = vcmp.eq.s32.totalorder %v16552_v41, %v14588_v15  ;;  %20532 = vst [vmem:[#allocation159_spill] sm:$0xff] %v16663_v26 }
 0x46c   : > { %vm11914_vm4 = vmpackc.low %vm2854_vm11, %vm2850_vm14  ;;  %vm2859_vm14 = vcmp.eq.s32.totalorder %v16552_v41, %v14581_v14  ;;  %20533 = vst [vmem:[#allocation160_spill] sm:$0xff] %v16666_v33 }
 0x46d   : > { %11705 = vmatpush1.bf16.msk.msra.mxu0 %vm16557_vm9, %v20280_v10  ;;  %vm16595_vm0 = vmpackc.low %vm2851_vm8, %vm2847_vm13  ;;  %vm2855_vm9 = vcmp.eq.s32.totalorder %v16549_v48, %v14581_v14  ;;  %vm2857_vm13 = vcmp.eq.s32.totalorder %v16549_v48, %v14592_v17  ;;  %v16701_v48 = vadd.s32 784, %v14391_v1 }
 0x46e   : > { %11913 = vmatpush1.bf16.msk.msra.mxu1 %vm16569_vm10, %v20280_v10  ;;  %11707 = vmatprep.subr.msk.bf16.mxu0 %vm11706_vm3, %v20280_v10  ;;  %vm16607_vm1 = vmpackc.low %vm2853_vm6, %vm2849_vm15  ;;  %vm2861_vm10 = vcmp.eq.s32.totalorder %v16552_v41, %v14592_v17  ;;  %vm2864_vm3 = vcmp.eq.s32.totalorder %v16587_v51, %v14583_v6  ;;  %vm2868_vm15 = vcmp.eq.s32.totalorder %v16590_v34, %v14583_v6  ;;  %v16704_v41 = vadd.s32 792, %v14391_v1 }
 0x46f   : > { %11915 = vmatprep.subr.msk.bf16.mxu1 %vm11914_vm4, %v20280_v10  ;;  %vm11710_vm11 = vmpackc.low %vm2860_vm7, %vm2856_vm12  ;;  %vm2866_vm4 = vcmp.eq.s32.totalorder %v16587_v51, %v14588_v15  ;;  %vm2870_vm12 = vcmp.eq.s32.totalorder %v16590_v34, %v14588_v15  ;;  %20538 = vst [vmem:[#allocation161_spill] sm:$0xff] %v16701_v48 }
 0x470   : > { %vm11918_vm8 = vmpackc.low %vm2862_vm2, %vm2858_vm5  ;;  %vm2867_vm5 = vcmp.eq.s32.totalorder %v16590_v34, %v14581_v14  ;;  %20539 = vst [vmem:[#allocation162_spill] sm:$0xff] %v16704_v41 }
 0x471   : > { %11709 = vmatpush1.bf16.msk.msra.mxu0 %vm16595_vm0, %v20280_v10  ;;  %vm16633_vm6 = vmpackc.low %vm2859_vm14, %vm2855_vm9  ;;  %vm2863_vm0 = vcmp.eq.s32.totalorder %v16587_v51, %v14581_v14  ;;  %vm2865_vm9 = vcmp.eq.s32.totalorder %v16587_v51, %v14592_v17  ;;  %v16739_v51 = vadd.s32 800, %v14391_v1 }
 0x472   : > { %11917 = vmatpush1.bf16.msk.msra.mxu1 %vm16607_vm1, %v20280_v10  ;;  %11711 = vmatprep.subr.msk.bf16.mxu0 %vm11710_vm11, %v20280_v10  ;;  %vm16645_vm7 = vmpackc.low %vm2861_vm10, %vm2857_vm13  ;;  %vm2869_vm1 = vcmp.eq.s32.totalorder %v16590_v34, %v14592_v17  ;;  %vm2872_vm11 = vcmp.eq.s32.totalorder %v16625_v29, %v14583_v6  ;;  %vm2876_vm13 = vcmp.eq.s32.totalorder %v16628_v37, %v14583_v6  ;;  %v16742_v34 = vadd.s32 808, %v14391_v1 }
 0x473   : > { %11919 = vmatprep.subr.msk.bf16.mxu1 %vm11918_vm8, %v20280_v10  ;;  %vm11714_vm2 = vmpackc.low %vm2868_vm15, %vm2864_vm3  ;;  %vm2874_vm8 = vcmp.eq.s32.totalorder %v16625_v29, %v14588_v15  ;;  %vm2878_vm3 = vcmp.eq.s32.totalorder %v16628_v37, %v14588_v15 }
 0x474   : > { %vm11922_vm14 = vmpackc.low %vm2870_vm12, %vm2866_vm4  ;;  %vm2875_vm4 = vcmp.eq.s32.totalorder %v16628_v37, %v14581_v14  ;;  %20544 = vst [vmem:[#allocation163_spill] sm:$0xff] %v16742_v34 }
 0x475   : > { %11713 = vmatpush1.bf16.msk.msra.mxu0 %vm16633_vm6, %v20280_v10  ;;  %vm16671_vm10 = vmpackc.low %vm2867_vm5, %vm2863_vm0  ;;  %vm2871_vm6 = vcmp.eq.s32.totalorder %v16625_v29, %v14581_v14  ;;  %vm2873_vm0 = vcmp.eq.s32.totalorder %v16625_v29, %v14592_v17  ;;  %v20554_v29 = vmov 0.0  }
 0x476   : > { %11921 = vmatpush1.bf16.msk.msra.mxu1 %vm16645_vm7, %v20280_v10  ;;  %11715 = vmatprep.subr.msk.bf16.mxu0 %vm11714_vm2, %v20280_v10  ;;  %vm16683_vm15 = vmpackc.low %vm2869_vm1, %vm2865_vm9  ;;  %vm2877_vm7 = vcmp.eq.s32.totalorder %v16628_v37, %v14592_v17  ;;  %vm2880_vm2 = vcmp.eq.s32.totalorder %v16663_v26, %v14583_v6  ;;  %vm2884_vm9 = vcmp.eq.s32.totalorder %v16666_v33, %v14583_v6  ;;  %v16787_v37 = vadd.s32 824, %v14391_v1 }
 0x477   : > { %11923 = vmatprep.subr.msk.bf16.mxu1 %vm11922_vm14, %v20280_v10  ;;  %vm11718_vm12 = vmpackc.low %vm2876_vm13, %vm2872_vm11  ;;  %vm2882_vm14 = vcmp.eq.s32.totalorder %v16663_v26, %v14588_v15  ;;  %vm2886_vm11 = vcmp.eq.s32.totalorder %v16666_v33, %v14588_v15 }
 0x478   : > { %vm11926_vm5 = vmpackc.low %vm2878_vm3, %vm2874_vm8  ;;  %vm2883_vm8 = vcmp.eq.s32.totalorder %v16666_v33, %v14581_v14 }
 0x479   : > { %11717 = vmatpush1.bf16.msk.msra.mxu0 %vm16671_vm10, %v20280_v10  ;;  %vm16709_vm1 = vmpackc.low %vm2875_vm4, %vm2871_vm6  ;;  %vm2879_vm10 = vcmp.eq.s32.totalorder %v16663_v26, %v14581_v14  ;;  %vm2881_vm6 = vcmp.eq.s32.totalorder %v16663_v26, %v14592_v17  ;;  %v16883_v26 = vadd.s32 1, %v14592_v17 }
 0x47a   : > { %11925 = vmatpush1.bf16.msk.msra.mxu1 %vm16683_vm15, %v20280_v10  ;;  %11719 = vmatprep.subr.msk.bf16.mxu0 %vm11718_vm12, %v20280_v10  ;;  %vm16721_vm13 = vmpackc.low %vm2877_vm7, %vm2873_vm0  ;;  %vm2885_vm15 = vcmp.eq.s32.totalorder %v16666_v33, %v14592_v17  ;;  %vm2888_vm12 = vcmp.eq.s32.totalorder %v16701_v48, %v14583_v6  ;;  %vm2892_vm0 = vcmp.eq.s32.totalorder %v16704_v41, %v14583_v6  ;;  %v16756_v33 = vmax.f32 %v15515_v55, 0.0 }
 0x47b   : > { %11927 = vmatprep.subr.msk.bf16.mxu1 %vm11926_vm5, %v20280_v10  ;;  %vm11722_vm3 = vmpackc.low %vm2884_vm9, %vm2880_vm2  ;;  %vm2890_vm5 = vcmp.eq.s32.totalorder %v16701_v48, %v14588_v15  ;;  %vm2894_vm2 = vcmp.eq.s32.totalorder %v16704_v41, %v14588_v15  ;;  %v16784_v55 = vadd.s32 816, %v14391_v1 }
 0x47c   : > { %vm11930_vm4 = vmpackc.low %vm2886_vm11, %vm2882_vm14  ;;  %20547 = vst [vmem:[#allocation164_spill] sm:$0xff] %v16756_v33  ;;  %vm2891_vm14 = vcmp.eq.s32.totalorder %v16704_v41, %v14581_v14 }
 0x47d   : > { %11721 = vmatpush1.bf16.msk.msra.mxu0 %vm16709_vm1, %v20280_v10  ;;  %vm16747_vm7 = vmpackc.low %vm2883_vm8, %vm2879_vm10  ;;  %vm2887_vm1 = vcmp.eq.s32.totalorder %v16701_v48, %v14581_v14  ;;  %vm2893_vm10 = vcmp.eq.s32.totalorder %v16704_v41, %v14592_v17  ;;  %v20574_v41 = vmov 0 }
 0x47e   : > { %11929 = vmatpush1.bf16.msk.msra.mxu1 %vm16721_vm13, %v20280_v10  ;;  %11723 = vmatprep.subr.msk.bf16.mxu0 %vm11722_vm3, %v20280_v10  ;;  %vm16762_vm9 = vmpackc.low %vm2885_vm15, %vm2881_vm6  ;;  %vm2889_vm13 = vcmp.eq.s32.totalorder %v16701_v48, %v14592_v17  ;;  %vm2896_vm3 = vcmp.eq.s32.totalorder %v16739_v51, %v14583_v6  ;;  %vm2900_vm6 = vcmp.eq.s32.totalorder %v16742_v34, %v14583_v6  ;;  %v16835_v48 = vadd.s32 1, %v14583_v6 }
 0x47f   : > { %11931 = vmatprep.subr.msk.bf16.mxu1 %vm11930_vm4, %v20280_v10  ;;  %vm11726_vm11 = vmpackc.low %vm2892_vm0, %vm2888_vm12  ;;  %vm2898_vm4 = vcmp.eq.s32.totalorder %v16739_v51, %v14588_v15  ;;  %vm2902_vm12 = vcmp.eq.s32.totalorder %v16742_v34, %v14588_v15 }
 0x480   : > { %3538 = vmatmul.mubr.f32.vlgmr.msra.gmra.mrb[10].mxu0 %v16756_v33  ;;  %vm11934_vm8 = vmpackc.low %vm2894_vm2, %vm2890_vm5  ;;  %vm2899_vm5 = vcmp.eq.s32.totalorder %v16742_v34, %v14581_v14 }
 0x481   : > { %3822 = vmatmul.mubr.f32.vlgmr.msra.gmra.mrb[6].mxu1 %v16756_v33  ;;  %11725 = vmatpush1.bf16.msk.msra.mxu0 %vm16747_vm7, %v20280_v10  ;;  %vm16793_vm15 = vmpackc.low %vm2891_vm14, %vm2887_vm1  ;;  %vm2895_vm7 = vcmp.eq.s32.totalorder %v16739_v51, %v14581_v14  ;;  %vm2901_vm1 = vcmp.eq.s32.totalorder %v16742_v34, %v14592_v17  ;;  %v20566_v33 = vmov 0  ;;  %v20600_v34 = vmov 0 }
 0x482   : > { %11933 = vmatpush1.bf16.msk.msra.mxu1 %vm16762_vm9, %v20280_v10  ;;  %11727 = vmatprep.subr.msk.bf16.mxu0 %vm11726_vm11, %v20280_v10  ;;  %vm16808_vm0 = vmpackc.low %vm2893_vm10, %vm2889_vm13  ;;  %vm2897_vm9 = vcmp.eq.s32.totalorder %v16739_v51, %v14592_v17  ;;  %vm2904_vm11 = vcmp.eq.s32.totalorder %v16784_v55, %v14583_v6  ;;  %vm2908_vm13 = vcmp.eq.s32.totalorder %v16787_v37, %v14583_v6  ;;  %v20667_v6 = vld [vmem:[#allocation94_spill] sm:$0xff] }
 0x483   : > { %11935 = vmatprep.subr.msk.bf16.mxu1 %vm11934_vm8, %v20280_v10  ;;  %vm11730_vm2 = vmpackc.low %vm2900_vm6, %vm2896_vm3  ;;  %3608 = vmatprep.mubr.f32.mxu0 %v20554_v29  ;;  %vm2906_vm8 = vcmp.eq.s32.totalorder %v16784_v55, %v14588_v15  ;;  %vm2910_vm3 = vcmp.eq.s32.totalorder %v16787_v37, %v14588_v15  ;;  %v16867_v15 = vadd.s32 1, %v14581_v14 }
 0x484   : > { %vm16825_vm14 = vmpackc.low %vm2902_vm12, %vm2898_vm4  ;;  %3892 = vmatprep.mubr.f32.mxu1 %v20554_v29  ;;  %vm2907_vm4 = vcmp.eq.s32.totalorder %v16787_v37, %v14581_v14 }
 0x485   : > { %11729 = vmatpush1.bf16.msk.msra.mxu0 %vm16793_vm15, %v20280_v10  ;;  %vm16840_vm10 = vmpackc.low %vm2899_vm5, %vm2895_vm7  ;;  %vm2903_vm15 = vcmp.eq.s32.totalorder %v16784_v55, %v14581_v14  ;;  %20561 = vst [vmem:[#allocation165_spill] sm:$0xff] %v16867_v15  ;;  %vm2909_vm7 = vcmp.eq.s32.totalorder %v16787_v37, %v14592_v17  ;;  %v20684_v14 = vmov 0 }
 0x486   : > { %11937 = vmatpush1.bf16.msk.msra.mxu1 %vm16808_vm0, %v20280_v10  ;;  %11731 = vmatprep.subr.msk.bf16.mxu0 %vm11730_vm2, %v20280_v10  ;;  %vm16858_vm6 = vmpackc.low %vm2901_vm1, %vm2897_vm9  ;;  %vm2905_vm0 = vcmp.eq.s32.totalorder %v16784_v55, %v14592_v17  ;;  %vm3904_vm2 = vcmp.eq.s32.totalorder %v14391_v1, %v16835_v48  ;;  %vm3908_vm9 = vcmp.eq.s32.totalorder %v14579_v12, %v16835_v48  ;;  %v20564_v17 = vmov 0 }
 0x487   : > { %11939 = vmatprep.subr.msk.bf16.mxu1 %vm16825_vm14, %v20280_v10  ;;  %vm11734_vm12 = vmpackc.low %vm2908_vm13, %vm2904_vm11  ;;  %vm3906_vm14 = vcmp.eq.s32.totalorder %v14391_v1, %v16849_v4  ;;  %vm3910_vm11 = vcmp.eq.s32.totalorder %v14579_v12, %v16849_v4 }
 0x488   : > { %vm11942_vm5 = vmpackc.low %vm2910_vm3, %vm2906_vm8  ;;  %vm3907_vm8 = vcmp.eq.s32.totalorder %v14579_v12, %v16867_v15 }
 0x489   : > { %11733 = vmatpush1.bf16.msk.msra.mxu0 %vm16840_vm10, %v20280_v10  ;;  %vm11736_vm1 = vmpackc.low %vm2907_vm4, %vm2903_vm15  ;;  %vm3903_vm10 = vcmp.eq.s32.totalorder %v14391_v1, %v16867_v15  ;;  %vm3909_vm15 = vcmp.eq.s32.totalorder %v14579_v12, %v16883_v26  ;;  %v20588_v12 = vmov 0 }
 0x48a   : > { %11941 = vmatpush1.bf16.msk.msra.mxu1 %vm16858_vm6, %v20280_v10  ;;  %11735 = vmatprep.subr.msk.bf16.mxu0 %vm11734_vm12, %v20280_v10  ;;  %vm16900_vm13 = vmpackc.low %vm2909_vm7, %vm2905_vm0  ;;  %vm3905_vm6 = vcmp.eq.s32.totalorder %v14391_v1, %v16883_v26  ;;  %vm3912_vm12 = vcmp.eq.s32.totalorder %v14602_v21, %v16835_v48  ;;  %vm3916_vm0 = vcmp.eq.s32.totalorder %v14605_v22, %v16835_v48  ;;  %vm20004_vm7 = vcmask 523264  }
 0x48b   : > { %11943 = vmatprep.subr.msk.bf16.mxu1 %vm11942_vm5, %v20280_v10  ;;  %vm16909_vm3 = vmpackc.low %vm3908_vm9, %vm3904_vm2  ;;  %vm3914_vm2 = vcmp.eq.s32.totalorder %v14602_v21, %v16849_v4  ;;  %vm3918_vm9 = vcmp.eq.s32.totalorder %v14605_v22, %v16849_v4  ;;  %v16931_v1 = vmax.f32 %v15555_v42, 0.0  ;;  %v20570_v42 = vmov 0 }
 0x48c   : > { %v20565_v17 = vsel %vm16909_vm3, 4294967295, %v20564_v17  ;;  %vm12154_vm4 = vmpackc.low %vm3910_vm11, %vm3906_vm14  ;;  %vm20002_vm14 = vcmp.eq.s32.totalorder %v14602_v21, %v16867_v15  ;;  %vm20003_vm11 = vcmp.eq.s32.totalorder %v14605_v22, %v16867_v15 }
 0x48d   : > { %11737 = vmatpush1.bf16.msk.msra.mxu0 %vm11736_vm1, %v20280_v10  ;;  %vm16922_vm5 = vmpackc.low %vm3907_vm8, %vm3903_vm10  ;;  %vm3917_vm8 = vcmp.eq.s32.totalorder %v14605_v22, %v16883_v26  ;;  %v20676_v22 = vmov 0 }
 0x48e   : > { %v20567_v33 = vsel %vm16922_vm5, 4294967295, %v20566_v33  ;;  %11945 = vmatpush1.bf16.msk.msra.mxu1 %vm16900_vm13, %v20280_v10  ;;  %11947 = vmatprep.subr.msk.bf16.mxu0 %vm16909_vm3, %v20280_v10  ;;  %vm16939_vm1 = vmpackc.low %vm3909_vm15, %vm3905_vm6  ;;  %vm3913_vm13 = vcmp.eq.s32.totalorder %v14602_v21, %v16883_v26  ;;  %vm3920_vm15 = vcmp.eq.s32.totalorder %v14632_v27, %v16835_v48  ;;  %v20578_v21 = vmov 0 }
 0x48f   : > { %12155 = vmatprep.subr.msk.bf16.mxu1 %vm12154_vm4, %v20280_v10  ;;  %vm16948_vm10 = vmpackc.low %vm3916_vm0, %vm3912_vm12  ;;  %vm3924_vm4 = vcmp.eq.s32.totalorder %v14635_v28, %v16835_v48  ;;  %vm3922_vm0 = vcmp.eq.s32.totalorder %v14632_v27, %v16849_v4 }
 0x490   : > { %v20571_v42 = vsel %vm16948_vm10, 4294967295, %v20570_v42  ;;  %9833 = vmatmul.mubr.msk.f32.vlgmr.msra.gmra.mrb[10].mxu0 %vm20004_vm7, %v16931_v1  ;;  %vm16958_vm6 = vmpackc.low %vm3918_vm9, %vm3914_vm2  ;;  %vm3926_vm2 = vcmp.eq.s32.totalorder %v14635_v28, %v16849_v4 }
 0x491   : > { %10042 = vmatmul.mubr.msk.f32.vlgmr.msra.gmra.mrb[6].mxu1 %vm20004_vm7, %v16931_v1  ;;  %11949 = vmatpush1.bf16.msk.msra.mxu0 %vm16922_vm5, %v20280_v10  ;;  %vm16977_vm12 = vmpackc.low %vm20003_vm11, %vm20002_vm14  ;;  %vm3919_vm14 = vcmp.eq.s32.totalorder %v14632_v27, %v16867_v15  ;;  %vm3923_vm11 = vcmp.eq.s32.totalorder %v14635_v28, %v16867_v15  ;;  %vm3928_vm5 = vcmp.eq.s32.totalorder %v14677_v35, %v16835_v48 }
 0x492   : > { %v20575_v41 = vsel %vm16977_vm12, 4294967295, %v20574_v41  ;;  %4799 = vmatprep.mubr.f32.mxu0 %v15308_v63  ;;  %12157 = vmatpush1.bf16.msk.msra.mxu1 %vm16939_vm1, %v20280_v10  ;;  %vm16989_vm9 = vmpackc.low %vm3917_vm8, %vm3913_vm13  ;;  %vm3921_vm1 = vcmp.eq.s32.totalorder %v14632_v27, %v16883_v26  ;;  %vm3925_vm13 = vcmp.eq.s32.totalorder %v14635_v28, %v16883_v26  ;;  %v20580_v27 = vmov 0 }
 0x493   : > { %5083 = vmatprep.mubr.f32.mxu1 %v15308_v63  ;;  %11951 = vmatprep.subr.msk.bf16.mxu0 %vm16948_vm10, %v20280_v10  ;;  %vm17001_vm7 = vmpackc.low %vm3924_vm4, %vm3920_vm15  ;;  %vm3932_vm15 = vcmp.eq.s32.totalorder %v14680_v36, %v16835_v48  ;;  %vm3930_vm10 = vcmp.eq.s32.totalorder %v14677_v35, %v16849_v4  ;;  %v20582_v28 = vmov 0  ;;  %v20584_v63 = vmov 0 }
 0x494   : > { %v20579_v21 = vsel %vm17001_vm7, 4294967295, %v20578_v21  ;;  %12159 = vmatprep.subr.msk.bf16.mxu1 %vm16958_vm6, %v20280_v10  ;;  %vm12162_vm8 = vmpackc.low %vm3926_vm2, %vm3922_vm0  ;;  %vm3934_vm6 = vcmp.eq.s32.totalorder %v14680_v36, %v16849_v4 }
 0x495   : > { %11953 = vmatpush1.bf16.msk.msra.mxu0 %vm16977_vm12, %v20280_v10  ;;  %vm17019_vm4 = vmpackc.low %vm3923_vm11, %vm3919_vm14  ;;  %vm20013_vm14 = vcmp.eq.s32.totalorder %v14677_v35, %v16867_v15  ;;  %vm3931_vm11 = vcmp.eq.s32.totalorder %v14680_v36, %v16867_v15  ;;  %vm3933_vm12 = vcmp.eq.s32.totalorder %v14680_v36, %v16883_v26  ;;  %v20586_v36 = vmov 0 }
 0x496   : > { %v20581_v27 = vsel %vm17019_vm4, 4294967295, %v20580_v27  ;;  %12161 = vmatpush1.bf16.msk.msra.mxu1 %vm16989_vm9, %v20280_v10  ;;  %11955 = vmatprep.subr.msk.bf16.mxu0 %vm17001_vm7, %v20280_v10  ;;  %vm12164_vm0 = vmpackc.low %vm3925_vm13, %vm3921_vm1  ;;  %vm3929_vm9 = vcmp.eq.s32.totalorder %v14677_v35, %v16883_v26  ;;  %vm3936_vm1 = vcmp.eq.s32.totalorder %v14741_v39, %v16835_v48  ;;  %vm3940_vm13 = vcmp.eq.s32.totalorder %v14744_v40, %v16835_v48  ;;  %v20683_v35 = vld [vmem:[#allocation102_spill] sm:$0xff] }
 0x497   : > { %12163 = vmatprep.subr.msk.bf16.mxu1 %vm12162_vm8, %v20280_v10  ;;  %vm17038_vm2 = vmpackc.low %vm3932_vm15, %vm3928_vm5  ;;  %vm3942_vm8 = vcmp.eq.s32.totalorder %v14744_v40, %v16849_v4 }
 0x498   : > { %v20583_v28 = vsel %vm17038_vm2, 4294967295, %v20582_v28  ;;  %vm12166_vm7 = vmpackc.low %vm3934_vm6, %vm3930_vm10  ;;  %vm3938_vm10 = vcmp.eq.s32.totalorder %v14741_v39, %v16849_v4  ;;  %vm3935_vm6 = vcmp.eq.s32.totalorder %v14741_v39, %v16867_v15 }
 0x499   : > { %11957 = vmatpush1.bf16.msk.msra.mxu0 %vm17019_vm4, %v20280_v10  ;;  %vm17056_vm5 = vmpackc.low %vm3931_vm11, %vm20013_vm14  ;;  %vm3939_vm11 = vcmp.eq.s32.totalorder %v14744_v40, %v16867_v15  ;;  %vm3941_vm4 = vcmp.eq.s32.totalorder %v14744_v40, %v16883_v26  ;;  %v20592_v40 = vmov 0 }
 0x49a   : > { %v20585_v63 = vsel %vm17056_vm5, 4294967295, %v20584_v63  ;;  %12165 = vmatpush1.bf16.msk.msra.mxu1 %vm12164_vm0, %v20280_v10  ;;  %11959 = vmatprep.subr.msk.bf16.mxu0 %vm17038_vm2, %v20280_v10  ;;  %vm12168_vm15 = vmpackc.low %vm3933_vm12, %vm3929_vm9  ;;  %vm3937_vm0 = vcmp.eq.s32.totalorder %v14741_v39, %v16883_v26  ;;  %vm3944_vm12 = vcmp.eq.s32.totalorder %v14779_v44, %v16835_v48  ;;  %vm3948_vm9 = vcmp.eq.s32.totalorder %v14782_v46, %v16835_v48 }
 0x49b   : > { %12167 = vmatprep.subr.msk.bf16.mxu1 %vm12166_vm7, %v20280_v10  ;;  %vm17073_vm14 = vmpackc.low %vm3940_vm13, %vm3936_vm1  ;;  %vm3946_vm1 = vcmp.eq.s32.totalorder %v14779_v44, %v16849_v4  ;;  %vm3950_vm13 = vcmp.eq.s32.totalorder %v14782_v46, %v16849_v4  ;;  %v20590_v39 = vmov 0 }
 0x49c   : > { %v20587_v36 = vsel %vm17073_vm14, 4294967295, %v20586_v36  ;;  %vm12170_vm2 = vmpackc.low %vm3942_vm8, %vm3938_vm10  ;;  %vm3943_vm8 = vcmp.eq.s32.totalorder %v14779_v44, %v16867_v15 }
 0x49d   : > { %11961 = vmatpush1.bf16.msk.msra.mxu0 %vm17056_vm5, %v20280_v10  ;;  %vm17088_vm7 = vmpackc.low %vm3939_vm11, %vm3935_vm6  ;;  %vm3947_vm6 = vcmp.eq.s32.totalorder %v14782_v46, %v16867_v15  ;;  %vm3949_vm5 = vcmp.eq.s32.totalorder %v14782_v46, %v16883_v26  ;;  %v20596_v46 = vmov 0 }
 0x49e   : > { %v20589_v12 = vsel %vm17088_vm7, 4294967295, %v20588_v12  ;;  %12169 = vmatpush1.bf16.msk.msra.mxu1 %vm12168_vm15, %v20280_v10  ;;  %11963 = vmatprep.subr.msk.bf16.mxu0 %vm17073_vm14, %v20280_v10  ;;  %vm12172_vm10 = vmpackc.low %vm3941_vm4, %vm3937_vm0  ;;  %vm3945_vm15 = vcmp.eq.s32.totalorder %v14779_v44, %v16883_v26  ;;  %vm3952_vm4 = vcmp.eq.s32.totalorder %v14820_v49, %v16835_v48  ;;  %vm3956_vm0 = vcmp.eq.s32.totalorder %v14823_v50, %v16835_v48 }
 0x49f   : > { %12171 = vmatprep.subr.msk.bf16.mxu1 %vm12170_vm2, %v20280_v10  ;;  %vm17105_vm11 = vmpackc.low %vm3948_vm9, %vm3944_vm12  ;;  %vm3954_vm12 = vcmp.eq.s32.totalorder %v14820_v49, %v16849_v4  ;;  %vm3958_vm9 = vcmp.eq.s32.totalorder %v14823_v50, %v16849_v4  ;;  %v20594_v44 = vmov 0 }
 0x4a0   : > { %v20591_v39 = vsel %vm17105_vm11, 4294967295, %v20590_v39  ;;  %vm12174_vm14 = vmpackc.low %vm3950_vm13, %vm3946_vm1  ;;  %vm20023_vm13 = vcmp.eq.s32.totalorder %v14820_v49, %v16867_v15 }
 0x4a1   : > { %11965 = vmatpush1.bf16.msk.msra.mxu0 %vm17088_vm7, %v20280_v10  ;;  %vm17120_vm2 = vmpackc.low %vm3947_vm6, %vm3943_vm8  ;;  %vm3955_vm8 = vcmp.eq.s32.totalorder %v14823_v50, %v16867_v15  ;;  %vm3957_vm7 = vcmp.eq.s32.totalorder %v14823_v50, %v16883_v26  ;;  %v20598_v50 = vmov 0 }
 0x4a2   : > { %v20593_v40 = vsel %vm17120_vm2, 4294967295, %v20592_v40  ;;  %12173 = vmatpush1.bf16.msk.msra.mxu1 %vm12172_vm10, %v20280_v10  ;;  %11967 = vmatprep.subr.msk.bf16.mxu0 %vm17105_vm11, %v20280_v10  ;;  %vm12176_vm1 = vmpackc.low %vm3949_vm5, %vm3945_vm15  ;;  %vm3953_vm10 = vcmp.eq.s32.totalorder %v14820_v49, %v16883_v26  ;;  %vm3960_vm5 = vcmp.eq.s32.totalorder %v14858_v53, %v16835_v48  ;;  %vm3964_vm15 = vcmp.eq.s32.totalorder %v14861_v54, %v16835_v48  ;;  %v20691_v49 = vld [vmem:[#allocation106_spill] sm:$0xff] }
 0x4a3   : > { %12175 = vmatprep.subr.msk.bf16.mxu1 %vm12174_vm14, %v20280_v10  ;;  %vm17137_vm6 = vmpackc.low %vm3956_vm0, %vm3952_vm4  ;;  %vm3962_vm4 = vcmp.eq.s32.totalorder %v14858_v53, %v16849_v4  ;;  %vm3966_vm0 = vcmp.eq.s32.totalorder %v14861_v54, %v16849_v4 }
 0x4a4   : > { %v20595_v44 = vsel %vm17137_vm6, 4294967295, %v20594_v44  ;;  %vm12178_vm11 = vmpackc.low %vm3958_vm9, %vm3954_vm12  ;;  %vm3959_vm9 = vcmp.eq.s32.totalorder %v14858_v53, %v16867_v15 }
 0x4a5   : > { %11969 = vmatpush1.bf16.msk.msra.mxu0 %vm17120_vm2, %v20280_v10  ;;  %vm17155_vm14 = vmpackc.low %vm3955_vm8, %vm20023_vm13  ;;  %vm3963_vm8 = vcmp.eq.s32.totalorder %v14861_v54, %v16867_v15  ;;  %vm3965_vm2 = vcmp.eq.s32.totalorder %v14861_v54, %v16883_v26  ;;  %v20604_v54 = vmov 0 }
 0x4a6   : > { %v20597_v46 = vsel %vm17155_vm14, 4294967295, %v20596_v46  ;;  %12177 = vmatpush1.bf16.msk.msra.mxu1 %vm12176_vm1, %v20280_v10  ;;  %11971 = vmatprep.subr.msk.bf16.mxu0 %vm17137_vm6, %v20280_v10  ;;  %vm12180_vm12 = vmpackc.low %vm3957_vm7, %vm3953_vm10  ;;  %vm3961_vm1 = vcmp.eq.s32.totalorder %v14858_v53, %v16883_v26  ;;  %vm3968_vm7 = vcmp.eq.s32.totalorder %v14896_v57, %v16835_v48  ;;  %vm3972_vm10 = vcmp.eq.s32.totalorder %v14899_v58, %v16835_v48 }
 0x4a7   : > { %12179 = vmatprep.subr.msk.bf16.mxu1 %vm12178_vm11, %v20280_v10  ;;  %vm17172_vm13 = vmpackc.low %vm3964_vm15, %vm3960_vm5  ;;  %vm3970_vm5 = vcmp.eq.s32.totalorder %v14896_v57, %v16849_v4  ;;  %vm3974_vm15 = vcmp.eq.s32.totalorder %v14899_v58, %v16849_v4  ;;  %v20602_v53 = vmov 0 }
 0x4a8   : > { %v20599_v50 = vsel %vm17172_vm13, 4294967295, %v20598_v50  ;;  %vm12182_vm6 = vmpackc.low %vm3966_vm0, %vm3962_vm4  ;;  %vm3967_vm0 = vcmp.eq.s32.totalorder %v14896_v57, %v16867_v15 }
 0x4a9   : > { %11973 = vmatpush1.bf16.msk.msra.mxu0 %vm17155_vm14, %v20280_v10  ;;  %vm17187_vm11 = vmpackc.low %vm3963_vm8, %vm3959_vm9  ;;  %vm3971_vm9 = vcmp.eq.s32.totalorder %v14899_v58, %v16867_v15  ;;  %vm3973_vm14 = vcmp.eq.s32.totalorder %v14899_v58, %v16883_v26  ;;  %v20608_v58 = vmov 0 }
 0x4aa   : > { %v20601_v34 = vsel %vm17187_vm11, 4294967295, %v20600_v34  ;;  %12181 = vmatpush1.bf16.msk.msra.mxu1 %vm12180_vm12, %v20280_v10  ;;  %11975 = vmatprep.subr.msk.bf16.mxu0 %vm17172_vm13, %v20280_v10  ;;  %vm12184_vm4 = vmpackc.low %vm3965_vm2, %vm3961_vm1  ;;  %vm3969_vm12 = vcmp.eq.s32.totalorder %v14896_v57, %v16883_v26  ;;  %vm3976_vm2 = vcmp.eq.s32.totalorder %v14937_v61, %v16835_v48  ;;  %vm3980_vm1 = vcmp.eq.s32.totalorder %v14940_v62, %v16835_v48 }
 0x4ab   : > { %12183 = vmatprep.subr.msk.bf16.mxu1 %vm12182_vm6, %v20280_v10  ;;  %vm17204_vm8 = vmpackc.low %vm3972_vm10, %vm3968_vm7  ;;  %vm3978_vm7 = vcmp.eq.s32.totalorder %v14937_v61, %v16849_v4  ;;  %vm3982_vm10 = vcmp.eq.s32.totalorder %v14940_v62, %v16849_v4  ;;  %v20606_v57 = vmov 0 }
 0x4ac   : > { %v20603_v53 = vsel %vm17204_vm8, 4294967295, %v20602_v53  ;;  %vm12186_vm13 = vmpackc.low %vm3974_vm15, %vm3970_vm5  ;;  %vm3975_vm15 = vcmp.eq.s32.totalorder %v14937_v61, %v16867_v15 }
 0x4ad   : > { %11977 = vmatpush1.bf16.msk.msra.mxu0 %vm17187_vm11, %v20280_v10  ;;  %vm17219_vm6 = vmpackc.low %vm3971_vm9, %vm3967_vm0  ;;  %vm3979_vm0 = vcmp.eq.s32.totalorder %v14940_v62, %v16867_v15  ;;  %vm3981_vm11 = vcmp.eq.s32.totalorder %v14940_v62, %v16883_v26  ;;  %v20612_v62 = vmov 0 }
 0x4ae   : > { %v20605_v54 = vsel %vm17219_vm6, 4294967295, %v20604_v54  ;;  %12185 = vmatpush1.bf16.msk.msra.mxu1 %vm12184_vm4, %v20280_v10  ;;  %11979 = vmatprep.subr.msk.bf16.mxu0 %vm17204_vm8, %v20280_v10  ;;  %vm12188_vm5 = vmpackc.low %vm3973_vm14, %vm3969_vm12  ;;  %vm3977_vm4 = vcmp.eq.s32.totalorder %v14937_v61, %v16883_v26  ;;  %vm3984_vm14 = vcmp.eq.s32.totalorder %v14975_v0, %v16835_v48  ;;  %vm3988_vm12 = vcmp.eq.s32.totalorder %v14978_v3, %v16835_v48 }
 0x4af   : > { %12187 = vmatprep.subr.msk.bf16.mxu1 %vm12186_vm13, %v20280_v10  ;;  %vm17236_vm9 = vmpackc.low %vm3980_vm1, %vm3976_vm2  ;;  %vm3986_vm2 = vcmp.eq.s32.totalorder %v14975_v0, %v16849_v4  ;;  %vm3990_vm1 = vcmp.eq.s32.totalorder %v14978_v3, %v16849_v4  ;;  %v20610_v61 = vmov 0 }
 0x4b0   : > { %v20607_v57 = vsel %vm17236_vm9, 4294967295, %v20606_v57  ;;  %vm12190_vm8 = vmpackc.low %vm3982_vm10, %vm3978_vm7  ;;  %vm3983_vm10 = vcmp.eq.s32.totalorder %v14975_v0, %v16867_v15 }
 0x4b1   : > { %11981 = vmatpush1.bf16.msk.msra.mxu0 %vm17219_vm6, %v20280_v10  ;;  %vm17251_vm13 = vmpackc.low %vm3979_vm0, %vm3975_vm15  ;;  %vm3987_vm15 = vcmp.eq.s32.totalorder %v14978_v3, %v16867_v15  ;;  %vm3989_vm6 = vcmp.eq.s32.totalorder %v14978_v3, %v16883_v26  ;;  %v20616_v3 = vmov 0 }
 0x4b2   : > { %v20609_v58 = vsel %vm17251_vm13, 4294967295, %v20608_v58  ;;  %12189 = vmatpush1.bf16.msk.msra.mxu1 %vm12188_vm5, %v20280_v10  ;;  %11983 = vmatprep.subr.msk.bf16.mxu0 %vm17236_vm9, %v20280_v10  ;;  %vm12192_vm7 = vmpackc.low %vm3981_vm11, %vm3977_vm4  ;;  %vm3985_vm5 = vcmp.eq.s32.totalorder %v14975_v0, %v16883_v26  ;;  %vm3992_vm11 = vcmp.eq.s32.totalorder %v15013_v9, %v16835_v48  ;;  %vm3996_vm4 = vcmp.eq.s32.totalorder %v15016_v7, %v16835_v48 }
 0x4b3   : > { %12191 = vmatprep.subr.msk.bf16.mxu1 %vm12190_vm8, %v20280_v10  ;;  %vm17268_vm0 = vmpackc.low %vm3988_vm12, %vm3984_vm14  ;;  %vm3994_vm14 = vcmp.eq.s32.totalorder %v15013_v9, %v16849_v4  ;;  %vm3998_vm12 = vcmp.eq.s32.totalorder %v15016_v7, %v16849_v4  ;;  %v20614_v0 = vmov 0 }
 0x4b4   : > { %v20611_v61 = vsel %vm17268_vm0, 4294967295, %v20610_v61  ;;  %vm12194_vm9 = vmpackc.low %vm3990_vm1, %vm3986_vm2  ;;  %vm3991_vm1 = vcmp.eq.s32.totalorder %v15013_v9, %v16867_v15 }
 0x4b5   : > { %11985 = vmatpush1.bf16.msk.msra.mxu0 %vm17251_vm13, %v20280_v10  ;;  %vm17283_vm8 = vmpackc.low %vm3987_vm15, %vm3983_vm10  ;;  %vm3995_vm10 = vcmp.eq.s32.totalorder %v15016_v7, %v16867_v15  ;;  %vm3997_vm13 = vcmp.eq.s32.totalorder %v15016_v7, %v16883_v26  ;;  %v20620_v7 = vmov 0 }
 0x4b6   : > { %v20613_v62 = vsel %vm17283_vm8, 4294967295, %v20612_v62  ;;  %12193 = vmatpush1.bf16.msk.msra.mxu1 %vm12192_vm7, %v20280_v10  ;;  %11987 = vmatprep.subr.msk.bf16.mxu0 %vm17268_vm0, %v20280_v10  ;;  %vm12196_vm2 = vmpackc.low %vm3989_vm6, %vm3985_vm5  ;;  %vm3993_vm7 = vcmp.eq.s32.totalorder %v15013_v9, %v16883_v26  ;;  %vm4000_vm6 = vcmp.eq.s32.totalorder %v15051_v13, %v16835_v48  ;;  %vm4004_vm5 = vcmp.eq.s32.totalorder %v15054_v16, %v16835_v48 }
 0x4b7   : > { %12195 = vmatprep.subr.msk.bf16.mxu1 %vm12194_vm9, %v20280_v10  ;;  %vm17300_vm15 = vmpackc.low %vm3996_vm4, %vm3992_vm11  ;;  %vm4002_vm11 = vcmp.eq.s32.totalorder %v15051_v13, %v16849_v4  ;;  %vm4006_vm4 = vcmp.eq.s32.totalorder %v15054_v16, %v16849_v4  ;;  %v20618_v9 = vmov 0 }
 0x4b8   : > { %v20615_v0 = vsel %vm17300_vm15, 4294967295, %v20614_v0  ;;  %vm12198_vm0 = vmpackc.low %vm3998_vm12, %vm3994_vm14  ;;  %vm3999_vm12 = vcmp.eq.s32.totalorder %v15051_v13, %v16867_v15 }
 0x4b9   : > { %11989 = vmatpush1.bf16.msk.msra.mxu0 %vm17283_vm8, %v20280_v10  ;;  %vm17315_vm9 = vmpackc.low %vm3995_vm10, %vm3991_vm1  ;;  %vm4003_vm1 = vcmp.eq.s32.totalorder %v15054_v16, %v16867_v15  ;;  %vm4005_vm8 = vcmp.eq.s32.totalorder %v15054_v16, %v16883_v26  ;;  %v20624_v16 = vmov 0 }
 0x4ba   : > { %v20617_v3 = vsel %vm17315_vm9, 4294967295, %v20616_v3  ;;  %12197 = vmatpush1.bf16.msk.msra.mxu1 %vm12196_vm2, %v20280_v10  ;;  %11991 = vmatprep.subr.msk.bf16.mxu0 %vm17300_vm15, %v20280_v10  ;;  %vm12200_vm14 = vmpackc.low %vm3997_vm13, %vm3993_vm7  ;;  %vm4001_vm2 = vcmp.eq.s32.totalorder %v15051_v13, %v16883_v26  ;;  %vm4008_vm13 = vcmp.eq.s32.totalorder %v15089_v23, %v16835_v48  ;;  %vm4012_vm7 = vcmp.eq.s32.totalorder %v15092_v24, %v16835_v48 }
 0x4bb   : > { %12199 = vmatprep.subr.msk.bf16.mxu1 %vm12198_vm0, %v20280_v10  ;;  %vm17332_vm10 = vmpackc.low %vm4004_vm5, %vm4000_vm6  ;;  %vm4010_vm6 = vcmp.eq.s32.totalorder %v15089_v23, %v16849_v4  ;;  %vm4014_vm5 = vcmp.eq.s32.totalorder %v15092_v24, %v16849_v4  ;;  %v20622_v13 = vmov 0 }
 0x4bc   : > { %v20619_v9 = vsel %vm17332_vm10, 4294967295, %v20618_v9  ;;  %vm12202_vm15 = vmpackc.low %vm4006_vm4, %vm4002_vm11  ;;  %vm4007_vm4 = vcmp.eq.s32.totalorder %v15089_v23, %v16867_v15 }
 0x4bd   : > { %11993 = vmatpush1.bf16.msk.msra.mxu0 %vm17315_vm9, %v20280_v10  ;;  %vm17347_vm0 = vmpackc.low %vm4003_vm1, %vm3999_vm12  ;;  %vm4011_vm12 = vcmp.eq.s32.totalorder %v15092_v24, %v16867_v15  ;;  %vm4013_vm9 = vcmp.eq.s32.totalorder %v15092_v24, %v16883_v26  ;;  %v20628_v24 = vmov 0 }
 0x4be   : > { %v20621_v7 = vsel %vm17347_vm0, 4294967295, %v20620_v7  ;;  %12201 = vmatpush1.bf16.msk.msra.mxu1 %vm12200_vm14, %v20280_v10  ;;  %11995 = vmatprep.subr.msk.bf16.mxu0 %vm17332_vm10, %v20280_v10  ;;  %vm12204_vm11 = vmpackc.low %vm4005_vm8, %vm4001_vm2  ;;  %vm4009_vm14 = vcmp.eq.s32.totalorder %v15089_v23, %v16883_v26  ;;  %vm4016_vm8 = vcmp.eq.s32.totalorder %v15127_v31, %v16835_v48  ;;  %vm4020_vm2 = vcmp.eq.s32.totalorder %v15130_v32, %v16835_v48 }
 0x4bf   : > { %12203 = vmatprep.subr.msk.bf16.mxu1 %vm12202_vm15, %v20280_v10  ;;  %vm17364_vm1 = vmpackc.low %vm4012_vm7, %vm4008_vm13  ;;  %vm4018_vm13 = vcmp.eq.s32.totalorder %v15127_v31, %v16849_v4  ;;  %vm4022_vm7 = vcmp.eq.s32.totalorder %v15130_v32, %v16849_v4  ;;  %v20626_v23 = vmov 0 }
 0x4c0   : > { %v20623_v13 = vsel %vm17364_vm1, 4294967295, %v20622_v13  ;;  %vm12206_vm10 = vmpackc.low %vm4014_vm5, %vm4010_vm6  ;;  %vm4015_vm5 = vcmp.eq.s32.totalorder %v15127_v31, %v16867_v15 }
 0x4c1   : > { %11997 = vmatpush1.bf16.msk.msra.mxu0 %vm17347_vm0, %v20280_v10  ;;  %vm17379_vm15 = vmpackc.low %vm4011_vm12, %vm4007_vm4  ;;  %vm4019_vm4 = vcmp.eq.s32.totalorder %v15130_v32, %v16867_v15  ;;  %vm4021_vm0 = vcmp.eq.s32.totalorder %v15130_v32, %v16883_v26  ;;  %v20632_v32 = vmov 0 }
 0x4c2   : > { %v20625_v16 = vsel %vm17379_vm15, 4294967295, %v20624_v16  ;;  %12205 = vmatpush1.bf16.msk.msra.mxu1 %vm12204_vm11, %v20280_v10  ;;  %11999 = vmatprep.subr.msk.bf16.mxu0 %vm17364_vm1, %v20280_v10  ;;  %vm12208_vm6 = vmpackc.low %vm4013_vm9, %vm4009_vm14  ;;  %vm4017_vm11 = vcmp.eq.s32.totalorder %v15127_v31, %v16883_v26  ;;  %vm4024_vm9 = vcmp.eq.s32.totalorder %v15213_v30, %v16835_v48  ;;  %vm4028_vm14 = vcmp.eq.s32.totalorder %v15216_v20, %v16835_v48 }
 0x4c3   : > { %12207 = vmatprep.subr.msk.bf16.mxu1 %vm12206_vm10, %v20280_v10  ;;  %vm17396_vm12 = vmpackc.low %vm4020_vm2, %vm4016_vm8  ;;  %vm4026_vm8 = vcmp.eq.s32.totalorder %v15213_v30, %v16849_v4  ;;  %vm4030_vm2 = vcmp.eq.s32.totalorder %v15216_v20, %v16849_v4  ;;  %v20630_v31 = vmov 0 }
 0x4c4   : > { %v20627_v23 = vsel %vm17396_vm12, 4294967295, %v20626_v23  ;;  %vm12210_vm1 = vmpackc.low %vm4022_vm7, %vm4018_vm13  ;;  %vm4023_vm7 = vcmp.eq.s32.totalorder %v15213_v30, %v16867_v15 }
 0x4c5   : > { %12001 = vmatpush1.bf16.msk.msra.mxu0 %vm17379_vm15, %v20280_v10  ;;  %vm17411_vm10 = vmpackc.low %vm4019_vm4, %vm4015_vm5  ;;  %vm4027_vm5 = vcmp.eq.s32.totalorder %v15216_v20, %v16867_v15  ;;  %vm4029_vm15 = vcmp.eq.s32.totalorder %v15216_v20, %v16883_v26  ;;  %v20634_v20 = vmov 0 }
 0x4c6   : > { %v20629_v24 = vsel %vm17411_vm10, 4294967295, %v20628_v24  ;;  %12209 = vmatpush1.bf16.msk.msra.mxu1 %vm12208_vm6, %v20280_v10  ;;  %12003 = vmatprep.subr.msk.bf16.mxu0 %vm17396_vm12, %v20280_v10  ;;  %vm12212_vm13 = vmpackc.low %vm4021_vm0, %vm4017_vm11  ;;  %vm4025_vm6 = vcmp.eq.s32.totalorder %v15213_v30, %v16883_v26  ;;  %vm4032_vm0 = vcmp.eq.s32.totalorder %v15242_v25, %v16835_v48  ;;  %vm4036_vm11 = vcmp.eq.s32.totalorder %v15245_v19, %v16835_v48 }
 0x4c7   : > { %12211 = vmatprep.subr.msk.bf16.mxu1 %vm12210_vm1, %v20280_v10  ;;  %vm17428_vm4 = vmpackc.low %vm4028_vm14, %vm4024_vm9  ;;  %vm4034_vm9 = vcmp.eq.s32.totalorder %v15242_v25, %v16849_v4  ;;  %vm4038_vm14 = vcmp.eq.s32.totalorder %v15245_v19, %v16849_v4  ;;  %v20636_v30 = vmov 0 }
 0x4c8   : > { %v20631_v31 = vsel %vm17428_vm4, 4294967295, %v20630_v31  ;;  %vm12214_vm12 = vmpackc.low %vm4030_vm2, %vm4026_vm8  ;;  %vm4031_vm2 = vcmp.eq.s32.totalorder %v15242_v25, %v16867_v15 }
 0x4c9   : > { %12005 = vmatpush1.bf16.msk.msra.mxu0 %vm17411_vm10, %v20280_v10  ;;  %vm17443_vm1 = vmpackc.low %vm4027_vm5, %vm4023_vm7  ;;  %vm4035_vm7 = vcmp.eq.s32.totalorder %v15245_v19, %v16867_v15  ;;  %vm4037_vm10 = vcmp.eq.s32.totalorder %v15245_v19, %v16883_v26  ;;  %v20661_v19 = vmov 0 }
 0x4ca   : > { %v20633_v32 = vsel %vm17443_vm1, 4294967295, %v20632_v32  ;;  %12213 = vmatpush1.bf16.msk.msra.mxu1 %vm12212_vm13, %v20280_v10  ;;  %12007 = vmatprep.subr.msk.bf16.mxu0 %vm17428_vm4, %v20280_v10  ;;  %vm12216_vm8 = vmpackc.low %vm4029_vm15, %vm4025_vm6  ;;  %vm4033_vm13 = vcmp.eq.s32.totalorder %v15242_v25, %v16883_v26  ;;  %vm4040_vm15 = vcmp.eq.s32.totalorder %v15273_v8, %v16835_v48  ;;  %vm4044_vm6 = vcmp.eq.s32.totalorder %v15276_v5, %v16835_v48 }
 0x4cb   : > { %12215 = vmatprep.subr.msk.bf16.mxu1 %vm12214_vm12, %v20280_v10  ;;  %vm17460_vm5 = vmpackc.low %vm4036_vm11, %vm4032_vm0  ;;  %vm4042_vm0 = vcmp.eq.s32.totalorder %v15273_v8, %v16849_v4  ;;  %vm4046_vm11 = vcmp.eq.s32.totalorder %v15276_v5, %v16849_v4  ;;  %v20641_v25 = vmov 0 }
 0x4cc   : > { %v20635_v20 = vsel %vm17460_vm5, 4294967295, %v20634_v20  ;;  %vm12218_vm4 = vmpackc.low %vm4038_vm14, %vm4034_vm9  ;;  %vm4039_vm14 = vcmp.eq.s32.totalorder %v15273_v8, %v16867_v15 }
 0x4cd   : > { %12009 = vmatpush1.bf16.msk.msra.mxu0 %vm17443_vm1, %v20280_v10  ;;  %vm17475_vm12 = vmpackc.low %vm4035_vm7, %vm4031_vm2  ;;  %vm4043_vm2 = vcmp.eq.s32.totalorder %v15276_v5, %v16867_v15  ;;  %vm4056_vm1 = vcmp.eq.s32.totalorder %v15329_v11, %v16835_v48 }
 0x4ce   : > { %v20637_v30 = vsel %vm17475_vm12, 4294967295, %v20636_v30  ;;  %12217 = vmatpush1.bf16.msk.msra.mxu1 %vm12216_vm8, %v20280_v10  ;;  %12011 = vmatprep.subr.msk.bf16.mxu0 %vm17460_vm5, %v20280_v10  ;;  %vm17487_vm9 = vmpackc.low %vm4037_vm10, %vm4033_vm13  ;;  %vm4041_vm8 = vcmp.eq.s32.totalorder %v15273_v8, %v16883_v26  ;;  %vm4045_vm10 = vcmp.eq.s32.totalorder %v15276_v5, %v16883_v26  ;;  %vm4048_vm5 = vcmp.eq.s32.totalorder %v15295_v18, %v16835_v48 }
 0x4cf   : > { %20638 = vst [vmem:[#allocation166_spill] sm:$0xff] %v20637_v30  ;;  %12219 = vmatprep.subr.msk.bf16.mxu1 %vm12218_vm4, %v20280_v10  ;;  %vm17496_vm7 = vmpackc.low %vm4044_vm6, %vm4040_vm15  ;;  %vm4052_vm4 = vcmp.eq.s32.totalorder %v15298_v2, %v16835_v48  ;;  %v20646_v5 = vmov 0  ;;  %vm4050_vm6 = vcmp.eq.s32.totalorder %v15295_v18, %v16849_v4  ;;  %v20651_v8 = vmov 0 }
 0x4d0   : > { %v20642_v25 = vsel %vm17496_vm7, 4294967295, %v20641_v25  ;;  %4800 = vmatmul.mubr.f32.vlgmr.msra.gmra.mrb[12].mxu0 %v15318_v56  ;;  %vm17505_vm13 = vmpackc.low %vm4046_vm11, %vm4042_vm0  ;;  %vm4054_vm0 = vcmp.eq.s32.totalorder %v15298_v2, %v16849_v4 }
 0x4d1   : > { %20643 = vst [vmem:[#allocation167_spill] sm:$0xff] %v20642_v25  ;;  %5084 = vmatmul.mubr.f32.vlgmr.msra.gmra.mrb[8].mxu1 %v15318_v56  ;;  %12013 = vmatpush1.bf16.msk.msra.mxu0 %vm17475_vm12, %v20280_v10  ;;  %vm17517_vm15 = vmpackc.low %vm4043_vm2, %vm4039_vm14  ;;  %vm4047_vm14 = vcmp.eq.s32.totalorder %v15295_v18, %v16867_v15  ;;  %vm4051_vm2 = vcmp.eq.s32.totalorder %v15298_v2, %v16867_v15  ;;  %v20668_v56 = vmov 0 }
 0x4d2   : > { %v20647_v5 = vsel %vm17517_vm15, 4294967295, %v20646_v5  ;;  %4870 = vmatprep.mubr.f32.mxu0 %v15448_v38  ;;  %12221 = vmatpush1.bf16.msk.msra.mxu1 %vm17487_vm9, %v20280_v10  ;;  %vm17529_vm11 = vmpackc.low %vm4045_vm10, %vm4041_vm8  ;;  %vm4049_vm9 = vcmp.eq.s32.totalorder %v15295_v18, %v16883_v26  ;;  %vm4053_vm8 = vcmp.eq.s32.totalorder %v15298_v2, %v16883_v26  ;;  %v20655_v18 = vmov 0 }
 0x4d3   : > { %20648 = vst [vmem:[#allocation168_spill] sm:$0xff] %v20647_v5  ;;  %5154 = vmatprep.mubr.f32.mxu1 %v15448_v38  ;;  %12015 = vmatprep.subr.msk.bf16.mxu0 %vm17496_vm7, %v20280_v10  ;;  %vm17541_vm12 = vmpackc.low %vm4052_vm4, %vm4048_vm5  ;;  %v20654_v38 = vld [vmem:[#allocation89_spill] sm:$0xff]  ;;  %vm4058_vm7 = vcmp.eq.s32.totalorder %v15329_v11, %v16849_v4  ;;  %v20658_v2 = vmov 0 }
 0x4d4   : > { %v20652_v8 = vsel %vm17541_vm12, 4294967295, %v20651_v8  ;;  %12223 = vmatprep.subr.msk.bf16.mxu1 %vm17505_vm13, %v20280_v10  ;;  %vm12226_vm10 = vmpackc.low %vm4054_vm0, %vm4050_vm6  ;;  %vm4060_vm5 = vcmp.eq.s32.totalorder %v20654_v38, %v16835_v48  ;;  %vm4062_vm13 = vcmp.eq.s32.totalorder %v20654_v38, %v16849_v4  ;;  %vm4055_vm0 = vcmp.eq.s32.totalorder %v15329_v11, %v16867_v15 }
 0x4d5   : > { %20653 = vst [vmem:[#allocation169_spill] sm:$0xff] %v20652_v8  ;;  %12017 = vmatpush1.bf16.msk.msra.mxu0 %vm17517_vm15, %v20280_v10  ;;  %vm17559_vm4 = vmpackc.low %vm4051_vm2, %vm4047_vm14  ;;  %vm4059_vm14 = vcmp.eq.s32.totalorder %v20654_v38, %v16867_v15  ;;  %vm4061_vm15 = vcmp.eq.s32.totalorder %v20654_v38, %v16883_v26  ;;  %v20675_v38 = vld [vmem:[#allocation98_spill] sm:$0xff] }
 0x4d6   : > { %v20656_v18 = vsel %vm17559_vm4, 4294967295, %v20655_v18  ;;  %12225 = vmatpush1.bf16.msk.msra.mxu1 %vm17529_vm11, %v20280_v10  ;;  %12019 = vmatprep.subr.msk.bf16.mxu0 %vm17541_vm12, %v20280_v10  ;;  %vm12228_vm6 = vmpackc.low %vm4053_vm8, %vm4049_vm9  ;;  %vm4057_vm11 = vcmp.eq.s32.totalorder %v15329_v11, %v16883_v26  ;;  %vm4064_vm9 = vcmp.eq.s32.totalorder %v15411_v47, %v16835_v48  ;;  %vm4068_vm8 = vcmp.eq.s32.totalorder %v15414_v43, %v16835_v48 }
 0x4d7   : > { %20657 = vst [vmem:[#allocation89_spill] sm:$0xff] %v20656_v18  ;;  %12227 = vmatprep.subr.msk.bf16.mxu1 %vm12226_vm10, %v20280_v10  ;;  %vm17578_vm2 = vmpackc.low %vm4060_vm5, %vm4056_vm1  ;;  %vm4066_vm10 = vcmp.eq.s32.totalorder %v15411_v47, %v16849_v4  ;;  %v20664_v11 = vmov 0 }
 0x4d8   : > { %v20659_v2 = vsel %vm17578_vm2, 4294967295, %v20658_v2  ;;  %vm12230_vm12 = vmpackc.low %vm4062_vm13, %vm4058_vm7  ;;  %vm4070_vm7 = vcmp.eq.s32.totalorder %v15414_v43, %v16849_v4  ;;  %vm4063_vm13 = vcmp.eq.s32.totalorder %v15411_v47, %v16867_v15 }
 0x4d9   : > { %20660 = vst [vmem:[#allocation170_spill] sm:$0xff] %v20659_v2  ;;  %12021 = vmatpush1.bf16.msk.msra.mxu0 %vm17559_vm4, %v20280_v10  ;;  %vm17593_vm1 = vmpackc.low %vm4059_vm14, %vm4055_vm0  ;;  %vm4067_vm0 = vcmp.eq.s32.totalorder %v15414_v43, %v16867_v15  ;;  %vm4069_vm4 = vcmp.eq.s32.totalorder %v15414_v43, %v16883_v26  ;;  %v20671_v43 = vmov 0 }
 0x4da   : > { %v20662_v19 = vsel %vm17593_vm1, 4294967295, %v20661_v19  ;;  %12229 = vmatpush1.bf16.msk.msra.mxu1 %vm12228_vm6, %v20280_v10  ;;  %12023 = vmatprep.subr.msk.bf16.mxu0 %vm17578_vm2, %v20280_v10  ;;  %vm12232_vm5 = vmpackc.low %vm4061_vm15, %vm4057_vm11  ;;  %vm4065_vm6 = vcmp.eq.s32.totalorder %v15411_v47, %v16883_v26  ;;  %vm4072_vm15 = vcmp.eq.s32.totalorder %v15469_v60, %v16835_v48  ;;  %vm4076_vm11 = vcmp.eq.s32.totalorder %v20667_v6, %v16835_v48  ;;  %v20674_v47 = vld [vmem:[#allocation97_spill] sm:$0xff] }
 0x4db   : > { %20663 = vst [vmem:[#allocation171_spill] sm:$0xff] %v20662_v19  ;;  %12231 = vmatprep.subr.msk.bf16.mxu1 %vm12230_vm12, %v20280_v10  ;;  %vm17610_vm14 = vmpackc.low %vm4068_vm8, %vm4064_vm9  ;;  %vm4074_vm9 = vcmp.eq.s32.totalorder %v15469_v60, %v16849_v4  ;;  %vm4078_vm8 = vcmp.eq.s32.totalorder %v20667_v6, %v16849_v4 }
 0x4dc   : > { %v20665_v11 = vsel %vm17610_vm14, 4294967295, %v20664_v11  ;;  %vm12234_vm2 = vmpackc.low %vm4070_vm7, %vm4066_vm10  ;;  %vm4071_vm7 = vcmp.eq.s32.totalorder %v15469_v60, %v16867_v15 }
 0x4dd   : > { %20666 = vst [vmem:[#allocation172_spill] sm:$0xff] %v20665_v11  ;;  %12025 = vmatpush1.bf16.msk.msra.mxu0 %vm17593_vm1, %v20280_v10  ;;  %vm17625_vm12 = vmpackc.low %vm4067_vm0, %vm4063_vm13  ;;  %vm4075_vm13 = vcmp.eq.s32.totalorder %v20667_v6, %v16867_v15  ;;  %vm4077_vm1 = vcmp.eq.s32.totalorder %v20667_v6, %v16883_v26  ;;  %v20682_v6 = vld [vmem:[#allocation101_spill] sm:$0xff]  ;;  %v20799_v11 = vld [vmem:[#allocation47_spill] sm:$0xff] }
 0x4de   : > { %v20669_v56 = vsel %vm17625_vm12, 4294967295, %v20668_v56  ;;  %12233 = vmatpush1.bf16.msk.msra.mxu1 %vm12232_vm5, %v20280_v10  ;;  %12027 = vmatprep.subr.msk.bf16.mxu0 %vm17610_vm14, %v20280_v10  ;;  %vm12236_vm10 = vmpackc.low %vm4069_vm4, %vm4065_vm6  ;;  %vm4073_vm5 = vcmp.eq.s32.totalorder %v15469_v60, %v16883_v26  ;;  %vm4080_vm4 = vcmp.eq.s32.totalorder %v20674_v47, %v16835_v48  ;;  %vm4084_vm6 = vcmp.eq.s32.totalorder %v20675_v38, %v16835_v48 }
 0x4df   : > { %20670 = vst [vmem:[#allocation94_spill] sm:$0xff] %v20669_v56  ;;  %12235 = vmatprep.subr.msk.bf16.mxu1 %vm12234_vm2, %v20280_v10  ;;  %vm17642_vm0 = vmpackc.low %vm4076_vm11, %vm4072_vm15  ;;  %vm4082_vm15 = vcmp.eq.s32.totalorder %v20674_v47, %v16849_v4  ;;  %vm4086_vm11 = vcmp.eq.s32.totalorder %v20675_v38, %v16849_v4  ;;  %v20679_v60 = vmov 0 }
 0x4e0   : > { %v20672_v43 = vsel %vm17642_vm0, 4294967295, %v20671_v43  ;;  %vm12238_vm14 = vmpackc.low %vm4078_vm8, %vm4074_vm9  ;;  %vm4079_vm8 = vcmp.eq.s32.totalorder %v20674_v47, %v16867_v15 }
 0x4e1   : > { %20673 = vst [vmem:[#allocation173_spill] sm:$0xff] %v20672_v43  ;;  %12029 = vmatpush1.bf16.msk.msra.mxu0 %vm17625_vm12, %v20280_v10  ;;  %vm17657_vm2 = vmpackc.low %vm4075_vm13, %vm4071_vm7  ;;  %vm4083_vm7 = vcmp.eq.s32.totalorder %v20675_v38, %v16867_v15  ;;  %vm4085_vm12 = vcmp.eq.s32.totalorder %v20675_v38, %v16883_v26  ;;  %v20690_v38 = vld [vmem:[#allocation105_spill] sm:$0xff] }
 0x4e2   : > { %v20677_v22 = vsel %vm17657_vm2, 4294967295, %v20676_v22  ;;  %12237 = vmatpush1.bf16.msk.msra.mxu1 %vm12236_vm10, %v20280_v10  ;;  %12031 = vmatprep.subr.msk.bf16.mxu0 %vm17642_vm0, %v20280_v10  ;;  %vm12240_vm9 = vmpackc.low %vm4077_vm1, %vm4073_vm5  ;;  %vm4081_vm10 = vcmp.eq.s32.totalorder %v20674_v47, %v16883_v26  ;;  %vm4088_vm1 = vcmp.eq.s32.totalorder %v20682_v6, %v16835_v48  ;;  %vm4092_vm5 = vcmp.eq.s32.totalorder %v20683_v35, %v16835_v48 }
 0x4e3   : > { %20678 = vst [vmem:[#allocation97_spill] sm:$0xff] %v20677_v22  ;;  %12239 = vmatprep.subr.msk.bf16.mxu1 %vm12238_vm14, %v20280_v10  ;;  %vm17674_vm13 = vmpackc.low %vm4084_vm6, %vm4080_vm4  ;;  %vm4090_vm4 = vcmp.eq.s32.totalorder %v20682_v6, %v16849_v4  ;;  %vm4094_vm6 = vcmp.eq.s32.totalorder %v20683_v35, %v16849_v4  ;;  %v20687_v47 = vmov 0  ;;  %v5307_v22 = vld [vmem:[#allocation6] sm:$0xff] }
 0x4e4   : > { %v20680_v60 = vsel %vm17674_vm13, 4294967295, %v20679_v60  ;;  %vm12242_vm0 = vmpackc.low %vm4086_vm11, %vm4082_vm15  ;;  %vm4087_vm11 = vcmp.eq.s32.totalorder %v20682_v6, %v16867_v15 }
 0x4e5   : > { %20681 = vst [vmem:[#allocation98_spill] sm:$0xff] %v20680_v60  ;;  %12033 = vmatpush1.bf16.msk.msra.mxu0 %vm17657_vm2, %v20280_v10  ;;  %vm17689_vm14 = vmpackc.low %vm4083_vm7, %vm4079_vm8  ;;  %vm4091_vm8 = vcmp.eq.s32.totalorder %v20683_v35, %v16867_v15  ;;  %vm4093_vm2 = vcmp.eq.s32.totalorder %v20683_v35, %v16883_v26  ;;  %v20692_v60 = vmov 0  ;;  %v20695_v35 = vmov 0 }
 0x4e6   : > { %v20685_v14 = vsel %vm17689_vm14, 4294967295, %v20684_v14  ;;  %12241 = vmatpush1.bf16.msk.msra.mxu1 %vm12240_vm9, %v20280_v10  ;;  %12035 = vmatprep.subr.msk.bf16.mxu0 %vm17674_vm13, %v20280_v10  ;;  %vm12244_vm15 = vmpackc.low %vm4085_vm12, %vm4081_vm10  ;;  %vm4089_vm9 = vcmp.eq.s32.totalorder %v20682_v6, %v16883_v26  ;;  %vm4096_vm12 = vcmp.eq.s32.totalorder %v20690_v38, %v16835_v48  ;;  %vm4100_vm10 = vcmp.eq.s32.totalorder %v20691_v49, %v16835_v48  ;;  %v20698_v6 = vld [vmem:[#allocation109_spill] sm:$0xff] }
 0x4e7   : > { %20686 = vst [vmem:[#allocation101_spill] sm:$0xff] %v20685_v14  ;;  %12243 = vmatprep.subr.msk.bf16.mxu1 %vm12242_vm0, %v20280_v10  ;;  %vm17706_vm7 = vmpackc.low %vm4092_vm5, %vm4088_vm1  ;;  %vm4098_vm1 = vcmp.eq.s32.totalorder %v20690_v38, %v16849_v4  ;;  %vm4102_vm5 = vcmp.eq.s32.totalorder %v20691_v49, %v16849_v4  ;;  %v20700_v14 = vmov 0 }
 0x4e8   : > { %v20688_v47 = vsel %vm17706_vm7, 4294967295, %v20687_v47  ;;  %vm12246_vm13 = vmpackc.low %vm4094_vm6, %vm4090_vm4  ;;  %vm4095_vm6 = vcmp.eq.s32.totalorder %v20690_v38, %v16867_v15 }
 0x4e9   : > { %20689 = vst [vmem:[#allocation102_spill] sm:$0xff] %v20688_v47  ;;  %12037 = vmatpush1.bf16.msk.msra.mxu0 %vm17689_vm14, %v20280_v10  ;;  %vm17721_vm0 = vmpackc.low %vm4091_vm8, %vm4087_vm11  ;;  %vm4099_vm11 = vcmp.eq.s32.totalorder %v20691_v49, %v16867_v15  ;;  %vm4101_vm14 = vcmp.eq.s32.totalorder %v20691_v49, %v16883_v26  ;;  %v20699_v47 = vld [vmem:[#allocation110_spill] sm:$0xff]  ;;  %v20703_v49 = vmov 0 }
 0x4ea   : > { %v20693_v60 = vsel %vm17721_vm0, 4294967295, %v20692_v60  ;;  %12245 = vmatpush1.bf16.msk.msra.mxu1 %vm12244_vm15, %v20280_v10  ;;  %12039 = vmatprep.subr.msk.bf16.mxu0 %vm17706_vm7, %v20280_v10  ;;  %vm12248_vm4 = vmpackc.low %vm4093_vm2, %vm4089_vm9  ;;  %vm4097_vm15 = vcmp.eq.s32.totalorder %v20690_v38, %v16883_v26  ;;  %vm4104_vm2 = vcmp.eq.s32.totalorder %v20698_v6, %v16835_v48  ;;  %vm4108_vm9 = vcmp.eq.s32.totalorder %v20699_v47, %v16835_v48  ;;  %v20706_v38 = vld [vmem:[#allocation113_spill] sm:$0xff] }
 0x4eb   : > { %20694 = vst [vmem:[#allocation105_spill] sm:$0xff] %v20693_v60  ;;  %12247 = vmatprep.subr.msk.bf16.mxu1 %vm12246_vm13, %v20280_v10  ;;  %vm17738_vm8 = vmpackc.low %vm4100_vm10, %vm4096_vm12  ;;  %vm4106_vm12 = vcmp.eq.s32.totalorder %v20698_v6, %v16849_v4  ;;  %vm4110_vm10 = vcmp.eq.s32.totalorder %v20699_v47, %v16849_v4  ;;  %v20708_v60 = vmov 0 }
 0x4ec   : > { %v20696_v35 = vsel %vm17738_vm8, 4294967295, %v20695_v35  ;;  %vm12250_vm7 = vmpackc.low %vm4102_vm5, %vm4098_vm1  ;;  %vm4103_vm5 = vcmp.eq.s32.totalorder %v20698_v6, %v16867_v15 }
 0x4ed   : > { %20697 = vst [vmem:[#allocation106_spill] sm:$0xff] %v20696_v35  ;;  %12041 = vmatpush1.bf16.msk.msra.mxu0 %vm17721_vm0, %v20280_v10  ;;  %vm17753_vm13 = vmpackc.low %vm4099_vm11, %vm4095_vm6  ;;  %vm4107_vm6 = vcmp.eq.s32.totalorder %v20699_v47, %v16867_v15  ;;  %vm4109_vm0 = vcmp.eq.s32.totalorder %v20699_v47, %v16883_v26  ;;  %v20707_v35 = vld [vmem:[#allocation114_spill] sm:$0xff]  ;;  %v20711_v47 = vld [vmem:[#allocation117_spill] sm:$0xff] }
 0x4ee   : > { %v20701_v14 = vsel %vm17753_vm13, 4294967295, %v20700_v14  ;;  %12249 = vmatpush1.bf16.msk.msra.mxu1 %vm12248_vm4, %v20280_v10  ;;  %12043 = vmatprep.subr.msk.bf16.mxu0 %vm17738_vm8, %v20280_v10  ;;  %vm12252_vm1 = vmpackc.low %vm4101_vm14, %vm4097_vm15  ;;  %vm4105_vm4 = vcmp.eq.s32.totalorder %v20698_v6, %v16883_v26  ;;  %vm4112_vm14 = vcmp.eq.s32.totalorder %v20706_v38, %v16835_v48  ;;  %vm4116_vm15 = vcmp.eq.s32.totalorder %v20707_v35, %v16835_v48  ;;  %v20712_v6 = vld [vmem:[#allocation118_spill] sm:$0xff] }
 0x4ef   : > { %20702 = vst [vmem:[#allocation109_spill] sm:$0xff] %v20701_v14  ;;  %12251 = vmatprep.subr.msk.bf16.mxu1 %vm12250_vm7, %v20280_v10  ;;  %vm17770_vm11 = vmpackc.low %vm4108_vm9, %vm4104_vm2  ;;  %vm4114_vm2 = vcmp.eq.s32.totalorder %v20706_v38, %v16849_v4  ;;  %vm4118_vm9 = vcmp.eq.s32.totalorder %v20707_v35, %v16849_v4 }
 0x4f0   : > { %v20704_v49 = vsel %vm17770_vm11, 4294967295, %v20703_v49  ;;  %vm12254_vm8 = vmpackc.low %vm4110_vm10, %vm4106_vm12  ;;  %vm4111_vm10 = vcmp.eq.s32.totalorder %v20706_v38, %v16867_v15 }
 0x4f1   : > { %20705 = vst [vmem:[#allocation110_spill] sm:$0xff] %v20704_v49  ;;  %12045 = vmatpush1.bf16.msk.msra.mxu0 %vm17753_vm13, %v20280_v10  ;;  %vm17785_vm7 = vmpackc.low %vm4107_vm6, %vm4103_vm5  ;;  %vm4115_vm5 = vcmp.eq.s32.totalorder %v20707_v35, %v16867_v15  ;;  %vm4113_vm13 = vcmp.eq.s32.totalorder %v20706_v38, %v16883_v26  ;;  %v20714_v38 = vld [vmem:[#allocation121_spill] sm:$0xff]  ;;  %v20732_v49 = vld [vmem:[#allocation130_spill] sm:$0xff] }
 0x4f2   : > { %v20709_v60 = vsel %vm17785_vm7, 4294967295, %v20708_v60  ;;  %12253 = vmatpush1.bf16.msk.msra.mxu1 %vm12252_vm1, %v20280_v10  ;;  %12047 = vmatprep.subr.msk.bf16.mxu0 %vm17770_vm11, %v20280_v10  ;;  %vm12256_vm12 = vmpackc.low %vm4109_vm0, %vm4105_vm4  ;;  %vm4117_vm1 = vcmp.eq.s32.totalorder %v20707_v35, %v16883_v26  ;;  %vm4120_vm11 = vcmp.eq.s32.totalorder %v20711_v47, %v16835_v48  ;;  %vm4124_vm0 = vcmp.eq.s32.totalorder %v20712_v6, %v16835_v48  ;;  %v20713_v35 = vld [vmem:[#allocation120_spill] sm:$0xff] }
 0x4f3   : > { %20710 = vst [vmem:[#allocation113_spill] sm:$0xff] %v20709_v60  ;;  %12255 = vmatprep.subr.msk.bf16.mxu1 %vm12254_vm8, %v20280_v10  ;;  %vm12050_vm6 = vmpackc.low %vm4116_vm15, %vm4112_vm14  ;;  %vm4122_vm8 = vcmp.eq.s32.totalorder %v20711_v47, %v16849_v4  ;;  %vm4126_vm14 = vcmp.eq.s32.totalorder %v20712_v6, %v16849_v4  ;;  %v20741_v60 = vld [vmem:[#allocation136_spill] sm:$0xff] }
 0x4f4   : > { %vm12258_vm3 = vmpackc.low %vm4118_vm9, %vm4114_vm2  ;;  %vm4119_vm2 = vcmp.eq.s32.totalorder %v20711_v47, %v16867_v15  ;;  %vm4123_vm9 = vcmp.eq.s32.totalorder %v20712_v6, %v16867_v15 }
 0x4f5   : > { %12049 = vmatpush1.bf16.msk.msra.mxu0 %vm17785_vm7, %v20280_v10  ;;  %vm12052_vm4 = vmpackc.low %vm4115_vm5, %vm4111_vm10  ;;  %vm4121_vm5 = vcmp.eq.s32.totalorder %v20711_v47, %v16883_v26  ;;  %vm4125_vm7 = vcmp.eq.s32.totalorder %v20712_v6, %v16883_v26  ;;  %v20715_v47 = vld [vmem:[#allocation122_spill] sm:$0xff]  ;;  %v20716_v6 = vld [vmem:[#allocation123_spill] sm:$0xff] }
 0x4f6   : > { %12257 = vmatpush1.bf16.msk.msra.mxu1 %vm12256_vm12, %v20280_v10  ;;  %12051 = vmatprep.subr.msk.bf16.mxu0 %vm12050_vm6, %v20280_v10  ;;  %vm12260_vm15 = vmpackc.low %vm4117_vm1, %vm4113_vm13  ;;  %vm4128_vm6 = vcmp.eq.s32.totalorder %v20713_v35, %v16835_v48  ;;  %vm4132_vm13 = vcmp.eq.s32.totalorder %v20714_v38, %v16835_v48 }
 0x4f7   : > { %12259 = vmatprep.subr.msk.bf16.mxu1 %vm12258_vm3, %v20280_v10  ;;  %vm12054_vm10 = vmpackc.low %vm4124_vm0, %vm4120_vm11  ;;  %vm4130_vm3 = vcmp.eq.s32.totalorder %v20713_v35, %v16849_v4  ;;  %vm4134_vm11 = vcmp.eq.s32.totalorder %v20714_v38, %v16849_v4 }
 0x4f8   : > { %vm12262_vm12 = vmpackc.low %vm4126_vm14, %vm4122_vm8  ;;  %vm4127_vm8 = vcmp.eq.s32.totalorder %v20713_v35, %v16867_v15  ;;  %vm4131_vm14 = vcmp.eq.s32.totalorder %v20714_v38, %v16867_v15 }
 0x4f9   : > { %12053 = vmatpush1.bf16.msk.msra.mxu0 %vm12052_vm4, %v20280_v10  ;;  %vm12056_vm1 = vmpackc.low %vm4123_vm9, %vm4119_vm2  ;;  %vm4129_vm2 = vcmp.eq.s32.totalorder %v20713_v35, %v16883_v26  ;;  %vm4133_vm9 = vcmp.eq.s32.totalorder %v20714_v38, %v16883_v26  ;;  %v20717_v35 = vld [vmem:[#allocation124_spill] sm:$0xff]  ;;  %v20718_v38 = vld [vmem:[#allocation125_spill] sm:$0xff] }
 0x4fa   : > { %12261 = vmatpush1.bf16.msk.msra.mxu1 %vm12260_vm15, %v20280_v10  ;;  %12055 = vmatprep.subr.msk.bf16.mxu0 %vm12054_vm10, %v20280_v10  ;;  %vm12264_vm0 = vmpackc.low %vm4125_vm7, %vm4121_vm5  ;;  %vm4136_vm10 = vcmp.eq.s32.totalorder %v20715_v47, %v16835_v48  ;;  %vm4140_vm7 = vcmp.eq.s32.totalorder %v20716_v6, %v16835_v48 }
 0x4fb   : > { %12263 = vmatprep.subr.msk.bf16.mxu1 %vm12262_vm12, %v20280_v10  ;;  %vm12058_vm4 = vmpackc.low %vm4132_vm13, %vm4128_vm6  ;;  %vm4138_vm12 = vcmp.eq.s32.totalorder %v20715_v47, %v16849_v4  ;;  %vm4142_vm6 = vcmp.eq.s32.totalorder %v20716_v6, %v16849_v4 }
 0x4fc   : > { %vm12266_vm15 = vmpackc.low %vm4134_vm11, %vm4130_vm3  ;;  %vm4135_vm3 = vcmp.eq.s32.totalorder %v20715_v47, %v16867_v15  ;;  %vm4139_vm11 = vcmp.eq.s32.totalorder %v20716_v6, %v16867_v15 }
 0x4fd   : > { %12057 = vmatpush1.bf16.msk.msra.mxu0 %vm12056_vm1, %v20280_v10  ;;  %vm12060_vm5 = vmpackc.low %vm4131_vm14, %vm4127_vm8  ;;  %vm4137_vm8 = vcmp.eq.s32.totalorder %v20715_v47, %v16883_v26  ;;  %vm4141_vm14 = vcmp.eq.s32.totalorder %v20716_v6, %v16883_v26  ;;  %v20719_v47 = vld [vmem:[#allocation126_spill] sm:$0xff]  ;;  %v20720_v6 = vld [vmem:[#allocation127_spill] sm:$0xff] }
 0x4fe   : > { %12265 = vmatpush1.bf16.msk.msra.mxu1 %vm12264_vm0, %v20280_v10  ;;  %12059 = vmatprep.subr.msk.bf16.mxu0 %vm12058_vm4, %v20280_v10  ;;  %vm12268_vm13 = vmpackc.low %vm4133_vm9, %vm4129_vm2  ;;  %vm4144_vm4 = vcmp.eq.s32.totalorder %v20717_v35, %v16835_v48  ;;  %vm4148_vm2 = vcmp.eq.s32.totalorder %v20718_v38, %v16835_v48 }
 0x4ff   : > { %12267 = vmatprep.subr.msk.bf16.mxu1 %vm12266_vm15, %v20280_v10  ;;  %vm12062_vm1 = vmpackc.low %vm4140_vm7, %vm4136_vm10  ;;  %vm4146_vm15 = vcmp.eq.s32.totalorder %v20717_v35, %v16849_v4  ;;  %vm4150_vm10 = vcmp.eq.s32.totalorder %v20718_v38, %v16849_v4 }
 0x500   : > { %vm12270_vm0 = vmpackc.low %vm4142_vm6, %vm4138_vm12  ;;  %vm4143_vm12 = vcmp.eq.s32.totalorder %v20717_v35, %v16867_v15  ;;  %vm4147_vm6 = vcmp.eq.s32.totalorder %v20718_v38, %v16867_v15 }
 0x501   : > { %12061 = vmatpush1.bf16.msk.msra.mxu0 %vm12060_vm5, %v20280_v10  ;;  %vm12064_vm9 = vmpackc.low %vm4139_vm11, %vm4135_vm3  ;;  %vm4145_vm3 = vcmp.eq.s32.totalorder %v20717_v35, %v16883_v26  ;;  %vm4149_vm11 = vcmp.eq.s32.totalorder %v20718_v38, %v16883_v26  ;;  %v20721_v35 = vld [vmem:[#allocation128_spill] sm:$0xff]  ;;  %v20722_v38 = vld [vmem:[#allocation129_spill] sm:$0xff] }
 0x502   : > { %12269 = vmatpush1.bf16.msk.msra.mxu1 %vm12268_vm13, %v20280_v10  ;;  %12063 = vmatprep.subr.msk.bf16.mxu0 %vm12062_vm1, %v20280_v10  ;;  %vm12272_vm7 = vmpackc.low %vm4141_vm14, %vm4137_vm8  ;;  %vm4152_vm1 = vcmp.eq.s32.totalorder %v20719_v47, %v16835_v48  ;;  %vm4156_vm8 = vcmp.eq.s32.totalorder %v20720_v6, %v16835_v48 }
 0x503   : > { %12271 = vmatprep.subr.msk.bf16.mxu1 %vm12270_vm0, %v20280_v10  ;;  %vm12066_vm5 = vmpackc.low %vm4148_vm2, %vm4144_vm4  ;;  %vm4154_vm0 = vcmp.eq.s32.totalorder %v20719_v47, %v16849_v4  ;;  %vm4158_vm4 = vcmp.eq.s32.totalorder %v20720_v6, %v16849_v4 }
 0x504   : > { %vm12274_vm13 = vmpackc.low %vm4150_vm10, %vm4146_vm15  ;;  %vm4151_vm15 = vcmp.eq.s32.totalorder %v20719_v47, %v16867_v15  ;;  %vm4155_vm10 = vcmp.eq.s32.totalorder %v20720_v6, %v16867_v15 }
 0x505   : > { %12065 = vmatpush1.bf16.msk.msra.mxu0 %vm12064_vm9, %v20280_v10  ;;  %vm12068_vm14 = vmpackc.low %vm4147_vm6, %vm4143_vm12  ;;  %vm4153_vm12 = vcmp.eq.s32.totalorder %v20719_v47, %v16883_v26  ;;  %vm4157_vm6 = vcmp.eq.s32.totalorder %v20720_v6, %v16883_v26  ;;  %v20738_v47 = vld [vmem:[#allocation133_spill] sm:$0xff]  ;;  %v20739_v6 = vld [vmem:[#allocation134_spill] sm:$0xff] }
 0x506   : > { %12273 = vmatpush1.bf16.msk.msra.mxu1 %vm12272_vm7, %v20280_v10  ;;  %12067 = vmatprep.subr.msk.bf16.mxu0 %vm12066_vm5, %v20280_v10  ;;  %vm12276_vm2 = vmpackc.low %vm4149_vm11, %vm4145_vm3  ;;  %vm4160_vm5 = vcmp.eq.s32.totalorder %v20721_v35, %v16835_v48  ;;  %vm4164_vm3 = vcmp.eq.s32.totalorder %v20722_v38, %v16835_v48 }
 0x507   : > { %12275 = vmatprep.subr.msk.bf16.mxu1 %vm12274_vm13, %v20280_v10  ;;  %vm12070_vm9 = vmpackc.low %vm4156_vm8, %vm4152_vm1  ;;  %vm4162_vm13 = vcmp.eq.s32.totalorder %v20721_v35, %v16849_v4  ;;  %vm4166_vm1 = vcmp.eq.s32.totalorder %v20722_v38, %v16849_v4 }
 0x508   : > { %vm12278_vm7 = vmpackc.low %vm4158_vm4, %vm4154_vm0  ;;  %vm4159_vm0 = vcmp.eq.s32.totalorder %v20721_v35, %v16867_v15  ;;  %vm4163_vm4 = vcmp.eq.s32.totalorder %v20722_v38, %v16867_v15 }
 0x509   : > { %12069 = vmatpush1.bf16.msk.msra.mxu0 %vm12068_vm14, %v20280_v10  ;;  %vm12072_vm11 = vmpackc.low %vm4155_vm10, %vm4151_vm15  ;;  %vm4161_vm15 = vcmp.eq.s32.totalorder %v20721_v35, %v16883_v26  ;;  %vm4165_vm10 = vcmp.eq.s32.totalorder %v20722_v38, %v16883_v26  ;;  %v20729_v38 = vld [vmem:[#allocation131_spill] sm:$0xff]  ;;  %v20743_v35 = vld [vmem:[#allocation138_spill] sm:$0xff] }
 0x50a   : > { %12277 = vmatpush1.bf16.msk.msra.mxu1 %vm12276_vm2, %v20280_v10  ;;  %12071 = vmatprep.subr.msk.bf16.mxu0 %vm12070_vm9, %v20280_v10  ;;  %vm12280_vm8 = vmpackc.low %vm4157_vm6, %vm4153_vm12  ;;  %vm4168_vm9 = vcmp.eq.s32.totalorder %v16058_v52, %v16835_v48  ;;  %vm4172_vm12 = vcmp.eq.s32.totalorder %v16061_v59, %v16835_v48 }
 0x50b   : > { %12279 = vmatprep.subr.msk.bf16.mxu1 %vm12278_vm7, %v20280_v10  ;;  %vm12074_vm14 = vmpackc.low %vm4164_vm3, %vm4160_vm5  ;;  %vm4170_vm7 = vcmp.eq.s32.totalorder %v16058_v52, %v16849_v4  ;;  %vm4174_vm5 = vcmp.eq.s32.totalorder %v16061_v59, %v16849_v4 }
 0x50c   : > { %vm12282_vm2 = vmpackc.low %vm4166_vm1, %vm4162_vm13  ;;  %vm4171_vm13 = vcmp.eq.s32.totalorder %v16061_v59, %v16867_v15 }
 0x50d   : > { %12073 = vmatpush1.bf16.msk.msra.mxu0 %vm12072_vm11, %v20280_v10  ;;  %vm17933_vm6 = vmpackc.low %vm4163_vm4, %vm4159_vm0  ;;  %vm4167_vm11 = vcmp.eq.s32.totalorder %v16058_v52, %v16867_v15  ;;  %vm4173_vm0 = vcmp.eq.s32.totalorder %v16061_v59, %v16883_v26  ;;  %v20735_v59 = vld [vmem:[#allocation132_spill] sm:$0xff] }
 0x50e   : > { %12281 = vmatpush1.bf16.msk.msra.mxu1 %vm12280_vm8, %v20280_v10  ;;  %12075 = vmatprep.subr.msk.bf16.mxu0 %vm12074_vm14, %v20280_v10  ;;  %vm17943_vm3 = vmpackc.low %vm4165_vm10, %vm4161_vm15  ;;  %vm4169_vm8 = vcmp.eq.s32.totalorder %v16058_v52, %v16883_v26  ;;  %vm4176_vm14 = vcmp.eq.s32.totalorder %v16088_v45, %v16835_v48  ;;  %vm4180_vm15 = vcmp.eq.s32.totalorder %v20732_v49, %v16835_v48  ;;  %v20744_v52 = vld [vmem:[#allocation139_spill] sm:$0xff] }
 0x50f   : > { %12283 = vmatprep.subr.msk.bf16.mxu1 %vm12282_vm2, %v20280_v10  ;;  %vm17952_vm1 = vmpackc.low %vm4172_vm12, %vm4168_vm9  ;;  %vm4178_vm2 = vcmp.eq.s32.totalorder %v16088_v45, %v16849_v4  ;;  %vm4182_vm9 = vcmp.eq.s32.totalorder %v20732_v49, %v16849_v4 }
 0x510   : > { %4871 = vmatmul.mubr.f32.vlgmr.msra.gmra.mrb[12].mxu0 %v20729_v38  ;;  %vm17961_vm4 = vmpackc.low %vm4174_vm5, %vm4170_vm7  ;;  %vm4179_vm7 = vcmp.eq.s32.totalorder %v20732_v49, %v16867_v15 }
 0x511   : > { %5155 = vmatmul.mubr.f32.vlgmr.msra.gmra.mrb[8].mxu1 %v20729_v38  ;;  %12077 = vmatpush1.bf16.msk.msra.mxu0 %vm17933_vm6, %v20280_v10  ;;  %vm17973_vm10 = vmpackc.low %vm4171_vm13, %vm4167_vm11  ;;  %vm4175_vm6 = vcmp.eq.s32.totalorder %v16088_v45, %v16867_v15  ;;  %vm4181_vm11 = vcmp.eq.s32.totalorder %v20732_v49, %v16883_v26  ;;  %v20742_v49 = vld [vmem:[#allocation137_spill] sm:$0xff] }
 0x512   : > { %4941 = vmatprep.mubr.f32.mxu0 %v20735_v59  ;;  %12285 = vmatpush1.bf16.msk.msra.mxu1 %vm17943_vm3, %v20280_v10  ;;  %vm17985_vm12 = vmpackc.low %vm4173_vm0, %vm4169_vm8  ;;  %vm4177_vm3 = vcmp.eq.s32.totalorder %v16088_v45, %v16883_v26  ;;  %vm4184_vm8 = vcmp.eq.s32.totalorder %v20738_v47, %v16835_v48  ;;  %vm4188_vm0 = vcmp.eq.s32.totalorder %v20739_v6, %v16835_v48  ;;  %v20740_v45 = vld [vmem:[#allocation135_spill] sm:$0xff]  ;;  %v20746_v38 = vld [vmem:[#allocation141_spill] sm:$0xff] }
 0x513   : > { %5225 = vmatprep.mubr.f32.mxu1 %v20735_v59  ;;  %12079 = vmatprep.subr.msk.bf16.mxu0 %vm17952_vm1, %v20280_v10  ;;  %vm12082_vm5 = vmpackc.low %vm4180_vm15, %vm4176_vm14  ;;  %vm4186_vm14 = vcmp.eq.s32.totalorder %v20738_v47, %v16849_v4  ;;  %vm4190_vm15 = vcmp.eq.s32.totalorder %v20739_v6, %v16849_v4  ;;  %v20745_v59 = vld [vmem:[#allocation140_spill] sm:$0xff] }
 0x514   : > { %12287 = vmatprep.subr.msk.bf16.mxu1 %vm17961_vm4, %v20280_v10  ;;  %vm12290_vm13 = vmpackc.low %vm4182_vm9, %vm4178_vm2  ;;  %vm4183_vm2 = vcmp.eq.s32.totalorder %v20738_v47, %v16867_v15 }
 0x515   : > { %12081 = vmatpush1.bf16.msk.msra.mxu0 %vm17973_vm10, %v20280_v10  ;;  %vm12084_vm1 = vmpackc.low %vm4179_vm7, %vm4175_vm6  ;;  %vm4187_vm10 = vcmp.eq.s32.totalorder %v20739_v6, %v16867_v15  ;;  %vm4185_vm6 = vcmp.eq.s32.totalorder %v20738_v47, %v16883_v26  ;;  %vm4189_vm7 = vcmp.eq.s32.totalorder %v20739_v6, %v16883_v26  ;;  %v20747_v47 = vld [vmem:[#allocation142_spill] sm:$0xff]  ;;  %v20748_v6 = vld [vmem:[#allocation143_spill] sm:$0xff] }
 0x516   : > { %12289 = vmatpush1.bf16.msk.msra.mxu1 %vm17985_vm12, %v20280_v10  ;;  %12083 = vmatprep.subr.msk.bf16.mxu0 %vm12082_vm5, %v20280_v10  ;;  %vm12292_vm4 = vmpackc.low %vm4181_vm11, %vm4177_vm3  ;;  %vm4192_vm5 = vcmp.eq.s32.totalorder %v20740_v45, %v16835_v48  ;;  %vm4196_vm3 = vcmp.eq.s32.totalorder %v20741_v60, %v16835_v48 }
 0x517   : > { %12291 = vmatprep.subr.msk.bf16.mxu1 %vm12290_vm13, %v20280_v10  ;;  %vm12086_vm9 = vmpackc.low %vm4188_vm0, %vm4184_vm8  ;;  %vm4194_vm13 = vcmp.eq.s32.totalorder %v20740_v45, %v16849_v4  ;;  %vm4198_vm8 = vcmp.eq.s32.totalorder %v20741_v60, %v16849_v4 }
 0x518   : > { %vm12294_vm12 = vmpackc.low %vm4190_vm15, %vm4186_vm14  ;;  %vm4191_vm14 = vcmp.eq.s32.totalorder %v20740_v45, %v16867_v15  ;;  %vm4195_vm15 = vcmp.eq.s32.totalorder %v20741_v60, %v16867_v15 }
 0x519   : > { %12085 = vmatpush1.bf16.msk.msra.mxu0 %vm12084_vm1, %v20280_v10  ;;  %vm12088_vm11 = vmpackc.low %vm4187_vm10, %vm4183_vm2  ;;  %vm4193_vm2 = vcmp.eq.s32.totalorder %v20740_v45, %v16883_v26  ;;  %vm4197_vm10 = vcmp.eq.s32.totalorder %v20741_v60, %v16883_v26  ;;  %v20749_v45 = vld [vmem:[#allocation144_spill] sm:$0xff]  ;;  %v20750_v60 = vld [vmem:[#allocation145_spill] sm:$0xff] }
 0x51a   : > { %12293 = vmatpush1.bf16.msk.msra.mxu1 %vm12292_vm4, %v20280_v10  ;;  %12087 = vmatprep.subr.msk.bf16.mxu0 %vm12086_vm9, %v20280_v10  ;;  %vm12296_vm0 = vmpackc.low %vm4189_vm7, %vm4185_vm6  ;;  %vm4200_vm9 = vcmp.eq.s32.totalorder %v20742_v49, %v16835_v48  ;;  %vm4204_vm6 = vcmp.eq.s32.totalorder %v20743_v35, %v16835_v48 }
 0x51b   : > { %12295 = vmatprep.subr.msk.bf16.mxu1 %vm12294_vm12, %v20280_v10  ;;  %vm12090_vm1 = vmpackc.low %vm4196_vm3, %vm4192_vm5  ;;  %vm4202_vm12 = vcmp.eq.s32.totalorder %v20742_v49, %v16849_v4  ;;  %vm4206_vm5 = vcmp.eq.s32.totalorder %v20743_v35, %v16849_v4 }
 0x51c   : > { %vm12298_vm4 = vmpackc.low %vm4198_vm8, %vm4194_vm13  ;;  %vm4199_vm13 = vcmp.eq.s32.totalorder %v20742_v49, %v16867_v15  ;;  %vm4203_vm8 = vcmp.eq.s32.totalorder %v20743_v35, %v16867_v15 }
 0x51d   : > { %12089 = vmatpush1.bf16.msk.msra.mxu0 %vm12088_vm11, %v20280_v10  ;;  %vm12092_vm7 = vmpackc.low %vm4195_vm15, %vm4191_vm14  ;;  %vm4201_vm14 = vcmp.eq.s32.totalorder %v20742_v49, %v16883_v26  ;;  %vm4205_vm15 = vcmp.eq.s32.totalorder %v20743_v35, %v16883_v26  ;;  %v20751_v49 = vld [vmem:[#allocation146_spill] sm:$0xff]  ;;  %v20752_v35 = vld [vmem:[#allocation147_spill] sm:$0xff] }
 0x51e   : > { %12297 = vmatpush1.bf16.msk.msra.mxu1 %vm12296_vm0, %v20280_v10  ;;  %12091 = vmatprep.subr.msk.bf16.mxu0 %vm12090_vm1, %v20280_v10  ;;  %vm12300_vm3 = vmpackc.low %vm4197_vm10, %vm4193_vm2  ;;  %vm4208_vm1 = vcmp.eq.s32.totalorder %v20744_v52, %v16835_v48  ;;  %vm4212_vm2 = vcmp.eq.s32.totalorder %v20745_v59, %v16835_v48 }
 0x51f   : > { %12299 = vmatprep.subr.msk.bf16.mxu1 %vm12298_vm4, %v20280_v10  ;;  %vm12094_vm11 = vmpackc.low %vm4204_vm6, %vm4200_vm9  ;;  %vm4210_vm4 = vcmp.eq.s32.totalorder %v20744_v52, %v16849_v4  ;;  %vm4214_vm9 = vcmp.eq.s32.totalorder %v20745_v59, %v16849_v4 }
 0x520   : > { %vm12302_vm0 = vmpackc.low %vm4206_vm5, %vm4202_vm12  ;;  %vm4207_vm12 = vcmp.eq.s32.totalorder %v20744_v52, %v16867_v15  ;;  %vm4211_vm5 = vcmp.eq.s32.totalorder %v20745_v59, %v16867_v15 }
 0x521   : > { %12093 = vmatpush1.bf16.msk.msra.mxu0 %vm12092_vm7, %v20280_v10  ;;  %vm12096_vm10 = vmpackc.low %vm4203_vm8, %vm4199_vm13  ;;  %vm4209_vm13 = vcmp.eq.s32.totalorder %v20744_v52, %v16883_v26  ;;  %vm4213_vm8 = vcmp.eq.s32.totalorder %v20745_v59, %v16883_v26  ;;  %v20753_v52 = vld [vmem:[#allocation148_spill] sm:$0xff]  ;;  %v20754_v59 = vld [vmem:[#allocation149_spill] sm:$0xff] }
 0x522   : > { %12301 = vmatpush1.bf16.msk.msra.mxu1 %vm12300_vm3, %v20280_v10  ;;  %12095 = vmatprep.subr.msk.bf16.mxu0 %vm12094_vm11, %v20280_v10  ;;  %vm12304_vm6 = vmpackc.low %vm4205_vm15, %vm4201_vm14  ;;  %vm4216_vm11 = vcmp.eq.s32.totalorder %v20746_v38, %v16835_v48  ;;  %vm4220_vm14 = vcmp.eq.s32.totalorder %v20747_v47, %v16835_v48 }
 0x523   : > { %12303 = vmatprep.subr.msk.bf16.mxu1 %vm12302_vm0, %v20280_v10  ;;  %vm12098_vm7 = vmpackc.low %vm4212_vm2, %vm4208_vm1  ;;  %vm4218_vm0 = vcmp.eq.s32.totalorder %v20746_v38, %v16849_v4  ;;  %vm4222_vm1 = vcmp.eq.s32.totalorder %v20747_v47, %v16849_v4 }
 0x524   : > { %vm12306_vm3 = vmpackc.low %vm4214_vm9, %vm4210_vm4  ;;  %vm4215_vm4 = vcmp.eq.s32.totalorder %v20746_v38, %v16867_v15  ;;  %vm4219_vm9 = vcmp.eq.s32.totalorder %v20747_v47, %v16867_v15 }
 0x525   : > { %12097 = vmatpush1.bf16.msk.msra.mxu0 %vm12096_vm10, %v20280_v10  ;;  %vm12100_vm15 = vmpackc.low %vm4211_vm5, %vm4207_vm12  ;;  %vm4217_vm12 = vcmp.eq.s32.totalorder %v20746_v38, %v16883_v26  ;;  %vm4221_vm5 = vcmp.eq.s32.totalorder %v20747_v47, %v16883_v26  ;;  %v20755_v38 = vld [vmem:[#allocation150_spill] sm:$0xff]  ;;  %v20756_v47 = vld [vmem:[#allocation151_spill] sm:$0xff] }
 0x526   : > { %12305 = vmatpush1.bf16.msk.msra.mxu1 %vm12304_vm6, %v20280_v10  ;;  %12099 = vmatprep.subr.msk.bf16.mxu0 %vm12098_vm7, %v20280_v10  ;;  %vm12308_vm2 = vmpackc.low %vm4213_vm8, %vm4209_vm13  ;;  %vm4224_vm7 = vcmp.eq.s32.totalorder %v20748_v6, %v16835_v48  ;;  %vm4228_vm13 = vcmp.eq.s32.totalorder %v20749_v45, %v16835_v48 }
 0x527   : > { %12307 = vmatprep.subr.msk.bf16.mxu1 %vm12306_vm3, %v20280_v10  ;;  %vm12102_vm10 = vmpackc.low %vm4220_vm14, %vm4216_vm11  ;;  %vm4226_vm3 = vcmp.eq.s32.totalorder %v20748_v6, %v16849_v4  ;;  %vm4230_vm11 = vcmp.eq.s32.totalorder %v20749_v45, %v16849_v4 }
 0x528   : > { %vm12310_vm6 = vmpackc.low %vm4222_vm1, %vm4218_vm0  ;;  %vm4223_vm0 = vcmp.eq.s32.totalorder %v20748_v6, %v16867_v15  ;;  %vm4227_vm1 = vcmp.eq.s32.totalorder %v20749_v45, %v16867_v15 }
 0x529   : > { %12101 = vmatpush1.bf16.msk.msra.mxu0 %vm12100_vm15, %v20280_v10  ;;  %vm12104_vm8 = vmpackc.low %vm4219_vm9, %vm4215_vm4  ;;  %vm4225_vm4 = vcmp.eq.s32.totalorder %v20748_v6, %v16883_v26  ;;  %vm4229_vm9 = vcmp.eq.s32.totalorder %v20749_v45, %v16883_v26  ;;  %v20757_v6 = vld [vmem:[#allocation152_spill] sm:$0xff]  ;;  %v20758_v45 = vld [vmem:[#allocation153_spill] sm:$0xff] }
 0x52a   : > { %12309 = vmatpush1.bf16.msk.msra.mxu1 %vm12308_vm2, %v20280_v10  ;;  %12103 = vmatprep.subr.msk.bf16.mxu0 %vm12102_vm10, %v20280_v10  ;;  %vm12312_vm14 = vmpackc.low %vm4221_vm5, %vm4217_vm12  ;;  %vm4232_vm10 = vcmp.eq.s32.totalorder %v20750_v60, %v16835_v48  ;;  %vm4236_vm12 = vcmp.eq.s32.totalorder %v20751_v49, %v16835_v48 }
 0x52b   : > { %12311 = vmatprep.subr.msk.bf16.mxu1 %vm12310_vm6, %v20280_v10  ;;  %vm12106_vm15 = vmpackc.low %vm4228_vm13, %vm4224_vm7  ;;  %vm4234_vm6 = vcmp.eq.s32.totalorder %v20750_v60, %v16849_v4  ;;  %vm4238_vm7 = vcmp.eq.s32.totalorder %v20751_v49, %v16849_v4 }
 0x52c   : > { %vm12314_vm2 = vmpackc.low %vm4230_vm11, %vm4226_vm3  ;;  %vm4231_vm3 = vcmp.eq.s32.totalorder %v20750_v60, %v16867_v15  ;;  %vm4235_vm11 = vcmp.eq.s32.totalorder %v20751_v49, %v16867_v15 }
 0x52d   : > { %12105 = vmatpush1.bf16.msk.msra.mxu0 %vm12104_vm8, %v20280_v10  ;;  %vm12108_vm5 = vmpackc.low %vm4227_vm1, %vm4223_vm0  ;;  %vm4233_vm0 = vcmp.eq.s32.totalorder %v20750_v60, %v16883_v26  ;;  %vm4237_vm1 = vcmp.eq.s32.totalorder %v20751_v49, %v16883_v26  ;;  %v20759_v60 = vld [vmem:[#allocation154_spill] sm:$0xff]  ;;  %v20760_v49 = vld [vmem:[#allocation155_spill] sm:$0xff] }
 0x52e   : > { %12313 = vmatpush1.bf16.msk.msra.mxu1 %vm12312_vm14, %v20280_v10  ;;  %12107 = vmatprep.subr.msk.bf16.mxu0 %vm12106_vm15, %v20280_v10  ;;  %vm12316_vm13 = vmpackc.low %vm4229_vm9, %vm4225_vm4  ;;  %vm4240_vm15 = vcmp.eq.s32.totalorder %v20752_v35, %v16835_v48  ;;  %vm4244_vm4 = vcmp.eq.s32.totalorder %v20753_v52, %v16835_v48 }
 0x52f   : > { %12315 = vmatprep.subr.msk.bf16.mxu1 %vm12314_vm2, %v20280_v10  ;;  %vm12110_vm8 = vmpackc.low %vm4236_vm12, %vm4232_vm10  ;;  %vm4242_vm2 = vcmp.eq.s32.totalorder %v20752_v35, %v16849_v4  ;;  %vm4246_vm10 = vcmp.eq.s32.totalorder %v20753_v52, %v16849_v4 }
 0x530   : > { %vm12318_vm14 = vmpackc.low %vm4238_vm7, %vm4234_vm6  ;;  %vm4239_vm6 = vcmp.eq.s32.totalorder %v20752_v35, %v16867_v15  ;;  %vm4243_vm7 = vcmp.eq.s32.totalorder %v20753_v52, %v16867_v15 }
 0x531   : > { %12109 = vmatpush1.bf16.msk.msra.mxu0 %vm12108_vm5, %v20280_v10  ;;  %vm12112_vm9 = vmpackc.low %vm4235_vm11, %vm4231_vm3  ;;  %vm4241_vm3 = vcmp.eq.s32.totalorder %v20752_v35, %v16883_v26  ;;  %vm4245_vm11 = vcmp.eq.s32.totalorder %v20753_v52, %v16883_v26  ;;  %v20761_v35 = vld [vmem:[#allocation156_spill] sm:$0xff]  ;;  %v20762_v52 = vld [vmem:[#allocation157_spill] sm:$0xff] }
 0x532   : > { %12317 = vmatpush1.bf16.msk.msra.mxu1 %vm12316_vm13, %v20280_v10  ;;  %12111 = vmatprep.subr.msk.bf16.mxu0 %vm12110_vm8, %v20280_v10  ;;  %vm12320_vm12 = vmpackc.low %vm4237_vm1, %vm4233_vm0  ;;  %vm4248_vm8 = vcmp.eq.s32.totalorder %v20754_v59, %v16835_v48  ;;  %vm4252_vm0 = vcmp.eq.s32.totalorder %v20755_v38, %v16835_v48 }
 0x533   : > { %12319 = vmatprep.subr.msk.bf16.mxu1 %vm12318_vm14, %v20280_v10  ;;  %vm12114_vm5 = vmpackc.low %vm4244_vm4, %vm4240_vm15  ;;  %vm4250_vm14 = vcmp.eq.s32.totalorder %v20754_v59, %v16849_v4  ;;  %vm4254_vm15 = vcmp.eq.s32.totalorder %v20755_v38, %v16849_v4 }
 0x534   : > { %vm12322_vm13 = vmpackc.low %vm4246_vm10, %vm4242_vm2  ;;  %vm4247_vm2 = vcmp.eq.s32.totalorder %v20754_v59, %v16867_v15  ;;  %vm4251_vm10 = vcmp.eq.s32.totalorder %v20755_v38, %v16867_v15 }
 0x535   : > { %12113 = vmatpush1.bf16.msk.msra.mxu0 %vm12112_vm9, %v20280_v10  ;;  %vm12116_vm1 = vmpackc.low %vm4243_vm7, %vm4239_vm6  ;;  %vm4249_vm6 = vcmp.eq.s32.totalorder %v20754_v59, %v16883_v26  ;;  %vm4253_vm7 = vcmp.eq.s32.totalorder %v20755_v38, %v16883_v26  ;;  %v20763_v59 = vld [vmem:[#allocation158_spill] sm:$0xff]  ;;  %v20764_v38 = vld [vmem:[#allocation159_spill] sm:$0xff] }
 0x536   : > { %12321 = vmatpush1.bf16.msk.msra.mxu1 %vm12320_vm12, %v20280_v10  ;;  %12115 = vmatprep.subr.msk.bf16.mxu0 %vm12114_vm5, %v20280_v10  ;;  %vm12324_vm4 = vmpackc.low %vm4245_vm11, %vm4241_vm3  ;;  %vm4256_vm5 = vcmp.eq.s32.totalorder %v20756_v47, %v16835_v48  ;;  %vm4260_vm3 = vcmp.eq.s32.totalorder %v20757_v6, %v16835_v48 }
 0x537   : > { %12323 = vmatprep.subr.msk.bf16.mxu1 %vm12322_vm13, %v20280_v10  ;;  %vm12118_vm9 = vmpackc.low %vm4252_vm0, %vm4248_vm8  ;;  %vm4258_vm13 = vcmp.eq.s32.totalorder %v20756_v47, %v16849_v4  ;;  %vm4262_vm8 = vcmp.eq.s32.totalorder %v20757_v6, %v16849_v4 }
 0x538   : > { %vm12326_vm12 = vmpackc.low %vm4254_vm15, %vm4250_vm14  ;;  %vm4255_vm14 = vcmp.eq.s32.totalorder %v20756_v47, %v16867_v15  ;;  %vm4259_vm15 = vcmp.eq.s32.totalorder %v20757_v6, %v16867_v15 }
 0x539   : > { %12117 = vmatpush1.bf16.msk.msra.mxu0 %vm12116_vm1, %v20280_v10  ;;  %vm12120_vm11 = vmpackc.low %vm4251_vm10, %vm4247_vm2  ;;  %vm4257_vm2 = vcmp.eq.s32.totalorder %v20756_v47, %v16883_v26  ;;  %vm4261_vm10 = vcmp.eq.s32.totalorder %v20757_v6, %v16883_v26  ;;  %v20765_v47 = vld [vmem:[#allocation160_spill] sm:$0xff]  ;;  %v20766_v6 = vld [vmem:[#allocation161_spill] sm:$0xff] }
 0x53a   : > { %12325 = vmatpush1.bf16.msk.msra.mxu1 %vm12324_vm4, %v20280_v10  ;;  %12119 = vmatprep.subr.msk.bf16.mxu0 %vm12118_vm9, %v20280_v10  ;;  %vm12328_vm0 = vmpackc.low %vm4253_vm7, %vm4249_vm6  ;;  %vm4264_vm9 = vcmp.eq.s32.totalorder %v20758_v45, %v16835_v48  ;;  %vm4268_vm6 = vcmp.eq.s32.totalorder %v20759_v60, %v16835_v48 }
 0x53b   : > { %12327 = vmatprep.subr.msk.bf16.mxu1 %vm12326_vm12, %v20280_v10  ;;  %vm12122_vm1 = vmpackc.low %vm4260_vm3, %vm4256_vm5  ;;  %vm4266_vm12 = vcmp.eq.s32.totalorder %v20758_v45, %v16849_v4  ;;  %vm4270_vm5 = vcmp.eq.s32.totalorder %v20759_v60, %v16849_v4 }
 0x53c   : > { %vm12330_vm4 = vmpackc.low %vm4262_vm8, %vm4258_vm13  ;;  %vm4263_vm13 = vcmp.eq.s32.totalorder %v20758_v45, %v16867_v15  ;;  %vm4267_vm8 = vcmp.eq.s32.totalorder %v20759_v60, %v16867_v15 }
 0x53d   : > { %12121 = vmatpush1.bf16.msk.msra.mxu0 %vm12120_vm11, %v20280_v10  ;;  %vm12124_vm7 = vmpackc.low %vm4259_vm15, %vm4255_vm14  ;;  %vm4265_vm14 = vcmp.eq.s32.totalorder %v20758_v45, %v16883_v26  ;;  %vm4269_vm15 = vcmp.eq.s32.totalorder %v20759_v60, %v16883_v26  ;;  %v20767_v45 = vld [vmem:[#allocation162_spill] sm:$0xff] }
 0x53e   : > { %12329 = vmatpush1.bf16.msk.msra.mxu1 %vm12328_vm0, %v20280_v10  ;;  %12123 = vmatprep.subr.msk.bf16.mxu0 %vm12122_vm1, %v20280_v10  ;;  %vm12332_vm3 = vmpackc.low %vm4261_vm10, %vm4257_vm2  ;;  %vm4272_vm1 = vcmp.eq.s32.totalorder %v20760_v49, %v16835_v48  ;;  %vm4276_vm2 = vcmp.eq.s32.totalorder %v20761_v35, %v16835_v48 }
 0x53f   : > { %12331 = vmatprep.subr.msk.bf16.mxu1 %vm12330_vm4, %v20280_v10  ;;  %vm12126_vm11 = vmpackc.low %vm4268_vm6, %vm4264_vm9  ;;  %vm4274_vm4 = vcmp.eq.s32.totalorder %v20760_v49, %v16849_v4  ;;  %vm4278_vm9 = vcmp.eq.s32.totalorder %v20761_v35, %v16849_v4 }
 0x540   : > { %vm12334_vm0 = vmpackc.low %vm4270_vm5, %vm4266_vm12  ;;  %vm4271_vm12 = vcmp.eq.s32.totalorder %v20760_v49, %v16867_v15  ;;  %vm4275_vm5 = vcmp.eq.s32.totalorder %v20761_v35, %v16867_v15 }
 0x541   : > { %12125 = vmatpush1.bf16.msk.msra.mxu0 %vm12124_vm7, %v20280_v10  ;;  %vm12128_vm10 = vmpackc.low %vm4267_vm8, %vm4263_vm13  ;;  %vm4273_vm13 = vcmp.eq.s32.totalorder %v20760_v49, %v16883_v26  ;;  %vm4277_vm8 = vcmp.eq.s32.totalorder %v20761_v35, %v16883_v26  ;;  %v20772_v35 = vld [vmem:[#allocation164_spill] sm:$0xff] }
 0x542   : > { %12333 = vmatpush1.bf16.msk.msra.mxu1 %vm12332_vm3, %v20280_v10  ;;  %12127 = vmatprep.subr.msk.bf16.mxu0 %vm12126_vm11, %v20280_v10  ;;  %vm12336_vm6 = vmpackc.low %vm4269_vm15, %vm4265_vm14  ;;  %vm4280_vm11 = vcmp.eq.s32.totalorder %v20762_v52, %v16835_v48  ;;  %vm4284_vm14 = vcmp.eq.s32.totalorder %v20763_v59, %v16835_v48 }
 0x543   : > { %12335 = vmatprep.subr.msk.bf16.mxu1 %vm12334_vm0, %v20280_v10  ;;  %vm12130_vm7 = vmpackc.low %vm4276_vm2, %vm4272_vm1  ;;  %vm4282_vm0 = vcmp.eq.s32.totalorder %v20762_v52, %v16849_v4  ;;  %vm4286_vm1 = vcmp.eq.s32.totalorder %v20763_v59, %v16849_v4 }
 0x544   : > { %vm12338_vm3 = vmpackc.low %vm4278_vm9, %vm4274_vm4  ;;  %vm4279_vm4 = vcmp.eq.s32.totalorder %v20762_v52, %v16867_v15  ;;  %vm4283_vm9 = vcmp.eq.s32.totalorder %v20763_v59, %v16867_v15 }
 0x545   : > { %12129 = vmatpush1.bf16.msk.msra.mxu0 %vm12128_vm10, %v20280_v10  ;;  %vm12132_vm15 = vmpackc.low %vm4275_vm5, %vm4271_vm12  ;;  %vm4281_vm12 = vcmp.eq.s32.totalorder %v20762_v52, %v16883_v26  ;;  %vm4285_vm5 = vcmp.eq.s32.totalorder %v20763_v59, %v16883_v26  ;;  %v20773_v52 = vld [vmem:[#allocation163_spill] sm:$0xff] }
 0x546   : > { %12337 = vmatpush1.bf16.msk.msra.mxu1 %vm12336_vm6, %v20280_v10  ;;  %12131 = vmatprep.subr.msk.bf16.mxu0 %vm12130_vm7, %v20280_v10  ;;  %vm12340_vm2 = vmpackc.low %vm4277_vm8, %vm4273_vm13  ;;  %vm4288_vm7 = vcmp.eq.s32.totalorder %v20764_v38, %v16835_v48  ;;  %vm4292_vm13 = vcmp.eq.s32.totalorder %v20765_v47, %v16835_v48  ;;  %v5310_v59 = vld [vmem:[%s20780_s3 + $0x8] sm:$0xff] }
 0x547   : > { %12339 = vmatprep.subr.msk.bf16.mxu1 %vm12338_vm3, %v20280_v10  ;;  %vm12134_vm10 = vmpackc.low %vm4284_vm14, %vm4280_vm11  ;;  %vm4290_vm3 = vcmp.eq.s32.totalorder %v20764_v38, %v16849_v4  ;;  %vm4294_vm11 = vcmp.eq.s32.totalorder %v20765_v47, %v16849_v4 }
 0x548   : > { %vm12342_vm6 = vmpackc.low %vm4286_vm1, %vm4282_vm0  ;;  %vm4287_vm0 = vcmp.eq.s32.totalorder %v20764_v38, %v16867_v15  ;;  %vm4291_vm1 = vcmp.eq.s32.totalorder %v20765_v47, %v16867_v15 }
 0x549   : > { %12133 = vmatpush1.bf16.msk.msra.mxu0 %vm12132_vm15, %v20280_v10  ;;  %vm12136_vm8 = vmpackc.low %vm4283_vm9, %vm4279_vm4  ;;  %vm4289_vm4 = vcmp.eq.s32.totalorder %v20764_v38, %v16883_v26  ;;  %vm4293_vm9 = vcmp.eq.s32.totalorder %v20765_v47, %v16883_v26  ;;  %v5309_v38 = vld [vmem:[%s20780_s3] sm:$0xff]  ;;  %s21056_s3 = sld [smem:[#allocation36_spill]] }
 0x54a   : > { %12341 = vmatpush1.bf16.msk.msra.mxu1 %vm12340_vm2, %v20280_v10  ;;  %12135 = vmatprep.subr.msk.bf16.mxu0 %vm12134_vm10, %v20280_v10  ;;  %vm12344_vm14 = vmpackc.low %vm4285_vm5, %vm4281_vm12  ;;  %vm4296_vm10 = vcmp.eq.s32.totalorder %v20766_v6, %v16835_v48  ;;  %vm4300_vm12 = vcmp.eq.s32.totalorder %v20767_v45, %v16835_v48 }
 0x54b   : > { %12343 = vmatprep.subr.msk.bf16.mxu1 %vm12342_vm6, %v20280_v10  ;;  %vm12138_vm15 = vmpackc.low %vm4292_vm13, %vm4288_vm7  ;;  %vm4298_vm6 = vcmp.eq.s32.totalorder %v20766_v6, %v16849_v4  ;;  %vm4302_vm7 = vcmp.eq.s32.totalorder %v20767_v45, %v16849_v4 }
 0x54c   : > { %vm12346_vm2 = vmpackc.low %vm4294_vm11, %vm4290_vm3  ;;  %vm4299_vm3 = vcmp.eq.s32.totalorder %v20767_v45, %v16867_v15 }
 0x54d   : > { %12137 = vmatpush1.bf16.msk.msra.mxu0 %vm12136_vm8, %v20280_v10  ;;  %vm18293_vm5 = vmpackc.low %vm4291_vm1, %vm4287_vm0  ;;  %vm4295_vm8 = vcmp.eq.s32.totalorder %v20766_v6, %v16867_v15  ;;  %vm4297_vm0 = vcmp.eq.s32.totalorder %v20766_v6, %v16883_v26 }
 0x54e   : > { %12345 = vmatpush1.bf16.msk.msra.mxu1 %vm12344_vm14, %v20280_v10  ;;  %12139 = vmatprep.subr.msk.bf16.mxu0 %vm12138_vm15, %v20280_v10  ;;  %vm18303_vm13 = vmpackc.low %vm4293_vm9, %vm4289_vm4  ;;  %vm4301_vm14 = vcmp.eq.s32.totalorder %v20767_v45, %v16883_v26  ;;  %vm4304_vm15 = vcmp.eq.s32.totalorder %v16739_v51, %v16835_v48  ;;  %vm4308_vm4 = vcmp.eq.s32.totalorder %v20773_v52, %v16835_v48 }
 0x54f   : > { %12347 = vmatprep.subr.msk.bf16.mxu1 %vm12346_vm2, %v20280_v10  ;;  %vm12142_vm11 = vmpackc.low %vm4300_vm12, %vm4296_vm10  ;;  %vm4306_vm2 = vcmp.eq.s32.totalorder %v16739_v51, %v16849_v4  ;;  %vm4310_vm10 = vcmp.eq.s32.totalorder %v20773_v52, %v16849_v4 }
 0x550   : > { %4942 = vmatmul.mubr.f32.vlgmr.msra.gmra.mrb[12].mxu0 %v20772_v35  ;;  %vm12350_vm1 = vmpackc.low %vm4302_vm7, %vm4298_vm6  ;;  %vm4307_vm6 = vcmp.eq.s32.totalorder %v20773_v52, %v16867_v15 }
 0x551   : > { %5226 = vmatmul.mubr.f32.vlgmr.msra.gmra.mrb[8].mxu1 %v20772_v35  ;;  %12141 = vmatpush1.bf16.msk.msra.mxu0 %vm18293_vm5, %v20280_v10  ;;  %vm18325_vm9 = vmpackc.low %vm4299_vm3, %vm4295_vm8  ;;  %vm4303_vm5 = vcmp.eq.s32.totalorder %v16739_v51, %v16867_v15  ;;  %vm4305_vm8 = vcmp.eq.s32.totalorder %v16739_v51, %v16883_v26 }
 0x552   : > { %12349 = vmatpush1.bf16.msk.msra.mxu1 %vm18303_vm13, %v20280_v10  ;;  %12143 = vmatprep.subr.msk.bf16.mxu0 %vm12142_vm11, %v20280_v10  ;;  %vm18337_vm12 = vmpackc.low %vm4301_vm14, %vm4297_vm0  ;;  %vm4309_vm13 = vcmp.eq.s32.totalorder %v20773_v52, %v16883_v26  ;;  %vm4312_vm11 = vcmp.eq.s32.totalorder %v16784_v55, %v16835_v48  ;;  %vm4316_vm0 = vcmp.eq.s32.totalorder %v16787_v37, %v16835_v48 }
 0x553   : > { %12351 = vmatprep.subr.msk.bf16.mxu1 %vm12350_vm1, %v20280_v10  ;;  %vm12146_vm7 = vmpackc.low %vm4308_vm4, %vm4304_vm15  ;;  %5012 = vmatprep.mubr.f32.mxu0 %v20554_v29  ;;  %vm4314_vm1 = vcmp.eq.s32.totalorder %v16784_v55, %v16849_v4  ;;  %vm4318_vm15 = vcmp.eq.s32.totalorder %v16787_v37, %v16849_v4 }
 0x554   : > { %vm12354_vm3 = vmpackc.low %vm4310_vm10, %vm4306_vm2  ;;  %5296 = vmatprep.mubr.f32.mxu1 %v20554_v29  ;;  %vm4315_vm10 = vcmp.eq.s32.totalorder %v16787_v37, %v16867_v15 }
 0x555   : > { %12145 = vmatpush1.bf16.msk.msra.mxu0 %vm18325_vm9, %v20280_v10  ;;  %vm12148_vm14 = vmpackc.low %vm4307_vm6, %vm4303_vm5  ;;  %vm4311_vm9 = vcmp.eq.s32.totalorder %v16784_v55, %v16867_v15  ;;  %vm4313_vm6 = vcmp.eq.s32.totalorder %v16784_v55, %v16883_v26  ;;  %v20782_v15 = vld [vmem:[#allocation48_spill] sm:$0xff] }
 0x556   : > { %12353 = vmatpush1.bf16.msk.msra.mxu1 %vm18337_vm12, %v20280_v10  ;;  %12147 = vmatprep.subr.msk.bf16.mxu0 %vm12146_vm7, %v20280_v10  ;;  %vm12356_vm4 = vmpackc.low %vm4309_vm13, %vm4305_vm8  ;;  %vm4317_vm12 = vcmp.eq.s32.totalorder %v16787_v37, %v16883_v26  ;;  %vm20778_vm13 = vcmask 523264  }
 0x557   : > { %12355 = vmatprep.subr.msk.bf16.mxu1 %vm12354_vm3, %v20280_v10  ;;  %vm12150_vm2 = vmpackc.low %vm4316_vm0, %vm4312_vm11  ;;  %vm20781_vm11 = vcmask 7168   ;;  %vm20783_vm0 = vnez %v20782_v15 }
 0x558   : > { %vm12358_vm5 = vmpackc.low %vm4318_vm15, %vm4314_vm1 }
 0x559   : > { %12149 = vmatpush1.bf16.msk.msra.mxu0 %vm12148_vm14, %v20280_v10  ;;  %vm12152_vm7 = vmpackc.low %vm4315_vm10, %vm4311_vm9  ;;  %vm20784_vm14 = vcmask 1039360   ;;  %vm5354_vm9 = vcmask 252928  }
 0x55a   : > { %12357 = vmatpush1.bf16.msk.msra.mxu1 %vm12356_vm4, %v20280_v10  ;;  %12151 = vmatprep.subr.msk.bf16.mxu0 %vm12150_vm2, %v20280_v10  ;;  %vm12360_vm8 = vmpackc.low %vm4317_vm12, %vm4313_vm6  ;;  %vm20788_vm2 = vcmask 195584  }
 0x55b   : > { %12359 = vmatprep.subr.msk.bf16.mxu1 %vm12358_vm5, %v20280_v10  ;;  %vm20779_vm3 = vmmov %vm20778_vm13 }
 0x55c   : > { %vm20785_vm1 = vmmov %vm20784_vm14 }
 0x55d   : > { %12153 = vmatpush1.bf16.msk.msra.mxu0 %vm12152_vm7, %v20280_v10  ;;  %vm20786_vm15 = vmmov %vm20781_vm11  ;;  %vm5544_vm7 = vcmask 64512  }
 0x55e   : > { %12361 = vmatpush1.bf16.msk.msra.mxu1 %vm12360_vm8, %v20280_v10  ;;  %vm20787_vm4 = vmmov %vm20781_vm11 }
 0x55f   : > { %vm20789_vm10 = vmmov %vm20788_vm2 }
 0x560   : > { %10251 = vmatmul.mubr.msk.f32.vlgmr.msra.gmra.mrb[12].mxu0 %vm20778_vm13, %v16931_v1  ;;  %vm20790_vm5 = vmmov %vm20785_vm1 }
 0x561   : > { %10460 = vmatmul.mubr.msk.f32.vlgmr.msra.gmra.mrb[8].mxu1 %vm20779_vm3, %v16931_v1  ;;  %5436 = vmatprep.mubr.f32.mxu0 %v20554_v29  ;;  %vm20791_vm6 = vmmov %vm20788_vm2  ;;  %vm20800_vm3 = vnez %v20799_v11 }
 0x562   : > { %5513 = vmatprep.mubr.f32.mxu1 %v20554_v29  ;;  %vm20793_vm12 = vmmov %vm20788_vm2 }
 0x563   : > { %v3610_v4 = vpop.f32.mrb[10].mxu0  ;;  %vm20797_vm8 = vmmov %vm20787_vm4 }
 0x564   : > { %v3894_v48 = vpop.f32.mrb[6].mxu1  ;;  %v3612_v51 = vpop.f32.mrb[11].mxu0  ;;  %vm20798_vm13 = vmmov %vm20787_vm4 }
 0x565   : > { %v3896_v55 = vpop.f32.mrb[7].mxu1 }
 0x633   : > { %v5014_v37 = vpop.f32.mrb[12].mxu0 }
 0x634   : > { %v5303_v26 = vmax.f32 %v3610_v4, %v5014_v37  ;;  %v5298_v47 = vpop.f32.mrb[8].mxu1  ;;  %v5016_v6 = vpop.f32.mrb[13].mxu0 }
 0x635   : > { %v5305_v45 = vmax.f32 %v3894_v48, %v5298_v47  ;;  %v5304_v60 = vmax.f32 %v3612_v51, %v5016_v6  ;;  %v5300_v49 = vpop.f32.mrb[9].mxu1 }
 0x636   : > { %v5306_v35 = vmax.f32 %v3896_v55, %v5300_v49 }
 0x637   : > { %5341 = vrot.lane.b32.xlu0 %v5304_v60, %s20108_s22  ;;  %v13337_v1 = vpack.i.bf16 %v5304_v60, %v5303_v26 }
 0x638   : > { %v13342_v52 = vpack.i.bf16 %v5306_v35, %v5305_v45 }
 0x639   : > { %13338 = vrot.lane.b32.xlu1 %v13337_v1, %s20110_s12 }
 0x63b   : > { %5339 = vrot.lane.b32.xlu0 %v5303_v26, %s20108_s22 }
 0x63d   : > { %5343 = vrot.lane.b32.xlu1 %v5305_v45, %s20108_s22 }
 0x63f   : > { %5345 = vrot.lane.b32.xlu0 %v5306_v35, %s20108_s22 }
 0x641   : > { %13343 = vrot.lane.b32.xlu1 %v13342_v52, %s20110_s12 }
 0x643   : > { %5363 = vperm.xlu0 %13320, %v5310_v59  }
 0x645   : > { %5358 = vperm.xlu1 %13336, %v5309_v38  }
 0x6a9   : > { %v5342_v48 = vpop.permute.xlu0 %5341 }
 0x6ab   : > { %v13339_v4 = vpop.permute.xlu1 %13338 }
 0x6ac   : > { %v13341_v51 = vunpack.i.h.bf16 %v13339_v4  ;;  %v13340_v55 = vunpack.i.l.bf16 %v13339_v4 }
 0x6ad   : > { %v5340_v1 = vpop.permute.xlu0 %5339 }
 0x6ae   : > { %v5331_v37 = vsel %vm20781_vm11, %v13340_v55, %v13341_v51  ;;  %v12364_v49 = vpack.c.bf16 %v5303_v26, %v13340_v55  ;;  %v5347_v43 = vsel %vm20785_vm1, %v5340_v1, %v5342_v48  ;;  %vm18480_vm11 = vmpackc.low %vm20800_vm3, %vm20800_vm3 }
 0x6af   : > { %v5344_v47 = vpop.permute.xlu1 %5343  ;;  %v12362_v6 = vpack.c.bf16 %v5304_v60, %v5331_v37 }
 0x6b0   : > { %v5348_v14 = vsel %vm20784_vm14, %v5342_v48, %v5344_v47 }
 0x6b1   : > { %12363 = vmatprep.subr.bf16.mxu0 %v12362_v6  ;;  %v5308_v6 = vld [vmem:[#allocation6 + $0x8] sm:$0xff] }
 0x6b2   : > { %12366 = vmatpush1.bf16.msk.msra.mxu0 %vm20783_vm0, %v12364_v49  ;;  %vm20804_vm0 = vmmov %vm20785_vm1 }
 0x6b3   : > { %v13344_v52 = vpop.permute.xlu1 %13343  ;;  %5376 = vmatprep.subr.mxu0 %v5348_v14  ;;  %v5346_v14 = vpop.permute.xlu0 %5345  ;;  %vm20805_vm14 = vmmov %vm20804_vm0 }
 0x6b4   : > { %v13346_v59 = vunpack.i.h.bf16 %v13344_v52  ;;  %v13345_v38 = vunpack.i.l.bf16 %v13344_v52  ;;  %vm20806_vm1 = vmmov %vm20804_vm0 }
 0x6b5   : > { %vm20818_vm3 = vmmov %vm20804_vm0 }
 0x6b6   : > { %v5332_v4 = vsel %vm20786_vm15, %v13341_v51, %v13345_v38  ;;  %5377 = vmatpush1.msra.mxu0 %v5347_v43  ;;  %v5333_v37 = vsel %vm20787_vm4, %v13345_v38, %v13346_v59  ;;  %v5349_v43 = vsel %vm20790_vm5, %v5344_v47, %v5346_v14  ;;  %vm20807_vm15 = vmmov %vm20804_vm0 }
 0x6b7   : > { %10463 = vmatmul.mubr.msk.f32.vlgmr.msra.gmra.mrb[14].mxu0 %vm20788_vm2, %v5307_v22  ;;  %5551 = vmatprep.subr.mxu0 %v5304_v60  ;;  %v12367_v55 = vpack.c.bf16 %v5306_v35, %v5333_v37  ;;  %v12369_v15 = vpack.c.bf16 %v5305_v45, %v5332_v4  ;;  %vm20809_vm2 = vmmov %vm20787_vm4 }
 0x6b8   : > { %5552 = vmatpush1.msra.mxu0 %v5303_v26  ;;  %5442 = vmatprep.mubr.f32.mxu0 %v20554_v29  ;;  %vm20811_vm5 = vmmov %vm20809_vm2 }
 0x6b9   : > { %12368 = vmatprep.subr.bf16.mxu1 %v12367_v55 }
 0x6ba   : > { %12370 = vmatpush1.bf16.msra.mxu1 %v12369_v15 }
 0x6bb   : > { %10464 = vmatmul.mubr.msk.f32.gmra.mrb[16].mxu0 %vm20789_vm10, %v5308_v6  ;;  %10465 = vmatprep.subr.msk.mxu1 %vm5354_vm9, %v5346_v14  ;;  %vm20810_vm10 = vmmov %vm20809_vm2 }
 0x6bc   : > { %5615 = vmatprep.mubr.f32.mxu0 %v20554_v29 }
 0x6be   : > { %5454 = vmatpush1.msra.mxu1 %v5349_v43 }
 0x6bf   : > { %10466 = vmatmul.mubr.msk.f32.vlgmr.msra.gmra.mrb[10].mxu1 %vm20791_vm6, %v5307_v22  ;;  %5628 = vmatprep.subr.mxu1 %v5306_v35  ;;  %v5315_v22 = vld [vmem:[%s20792_s26] sm:$0xff]  ;;  %vm20105_vm6 = vcmask 392192  }
 0x6c0   : > { %5629 = vmatpush1.msra.mxu1 %v5305_v45  ;;  %5519 = vmatprep.mubr.f32.mxu1 %v20554_v29 }
 0x6c1   : > { %10468 = vmatmul.mubr.msk.f32.vlgmr.msra.gmra.mrb[18].mxu0 %vm5544_vm7, %v5315_v22 }
 0x6c2   : > { %v5364_v47 = vpop.permute.xlu0 %5363  ;;  %5621 = vmatprep.mubr.f32.mxu0 %v20554_v29 }
 0x6c3   : > { %10467 = vmatmul.mubr.msk.f32.gmra.mrb[12].mxu1 %vm20793_vm12, %v5308_v6 }
 0x6c4   : > { %5692 = vmatprep.mubr.f32.mxu1 %v20554_v29  ;;  %v5359_v26 = vpop.permute.xlu1 %5358 }
 0x6c7   : > { %10470 = vmatmul.mubr.msk.f32.vlgmr.msra.gmra.mrb[14].mxu1 %vm5544_vm7, %v5315_v22 }
 0x6c8   : > { %5698 = vmatprep.mubr.f32.mxu1 %v20554_v29 }
 0x78a   : > { %v5438_v60 = vpop.f32.mrb[14].mxu0 }
 0x78b   : > { %v5439_v48 = vadd.f32 %v5438_v60, %v5359_v26  ;;  %v5440_v51 = vpop.f32.mrb[15].mxu0 }
 0x78c   : > { %v5441_v49 = vadd.f32 %v5440_v51, %v5359_v26 }
 0x78d   : > { %v18413_v1 = vmax.f32 %v5439_v48, 0.0 }
 0x78e   : > { %v18415_v52 = vmax.f32 %v5441_v49, 0.0  ;;  %v5444_v59 = vpop.f32.mrb[16].mxu0 }
 0x78f   : > { %v5445_v45 = vadd.f32 %v5444_v59, %v5364_v47  ;;  %v5446_v35 = vpop.f32.mrb[17].mxu0 }
 0x790   : > { %v5447_v38 = vadd.f32 %v5446_v35, %v5364_v47  ;;  %v13347_v4 = vpack.i.bf16 %v18415_v52, %v18413_v1  ;;  %v5316_v35 = vld [vmem:[%s20792_s26 + $0x8] sm:$0xff] }
 0x791   : > { %v18424_v37 = vmax.f32 %v5445_v45, 0.0  ;;  %10469 = vmatmul.mubr.msk.f32.gmra.mrb[20].mxu0 %vm5544_vm7, %v5316_v35  ;;  %10471 = vmatmul.mubr.msk.f32.gmra.mrb[16].mxu1 %vm5544_vm7, %v5316_v35  ;;  %vm12393_vm7 = vmpackc.low %vm5354_vm9, %vm5354_vm9 }
 0x792   : > { %v18426_v55 = vmax.f32 %v5447_v38, 0.0  ;;  %v5515_v15 = vpop.f32.mrb[10].mxu1  ;;  %13348 = vrot.lane.b32.xlu1 %v13347_v4, %s20110_s12  ;;  %5858 = vmatprep.mubr.f32.mxu0 %v20554_v29 }
 0x793   : > { %v5516_v14 = vadd.f32 %v5515_v15, %v5359_v26  ;;  %v5517_v43 = vpop.f32.mrb[11].mxu1  ;;  %v13367_v60 = vpack.i.bf16 %v18424_v37, %v18413_v1  ;;  %5935 = vmatprep.mubr.f32.mxu1 %v20554_v29 }
 0x794   : > { %v5518_v48 = vadd.f32 %v5517_v43, %v5359_v26  ;;  %v13352_v51 = vpack.i.bf16 %v18426_v55, %v18424_v37  ;;  %v12376_v49 = vpack.c.bf16 %v18426_v55, %v18415_v52 }
 0x795   : > { %v18437_v59 = vmax.f32 %v5516_v14, 0.0 }
 0x796   : > { %v18439_v22 = vmax.f32 %v5518_v48, 0.0  ;;  %v5521_v45 = vpop.f32.mrb[12].mxu1  ;;  %13353 = vrot.lane.b32.xlu0 %v13352_v51, %s20110_s12 }
 0x797   : > { %v5522_v38 = vadd.f32 %v5521_v45, %v5364_v47  ;;  %v5523_v4 = vpop.f32.mrb[13].mxu1  ;;  %v13357_v15 = vpack.i.bf16 %v18437_v59, %v18415_v52 }
 0x798   : > { %v5524_v26 = vadd.f32 %v5523_v4, %v5364_v47  ;;  %v13372_v14 = vpack.i.bf16 %v18439_v22, %v18437_v59  ;;  %v5318_v4 = vld [vmem:[%s20795_s14 + $0x8] sm:$0xff] }
 0x799   : > { %v18451_v43 = vmax.f32 %v5522_v38, 0.0  ;;  %13358 = vrot.lane.b32.xlu1 %v13357_v15, %s20108_s22  ;;  %v5317_v38 = vld [vmem:[%s20794_s7] sm:$0xff]  ;;  %v5314_v15 = vld [vmem:[%s20796_s28 + $0x8] sm:$0xff]  ;;  %s21039_s7 = sld [smem:[#allocation35_spill]] }
 0x79a   : > { %v18454_v52 = vmax.f32 %v5524_v26, 0.0 }
 0x79b   : > { %v13362_v47 = vpack.i.bf16 %v18451_v43, %v18426_v55  ;;  %v5313_v55 = vld [vmem:[%s20796_s28] sm:$0xff] }
 0x79c   : > { %v13377_v51 = vpack.i.bf16 %v18454_v52, %v18451_v43  ;;  %v13382_v45 = vpack.i.bf16 %v18454_v52, %v18439_v22 }
 0x79d   : > { %13363 = vrot.lane.b32.xlu0 %v13362_v47, %s20108_s22  ;;  %13368 = vrot.lane.b32.xlu1 %v13367_v60, %s20108_s22 }
 0x7a1   : > { %13373 = vrot.lane.b32.xlu0 %v13372_v14, %s20110_s12  ;;  %13378 = vrot.lane.b32.xlu1 %v13377_v51, %s20110_s12 }
 0x7a5   : > { %13383 = vrot.lane.b32.xlu0 %v13382_v45, %s20108_s22  ;;  %5536 = vperm.xlu1 %13336, %v5317_v38   ;;  %v20801_v45 = vmov 0 }
 0x7a6   : > { %v20802_v45 = vsel %vm18480_vm11, 4294967295, %v20801_v45 }
 0x7a7   : > { %20803 = vst [vmem:[#allocation114_spill] sm:$0xff] %v20802_v45 }
 0x7a9   : > { %5779 = vperm.xlu0 %13320, %v5313_v55   ;;  %5541 = vperm.xlu1 %13336, %v5318_v4  }
 0x7ad   : > { %5784 = vperm.xlu0 %13320, %v5314_v15  }
 0x804   : > { %v13349_v26 = vpop.permute.xlu1 %13348 }
 0x805   : > { %v13351_v48 = vunpack.i.h.bf16 %v13349_v26  ;;  %v13350_v35 = vunpack.i.l.bf16 %v13349_v26 }
 0x807   : > { %v5729_v14 = vsel %vm20797_vm8, %v13350_v35, %v13351_v48 }
 0x808   : > { %v13354_v47 = vpop.permute.xlu0 %13353 }
 0x809   : > { %v13356_v6 = vunpack.i.h.bf16 %v13354_v47  ;;  %v13355_v60 = vunpack.i.l.bf16 %v13354_v47 }
 0x80b   : > { %v13359_v56 = vpop.permute.xlu1 %13358  ;;  %v5732_v51 = vsel %vm20798_vm13, %v13355_v60, %v13356_v6  ;;  %v12373_v55 = vpack.c.bf16 %v13355_v60, %v13350_v35  ;;  %vm20817_vm13 = vmmov %vm20804_vm0 }
 0x80c   : > { %v12371_v38 = vpack.c.bf16 %v5732_v51, %v5729_v14  ;;  %v13361_v4 = vunpack.i.h.bf16 %v13359_v56  ;;  %v13360_v15 = vunpack.i.l.bf16 %v13359_v56  ;;  %v20808_v51 = vpack.c.bf16 %v18424_v37, %v18413_v1  ;;  %v5311_v1 = vld [vmem:[#allocation7] sm:$0xff] }
 0x80e   : > { %12372 = vmatprep.subr.bf16.mxu0 %v12371_v38  ;;  %v5762_v14 = vsel %vm20806_vm1, %v13360_v15, %v13361_v4  ;;  %vm20826_vm1 = vnez %v20565_v17  ;;  %v20833_v17 = vld [vmem:[#allocation60_spill] sm:$0xff] }
 0x80f   : > { %v13364_v26 = vpop.permute.xlu0 %13363  ;;  %v13369_v19 = vpop.permute.xlu1 %13368  ;;  %12375 = vmatpush1.bf16.msk.msra.mxu0 %vm18480_vm11, %v12373_v55 }
 0x810   : > { %v13366_v47 = vunpack.i.h.bf16 %v13364_v26  ;;  %v13365_v2 = vunpack.i.l.bf16 %v13364_v26  ;;  %v13371_v18 = vunpack.i.h.bf16 %v13369_v19  ;;  %v13370_v8 = vunpack.i.l.bf16 %v13369_v19  ;;  %12377 = vmatprep.subr.bf16.mxu0 %v12376_v49 }
 0x812   : > { %v5764_v11 = vsel %vm20804_vm0, %v13371_v18, %v13365_v2  ;;  %v5761_v5 = vsel %vm20805_vm14, %v13370_v8, %v13360_v15  ;;  %v5765_v35 = vsel %vm20807_vm15, %v13365_v2, %v13366_v47 }
 0x813   : > { %v13374_v56 = vpop.permute.xlu0 %13373  ;;  %v13379_v60 = vpop.permute.xlu1 %13378  ;;  %12379 = vmatpush1.bf16.msra.mxu0 %v20808_v51  ;;  %v12380_v38 = vpack.c.bf16 %v5765_v35, %v5762_v14  ;;  %v12382_v49 = vpack.c.bf16 %v5764_v11, %v5761_v5  ;;  %v20812_v14 = vld [vmem:[#allocation53_spill] sm:$0xff]  ;;  %v20841_v51 = vld [vmem:[#allocation64_spill] sm:$0xff] }
 0x814   : > { %v13376_v55 = vunpack.i.h.bf16 %v13374_v56  ;;  %v13375_v26 = vunpack.i.l.bf16 %v13374_v56  ;;  %v13381_v45 = vunpack.i.h.bf16 %v13379_v60  ;;  %v13380_v19 = vunpack.i.l.bf16 %v13379_v60  ;;  %v20819_v56 = vld [vmem:[#allocation54_spill] sm:$0xff]  ;;  %v20822_v60 = vld [vmem:[#allocation56_spill] sm:$0xff] }
 0x815   : > { %12381 = vmatprep.subr.bf16.mxu0 %v12380_v38  ;;  %vm20813_vm12 = vnez %v20812_v14  ;;  %vm20820_vm0 = vnez %v20819_v56  ;;  %vm20823_vm9 = vnez %v20822_v60  ;;  %v20845_v38 = vld [vmem:[#allocation65_spill] sm:$0xff] }
 0x816   : > { %v5730_v18 = vsel %vm20787_vm4, %v13351_v48, %v13375_v26  ;;  %v5733_v8 = vsel %vm20809_vm2, %v13356_v6, %v13380_v19  ;;  %v5731_v15 = vsel %vm20810_vm10, %v13375_v26, %v13376_v55  ;;  %v5734_v2 = vsel %vm20811_vm5, %v13380_v19, %v13381_v45  ;;  %v5312_v48 = vld [vmem:[#allocation7 + $0x8] sm:$0xff]  ;;  %v20851_v55 = vld [vmem:[#allocation67_spill] sm:$0xff]  ;;  %v20857_v26 = vld [vmem:[#allocation69_spill] sm:$0xff] }
 0x817   : > { %v13384_v25 = vpop.permute.xlu0 %13383  ;;  %12383 = vmatpush1.bf16.msra.mxu0 %v12382_v49  ;;  %v12384_v30 = vpack.c.bf16 %v5734_v2, %v5731_v15  ;;  %v12386_v37 = vpack.c.bf16 %v5733_v8, %v5730_v18  ;;  %v20814_v6 = vpack.c.bf16 %v18454_v52, %v18439_v22  ;;  %v20815_v45 = vld [vmem:[#allocation52_spill] sm:$0xff]  ;;  %v20821_v22 = vpack.c.bf16 %v18451_v43, %v18437_v59  ;;  %v20829_v59 = vld [vmem:[#allocation59_spill] sm:$0xff]  ;;  %v20835_v43 = vld [vmem:[#allocation61_spill] sm:$0xff] }
 0x818   : > { %12398 = vmatprep.subr.msk.bf16.mxu0 %vm20813_vm12, %v20280_v10  ;;  %v13386_v35 = vunpack.i.h.bf16 %v13384_v25  ;;  %v13385_v5 = vunpack.i.l.bf16 %v13384_v25  ;;  %vm20816_vm8 = vnez %v20815_v45  ;;  %vm20830_vm4 = vnez %v20829_v59  ;;  %v20863_v19 = vld [vmem:[#allocation71_spill] sm:$0xff]  ;;  %v20869_v49 = vld [vmem:[#allocation73_spill] sm:$0xff] }
 0x819   : > { %12385 = vmatprep.subr.bf16.mxu1 %v12384_v30  ;;  %vm20831_vm2 = vnez %v20567_v33  ;;  %vm20832_vm10 = vnez %v20571_v42  ;;  %vm20834_vm5 = vnez %v20833_v17  ;;  %vm20836_vm12 = vnez %v20835_v43  ;;  %v20839_v42 = vld [vmem:[#allocation63_spill] sm:$0xff]  ;;  %v20881_v8 = vld [vmem:[#allocation77_spill] sm:$0xff]  ;;  %v20919_v43 = vld [vmem:[#allocation88_spill] sm:$0xff] }
 0x81a   : > { %10476 = vmatmul.mubr.msk.f32.vlgmr.msra.gmra.mrb[18].mxu0 %vm20105_vm6, %v5311_v1  ;;  %12387 = vmatpush1.bf16.msra.mxu1 %v12386_v37  ;;  %v5763_v25 = vsel %vm20817_vm13, %v13361_v4, %v13385_v5  ;;  %v5766_v30 = vsel %vm20818_vm3, %v13366_v47, %v13386_v35  ;;  %v12392_v11 = vpack.c.bf16 %v13386_v35, %v13385_v5  ;;  %v20824_v4 = vld [vmem:[#allocation57_spill] sm:$0xff]  ;;  %v20827_v47 = vld [vmem:[#allocation58_spill] sm:$0xff]  ;;  %v20875_v18 = vld [vmem:[#allocation75_spill] sm:$0xff] }
 0x81b   : > { %12389 = vmatprep.subr.bf16.mxu1 %v20814_v6  ;;  %5864 = vmatprep.mubr.f32.mxu0 %v20554_v29  ;;  %v12395_v52 = vpack.c.bf16 %v5766_v30, %v5763_v25  ;;  %vm20825_vm14 = vnez %v20824_v4  ;;  %vm20828_vm15 = vnez %v20827_v47  ;;  %vm20838_vm13 = vnez %v20579_v21  ;;  %v20847_v21 = vld [vmem:[#allocation66_spill] sm:$0xff]  ;;  %v20887_v15 = vld [vmem:[#allocation79_spill] sm:$0xff]  ;;  %v20893_v2 = vld [vmem:[#allocation81_spill] sm:$0xff] }
 0x81c   : > { %12400 = vmatpush1.bf16.msk.msra.mxu0 %vm20816_vm8, %v20280_v10  ;;  %vm20840_vm3 = vnez %v20839_v42  ;;  %v20905_v37 = vld [vmem:[#allocation85_spill] sm:$0xff]  ;;  %v20917_v4 = vld [vmem:[#allocation166_spill] sm:$0xff] }
 0x81d   : > { %12402 = vmatprep.subr.msk.bf16.mxu0 %vm20820_vm0, %v20280_v10  ;;  %vm20842_vm0 = vnez %v20841_v51  ;;  %v20921_v51 = vld [vmem:[#allocation167_spill] sm:$0xff] }
 0x81e   : > { %10477 = vmatmul.mubr.msk.f32.gmra.mrb[20].mxu0 %vm20105_vm6, %v5312_v48  ;;  %12391 = vmatpush1.bf16.msra.mxu1 %v20821_v22  ;;  %v6835_v17 = vld [vmem:[%s21034_s15] sm:$0xff]  ;;  %s21042_s15 = smov 1  }
 0x81f   : > { %12394 = vmatprep.subr.msk.bf16.mxu1 %vm12393_vm7, %v12392_v11  ;;  %vm20837_vm7 = vnez %v20575_v41 }
 0x820   : > { %12404 = vmatpush1.bf16.msk.msra.mxu0 %vm20823_vm9, %v20280_v10 }
 0x821   : > { %12406 = vmatprep.subr.msk.bf16.mxu0 %vm20825_vm14, %v20280_v10  ;;  %vm20843_vm14 = vnez %v20581_v27 }
 0x822   : > { %12396 = vmatpush1.bf16.msra.mxu1 %v12395_v52  ;;  %v20915_v52 = vld [vmem:[#allocation87_spill] sm:$0xff] }
 0x823   : > { %12502 = vmatprep.subr.msk.bf16.mxu1 %vm20826_vm1, %v20280_v10  ;;  %vm20844_vm1 = vnez %v20583_v28  ;;  %v20853_v28 = vld [vmem:[#allocation68_spill] sm:$0xff] }
 0x824   : > { %12408 = vmatpush1.bf16.msk.msra.mxu0 %vm20828_vm15, %v20280_v10 }
 0x825   : > { %10480 = vmatmul.mubr.msk.f32.vlgmr.msra.gmra.mrb[14].mxu1 %vm20105_vm6, %v5311_v1  ;;  %12410 = vmatprep.subr.msk.bf16.mxu0 %vm20830_vm4, %v20280_v10  ;;  %vm20846_vm4 = vnez %v20845_v38  ;;  %v20899_v1 = vld [vmem:[#allocation83_spill] sm:$0xff] }
 0x826   : > { %5941 = vmatprep.mubr.f32.mxu1 %v20554_v29  ;;  %12504 = vmatpush1.bf16.msk.msra.mxu1 %vm20831_vm2, %v20280_v10  ;;  %vm20873_vm2 = vnez %v20601_v34 }
 0x827   : > { %12506 = vmatprep.subr.msk.bf16.mxu1 %vm20832_vm10, %v20280_v10  ;;  %vm20848_vm10 = vnez %v20847_v21 }
 0x828   : > { %12412 = vmatpush1.bf16.msk.msra.mxu0 %vm20834_vm5, %v20280_v10 }
 0x829   : > { %10481 = vmatmul.mubr.msk.f32.gmra.mrb[16].mxu1 %vm20105_vm6, %v5312_v48  ;;  %12414 = vmatprep.subr.msk.bf16.mxu0 %vm20836_vm12, %v20280_v10  ;;  %vm20849_vm12 = vnez %v20585_v63  ;;  %vm20855_vm6 = vnez %v20589_v12 }
 0x82a   : > { %12508 = vmatpush1.bf16.msk.msra.mxu1 %vm20837_vm7, %v20280_v10  ;;  %vm20867_vm7 = vnez %v20597_v46 }
 0x82b   : > { %12510 = vmatprep.subr.msk.bf16.mxu1 %vm20838_vm13, %v20280_v10  ;;  %vm20850_vm13 = vnez %v20587_v36  ;;  %v20859_v36 = vld [vmem:[#allocation70_spill] sm:$0xff] }
 0x82c   : > { %12416 = vmatpush1.bf16.msk.msra.mxu0 %vm20840_vm3, %v20280_v10 }
 0x82d   : > { %12418 = vmatprep.subr.msk.bf16.mxu0 %vm20842_vm0, %v20280_v10  ;;  %vm20852_vm0 = vnez %v20851_v55 }
 0x82e   : > { %12512 = vmatpush1.bf16.msk.msra.mxu1 %vm20843_vm14, %v20280_v10  ;;  %vm20861_vm14 = vnez %v20593_v40 }
 0x82f   : > { %12514 = vmatprep.subr.msk.bf16.mxu1 %vm20844_vm1, %v20280_v10  ;;  %vm20854_vm1 = vnez %v20853_v28  ;;  %v20923_v28 = vld [vmem:[#allocation90_spill] sm:$0xff] }
 0x830   : > { %12420 = vmatpush1.bf16.msk.msra.mxu0 %vm20846_vm4, %v20280_v10 }
 0x831   : > { %12422 = vmatprep.subr.msk.bf16.mxu0 %vm20848_vm10, %v20280_v10  ;;  %vm20856_vm10 = vnez %v20591_v39  ;;  %v20865_v39 = vld [vmem:[#allocation72_spill] sm:$0xff] }
 0x832   : > { %12516 = vmatpush1.bf16.msk.msra.mxu1 %vm20849_vm12, %v20280_v10  ;;  %vm20858_vm12 = vnez %v20857_v26 }
 0x833   : > { %12518 = vmatprep.subr.msk.bf16.mxu1 %vm20850_vm13, %v20280_v10  ;;  %vm20860_vm13 = vnez %v20859_v36  ;;  %v20925_v36 = vld [vmem:[#allocation168_spill] sm:$0xff] }
 0x834   : > { %12424 = vmatpush1.bf16.msk.msra.mxu0 %vm20852_vm0, %v20280_v10 }
 0x835   : > { %12426 = vmatprep.subr.msk.bf16.mxu0 %vm20854_vm1, %v20280_v10  ;;  %vm20862_vm1 = vnez %v20595_v44  ;;  %v20871_v44 = vld [vmem:[#allocation74_spill] sm:$0xff] }
 0x836   : > { %12520 = vmatpush1.bf16.msk.msra.mxu1 %vm20855_vm6, %v20280_v10  ;;  %vm20864_vm6 = vnez %v20863_v19 }
 0x837   : > { %12522 = vmatprep.subr.msk.bf16.mxu1 %vm20856_vm10, %v20280_v10  ;;  %vm20866_vm10 = vnez %v20865_v39 }
 0x838   : > { %12428 = vmatpush1.bf16.msk.msra.mxu0 %vm20858_vm12, %v20280_v10 }
 0x839   : > { %12430 = vmatprep.subr.msk.bf16.mxu0 %vm20860_vm13, %v20280_v10  ;;  %vm20868_vm13 = vnez %v20599_v50  ;;  %v20877_v50 = vld [vmem:[#allocation76_spill] sm:$0xff] }
 0x83a   : > { %12524 = vmatpush1.bf16.msk.msra.mxu1 %vm20861_vm14, %v20280_v10  ;;  %vm20870_vm14 = vnez %v20869_v49 }
 0x83b   : > { %12526 = vmatprep.subr.msk.bf16.mxu1 %vm20862_vm1, %v20280_v10  ;;  %vm20872_vm1 = vnez %v20871_v44 }
 0x83c   : > { %12432 = vmatpush1.bf16.msk.msra.mxu0 %vm20864_vm6, %v20280_v10 }
 0x83d   : > { %12434 = vmatprep.subr.msk.bf16.mxu0 %vm20866_vm10, %v20280_v10  ;;  %vm20874_vm10 = vnez %v20603_v53  ;;  %v20883_v53 = vld [vmem:[#allocation78_spill] sm:$0xff] }
 0x83e   : > { %12528 = vmatpush1.bf16.msk.msra.mxu1 %vm20867_vm7, %v20280_v10  ;;  %vm20876_vm7 = vnez %v20875_v18 }
 0x83f   : > { %12530 = vmatprep.subr.msk.bf16.mxu1 %vm20868_vm13, %v20280_v10  ;;  %vm20878_vm13 = vnez %v20877_v50  ;;  %v20927_v50 = vld [vmem:[#allocation91_spill] sm:$0xff] }
 0x840   : > { %12436 = vmatpush1.bf16.msk.msra.mxu0 %vm20870_vm14, %v20280_v10  ;;  %vm20879_vm14 = vnez %v20605_v54 }
 0x841   : > { %12438 = vmatprep.subr.msk.bf16.mxu0 %vm20872_vm1, %v20280_v10  ;;  %vm20880_vm1 = vnez %v20607_v57  ;;  %v20889_v57 = vld [vmem:[#allocation80_spill] sm:$0xff] }
 0x842   : > { %12532 = vmatpush1.bf16.msk.msra.mxu1 %vm20873_vm2, %v20280_v10  ;;  %vm20882_vm2 = vnez %v20881_v8 }
 0x843   : > { %12534 = vmatprep.subr.msk.bf16.mxu1 %vm20874_vm10, %v20280_v10  ;;  %vm20884_vm10 = vnez %v20883_v53  ;;  %v20929_v53 = vld [vmem:[#allocation169_spill] sm:$0xff] }
 0x844   : > { %12440 = vmatpush1.bf16.msk.msra.mxu0 %vm20876_vm7, %v20280_v10  ;;  %vm20885_vm7 = vnez %v20609_v58 }
 0x845   : > { %12442 = vmatprep.subr.msk.bf16.mxu0 %vm20878_vm13, %v20280_v10  ;;  %vm20886_vm13 = vnez %v20611_v61  ;;  %v20895_v61 = vld [vmem:[#allocation82_spill] sm:$0xff] }
 0x846   : > { %12536 = vmatpush1.bf16.msk.msra.mxu1 %vm20879_vm14, %v20280_v10  ;;  %vm20888_vm14 = vnez %v20887_v15 }
 0x847   : > { %12538 = vmatprep.subr.msk.bf16.mxu1 %vm20880_vm1, %v20280_v10  ;;  %vm20890_vm1 = vnez %v20889_v57 }
 0x848   : > { %12444 = vmatpush1.bf16.msk.msra.mxu0 %vm20882_vm2, %v20280_v10  ;;  %vm20891_vm2 = vnez %v20613_v62 }
 0x849   : > { %12446 = vmatprep.subr.msk.bf16.mxu0 %vm20884_vm10, %v20280_v10  ;;  %vm20892_vm10 = vnez %v20615_v0  ;;  %v20901_v0 = vld [vmem:[#allocation84_spill] sm:$0xff] }
 0x84a   : > { %12540 = vmatpush1.bf16.msk.msra.mxu1 %vm20885_vm7, %v20280_v10  ;;  %vm20894_vm7 = vnez %v20893_v2 }
 0x84b   : > { %12542 = vmatprep.subr.msk.bf16.mxu1 %vm20886_vm13, %v20280_v10  ;;  %vm20896_vm13 = vnez %v20895_v61  ;;  %v20931_v61 = vld [vmem:[#allocation92_spill] sm:$0xff] }
 0x84c   : > { %12448 = vmatpush1.bf16.msk.msra.mxu0 %vm20888_vm14, %v20280_v10  ;;  %vm20897_vm14 = vnez %v20617_v3 }
 0x84d   : > { %12450 = vmatprep.subr.msk.bf16.mxu0 %vm20890_vm1, %v20280_v10  ;;  %vm20898_vm1 = vnez %v20619_v9  ;;  %v20907_v9 = vld [vmem:[#allocation86_spill] sm:$0xff] }
 0x84e   : > { %12544 = vmatpush1.bf16.msk.msra.mxu1 %vm20891_vm2, %v20280_v10  ;;  %vm20900_vm2 = vnez %v20899_v1  ;;  %v20933_v1 = vld [vmem:[#allocation89_spill] sm:$0xff] }
 0x84f   : > { %12546 = vmatprep.subr.msk.bf16.mxu1 %vm20892_vm10, %v20280_v10  ;;  %vm20902_vm10 = vnez %v20901_v0 }
 0x850   : > { %12452 = vmatpush1.bf16.msk.msra.mxu0 %vm20894_vm7, %v20280_v10  ;;  %vm20903_vm7 = vnez %v20621_v7 }
 0x851   : > { %12454 = vmatprep.subr.msk.bf16.mxu0 %vm20896_vm13, %v20280_v10  ;;  %vm20904_vm13 = vnez %v20623_v13  ;;  %v5780_v13 = vpop.permute.xlu0 %5779 }
 0x852   : > { %12548 = vmatpush1.bf16.msk.msra.mxu1 %vm20897_vm14, %v20280_v10  ;;  %vm20906_vm14 = vnez %v20905_v37  ;;  %v20935_v37 = vld [vmem:[#allocation93_spill] sm:$0xff] }
 0x853   : > { %12550 = vmatprep.subr.msk.bf16.mxu1 %vm20898_vm1, %v20280_v10  ;;  %vm20908_vm1 = vnez %v20907_v9  ;;  %v20937_v9 = vld [vmem:[#allocation170_spill] sm:$0xff] }
 0x854   : > { %12456 = vmatpush1.bf16.msk.msra.mxu0 %vm20900_vm2, %v20280_v10  ;;  %vm20909_vm2 = vnez %v20625_v16  ;;  %v5537_v16 = vpop.permute.xlu1 %5536 }
 0x855   : > { %12458 = vmatprep.subr.msk.bf16.mxu0 %vm20902_vm10, %v20280_v10  ;;  %vm20910_vm10 = vnez %v20627_v23  ;;  %v18711_v23 = vadd.f32 %v5780_v13, %v5537_v16  ;;  %v5785_v14 = vpop.permute.xlu0 %5784  ;;  %v20939_v13 = vld [vmem:[#allocation95_spill] sm:$0xff] }
 0x856   : > { %12552 = vmatpush1.bf16.msk.msra.mxu1 %vm20903_vm7, %v20280_v10  ;;  %vm20911_vm7 = vnez %v20629_v24  ;;  %v20941_v16 = vld [vmem:[#allocation171_spill] sm:$0xff] }
 0x857   : > { %12554 = vmatprep.subr.msk.bf16.mxu1 %vm20904_vm13, %v20280_v10  ;;  %vm20912_vm13 = vnez %v20631_v31 }
 0x858   : > { %12460 = vmatpush1.bf16.msk.msra.mxu0 %vm20906_vm14, %v20280_v10  ;;  %vm20913_vm14 = vnez %v20633_v32  ;;  %v5542_v6 = vpop.permute.xlu1 %5541 }
 0x859   : > { %12462 = vmatprep.subr.msk.bf16.mxu0 %vm20908_vm1, %v20280_v10  ;;  %vm20914_vm1 = vnez %v20635_v20  ;;  %v18715_v48 = vadd.f32 %v5785_v14, %v5542_v6  ;;  %v20943_v14 = vld [vmem:[#allocation96_spill] sm:$0xff] }
 0x85a   : > { %12556 = vmatpush1.bf16.msk.msra.mxu1 %vm20909_vm2, %v20280_v10  ;;  %vm20918_vm2 = vnez %v20917_v4  ;;  %v20951_v6 = vld [vmem:[#allocation100_spill] sm:$0xff]  ;;  %v20971_v4 = vld [vmem:[#allocation111_spill] sm:$0xff] }
 0x85b   : > { %12558 = vmatprep.subr.msk.bf16.mxu1 %vm20910_vm10, %v20280_v10  ;;  %vm20920_vm10 = vnez %v20919_v43  ;;  %v20975_v43 = vld [vmem:[#allocation112_spill] sm:$0xff] }
 0x85e   : > { %12560 = vmatpush1.bf16.msk.msra.mxu1 %vm20911_vm7, %v20280_v10  ;;  %vm20916_vm7 = vnez %v20915_v52  ;;  %v20969_v52 = vld [vmem:[#allocation102_spill] sm:$0xff] }
 0x85f   : > { %12562 = vmatprep.subr.msk.bf16.mxu1 %vm20912_vm13, %v20280_v10  ;;  %vm20922_vm13 = vnez %v20921_v51  ;;  %v20977_v51 = vld [vmem:[#allocation106_spill] sm:$0xff] }
 0x862   : > { %12564 = vmatpush1.bf16.msk.msra.mxu1 %vm20913_vm14, %v20280_v10  ;;  %vm20924_vm14 = vnez %v20923_v28  ;;  %v20979_v28 = vld [vmem:[#allocation115_spill] sm:$0xff] }
 0x863   : > { %12566 = vmatprep.subr.msk.bf16.mxu1 %vm20914_vm1, %v20280_v10  ;;  %vm20926_vm1 = vnez %v20925_v36  ;;  %v20981_v36 = vld [vmem:[#allocation109_spill] sm:$0xff] }
 0x8ed   : > { %v5860_v35 = vpop.f32.mrb[18].mxu0 }
 0x8ee   : > { %v13062_v24 = vadd.f32 %v18711_v23, %v5860_v35  ;;  %v5862_v5 = vpop.f32.mrb[19].mxu0  ;;  %v20945_v35 = vld [vmem:[#allocation172_spill] sm:$0xff] }
 0x8ef   : > { %v13064_v31 = vadd.f32 %v18711_v23, %v5862_v5  ;;  %v20949_v5 = vld [vmem:[#allocation94_spill] sm:$0xff] }
 0x8f0   : > { %v5956_v30 = vmax.f32 %v13062_v24, 0.0  ;;  %v20947_v24 = vld [vmem:[#allocation99_spill] sm:$0xff] }
 0x8f1   : > { %v5957_v32 = vmax.f32 %v13064_v31, 0.0  ;;  %v5866_v25 = vpop.f32.mrb[20].mxu0  ;;  %v20953_v31 = vld [vmem:[#allocation173_spill] sm:$0xff] }
 0x8f2   : > { %v13066_v20 = vadd.f32 %v18715_v48, %v5866_v25  ;;  %v5868_v11 = vpop.f32.mrb[21].mxu0  ;;  %v20957_v25 = vld [vmem:[#allocation97_spill] sm:$0xff] }
 0x8f3   : > { %v13068_v56 = vadd.f32 %v18715_v48, %v5868_v11  ;;  %6035 = vmatprep.mubr.f32.mxu0 %v5957_v32  ;;  %6189 = vmatprep.mubr.f32.mxu1 %v5957_v32  ;;  %v20955_v32 = vld [vmem:[#allocation103_spill] sm:$0xff] }
 0x8f4   : > { %6036 = vmatmul.mubr.f32.vlgmr.msra.gmra.mrb[22].mxu0 %v5956_v30  ;;  %6190 = vmatmul.mubr.f32.vlgmr.msra.gmra.mrb[18].mxu1 %v5956_v30  ;;  %v5960_v59 = vmax.f32 %v13066_v20, 0.0  ;;  %v20959_v30 = vld [vmem:[#allocation104_spill] sm:$0xff]  ;;  %v20961_v20 = vld [vmem:[#allocation98_spill] sm:$0xff]  ;;  %v20963_v11 = vld [vmem:[#allocation107_spill] sm:$0xff] }
 0x8f5   : > { %v5961_v22 = vmax.f32 %v13068_v56, 0.0  ;;  %12464 = vmatpush1.bf16.msk.msra.mxu0 %vm20916_vm7, %v20280_v10  ;;  %12568 = vmatpush1.bf16.msk.msra.mxu1 %vm20918_vm2, %v20280_v10  ;;  %vm20928_vm7 = vnez %v20927_v50  ;;  %vm20930_vm2 = vnez %v20929_v53  ;;  %v20965_v56 = vld [vmem:[#allocation101_spill] sm:$0xff]  ;;  %v20985_v50 = vld [vmem:[#allocation110_spill] sm:$0xff] }
 0x8f6   : > { %12466 = vmatprep.subr.msk.bf16.mxu0 %vm20920_vm10, %v20280_v10  ;;  %12570 = vmatprep.subr.msk.bf16.mxu1 %vm20922_vm13, %v20280_v10  ;;  %vm20106_vm10 = vcmask 261120   ;;  %vm20932_vm13 = vnez %v20931_v61  ;;  %v20989_v61 = vld [vmem:[#allocation113_spill] sm:$0xff] }
 0x8f7   : > { %6041 = vmatprep.mubr.f32.mxu0 %v5961_v22  ;;  %6195 = vmatprep.mubr.f32.mxu1 %v5961_v22  ;;  %v20967_v22 = vld [vmem:[#allocation108_spill] sm:$0xff] }
 0x8f8   : > { %v5937_v21 = vpop.f32.mrb[14].mxu1  ;;  %6042 = vmatmul.mubr.f32.gmra.mrb[24].mxu0 %v5960_v59  ;;  %6196 = vmatmul.mubr.f32.gmra.mrb[20].mxu1 %v5960_v59  ;;  %v20973_v59 = vld [vmem:[#allocation105_spill] sm:$0xff] }
 0x8f9   : > { %12468 = vmatpush1.bf16.msk.msra.mxu0 %vm20924_vm14, %v20280_v10  ;;  %12572 = vmatpush1.bf16.msk.msra.mxu1 %vm20926_vm1, %v20280_v10  ;;  %v5939_v39 = vpop.f32.mrb[15].mxu1  ;;  %vm20934_vm14 = vnez %v20933_v1  ;;  %vm20936_vm1 = vnez %v20935_v37 }
 0x8fa   : > { %v13072_v44 = vadd.f32 %v18711_v23, %v5939_v39  ;;  %12470 = vmatprep.subr.msk.bf16.mxu0 %vm20928_vm7, %v20280_v10  ;;  %12574 = vmatprep.subr.msk.bf16.mxu1 %vm20930_vm2, %v20280_v10  ;;  %vm20938_vm7 = vnez %v20937_v9  ;;  %vm20940_vm2 = vnez %v20939_v13  ;;  %v13070_v39 = vadd.f32 %v18711_v23, %v5937_v21 }
 0x8fc   : > { %v5959_v57 = vmax.f32 %v13072_v44, 0.0  ;;  %v5943_v2 = vpop.f32.mrb[16].mxu1  ;;  %v20983_v44 = vld [vmem:[#allocation116_spill] sm:$0xff]  ;;  %v5958_v1 = vmax.f32 %v13070_v39, 0.0 }
 0x8fd   : > { %12472 = vmatpush1.bf16.msk.msra.mxu0 %vm20932_vm13, %v20280_v10  ;;  %12576 = vmatpush1.bf16.msk.msra.mxu1 %vm20934_vm14, %v20280_v10  ;;  %v5945_v0 = vpop.f32.mrb[17].mxu1  ;;  %vm20942_vm13 = vnez %v20941_v16  ;;  %vm20944_vm14 = vnez %v20943_v14  ;;  %v13074_v23 = vadd.f32 %v18715_v48, %v5943_v2 }
 0x8fe   : > { %10586 = vmatprep.mubr.msk.f32.mxu0 %vm20106_vm10, %v5959_v57  ;;  %10692 = vmatprep.mubr.msk.f32.mxu1 %vm20106_vm10, %v5959_v57  ;;  %vm20946_vm10 = vnez %v20945_v35  ;;  %v13076_v53 = vadd.f32 %v18715_v48, %v5945_v0  ;;  %v20987_v57 = vld [vmem:[#allocation119_spill] sm:$0xff] }
 0x8ff   : > { %12474 = vmatprep.subr.msk.bf16.mxu0 %vm20936_vm1, %v20280_v10  ;;  %12578 = vmatprep.subr.msk.bf16.mxu1 %vm20938_vm7, %v20280_v10  ;;  %vm20948_vm1 = vnez %v20947_v24  ;;  %vm20950_vm7 = vnez %v20949_v5  ;;  %v5962_v37 = vmax.f32 %v13074_v23, 0.0 }
 0x900   : > { %v5963_v21 = vmax.f32 %v13076_v53, 0.0 }
 0x901   : > { %12476 = vmatpush1.bf16.msk.msra.mxu0 %vm20940_vm2, %v20280_v10  ;;  %12580 = vmatpush1.bf16.msk.msra.mxu1 %vm20942_vm13, %v20280_v10  ;;  %vm20952_vm2 = vnez %v20951_v6  ;;  %vm20954_vm13 = vnez %v20953_v31 }
 0x902   : > { %12478 = vmatprep.subr.msk.bf16.mxu0 %vm20944_vm14, %v20280_v10  ;;  %12582 = vmatprep.subr.msk.bf16.mxu1 %vm20946_vm10, %v20280_v10  ;;  %vm20956_vm14 = vnez %v20955_v32  ;;  %vm20958_vm10 = vnez %v20957_v25 }
 0x905   : > { %12480 = vmatpush1.bf16.msk.msra.mxu0 %vm20948_vm1, %v20280_v10  ;;  %12584 = vmatpush1.bf16.msk.msra.mxu1 %vm20950_vm7, %v20280_v10  ;;  %vm20960_vm1 = vnez %v20959_v30  ;;  %vm20962_vm7 = vnez %v20961_v20 }
 0x906   : > { %12482 = vmatprep.subr.msk.bf16.mxu0 %vm20952_vm2, %v20280_v10  ;;  %12586 = vmatprep.subr.msk.bf16.mxu1 %vm20954_vm13, %v20280_v10  ;;  %vm20964_vm2 = vnez %v20963_v11  ;;  %vm20966_vm13 = vnez %v20965_v56  ;;  %v6285_v11 = vld [vmem:[%s20993_s16] sm:$0xff]  ;;  %v6286_v56 = vld [vmem:[%s20993_s16 + $0x8] sm:$0xff] }
 0x909   : > { %12484 = vmatpush1.bf16.msk.msra.mxu0 %vm20956_vm14, %v20280_v10  ;;  %12588 = vmatpush1.bf16.msk.msra.mxu1 %vm20958_vm10, %v20280_v10  ;;  %vm20968_vm14 = vnez %v20967_v22  ;;  %vm20970_vm10 = vnez %v20969_v52 }
 0x90a   : > { %12486 = vmatprep.subr.msk.bf16.mxu0 %vm20960_vm1, %v20280_v10  ;;  %12590 = vmatprep.subr.msk.bf16.mxu1 %vm20962_vm7, %v20280_v10  ;;  %vm20972_vm1 = vnez %v20971_v4  ;;  %vm20974_vm7 = vnez %v20973_v59 }
 0x90d   : > { %12488 = vmatpush1.bf16.msk.msra.mxu0 %vm20964_vm2, %v20280_v10  ;;  %12592 = vmatpush1.bf16.msk.msra.mxu1 %vm20966_vm13, %v20280_v10  ;;  %vm20976_vm2 = vnez %v20975_v43  ;;  %vm20978_vm13 = vnez %v20977_v51 }
 0x90e   : > { %12490 = vmatprep.subr.msk.bf16.mxu0 %vm20968_vm14, %v20280_v10  ;;  %12594 = vmatprep.subr.msk.bf16.mxu1 %vm20970_vm10, %v20280_v10  ;;  %vm20980_vm14 = vnez %v20979_v28  ;;  %vm20982_vm10 = vnez %v20981_v36 }
 0x911   : > { %12492 = vmatpush1.bf16.msk.msra.mxu0 %vm20972_vm1, %v20280_v10  ;;  %12596 = vmatpush1.bf16.msk.msra.mxu1 %vm20974_vm7, %v20280_v10  ;;  %vm20984_vm1 = vnez %v20983_v44  ;;  %vm20986_vm7 = vnez %v20985_v50 }
 0x912   : > { %12494 = vmatprep.subr.msk.bf16.mxu0 %vm20976_vm2, %v20280_v10  ;;  %12598 = vmatprep.subr.msk.bf16.mxu1 %vm20978_vm13, %v20280_v10  ;;  %vm20988_vm2 = vnez %v20987_v57  ;;  %vm20990_vm13 = vnez %v20989_v61 }
 0x915   : > { %12496 = vmatpush1.bf16.msk.msra.mxu0 %vm20980_vm14, %v20280_v10  ;;  %12600 = vmatpush1.bf16.msk.msra.mxu1 %vm20982_vm10, %v20280_v10  ;;  %vm20991_vm14 = vcmask 261120  }
 0x916   : > { %12498 = vmatprep.subr.msk.bf16.mxu0 %vm20984_vm1, %v20280_v10  ;;  %12602 = vmatprep.subr.msk.bf16.mxu1 %vm20986_vm7, %v20280_v10  ;;  %vm20992_vm10 = vmmov %vm20991_vm14  ;;  %vm20994_vm1 = vcmask 7168  }
 0x917   : > { %vm20995_vm7 = vmmov %vm20994_vm1 }
 0x919   : > { %12500 = vmatpush1.bf16.msk.msra.mxu0 %vm20988_vm2, %v20280_v10  ;;  %12604 = vmatpush1.bf16.msk.msra.mxu1 %vm20990_vm13, %v20280_v10  ;;  %vm6329_vm2 = vcmask 646144  }
 0x91a   : > { %vm18853_vm13 = vmpackc.low %vm6329_vm2, %vm6329_vm2  ;;  %vm21004_vm2 = vnez %v20869_v49 }
 0x91c   : > { %6113 = vmatmul.mubr.f32.vlgmr.msra.gmra.mrb[22].mxu0 %v5958_v1  ;;  %6267 = vmatmul.mubr.f32.vlgmr.msra.gmra.mrb[18].mxu1 %v5958_v1 }
 0x91d   : > { %10587 = vmatprep.mubr.msk.f32.mxu0 %vm20991_vm14, %v5963_v21  ;;  %10693 = vmatprep.mubr.msk.f32.mxu1 %vm20992_vm10, %v5963_v21  ;;  %vm20999_vm14 = vcmask 1039360  }
 0x91e   : > { %vm21000_vm10 = vmmov %vm20999_vm14 }
 0x920   : > { %6119 = vmatmul.mubr.f32.gmra.mrb[24].mxu0 %v5962_v37  ;;  %6273 = vmatmul.mubr.f32.gmra.mrb[20].mxu1 %v5962_v37 }
 0x921   : > { %6412 = vmatprep.mubr.f32.mxu0 %v20554_v29  ;;  %6510 = vmatprep.mubr.f32.mxu1 %v20554_v29 }
 0x9ef   : > { %v6114_v0 = vpop.f32.mrb[22].mxu0  ;;  %v6268_v9 = vpop.f32.mrb[18].mxu1 }
 0x9f0   : > { %v6279_v13 = vmax.f32 %v6114_v0, %v6268_v9  ;;  %v6116_v16 = vpop.f32.mrb[23].mxu0  ;;  %v6270_v14 = vpop.f32.mrb[19].mxu1 }
 0x9f1   : > { %v6280_v48 = vmax.f32 %v6116_v16, %v6270_v14  ;;  %v6283_v14 = vld [vmem:[#allocation9] sm:$0xff] }
 0x9f3   : > { %v6120_v2 = vpop.f32.mrb[24].mxu0  ;;  %v6274_v35 = vpop.f32.mrb[20].mxu1  ;;  %v13387_v24 = vpack.i.bf16 %v6280_v48, %v6279_v13 }
 0x9f4   : > { %v6281_v5 = vmax.f32 %v6120_v2, %v6274_v35  ;;  %v6122_v6 = vpop.f32.mrb[25].mxu0  ;;  %v6276_v31 = vpop.f32.mrb[21].mxu1  ;;  %v6284_v2 = vld [vmem:[#allocation9 + $0x8] sm:$0xff] }
 0x9f5   : > { %v6282_v32 = vmax.f32 %v6122_v6, %v6276_v31  ;;  %13388 = vrot.lane.b32.xlu1 %v13387_v24, %s20110_s12 }
 0x9f6   : > { %v12612_v25 = vpack.c.bf16 %v6281_v5, %v6279_v13 }
 0x9f7   : > { %v13392_v30 = vpack.i.bf16 %v6282_v32, %v6281_v5  ;;  %v12610_v20 = vpack.c.bf16 %v6282_v32, %v6280_v48  ;;  %v21001_v48 = vmov 0.0|0.0  }
 0x9f9   : > { %13398 = vrot.lane.b32.xlu1 %v13387_v24, %s20108_s22  ;;  %13393 = vrot.lane.b32.xlu0 %v13392_v30, %s20110_s12 }
 0x9fa   : > { %12620 = vmatprep.subr.bf16.mxu1 %v12610_v20 }
 0x9fb   : > { %12622 = vmatpush1.bf16.msra.mxu1 %v12612_v25 }
 0x9fd   : > { %6334 = vperm.xlu1 %13336, %v6285_v11   ;;  %13403 = vrot.lane.b32.xlu0 %v13392_v30, %s20108_s22 }
 0xa01   : > { %6339 = vperm.xlu0 %13320, %v6286_v56  }
 0xa67   : > { %v13389_v22 = vpop.permute.xlu1 %13388 }
 0xa68   : > { %v13391_v52 = vunpack.i.h.bf16 %v13389_v22  ;;  %v13390_v4 = vunpack.i.l.bf16 %v13389_v22 }
 0xa6a   : > { %v6307_v28 = vsel %vm20994_vm1, %v13390_v4, %v13391_v52  ;;  %vm21002_vm1 = vcmask 392192   ;;  %v6292_v52 = vld [vmem:[#allocation12 + $0x8] sm:$0xff] }
 0xa6b   : > { %v13394_v59 = vpop.permute.xlu0 %13393  ;;  %v13399_v50 = vpop.permute.xlu1 %13398 }
 0xa6c   : > { %v13396_v43 = vunpack.i.h.bf16 %v13394_v59  ;;  %v13395_v51 = vunpack.i.l.bf16 %v13394_v59  ;;  %v13401_v23 = vunpack.i.h.bf16 %v13399_v50  ;;  %v13400_v21 = vunpack.i.l.bf16 %v13399_v50  ;;  %v6289_v59 = vld [vmem:[%s21009_s17] sm:$0xff] }
 0xa6e   : > { %v6308_v36 = vsel %vm20995_vm7, %v13395_v51, %v13396_v43  ;;  %v12607_v53 = vpack.c.bf16 %v13395_v51, %v13390_v4  ;;  %v6323_v13 = vsel %vm21000_vm10, %v13400_v21, %v13401_v23  ;;  %vm21003_vm7 = vmmov %vm21002_vm1  ;;  %v6293_v4 = vld [vmem:[%s21008_s2] sm:$0xff]  ;;  %v6294_v43 = vld [vmem:[%s21008_s2 + $0x8] sm:$0xff]  ;;  %vm21010_vm10 = vcmask 7168  }
 0xa6f   : > { %v13404_v39 = vpop.permute.xlu0 %13403  ;;  %v12605_v44 = vpack.c.bf16 %v6308_v36, %v6307_v28  ;;  %v6290_v51 = vld [vmem:[%s21009_s17 + $0x8] sm:$0xff] }
 0xa70   : > { %v13406_v57 = vunpack.i.h.bf16 %v13404_v39  ;;  %v13405_v61 = vunpack.i.l.bf16 %v13404_v39 }
 0xa71   : > { %12606 = vmatprep.subr.bf16.mxu0 %v12605_v44 }
 0xa72   : > { %12609 = vmatpush1.bf16.msk.msra.mxu0 %vm18480_vm11, %v12607_v53  ;;  %v12614_v0 = vpack.c.bf16 %v13406_v57, %v13401_v23  ;;  %v6324_v9 = vsel %vm20999_vm14, %v13405_v61, %v13406_v57  ;;  %vm20107_vm14 = vcmask 130048  }
 0xa73   : > { %12611 = vmatprep.subr.bf16.mxu0 %v12610_v20  ;;  %v12617_v16 = vpack.c.bf16 %v6324_v9, %v6323_v13 }
 0xa76   : > { %12613 = vmatpush1.bf16.msra.mxu0 %v12612_v25  ;;  %v6291_v25 = vld [vmem:[#allocation12] sm:$0xff] }
 0xa77   : > { %12616 = vmatprep.subr.msk.bf16.mxu0 %vm18853_vm13, %v12614_v0  ;;  %10702 = vmatmul.mubr.msk.f32.vlgmr.msra.gmra.mrb[22].mxu1 %vm20107_vm14, %v6291_v25 }
 0xa78   : > { %6516 = vmatprep.mubr.f32.mxu1 %v20554_v29 }
 0xa7a   : > { %12618 = vmatpush1.bf16.msra.mxu0 %v12617_v16 }
 0xa7b   : > { %12637 = vmatprep.subr.bf16.mxu0 %v21001_v48  ;;  %10703 = vmatmul.mubr.msk.f32.gmra.mrb[24].mxu1 %vm20107_vm14, %v6292_v52  ;;  %vm21024_vm14 = vnez %v20605_v54 }
 0xa7c   : > { %v6335_v55 = vpop.permute.xlu1 %6334  ;;  %6639 = vmatprep.mubr.f32.mxu1 %v20554_v29 }
 0xa7d   : > { %10700 = vmatmul.mubr.msk.f32.vlgmr.msra.gmra.mrb[26].mxu0 %vm21002_vm1, %v6283_v14  ;;  %vm21011_vm1 = vmmov %vm21010_vm10 }
 0xa7e   : > { %6418 = vmatprep.mubr.f32.mxu0 %v20554_v29  ;;  %12639 = vmatpush1.bf16.msk.msra.mxu0 %vm20816_vm8, %v20280_v10 }
 0xa7f   : > { %12640 = vmatprep.subr.bf16.mxu0 %v21001_v48 }
 0xa81   : > { %10701 = vmatmul.mubr.msk.f32.gmra.mrb[28].mxu0 %vm21003_vm7, %v6284_v2  ;;  %vm21012_vm7 = vcmask 1039360  }
 0xa82   : > { %12642 = vmatpush1.bf16.msk.msra.mxu0 %vm20823_vm9, %v20280_v10 }
 0xa83   : > { %12643 = vmatprep.subr.bf16.mxu0 %v21001_v48 }
 0xa86   : > { %12645 = vmatpush1.bf16.msk.msra.mxu0 %vm20828_vm15, %v20280_v10 }
 0xa87   : > { %12646 = vmatprep.subr.bf16.mxu0 %v21001_v48 }
 0xa8a   : > { %12648 = vmatpush1.bf16.msk.msra.mxu0 %vm20834_vm5, %v20280_v10 }
 0xa8b   : > { %12649 = vmatprep.subr.bf16.mxu0 %v21001_v48 }
 0xa8e   : > { %12651 = vmatpush1.bf16.msk.msra.mxu0 %vm20840_vm3, %v20280_v10 }
 0xa8f   : > { %12652 = vmatprep.subr.bf16.mxu0 %v21001_v48 }
 0xa92   : > { %12654 = vmatpush1.bf16.msk.msra.mxu0 %vm20846_vm4, %v20280_v10 }
 0xa93   : > { %12655 = vmatprep.subr.bf16.mxu0 %v21001_v48 }
 0xa96   : > { %12657 = vmatpush1.bf16.msk.msra.mxu0 %vm20852_vm0, %v20280_v10  ;;  %vm21005_vm0 = vnez %v20875_v18  ;;  %v6340_v18 = vpop.permute.xlu0 %6339 }
 0xa97   : > { %12658 = vmatprep.subr.bf16.mxu0 %v21001_v48 }
 0xa9a   : > { %12660 = vmatpush1.bf16.msk.msra.mxu0 %vm20858_vm12, %v20280_v10  ;;  %vm21006_vm12 = vnez %v20881_v8 }
 0xa9b   : > { %12661 = vmatprep.subr.bf16.mxu0 %v21001_v48 }
 0xa9e   : > { %12663 = vmatpush1.bf16.msk.msra.mxu0 %vm20864_vm6, %v20280_v10  ;;  %vm21007_vm6 = vnez %v20887_v15 }
 0xa9f   : > { %12664 = vmatprep.subr.bf16.mxu0 %v21001_v48 }
 0xaa2   : > { %12666 = vmatpush1.bf16.msk.msra.mxu0 %vm21004_vm2, %v20280_v10  ;;  %vm21013_vm2 = vmmov %vm21012_vm7 }
 0xaa3   : > { %12667 = vmatprep.subr.bf16.mxu0 %v21001_v48 }
 0xaa6   : > { %12669 = vmatpush1.bf16.msk.msra.mxu0 %vm21005_vm0, %v20280_v10  ;;  %vm21014_vm0 = vcmask 392192  }
 0xaa7   : > { %12670 = vmatprep.subr.bf16.mxu0 %v21001_v48 }
 0xaaa   : > { %12672 = vmatpush1.bf16.msk.msra.mxu0 %vm21006_vm12, %v20280_v10  ;;  %vm21015_vm12 = vnez %v20567_v33 }
 0xaab   : > { %12673 = vmatprep.subr.bf16.mxu0 %v21001_v48 }
 0xaae   : > { %12675 = vmatpush1.bf16.msk.msra.mxu0 %vm21007_vm6, %v20280_v10  ;;  %vm21016_vm6 = vmmov %vm21014_vm0 }
 0xb50   : > { %v6414_v26 = vpop.f32.mrb[26].mxu0 }
 0xb51   : > { %v6415_v19 = vadd.f32 %v6414_v26, %v6335_v55  ;;  %v6416_v49 = vpop.f32.mrb[27].mxu0 }
 0xb52   : > { %v6417_v35 = vadd.f32 %v6416_v49, %v6335_v55 }
 0xb53   : > { %v6425_v24 = vmax.f32 %v6415_v19, 0.0 }
 0xb54   : > { %v6426_v5 = vmax.f32 %v6417_v35, 0.0  ;;  %v6420_v6 = vpop.f32.mrb[28].mxu0  ;;  %v6287_v35 = vld [vmem:[#allocation10] sm:$0xff] }
 0xb55   : > { %v6421_v31 = vadd.f32 %v6420_v6, %v6340_v18  ;;  %v6422_v32 = vpop.f32.mrb[29].mxu0 }
 0xb56   : > { %v6423_v8 = vadd.f32 %v6422_v32, %v6340_v18  ;;  %v13407_v30 = vpack.i.bf16 %v6426_v5, %v6425_v24 }
 0xb57   : > { %v6427_v15 = vmax.f32 %v6421_v31, 0.0 }
 0xb58   : > { %v6428_v20 = vmax.f32 %v6423_v8, 0.0  ;;  %13408 = vrot.lane.b32.xlu1 %v13407_v30, %s20110_s12 }
 0xb59   : > { %v12630_v11 = vpack.c.bf16 %v6427_v15, %v6425_v24  ;;  %v6288_v24 = vld [vmem:[#allocation10 + $0x8] sm:$0xff] }
 0xb5a   : > { %v13412_v56 = vpack.i.bf16 %v6428_v20, %v6427_v15  ;;  %v12628_v22 = vpack.c.bf16 %v6428_v20, %v6426_v5 }
 0xb5c   : > { %13413 = vrot.lane.b32.xlu0 %v13412_v56, %s20110_s12  ;;  %13418 = vrot.lane.b32.xlu1 %v13407_v30, %s20108_s22 }
 0xb60   : > { %13423 = vrot.lane.b32.xlu0 %v13412_v56, %s20108_s22  ;;  %6431 = vperm.xlu1 %13336, %v6293_v4  }
 0xb64   : > { %6561 = vperm.xlu0 %13320, %v6289_v59   ;;  %6436 = vperm.xlu1 %13336, %v6294_v43  }
 0xb68   : > { %6566 = vperm.xlu0 %13320, %v6290_v51  }
 0xbca   : > { %v13409_v28 = vpop.permute.xlu1 %13408 }
 0xbcb   : > { %v13411_v36 = vunpack.i.h.bf16 %v13409_v28  ;;  %v13410_v39 = vunpack.i.l.bf16 %v13409_v28 }
 0xbcd   : > { %v6535_v57 = vsel %vm21010_vm10, %v13410_v39, %v13411_v36  ;;  %vm21018_vm10 = vnez %v20581_v27 }
 0xbce   : > { %v13414_v44 = vpop.permute.xlu0 %13413  ;;  %v13419_v9 = vpop.permute.xlu1 %13418 }
 0xbcf   : > { %v13416_v50 = vunpack.i.h.bf16 %v13414_v44  ;;  %v13415_v53 = vunpack.i.l.bf16 %v13414_v44  ;;  %v13421_v14 = vunpack.i.h.bf16 %v13419_v9  ;;  %v13420_v2 = vunpack.i.l.bf16 %v13419_v9 }
 0xbd1   : > { %v6536_v61 = vsel %vm21011_vm1, %v13415_v53, %v13416_v50  ;;  %v12625_v0 = vpack.c.bf16 %v13415_v53, %v13410_v39  ;;  %v6551_v19 = vsel %vm21013_vm2, %v13420_v2, %v13421_v14  ;;  %vm21019_vm1 = vnez %v20585_v63  ;;  %v6819_v50 = vld [vmem:[#allocation13] sm:$0xff]  ;;  %v21051_v63 = vld [vmem:[#allocation165_spill] sm:$0xff] }
 0xbd2   : > { %v13424_v23 = vpop.permute.xlu0 %13423  ;;  %v12623_v21 = vpack.c.bf16 %v6536_v61, %v6535_v57  ;;  %vm21021_vm2 = vnez %v20593_v40  ;;  %v6824_v53 = vld [vmem:[%s21029_s1 + $0x8] sm:$0xff]  ;;  %v6823_v57 = vld [vmem:[%s21029_s1] sm:$0xff]  ;;  %v6826_v61 = vld [vmem:[%s21029_s1 + $0x18] sm:$0xff] }
 0xbd3   : > { %v13426_v13 = vunpack.i.h.bf16 %v13424_v23  ;;  %v13425_v16 = vunpack.i.l.bf16 %v13424_v23  ;;  %v6825_v23 = vld [vmem:[%s21029_s1 + $0x10] sm:$0xff]  ;;  %s21043_s1 = smov 127  }
 0xbd4   : > { %12624 = vmatprep.subr.bf16.mxu1 %v12623_v21 }
 0xbd5   : > { %12627 = vmatpush1.bf16.msk.msra.mxu1 %vm18480_vm11, %v12625_v0  ;;  %v6552_v55 = vsel %vm21012_vm7, %v13425_v16, %v13426_v13  ;;  %v12632_v26 = vpack.c.bf16 %v13426_v13, %v13421_v14  ;;  %vm21020_vm7 = vnez %v20589_v12 }
 0xbd6   : > { %12629 = vmatprep.subr.bf16.mxu1 %v12628_v22  ;;  %v12635_v49 = vpack.c.bf16 %v6552_v55, %v6551_v19  ;;  %v6820_v19 = vld [vmem:[#allocation13 + $0x8] sm:$0xff] }
 0xbd9   : > { %12631 = vmatpush1.bf16.msra.mxu1 %v12630_v11 }
 0xbda   : > { %12634 = vmatprep.subr.msk.bf16.mxu1 %vm18853_vm13, %v12632_v26  ;;  %vm21017_vm13 = vnez %v20575_v41 }
 0xbdd   : > { %12636 = vmatpush1.bf16.msra.mxu1 %v12635_v49  ;;  %v6821_v49 = vld [vmem:[#allocation13 + $0x10] sm:$0xff] }
 0xbde   : > { %12676 = vmatprep.subr.bf16.mxu1 %v21001_v48 }
 0xbe0   : > { %10710 = vmatmul.mubr.msk.f32.vlgmr.msra.gmra.mrb[22].mxu1 %vm21014_vm0, %v6287_v35  ;;  %vm21022_vm0 = vnez %v20597_v46  ;;  %v6822_v35 = vld [vmem:[#allocation13 + $0x18] sm:$0xff] }
 0xbe1   : > { %6645 = vmatprep.mubr.f32.mxu1 %v20554_v29  ;;  %12678 = vmatpush1.bf16.msk.msra.mxu1 %vm21015_vm12, %v20280_v10 }
 0xbe2   : > { %12679 = vmatprep.subr.bf16.mxu1 %v21001_v48 }
 0xbe3   : > { %v6562_v46 = vpop.permute.xlu0 %6561 }
 0xbe4   : > { %10711 = vmatmul.mubr.msk.f32.gmra.mrb[24].mxu1 %vm21016_vm6, %v6288_v24  ;;  %vm21023_vm6 = vnez %v20601_v34  ;;  %v6432_v34 = vpop.permute.xlu1 %6431 }
 0xbe5   : > { %12681 = vmatpush1.bf16.msk.msra.mxu1 %vm21017_vm13, %v20280_v10  ;;  %v13077_v54 = vadd.f32 %v6562_v46, %v6432_v34 }
 0xbe6   : > { %12682 = vmatprep.subr.bf16.mxu1 %v21001_v48 }
 0xbe8   : > { %v6437_v5 = vpop.permute.xlu1 %6436 }
 0xbe9   : > { %12684 = vmatpush1.bf16.msk.msra.mxu1 %vm21018_vm10, %v20280_v10 }
 0xbea   : > { %12685 = vmatprep.subr.bf16.mxu1 %v21001_v48 }
 0xbed   : > { %12687 = vmatpush1.bf16.msk.msra.mxu1 %vm21019_vm1, %v20280_v10 }
 0xbee   : > { %12688 = vmatprep.subr.bf16.mxu1 %v21001_v48 }
 0xbf1   : > { %12690 = vmatpush1.bf16.msk.msra.mxu1 %vm21020_vm7, %v20280_v10 }
 0xbf2   : > { %12691 = vmatprep.subr.bf16.mxu1 %v21001_v48 }
 0xbf5   : > { %12693 = vmatpush1.bf16.msk.msra.mxu1 %vm21021_vm2, %v20280_v10  ;;  %vm21025_vm2 = vnez %v20609_v58  ;;  %v6567_v58 = vpop.permute.xlu0 %6566 }
 0xbf6   : > { %12694 = vmatprep.subr.bf16.mxu1 %v21001_v48  ;;  %v13081_v31 = vadd.f32 %v6567_v58, %v6437_v5 }
 0xbf9   : > { %12696 = vmatpush1.bf16.msk.msra.mxu1 %vm21022_vm0, %v20280_v10  ;;  %vm21026_vm0 = vnez %v20613_v62 }
 0xbfa   : > { %12697 = vmatprep.subr.bf16.mxu1 %v21001_v48 }
 0xbfd   : > { %12699 = vmatpush1.bf16.msk.msra.mxu1 %vm21023_vm6, %v20280_v10  ;;  %vm21027_vm6 = vnez %v20617_v3 }
 0xbfe   : > { %12700 = vmatprep.subr.bf16.mxu1 %v21001_v48 }
 0xc01   : > { %12702 = vmatpush1.bf16.msk.msra.mxu1 %vm21024_vm14, %v20280_v10  ;;  %vm21028_vm14 = vnez %v20621_v7 }
 0xc02   : > { %12703 = vmatprep.subr.bf16.mxu1 %v21001_v48 }
 0xc05   : > { %12705 = vmatpush1.bf16.msk.msra.mxu1 %vm21025_vm2, %v20280_v10  ;;  %vm6660_vm2 = vcmask 654336  }
 0xc06   : > { %12706 = vmatprep.subr.bf16.mxu1 %v21001_v48 }
 0xc09   : > { %12708 = vmatpush1.bf16.msk.msra.mxu1 %vm21026_vm0, %v20280_v10  ;;  %vm21030_vm0 = vcmask 392192  }
 0xc0a   : > { %12709 = vmatprep.subr.bf16.mxu1 %v21001_v48 }
 0xc0d   : > { %12711 = vmatpush1.bf16.msk.msra.mxu1 %vm21027_vm6, %v20280_v10  ;;  %vm6859_vm6 = vcmask 842752  }
 0xc0e   : > { %12712 = vmatprep.subr.bf16.mxu1 %v21001_v48 }
 0xc11   : > { %12714 = vmatpush1.bf16.msk.msra.mxu1 %vm21028_vm14, %v20280_v10  ;;  %vm19002_vm14 = vmpackc.low %vm6859_vm6, %vm6859_vm6 }
 0xc12   : > { %vm21036_vm6 = vmmov %vm21030_vm0 }
 0xcb3   : > { %v6641_v37 = vpop.f32.mrb[22].mxu1 }
 0xcb4   : > { %v13078_v18 = vadd.f32 %v13077_v54, %v6641_v37  ;;  %v6643_v62 = vpop.f32.mrb[23].mxu1 }
 0xcb5   : > { %v13080_v6 = vadd.f32 %v13077_v54, %v6643_v62  ;;  %v6836_v54 = vld [vmem:[%s21035_s23 + $0x8] sm:$0xff] }
 0xcb6   : > { %v6656_v25 = vmax.f32 %v13078_v18, 0.0 }
 0xcb7   : > { %v6657_v32 = vmax.f32 %v13080_v6, 0.0  ;;  %v6647_v3 = vpop.f32.mrb[24].mxu1 }
 0xcb8   : > { %v13082_v8 = vadd.f32 %v13081_v31, %v6647_v3  ;;  %v6649_v30 = vpop.f32.mrb[25].mxu1 }
 0xcb9   : > { %v13084_v15 = vadd.f32 %v13081_v31, %v6649_v30  ;;  %10738 = vmatprep.mubr.msk.f32.mxu0 %vm6660_vm2, %v6657_v32  ;;  %10766 = vmatprep.mubr.msk.f32.mxu1 %vm6660_vm2, %v6657_v32 }
 0xcba   : > { %6732 = vmatmul.mubr.f32.vlgmr.msra.gmra.mrb[30].mxu0 %v6656_v25  ;;  %6807 = vmatmul.mubr.f32.vlgmr.msra.gmra.mrb[26].mxu1 %v6656_v25  ;;  %v6658_v20 = vmax.f32 %v13082_v8, 0.0 }
 0xcbb   : > { %v6659_v7 = vmax.f32 %v13084_v15, 0.0 }
 0xcbd   : > { %10739 = vmatprep.mubr.msk.f32.mxu0 %vm6660_vm2, %v6659_v7  ;;  %10767 = vmatprep.mubr.msk.f32.mxu1 %vm6660_vm2, %v6659_v7  ;;  %vm21033_vm2 = vmmov %vm21030_vm0 }
 0xcbe   : > { %6737 = vmatmul.mubr.f32.gmra.mrb[32].mxu0 %v6658_v20  ;;  %6812 = vmatmul.mubr.f32.gmra.mrb[28].mxu1 %v6658_v20 }
 0xcbf   : > { %11228 = vmatprep.mubr.msk.f32.mxu0 %vm21030_vm0, %v6819_v50 }
 0xd8d   : > { %v6733_v11 = vpop.f32.mrb[30].mxu0  ;;  %v6808_v56 = vpop.f32.mrb[26].mxu1 }
 0xd8e   : > { %v6817_v22 = vmax.f32 %v6733_v11, %v6808_v56  ;;  %v6735_v52 = vpop.f32.mrb[31].mxu0  ;;  %v6810_v4 = vpop.f32.mrb[27].mxu1  ;;  %v6839_v11 = vld [vmem:[%s21039_s7] sm:$0xff] }
 0xd8f   : > { %v6837_v52 = vld [vmem:[%s21035_s23 + $0x10] sm:$0xff]  ;;  %v6838_v4 = vld [vmem:[%s21035_s23 + $0x18] sm:$0xff] }
 0xd91   : > { %v6738_v59 = vpop.f32.mrb[32].mxu0  ;;  %v6813_v43 = vpop.f32.mrb[28].mxu1 }
 0xd92   : > { %v6818_v51 = vmax.f32 %v6738_v59, %v6813_v43  ;;  %v6740_v28 = vpop.f32.mrb[33].mxu0  ;;  %v6815_v36 = vpop.f32.mrb[29].mxu1  ;;  %v6827_v59 = vld [vmem:[#allocation15] sm:$0xff] }
 0xd94   : > { %v12721_v39 = vpack.c.bf16 %v6818_v51, %v6817_v22  ;;  %v13432_v44 = vpack.i.bf16 %v6818_v51, %v6817_v22 }
 0xd96   : > { %13433 = vrot.lane.b32.xlu0 %v13432_v44, %s20108_s22  ;;  %13428 = vrot.lane.b32.xlu1 %v13432_v44, %s20110_s12  ;;  %s21040_s22 = smov %s21039_s7  ;;  %s21041_s12 = sld [smem:[#allocation33_spill]] }
 0xd97   : > { %12732 = vmatprep.subr.bf16.mxu1 %v12721_v39  ;;  %v6840_v22 = vld [vmem:[%s21040_s22 + $0x8] sm:$0xff]  ;;  %v6841_v51 = vld [vmem:[%s21040_s22 + $0x10] sm:$0xff]  ;;  %v6842_v36 = vld [vmem:[%s21040_s22 + $0x18] sm:$0xff]  ;;  %s21054_s7 = sld [smem:[#allocation37_spill]] }
 0xd98   : > { %12734 = vmatpush3.bf16.msra.mxu1 %v12721_v39 }
 0xd9a   : > { %6869 = vperm.xlu0 %13320, %v6824_v53   ;;  %6864 = vperm.xlu1 %13336, %v6823_v57  }
 0xd9c   : > { %v6831_v56 = vld [vmem:[%s21041_s12] sm:$0xff]  ;;  %v6832_v43 = vld [vmem:[%s21041_s12 + $0x8] sm:$0xff]  ;;  %v6833_v28 = vld [vmem:[%s21041_s12 + $0x10] sm:$0xff] }
 0xd9d   : > { %s21055_s2 = smov %s21054_s7 }
 0xd9e   : > { %6879 = vperm.xlu0 %13320, %v6826_v61   ;;  %6874 = vperm.xlu1 %13336, %v6825_v23  }
 0xe08   : > { %v13429_v21 = vpop.permute.xlu1 %13428  ;;  %v13434_v13 = vpop.permute.xlu0 %13433 }
 0xe09   : > { %v13431_v0 = vunpack.i.h.bf16 %v13429_v21  ;;  %v13430_v9 = vunpack.i.l.bf16 %v13429_v21  ;;  %v13436_v14 = vunpack.i.h.bf16 %v13434_v13  ;;  %v13435_v2 = vunpack.i.l.bf16 %v13434_v13 }
 0xe0b   : > { %v12715_v16 = vpack.c.bf16 %v13431_v0, %v13430_v9  ;;  %v12725_v26 = vpack.c.bf16 %v13436_v14, %v13435_v2 }
 0xe0d   : > { %12717 = vmatprep.subr.msk.bf16.mxu0 %vm18480_vm11, %v12715_v16 }
 0xe0e   : > { %12720 = vmatpush3.bf16.msk.msra.mxu0 %vm18480_vm11, %v12715_v16 }
 0xe0f   : > { %12722 = vmatprep.subr.bf16.mxu0 %v12721_v39 }
 0xe12   : > { %12724 = vmatpush3.bf16.msra.mxu0 %v12721_v39  ;;  %v6834_v39 = vld [vmem:[%s21041_s12 + $0x18] sm:$0xff] }
 0xe13   : > { %12727 = vmatprep.subr.msk.bf16.mxu0 %vm19002_vm14, %v12725_v26 }
 0xe16   : > { %12730 = vmatpush3.bf16.msk.msra.mxu0 %vm19002_vm14, %v12725_v26 }
 0xe17   : > { %12768 = vmatprep.subr.msk.bf16.mxu0 %vm20816_vm8, %v20280_v10 }
 0xe19   : > { %11229 = vmatmul.mubr.msk.f32.vlgmr.msra.gmra.mrb[34].mxu0 %vm21033_vm2, %v6820_v19  ;;  %v6870_v24 = vpop.permute.xlu0 %6869  ;;  %v6865_v46 = vpop.permute.xlu1 %6864 }
 0xe1a   : > { %11231 = vmatprep.mubr.msk.f32.mxu0 %vm21030_vm0, %v6821_v49  ;;  %12770 = vmatpush3.bf16.msk.msra.mxu0 %vm20816_vm8, %v20280_v10  ;;  %vm7156_vm0 = vcmask 785408  }
 0xe1b   : > { %12772 = vmatprep.subr.msk.bf16.mxu0 %vm20823_vm9, %v20280_v10 }
 0xe1d   : > { %11232 = vmatmul.mubr.msk.f32.gmra.mrb[36].mxu0 %vm21036_vm6, %v6822_v35  ;;  %v6880_v62 = vpop.permute.xlu0 %6879  ;;  %v6875_v31 = vpop.permute.xlu1 %6874  ;;  %v6828_v35 = vld [vmem:[#allocation15 + $0x8] sm:$0xff] }
 0xe1e   : > { %12774 = vmatpush3.bf16.msk.msra.mxu0 %vm20823_vm9, %v20280_v10 }
 0xe1f   : > { %12776 = vmatprep.subr.msk.bf16.mxu0 %vm20828_vm15, %v20280_v10 }
 0xe22   : > { %12778 = vmatpush3.bf16.msk.msra.mxu0 %vm20828_vm15, %v20280_v10 }
 0xe23   : > { %12780 = vmatprep.subr.msk.bf16.mxu0 %vm20834_vm5, %v20280_v10 }
 0xe26   : > { %12782 = vmatpush3.bf16.msk.msra.mxu0 %vm20834_vm5, %v20280_v10  ;;  %vm21037_vm5 = vcmask 130048  }
 0xe27   : > { %12784 = vmatprep.subr.msk.bf16.mxu0 %vm20840_vm3, %v20280_v10  ;;  %11238 = vmatprep.mubr.msk.f32.mxu1 %vm21037_vm5, %v6835_v17  ;;  %vm21038_vm2 = vmmov %vm21037_vm5  ;;  %v13959_v17 = vmov 1.0  }
 0xe28   : > { %11239 = vmatmul.mubr.msk.f32.vlgmr.msra.gmra.mrb[30].mxu1 %vm21038_vm2, %v6836_v54  ;;  %v21047_v54 = vld [vmem:[#allocation49_spill] sm:$0xff] }
 0xe2a   : > { %12786 = vmatpush3.bf16.msk.msra.mxu0 %vm20840_vm3, %v20280_v10  ;;  %vm21044_vm3 = vmmov %vm21038_vm2 }
 0xe2b   : > { %12788 = vmatprep.subr.msk.bf16.mxu0 %vm20846_vm4, %v20280_v10  ;;  %11241 = vmatprep.mubr.msk.f32.mxu1 %vm21044_vm3, %v6837_v52 }
 0xe2e   : > { %12790 = vmatpush3.bf16.msk.msra.mxu0 %vm20846_vm4, %v20280_v10  ;;  %vm21045_vm4 = vmmov %vm21038_vm2  ;;  %vm21050_vm2 = vnez %v20593_v40 }
 0xe2f   : > { %11242 = vmatmul.mubr.msk.f32.gmra.mrb[32].mxu1 %vm21045_vm4, %v6838_v4 }
 0xe30   : > { %11268 = vmatprep.mubr.msk.f32.mxu1 %vm7156_vm0, %v6827_v59 }
 0xeec   : > { %v11230_v34 = vpop.f32.mrb[34].mxu0 }
 0xeed   : > { %v6966_v58 = vadd.f32 %v11230_v34, %v6870_v24  ;;  %v6960_v37 = vpop.f32.mrb[35].mxu0  ;;  %v6829_v24 = vld [vmem:[#allocation15 + $0x10] sm:$0xff]  ;;  %v21046_v34 = vld [vmem:[#allocation62_spill] sm:$0xff] }
 0xeee   : > { %v6961_v42 = vadd.f32 %v6960_v37, %v6865_v46  ;;  %v6830_v46 = vld [vmem:[#allocation15 + $0x18] sm:$0xff]  ;;  %vm21048_vm6 = vcmp.eq.s32.totalorder %v21046_v34, %v21047_v54 }
 0xeef   : > { %v6980_v18 = vmax.f32 %v6966_v58, 0.0  ;;  %11298 = vmatprep.subr.msk.mxu0 %vm21048_vm6, %v13959_v17  ;;  %vm21049_vm5 = vmmov %vm21048_vm6 }
 0xef0   : > { %v6979_v5 = vmax.f32 %v6961_v42, 0.0  ;;  %v11233_v6 = vpop.f32.mrb[36].mxu0  ;;  %11299 = vmatpush3.msk.msra.mxu0 %vm21049_vm5, %v13959_v17 }
 0xef1   : > { %v6976_v38 = vadd.f32 %v11233_v6, %v6880_v62  ;;  %v6970_v32 = vpop.f32.mrb[37].mxu0  ;;  %12792 = vmatprep.subr.msk.bf16.mxu0 %vm21015_vm12, %v20280_v10 }
 0xef2   : > { %v6971_v3 = vadd.f32 %v6970_v32, %v6875_v31  ;;  %v13437_v25 = vpack.i.bf16 %v6980_v18, %v6979_v5  ;;  %v12747_v8 = vpack.c.bf16 %v6980_v18, %v6979_v5 }
 0xef3   : > { %v6982_v30 = vmax.f32 %v6976_v38, 0.0 }
 0xef4   : > { %v6981_v15 = vmax.f32 %v6971_v3, 0.0  ;;  %13438 = vrot.lane.b32.xlu1 %v13437_v25, %s21042_s15 }
 0xef6   : > { %v13442_v7 = vpack.i.bf16 %v6982_v30, %v6981_v15  ;;  %v12751_v20 = vpack.c.bf16 %v6982_v30, %v6981_v15 }
 0xef8   : > { %13443 = vrot.lane.b32.xlu0 %v13442_v7, %s21042_s15  ;;  %13448 = vrot.lane.b32.xlu1 %v13437_v25, %s21043_s1 }
 0xefc   : > { %13453 = vrot.lane.b32.xlu0 %v13442_v7, %s21043_s1  ;;  %6985 = vperm.xlu1 %13336, %v6839_v11  }
 0xf00   : > { %7138 = vperm.xlu0 %13320, %v6831_v56   ;;  %6990 = vperm.xlu1 %13336, %v6840_v22  }
 0xf04   : > { %7143 = vperm.xlu0 %13320, %v6832_v43   ;;  %6995 = vperm.xlu1 %13336, %v6841_v51  }
 0xf08   : > { %7148 = vperm.xlu0 %13320, %v6833_v28   ;;  %7000 = vperm.xlu1 %13336, %v6842_v36  }
 0xf0c   : > { %7153 = vperm.xlu0 %13320, %v6834_v39  }
 0xf66   : > { %v13439_v44 = vpop.permute.xlu1 %13438 }
 0xf67   : > { %v13441_v50 = vunpack.i.h.bf16 %v13439_v44  ;;  %v13440_v53 = vunpack.i.l.bf16 %v13439_v44 }
 0xf69   : > { %v12735_v57 = vpack.c.bf16 %v13441_v50, %v13440_v53 }
 0xf6a   : > { %v13444_v61 = vpop.permute.xlu0 %13443  ;;  %v13449_v9 = vpop.permute.xlu1 %13448 }
 0xf6b   : > { %v13446_v23 = vunpack.i.h.bf16 %v13444_v61  ;;  %v13445_v21 = vunpack.i.l.bf16 %v13444_v61  ;;  %12737 = vmatprep.subr.msk.bf16.mxu1 %vm18480_vm11, %v12735_v57  ;;  %v13451_v13 = vunpack.i.h.bf16 %v13449_v9  ;;  %v13450_v16 = vunpack.i.l.bf16 %v13449_v9 }
 0xf6c   : > { %12740 = vmatpush3.bf16.msk.msra.mxu1 %vm18480_vm11, %v12735_v57 }
 0xf6d   : > { %v12741_v0 = vpack.c.bf16 %v13446_v23, %v13445_v21  ;;  %v12755_v2 = vpack.c.bf16 %v13451_v13, %v13450_v16  ;;  %v7457_v13 = vld [vmem:[%s21054_s7] sm:$0xff]  ;;  %v7459_v16 = vld [vmem:[%s21055_s2 + $0x10] sm:$0xff]  ;;  %s21068_s7 = sld [smem:[#allocation41_spill]] }
 0xf6e   : > { %v13454_v14 = vpop.permute.xlu0 %13453 }
 0xf6f   : > { %12743 = vmatprep.subr.msk.bf16.mxu1 %vm18480_vm11, %v12741_v0  ;;  %v13456_v26 = vunpack.i.h.bf16 %v13454_v14  ;;  %v13455_v19 = vunpack.i.l.bf16 %v13454_v14  ;;  %v7458_v14 = vld [vmem:[%s21055_s2 + $0x8] sm:$0xff] }
 0xf70   : > { %12746 = vmatpush3.bf16.msk.msra.mxu1 %vm18480_vm11, %v12741_v0 }
 0xf71   : > { %12748 = vmatprep.subr.bf16.mxu1 %v12747_v8  ;;  %v12761_v49 = vpack.c.bf16 %v13456_v26, %v13455_v19  ;;  %v7461_v26 = vld [vmem:[%s21055_s2 + $0x20] sm:$0xff]  ;;  %v7460_v19 = vld [vmem:[%s21055_s2 + $0x18] sm:$0xff] }
 0xf74   : > { %12750 = vmatpush3.bf16.msra.mxu1 %v12747_v8 }
 0xf75   : > { %12752 = vmatprep.subr.bf16.mxu1 %v12751_v20 }
 0xf78   : > { %12754 = vmatpush3.bf16.msra.mxu1 %v12751_v20 }
 0xf79   : > { %12757 = vmatprep.subr.msk.bf16.mxu1 %vm19002_vm14, %v12755_v2 }
 0xf7b   : > { %v6986_v58 = vpop.permute.xlu1 %6985 }
 0xf7c   : > { %12760 = vmatpush3.bf16.msk.msra.mxu1 %vm19002_vm14, %v12755_v2  ;;  %v7449_v2 = vld [vmem:[%s21056_s3] sm:$0xff] }
 0xf7d   : > { %12763 = vmatprep.subr.msk.bf16.mxu1 %vm19002_vm14, %v12761_v49 }
 0xf7f   : > { %v7139_v55 = vpop.permute.xlu0 %7138  ;;  %v6991_v42 = vpop.permute.xlu1 %6990 }
 0xf80   : > { %12766 = vmatpush3.bf16.msk.msra.mxu1 %vm19002_vm14, %v12761_v49  ;;  %v13087_v6 = vadd.f32 %v7139_v55, %v6986_v58  ;;  %vm7262_vm14 = vcmask 850944   ;;  %v7463_v49 = vld [vmem:[%s21055_s2 + $0x30] sm:$0xff]  ;;  %v7492_v58 = vld [vmem:[%s21057_s4 + $0x18] sm:$0xff] }
 0xf81   : > { %v7491_v55 = vld [vmem:[%s21057_s4 + $0x10] sm:$0xff] }
 0xf83   : > { %11269 = vmatmul.mubr.msk.f32.vlgmr.msra.gmra.mrb[30].mxu1 %vm7156_vm0, %v6828_v35  ;;  %v7144_v37 = vpop.permute.xlu0 %7143  ;;  %v6996_v62 = vpop.permute.xlu1 %6995  ;;  %v7462_v35 = vld [vmem:[%s21055_s2 + $0x28] sm:$0xff] }
 0xf84   : > { %11271 = vmatprep.mubr.msk.f32.mxu1 %vm7156_vm0, %v6829_v24  ;;  %v13085_v5 = vadd.f32 %v7144_v37, %v6991_v42  ;;  %v7464_v24 = vld [vmem:[%s21055_s2 + $0x38] sm:$0xff]  ;;  %v7493_v37 = vld [vmem:[%s21057_s4 + $0x20] sm:$0xff]  ;;  %v7494_v42 = vld [vmem:[%s21057_s4 + $0x28] sm:$0xff]  ;;  %s21069_s2 = smov %s21068_s7 }
 0xf87   : > { %11272 = vmatmul.mubr.msk.f32.gmra.mrb[32].mxu1 %vm7156_vm0, %v6830_v46  ;;  %v7149_v18 = vpop.permute.xlu0 %7148  ;;  %v7001_v25 = vpop.permute.xlu1 %7000  ;;  %v7489_v46 = vld [vmem:[%s21057_s4] sm:$0xff] }
 0xf88   : > { %v13091_v15 = vadd.f32 %v7149_v18, %v6996_v62  ;;  %11362 = vmatprep.mubr.msk.f32.mxu1 %vm7156_vm0, %v7449_v2  ;;  %v7495_v18 = vld [vmem:[%s21057_s4 + $0x30] sm:$0xff]  ;;  %v7496_v62 = vld [vmem:[%s21057_s4 + $0x38] sm:$0xff] }
 0xf8b   : > { %v7154_v31 = vpop.permute.xlu0 %7153 }
 0xf8c   : > { %v13089_v30 = vadd.f32 %v7154_v31, %v7001_v25 }
0x1056   : > { %v11270_v38 = vpop.f32.mrb[30].mxu1 }
0x1057   : > { %v13086_v32 = vadd.f32 %v13085_v5, %v11270_v38  ;;  %v7235_v3 = vpop.f32.mrb[31].mxu1 }
0x1058   : > { %v13088_v8 = vadd.f32 %v13087_v6, %v7235_v3 }
0x1059   : > { %v7259_v11 = vmax.f32 %v13086_v32, 0.0 }
0x105a   : > { %v7258_v7 = vmax.f32 %v13088_v8, 0.0  ;;  %v11273_v20 = vpop.f32.mrb[32].mxu1 }
0x105b   : > { %v13090_v56 = vadd.f32 %v13089_v30, %v11273_v20  ;;  %v7245_v22 = vpop.f32.mrb[33].mxu1 }
0x105c   : > { %v13092_v52 = vadd.f32 %v13091_v15, %v7245_v22  ;;  %11300 = vmatprep.mubr.msk.f32.mxu0 %vm7262_vm14, %v7258_v7 }
0x105d   : > { %11301 = vmatmul.mubr.msk.f32.vlgmr.msra.gmra.mrb[38].mxu0 %vm7262_vm14, %v7259_v11  ;;  %v7261_v59 = vmax.f32 %v13090_v56, 0.0 }
0x105e   : > { %v7260_v4 = vmax.f32 %v13092_v52, 0.0  ;;  %12794 = vmatpush3.bf16.msk.msra.mxu0 %vm21015_vm12, %v20280_v10  ;;  %v7450_v52 = vld [vmem:[%s21056_s3 + $0x8] sm:$0xff] }
0x105f   : > { %12796 = vmatprep.subr.msk.bf16.mxu0 %vm21017_vm13, %v20280_v10 }
0x1060   : > { %11303 = vmatprep.mubr.msk.f32.mxu0 %vm7262_vm14, %v7260_v4 }
0x1061   : > { %11304 = vmatmul.mubr.msk.f32.gmra.mrb[40].mxu0 %vm7262_vm14, %v7261_v59 }
0x1062   : > { %12798 = vmatpush3.bf16.msk.msra.mxu0 %vm21017_vm13, %v20280_v10  ;;  %11332 = vmatprep.mubr.msk.f32.mxu0 %vm7262_vm14, %v7258_v7 }
0x1063   : > { %12800 = vmatprep.subr.msk.bf16.mxu0 %vm21018_vm10, %v20280_v10 }
0x1066   : > { %12802 = vmatpush3.bf16.msk.msra.mxu0 %vm21018_vm10, %v20280_v10 }
0x1067   : > { %12804 = vmatprep.subr.msk.bf16.mxu0 %vm21019_vm1, %v20280_v10 }
0x106a   : > { %12806 = vmatpush3.bf16.msk.msra.mxu0 %vm21019_vm1, %v20280_v10  ;;  %vm21052_vm1 = vcmp.eq.s32.totalorder %v21046_v34, %v21051_v63  ;;  %v7490_v34 = vld [vmem:[%s21057_s4 + $0x8] sm:$0xff]  ;;  %s21071_s4 = sld [smem:[#allocation38_spill]] }
0x106b   : > { %12808 = vmatprep.subr.msk.bf16.mxu0 %vm21020_vm7, %v20280_v10  ;;  %vm21053_vm3 = vmmov %vm21052_vm1 }
0x106e   : > { %12810 = vmatpush3.bf16.msk.msra.mxu0 %vm21020_vm7, %v20280_v10  ;;  %vm21058_vm7 = vcmask 261120  }
0x106f   : > { %12812 = vmatprep.subr.msk.bf16.mxu0 %vm21050_vm2, %v20280_v10  ;;  %vm21059_vm4 = vmmov %vm21058_vm7 }
0x1070   : > { %vm21060_vm6 = vmmov %vm21059_vm4  ;;  %v7471_v7 = vld [vmem:[%s21071_s4 + $0x30] sm:$0xff] }
0x1071   : > { %vm21061_vm5 = vmmov %vm21059_vm4 }
0x1072   : > { %12814 = vmatpush3.bf16.msk.msra.mxu0 %vm21050_vm2, %v20280_v10  ;;  %vm21063_vm2 = vmmov %vm21059_vm4 }
0x1073   : > { %11330 = vmatprep.subr.msk.mxu0 %vm21052_vm1, %v13959_v17  ;;  %vm21064_vm1 = vmmov %vm21063_vm2 }
0x1076   : > { %11331 = vmatpush3.msk.msra.mxu0 %vm21053_vm3, %v13959_v17  ;;  %vm21065_vm3 = vmmov %vm21064_vm1 }
0x1077   : > { %11333 = vmatmul.mubr.msk.f32.vlgmr.msra.gmra.mrb[42].mxu0 %vm7262_vm14, %v7259_v11 }
0x1078   : > { %11335 = vmatprep.mubr.msk.f32.mxu0 %vm7262_vm14, %v7260_v4  ;;  %v7451_v4 = vld [vmem:[%s21056_s3 + $0x10] sm:$0xff] }
0x107b   : > { %11336 = vmatmul.mubr.msk.f32.gmra.mrb[44].mxu0 %vm7262_vm14, %v7261_v59  ;;  %vm21062_vm14 = vmmov %vm21059_vm4  ;;  %v7452_v59 = vld [vmem:[%s21056_s3 + $0x18] sm:$0xff] }
0x107c   : > { %11382 = vmatprep.mubr.msk.f32.mxu0 %vm21058_vm7, %v7489_v46 }
0x1130   : > { %v11302_v12 = vpop.f32.mrb[38].mxu0 }
0x1131   : > { %v7341_v43 = vpop.f32.mrb[39].mxu0 }
0x1134   : > { %v11305_v40 = vpop.f32.mrb[40].mxu0 }
0x1135   : > { %v7351_v51 = vpop.f32.mrb[41].mxu0 }
0x114a   : > { %v11334_v28 = vpop.f32.mrb[42].mxu0 }
0x114b   : > { %v7446_v36 = vmax.f32 %v11302_v12, %v11334_v28  ;;  %v7426_v39 = vpop.f32.mrb[43].mxu0  ;;  %v7453_v12 = vld [vmem:[%s21056_s3 + $0x20] sm:$0xff] }
0x114c   : > { %v7445_v44 = vmax.f32 %v7341_v43, %v7426_v39  ;;  %v7454_v43 = vld [vmem:[%s21056_s3 + $0x28] sm:$0xff] }
0x114e   : > { %v19149_v50 = vpack.c.bf16 %v7446_v36, %v7445_v44  ;;  %v11337_v53 = vpop.f32.mrb[44].mxu0  ;;  %v13457_v57 = vpack.i.bf16 %v7446_v36, %v7445_v44 }
0x114f   : > { %v7448_v61 = vmax.f32 %v11305_v40, %v11337_v53  ;;  %v7436_v23 = vpop.f32.mrb[45].mxu0  ;;  %v7455_v40 = vld [vmem:[%s21056_s3 + $0x30] sm:$0xff] }
0x1150   : > { %v7447_v21 = vmax.f32 %v7351_v51, %v7436_v23  ;;  %13458 = vrot.lane.b32.xlu1 %v13457_v57, %s21042_s15  ;;  %12848 = vmatprep.subr.bf16.mxu0 %v19149_v50  ;;  %v7456_v51 = vld [vmem:[%s21056_s3 + $0x38] sm:$0xff]  ;;  %s21070_s3 = sld [smem:[#allocation39_spill]] }
0x1151   : > { %12850 = vmatpush3.bf16.msra.mxu0 %v19149_v50 }
0x1152   : > { %v19154_v0 = vpack.c.bf16 %v7448_v61, %v7447_v21  ;;  %v13462_v9 = vpack.i.bf16 %v7448_v61, %v7447_v21 }
0x1154   : > { %13468 = vrot.lane.b32.xlu1 %v13457_v57, %s21043_s1  ;;  %13463 = vrot.lane.b32.xlu0 %v13462_v9, %s21042_s15 }
0x1155   : > { %12852 = vmatprep.subr.bf16.mxu0 %v19154_v0 }
0x1156   : > { %12854 = vmatpush3.bf16.msra.mxu0 %v19154_v0 }
0x1157   : > { %12900 = vmatprep.subr.msk.bf16.mxu0 %vm20816_vm8, %v20280_v10 }
0x1158   : > { %7544 = vperm.xlu1 %13336, %v7457_v13   ;;  %13473 = vrot.lane.b32.xlu0 %v13462_v9, %s21043_s1 }
0x1159   : > { %11383 = vmatmul.mubr.msk.f32.vlgmr.msra.gmra.mrb[46].mxu0 %vm21059_vm4, %v7490_v34 }
0x115a   : > { %11385 = vmatprep.mubr.msk.f32.mxu0 %vm21060_vm6, %v7491_v55  ;;  %12902 = vmatpush3.bf16.msk.msra.mxu0 %vm20816_vm8, %v20280_v10 }
0x115b   : > { %12904 = vmatprep.subr.msk.bf16.mxu0 %vm20823_vm9, %v20280_v10 }
0x115c   : > { %7554 = vperm.xlu1 %13336, %v7459_v16   ;;  %7549 = vperm.xlu0 %13320, %v7458_v14  }
0x115d   : > { %11386 = vmatmul.mubr.msk.f32.gmra.mrb[48].mxu0 %vm21061_vm5, %v7492_v58 }
0x115e   : > { %11388 = vmatprep.mubr.msk.f32.mxu0 %vm21062_vm14, %v7493_v37  ;;  %12906 = vmatpush3.bf16.msk.msra.mxu0 %vm20823_vm9, %v20280_v10  ;;  %vm7537_vm9 = vcmask 416768  }
0x115f   : > { %12908 = vmatprep.subr.msk.bf16.mxu0 %vm20828_vm15, %v20280_v10 }
0x1160   : > { %7564 = vperm.xlu1 %13336, %v7461_v26   ;;  %7559 = vperm.xlu0 %13320, %v7460_v19  }
0x1161   : > { %11389 = vmatmul.mubr.msk.f32.gmra.mrb[50].mxu0 %vm21063_vm2, %v7494_v42 }
0x1162   : > { %11391 = vmatprep.mubr.msk.f32.mxu0 %vm21064_vm1, %v7495_v18  ;;  %12910 = vmatpush3.bf16.msk.msra.mxu0 %vm20828_vm15, %v20280_v10  ;;  %vm19216_vm15 = vmpackc.low %vm7537_vm9, %vm7537_vm9  ;;  %vm8170_vm9 = vcmask 1043456  }
0x1164   : > { %7574 = vperm.xlu1 %13336, %v7463_v49   ;;  %7569 = vperm.xlu0 %13320, %v7462_v35  }
0x1165   : > { %11392 = vmatmul.mubr.msk.f32.gmra.mrb[52].mxu0 %vm21065_vm3, %v7496_v62 }
0x1168   : > { %7579 = vperm.xlu0 %13320, %v7464_v24  }
0x11c2   : > { %v13459_v5 = vpop.permute.xlu1 %13458 }
0x11c3   : > { %v13461_v6 = vunpack.i.h.bf16 %v13459_v5  ;;  %v13460_v60 = vunpack.i.l.bf16 %v13459_v5 }
0x11c5   : > { %v12815_v31 = vpack.c.bf16 %v13461_v6, %v13460_v60 }
0x11c6   : > { %v13464_v38 = vpop.permute.xlu0 %13463  ;;  %v13469_v47 = vpop.permute.xlu1 %13468 }
0x11c7   : > { %v13466_v32 = vunpack.i.h.bf16 %v13464_v38  ;;  %v13465_v3 = vunpack.i.l.bf16 %v13464_v38  ;;  %12817 = vmatprep.subr.msk.bf16.mxu1 %vm18480_vm11, %v12815_v31  ;;  %v13471_v8 = vunpack.i.h.bf16 %v13469_v47  ;;  %v13470_v30 = vunpack.i.l.bf16 %v13469_v47 }
0x11c8   : > { %12820 = vmatpush3.bf16.msk.msra.mxu1 %vm18480_vm11, %v12815_v31 }
0x11c9   : > { %v12821_v25 = vpack.c.bf16 %v13466_v32, %v13465_v3  ;;  %v12835_v20 = vpack.c.bf16 %v13471_v8, %v13470_v30 }
0x11ca   : > { %v13474_v15 = vpop.permute.xlu0 %13473 }
0x11cb   : > { %12823 = vmatprep.subr.msk.bf16.mxu1 %vm18480_vm11, %v12821_v25  ;;  %v13476_v11 = vunpack.i.h.bf16 %v13474_v15  ;;  %v13475_v56 = vunpack.i.l.bf16 %v13474_v15 }
0x11cc   : > { %12826 = vmatpush3.bf16.msk.msra.mxu1 %vm18480_vm11, %v12821_v25 }
0x11cd   : > { %12828 = vmatprep.subr.bf16.mxu1 %v19149_v50  ;;  %v12841_v22 = vpack.c.bf16 %v13476_v11, %v13475_v56  ;;  %v7497_v11 = vld [vmem:[%s21068_s7] sm:$0xff]  ;;  %s21083_s7 = sld [smem:[#allocation43_spill]] }
0x11ce   : > { %v7481_v56 = vld [vmem:[%s21070_s3] sm:$0xff] }
0x11d0   : > { %12830 = vmatpush3.bf16.msra.mxu1 %v19149_v50 }
0x11d1   : > { %12832 = vmatprep.subr.bf16.mxu1 %v19154_v0 }
0x11d4   : > { %12834 = vmatpush3.bf16.msra.mxu1 %v19154_v0 }
0x11d5   : > { %12837 = vmatprep.subr.msk.bf16.mxu1 %vm19216_vm15, %v12835_v20 }
0x11d7   : > { %v7545_v36 = vpop.permute.xlu1 %7544 }
0x11d8   : > { %12840 = vmatpush3.bf16.msk.msra.mxu1 %vm19216_vm15, %v12835_v20 }
0x11d9   : > { %12843 = vmatprep.subr.msk.bf16.mxu1 %vm19216_vm15, %v12841_v22 }
0x11db   : > { %v7550_v28 = vpop.permute.xlu0 %7549  ;;  %v7555_v50 = vpop.permute.xlu1 %7554 }
0x11dc   : > { %12846 = vmatpush3.bf16.msk.msra.mxu1 %vm19216_vm15, %v12841_v22  ;;  %v7498_v22 = vld [vmem:[%s21069_s2 + $0x8] sm:$0xff] }
0x11dd   : > { %12855 = vmatprep.subr.bf16.mxu1 %v21001_v48 }
0x11df   : > { %11363 = vmatmul.mubr.msk.f32.vlgmr.msra.gmra.mrb[34].mxu1 %vm7156_vm0, %v7450_v52  ;;  %v7560_v39 = vpop.permute.xlu0 %7559  ;;  %v7565_v19 = vpop.permute.xlu1 %7564 }
0x11e0   : > { %11365 = vmatprep.mubr.msk.f32.mxu1 %vm7156_vm0, %v7451_v4  ;;  %v7482_v4 = vld [vmem:[%s21070_s3 + $0x8] sm:$0xff] }
0x11e3   : > { %11366 = vmatmul.mubr.msk.f32.gmra.mrb[36].mxu1 %vm7156_vm0, %v7452_v59  ;;  %v7570_v16 = vpop.permute.xlu0 %7569  ;;  %v7575_v6 = vpop.permute.xlu1 %7574  ;;  %v7499_v59 = vld [vmem:[%s21069_s2 + $0x10] sm:$0xff] }
0x11e4   : > { %11368 = vmatprep.mubr.msk.f32.mxu1 %vm7156_vm0, %v7453_v12 }
0x11e7   : > { %11369 = vmatmul.mubr.msk.f32.gmra.mrb[38].mxu1 %vm7156_vm0, %v7454_v43  ;;  %v7580_v18 = vpop.permute.xlu0 %7579  ;;  %v7483_v43 = vld [vmem:[%s21070_s3 + $0x10] sm:$0xff] }
0x11e8   : > { %11371 = vmatprep.mubr.msk.f32.mxu1 %vm7156_vm0, %v7455_v40  ;;  %v7500_v40 = vld [vmem:[%s21069_s2 + $0x18] sm:$0xff] }
0x11eb   : > { %11372 = vmatmul.mubr.msk.f32.gmra.mrb[40].mxu1 %vm7156_vm0, %v7456_v51  ;;  %vm21072_vm0 = vcmask 523264  }
0x11ec   : > { %vm21073_vm7 = vmmov %vm21072_vm0 }
0x11ed   : > { %vm21074_vm4 = vmmov %vm21072_vm0 }
0x11ee   : > { %vm21075_vm6 = vmmov %vm21072_vm0 }
0x11ef   : > { %vm21076_vm5 = vmmov %vm21072_vm0 }
0x11f0   : > { %vm21077_vm14 = vmmov %vm21072_vm0 }
0x11f1   : > { %vm21078_vm2 = vmmov %vm21072_vm0 }
0x11f2   : > { %vm21079_vm1 = vmmov %vm21072_vm0 }
0x122c   : > { %v19257_v15 = vpop.f32.mrb[46].mxu0 }
0x122d   : > { %v19261_v20 = vpop.f32.mrb[47].mxu0 }
0x1230   : > { %v19267_v52 = vpop.f32.mrb[48].mxu0 }
0x1231   : > { %v19271_v12 = vpop.f32.mrb[49].mxu0 }
0x1234   : > { %v19275_v51 = vpop.f32.mrb[50].mxu0 }
0x12b2   : > { %v11364_v44 = vpop.f32.mrb[34].mxu1 }
0x12b3   : > { %v7678_v53 = vadd.f32 %v11364_v44, %v7550_v28  ;;  %v7672_v57 = vpop.f32.mrb[35].mxu1  ;;  %v7484_v28 = vld [vmem:[%s21070_s3 + $0x18] sm:$0xff]  ;;  %v7466_v44 = vld [vmem:[%s21071_s4 + $0x8] sm:$0xff] }
0x12b4   : > { %v7673_v61 = vadd.f32 %v7672_v57, %v7545_v36  ;;  %v7501_v36 = vld [vmem:[%s21069_s2 + $0x20] sm:$0xff]  ;;  %10884 = vmatprep.mubr.msk.f32.mxu1 %vm21072_vm0, %v7466_v44 }
0x12b5   : > { %v7712_v23 = vmax.f32 %v7678_v53, 0.0  ;;  %v7502_v53 = vld [vmem:[%s21069_s2 + $0x28] sm:$0xff]  ;;  %v7469_v44 = vld [vmem:[%s21071_s4 + $0x20] sm:$0xff] }
0x12b6   : > { %v7711_v21 = vmax.f32 %v7673_v61, 0.0  ;;  %v11367_v0 = vpop.f32.mrb[36].mxu1  ;;  %v7486_v61 = vld [vmem:[%s21070_s3 + $0x28] sm:$0xff] }
0x12b7   : > { %v7688_v9 = vadd.f32 %v11367_v0, %v7560_v39  ;;  %v7682_v13 = vpop.f32.mrb[37].mxu1  ;;  %v19279_v39 = vpop.f32.mrb[51].mxu0  ;;  %v7487_v0 = vld [vmem:[%s21070_s3 + $0x30] sm:$0xff] }
0x12b8   : > { %v19244_v14 = vpack.c.bf16 %v7712_v23, %v7711_v21  ;;  %v7683_v2 = vadd.f32 %v7682_v13, %v7555_v50  ;;  %v13477_v26 = vpack.i.bf16 %v7712_v23, %v7711_v21  ;;  %v7485_v50 = vld [vmem:[%s21070_s3 + $0x20] sm:$0xff]  ;;  %v19285_v57 = vpop.f32.mrb[52].mxu0  ;;  %v7503_v23 = vld [vmem:[%s21069_s2 + $0x30] sm:$0xff]  ;;  %v7488_v13 = vld [vmem:[%s21070_s3 + $0x38] sm:$0xff]  ;;  %s21085_s3 = sld [smem:[#allocation42_spill]] }
0x12b9   : > { %v7714_v49 = vmax.f32 %v7688_v9, 0.0  ;;  %v19289_v21 = vpop.f32.mrb[53].mxu0  ;;  %v7504_v9 = vld [vmem:[%s21069_s2 + $0x38] sm:$0xff]  ;;  %s21084_s2 = smov %s21083_s7 }
0x12ba   : > { %v7713_v35 = vmax.f32 %v7683_v2, 0.0  ;;  %v11370_v24 = vpop.f32.mrb[38].mxu1  ;;  %13478 = vrot.lane.b32.xlu1 %v13477_v26, %s21042_s15 }
0x12bb   : > { %v7698_v46 = vadd.f32 %v11370_v24, %v7570_v16  ;;  %v7692_v34 = vpop.f32.mrb[39].mxu1 }
0x12bc   : > { %v19247_v55 = vpack.c.bf16 %v7714_v49, %v7713_v35  ;;  %v7693_v58 = vadd.f32 %v7692_v34, %v7565_v19  ;;  %v13482_v37 = vpack.i.bf16 %v7714_v49, %v7713_v35 }
0x12bd   : > { %v7716_v42 = vmax.f32 %v7698_v46, 0.0 }
0x12be   : > { %v7715_v62 = vmax.f32 %v7693_v58, 0.0  ;;  %v11373_v5 = vpop.f32.mrb[40].mxu1  ;;  %13483 = vrot.lane.b32.xlu0 %v13482_v37, %s21042_s15  ;;  %v8403_v45 = vld [vmem:[%s21085_s3 + $0x40] sm:$0xff] }
0x12bf   : > { %v7708_v60 = vadd.f32 %v11373_v5, %v7580_v18  ;;  %v7702_v31 = vpop.f32.mrb[41].mxu1 }
0x12c0   : > { %v13507_v38 = vpack.i.bf16 %v7716_v42, %v7715_v62  ;;  %v19250_v32 = vpack.c.bf16 %v7716_v42, %v7715_v62  ;;  %v7703_v3 = vadd.f32 %v7702_v31, %v7575_v6 }
0x12c1   : > { %v7718_v25 = vmax.f32 %v7708_v60, 0.0 }
0x12c2   : > { %v7717_v47 = vmax.f32 %v7703_v3, 0.0  ;;  %13488 = vrot.lane.b32.xlu1 %v13507_v38, %s21042_s15 }
0x12c4   : > { %v13512_v8 = vpack.i.bf16 %v7718_v25, %v7717_v47  ;;  %v19253_v30 = vpack.c.bf16 %v7718_v25, %v7717_v47 }
0x12c6   : > { %13493 = vrot.lane.b32.xlu0 %v13512_v8, %s21042_s15  ;;  %13498 = vrot.lane.b32.xlu1 %v13477_v26, %s21043_s1 }
0x12ca   : > { %13503 = vrot.lane.b32.xlu0 %v13482_v37, %s21043_s1  ;;  %13508 = vrot.lane.b32.xlu1 %v13507_v38, %s21043_s1 }
0x12ce   : > { %13513 = vrot.lane.b32.xlu0 %v13512_v8, %s21043_s1  ;;  %7721 = vperm.xlu1 %13336, %v7497_v11  }
0x12d2   : > { %7962 = vperm.xlu0 %13320, %v7481_v56   ;;  %7726 = vperm.xlu1 %13336, %v7498_v22  }
0x12d6   : > { %7967 = vperm.xlu0 %13320, %v7482_v4   ;;  %7731 = vperm.xlu1 %13336, %v7499_v59  }
0x12da   : > { %7972 = vperm.xlu0 %13320, %v7483_v43   ;;  %7736 = vperm.xlu1 %13336, %v7500_v40   ;;  %v7465_v43 = vld [vmem:[%s21071_s4] sm:$0xff]  ;;  %v7468_v40 = vld [vmem:[%s21071_s4 + $0x18] sm:$0xff] }
0x12de   : > { %7977 = vperm.xlu0 %13320, %v7484_v28   ;;  %7741 = vperm.xlu1 %13336, %v7501_v36   ;;  %v7467_v28 = vld [vmem:[%s21071_s4 + $0x10] sm:$0xff]  ;;  %v7470_v36 = vld [vmem:[%s21071_s4 + $0x28] sm:$0xff] }
0x12e2   : > { %7982 = vperm.xlu0 %13320, %v7485_v50   ;;  %7746 = vperm.xlu1 %13336, %v7502_v53   ;;  %v7472_v50 = vld [vmem:[%s21071_s4 + $0x38] sm:$0xff]  ;;  %v7474_v53 = vld [vmem:[%s21071_s4 + $0x48] sm:$0xff] }
0x12e6   : > { %7987 = vperm.xlu0 %13320, %v7486_v61   ;;  %7751 = vperm.xlu1 %13336, %v7503_v23   ;;  %v7473_v61 = vld [vmem:[%s21071_s4 + $0x40] sm:$0xff]  ;;  %v7476_v23 = vld [vmem:[%s21071_s4 + $0x58] sm:$0xff] }
0x12ea   : > { %7992 = vperm.xlu0 %13320, %v7487_v0   ;;  %7756 = vperm.xlu1 %13336, %v7504_v9   ;;  %v7475_v0 = vld [vmem:[%s21071_s4 + $0x50] sm:$0xff]  ;;  %v7478_v9 = vld [vmem:[%s21071_s4 + $0x68] sm:$0xff] }
0x12ee   : > { %7997 = vperm.xlu0 %13320, %v7488_v13   ;;  %v7477_v13 = vld [vmem:[%s21071_s4 + $0x60] sm:$0xff] }
0x132c   : > { %v13479_v16 = vpop.permute.xlu1 %13478 }
0x132d   : > { %v13481_v2 = vunpack.i.h.bf16 %v13479_v16  ;;  %v13480_v26 = vunpack.i.l.bf16 %v13479_v16  ;;  %v7480_v16 = vld [vmem:[%s21071_s4 + $0x78] sm:$0xff] }
0x132f   : > { %v12856_v19 = vpack.c.bf16 %v13481_v2, %v13480_v26  ;;  %v7479_v2 = vld [vmem:[%s21071_s4 + $0x70] sm:$0xff]  ;;  %v21080_v26 = vld [vmem:[#allocation55_spill] sm:$0xff] }
0x1330   : > { %v13484_v49 = vpop.permute.xlu0 %13483  ;;  %vm21081_vm3 = vcmp.eq.s32.totalorder %v21080_v26, %v21047_v54  ;;  %vm21082_vm0 = vcmp.eq.s32.totalorder %v21080_v26, %v21051_v63 }
0x1331   : > { %v13486_v35 = vunpack.i.h.bf16 %v13484_v49  ;;  %v13485_v24 = vunpack.i.l.bf16 %v13484_v49  ;;  %12858 = vmatpush1.bf16.msk.msra.mxu1 %vm18480_vm11, %v12856_v19  ;;  %v2935_v19 = vsel %vm21081_vm3, 1.0, %v20554_v29  ;;  %vm8523_vm3 = vcmask 203776  }
0x1332   : > { %12859 = vmatprep.subr.bf16.mxu1 %v21001_v48  ;;  %11406 = vmatprep.subr.msk.mxu0 %vm8170_vm9, %v2935_v19 }
0x1333   : > { %v12860_v46 = vpack.c.bf16 %v13486_v35, %v13485_v24  ;;  %11407 = vmatpush3.msk.msra.mxu0 %vm8170_vm9, %v2935_v19 }
0x1334   : > { %v13489_v34 = vpop.permute.xlu1 %13488  ;;  %12912 = vmatprep.subr.msk.bf16.mxu0 %vm21015_vm12, %v20280_v10 }
0x1335   : > { %v13491_v58 = vunpack.i.h.bf16 %v13489_v34  ;;  %v13490_v37 = vunpack.i.l.bf16 %v13489_v34  ;;  %12862 = vmatpush1.bf16.msk.msra.mxu1 %vm18480_vm11, %v12860_v46 }
0x1336   : > { %12863 = vmatprep.subr.bf16.mxu1 %v21001_v48 }
0x1337   : > { %v12864_v42 = vpack.c.bf16 %v13491_v58, %v13490_v37 }
0x1338   : > { %v13494_v18 = vpop.permute.xlu0 %13493  ;;  %v13499_v60 = vpop.permute.xlu1 %13498 }
0x1339   : > { %v13496_v62 = vunpack.i.h.bf16 %v13494_v18  ;;  %v13495_v5 = vunpack.i.l.bf16 %v13494_v18  ;;  %12866 = vmatpush1.bf16.msk.msra.mxu1 %vm18480_vm11, %v12864_v42  ;;  %v13501_v31 = vunpack.i.h.bf16 %v13499_v60  ;;  %v13500_v38 = vunpack.i.l.bf16 %v13499_v60 }
0x133a   : > { %12867 = vmatprep.subr.bf16.mxu1 %v21001_v48 }
0x133b   : > { %v12868_v6 = vpack.c.bf16 %v13496_v62, %v13495_v5  ;;  %v12884_v25 = vpack.c.bf16 %v13501_v31, %v13500_v38 }
0x133c   : > { %v13504_v3 = vpop.permute.xlu0 %13503  ;;  %v13509_v8 = vpop.permute.xlu1 %13508 }
0x133d   : > { %12870 = vmatpush1.bf16.msk.msra.mxu1 %vm18480_vm11, %v12868_v6  ;;  %v13505_v47 = vunpack.i.l.bf16 %v13504_v3  ;;  %v13510_v11 = vunpack.i.l.bf16 %v13509_v8 }
0x133e   : > { %12871 = vmatprep.subr.bf16.mxu1 %v21001_v48 }
0x1340   : > { %v13514_v56 = vpop.permute.xlu0 %13513 }
0x1341   : > { %12873 = vmatpush1.bf16.msra.mxu1 %v19244_v14  ;;  %v13506_v14 = vunpack.i.h.bf16 %v13504_v3  ;;  %v13516_v22 = vunpack.i.h.bf16 %v13514_v56  ;;  %v13515_v4 = vunpack.i.l.bf16 %v13514_v56 }
0x1342   : > { %12874 = vmatprep.subr.bf16.mxu1 %v21001_v48 }
0x1343   : > { %v12896_v59 = vpack.c.bf16 %v13516_v22, %v13515_v4 }
0x1345   : > { %12876 = vmatpush1.bf16.msra.mxu1 %v19247_v55  ;;  %v12888_v55 = vpack.c.bf16 %v13506_v14, %v13505_v47 }
0x1346   : > { %12877 = vmatprep.subr.bf16.mxu1 %v21001_v48 }
0x1349   : > { %12879 = vmatpush1.bf16.msra.mxu1 %v19250_v32  ;;  %v13511_v32 = vunpack.i.h.bf16 %v13509_v8 }
0x134a   : > { %12880 = vmatprep.subr.bf16.mxu1 %v21001_v48 }
0x134d   : > { %12882 = vmatpush1.bf16.msra.mxu1 %v19253_v30  ;;  %v12892_v30 = vpack.c.bf16 %v13511_v32, %v13510_v11  ;;  %v7722_v49 = vpop.permute.xlu1 %7721 }
0x134e   : > { %12883 = vmatprep.subr.bf16.mxu1 %v21001_v48  ;;  %v7850_v42 = vadd.f32 %v19261_v20, %v7722_v49 }
0x1351   : > { %12886 = vmatpush1.bf16.msk.msra.mxu1 %vm19216_vm15, %v12884_v25  ;;  %v7963_v35 = vpop.permute.xlu0 %7962  ;;  %v7727_v24 = vpop.permute.xlu1 %7726 }
0x1352   : > { %12887 = vmatprep.subr.bf16.mxu1 %v21001_v48  ;;  %v7855_v38 = vadd.f32 %v19257_v15, %v7727_v24 }
0x1355   : > { %12890 = vmatpush1.bf16.msk.msra.mxu1 %vm19216_vm15, %v12888_v55  ;;  %v7968_v46 = vpop.permute.xlu0 %7967  ;;  %v7732_v34 = vpop.permute.xlu1 %7731 }
0x1356   : > { %12891 = vmatprep.subr.bf16.mxu1 %v21001_v48  ;;  %v7860_v55 = vadd.f32 %v19271_v12, %v7732_v34 }
0x1359   : > { %12894 = vmatpush1.bf16.msk.msra.mxu1 %vm19216_vm15, %v12892_v30  ;;  %v7973_v58 = vpop.permute.xlu0 %7972  ;;  %v7737_v5 = vpop.permute.xlu1 %7736 }
0x135a   : > { %12895 = vmatprep.subr.bf16.mxu1 %v21001_v48  ;;  %v7865_v4 = vadd.f32 %v19267_v52, %v7737_v5 }
0x135d   : > { %12898 = vmatpush1.bf16.msk.msra.mxu1 %vm19216_vm15, %v12896_v59  ;;  %v7978_v60 = vpop.permute.xlu0 %7977  ;;  %vm8145_vm15 = vcmask 424960   ;;  %v7742_v20 = vpop.permute.xlu1 %7741 }
0x1360   : > { %8089 = vmatmul.mubr.f32.vlgmr.msra.gmra.mrb[42].mxu1 %v7465_v43 }
0x1361   : > { %10885 = vmatprep.mubr.msk.f32.mxu1 %vm21073_vm7, %v7468_v40  ;;  %v7983_v30 = vpop.permute.xlu0 %7982  ;;  %v7747_v12 = vpop.permute.xlu1 %7746  ;;  %vm21088_vm7 = vmmov %vm21079_vm1 }
0x1364   : > { %8094 = vmatmul.mubr.f32.gmra.mrb[44].mxu1 %v7467_v28 }
0x1365   : > { %10886 = vmatprep.mubr.msk.f32.mxu1 %vm21074_vm4, %v7470_v36  ;;  %v7988_v36 = vpop.permute.xlu0 %7987  ;;  %vm21089_vm4 = vmmov %vm21079_vm1 }
0x1368   : > { %8099 = vmatmul.mubr.f32.gmra.mrb[46].mxu1 %v7469_v44 }
0x1369   : > { %10887 = vmatprep.mubr.msk.f32.mxu1 %vm21075_vm6, %v7472_v50  ;;  %v7870_v50 = vadd.f32 %v19279_v39, %v7742_v20  ;;  %v7875_v39 = vadd.f32 %v19275_v51, %v7747_v12  ;;  %vm21090_vm6 = vmmov %vm21079_vm1 }
0x136c   : > { %8104 = vmatmul.mubr.f32.gmra.mrb[48].mxu1 %v7471_v7 }
0x136d   : > { %10888 = vmatprep.mubr.msk.f32.mxu1 %vm21076_vm5, %v7474_v53  ;;  %vm21091_vm5 = vmmov %vm21079_vm1 }
0x1370   : > { %8109 = vmatmul.mubr.f32.gmra.mrb[50].mxu1 %v7473_v61  ;;  %v4343_v61 = vsel %vm21082_vm0, 1.0, %v20554_v29  ;;  %vm21097_vm0 = vmmov %vm21079_vm1 }
0x1371   : > { %10889 = vmatprep.mubr.msk.f32.mxu1 %vm21077_vm14, %v7476_v23  ;;  %vm21092_vm14 = vmmov %vm21079_vm1 }
0x1374   : > { %8114 = vmatmul.mubr.f32.gmra.mrb[52].mxu1 %v7475_v0  ;;  %v7752_v0 = vpop.permute.xlu1 %7751 }
0x1375   : > { %10890 = vmatprep.mubr.msk.f32.mxu1 %vm21078_vm2, %v7478_v9  ;;  %v7880_v49 = vadd.f32 %v19289_v21, %v7752_v0  ;;  %v8411_v0 = vld [vmem:[%s21083_s7] sm:$0xff]  ;;  %vm21093_vm2 = vmmov %vm21079_vm1  ;;  %s21103_s7 = sld [smem:[#allocation45_spill]] }
0x1378   : > { %8119 = vmatmul.mubr.f32.gmra.mrb[54].mxu1 %v7477_v13  ;;  %v7757_v51 = vpop.permute.xlu1 %7756 }
0x1379   : > { %10891 = vmatprep.mubr.msk.f32.mxu1 %vm21079_vm1, %v7480_v16 }
0x137c   : > { %8124 = vmatmul.mubr.f32.gmra.mrb[56].mxu1 %v7479_v2  ;;  %v7993_v2 = vpop.permute.xlu0 %7992 }
0x1380   : > { %v7998_v34 = vpop.permute.xlu0 %7997 }
0x1433   : > { %v8090_v37 = vpop.f32.mrb[42].mxu1 }
0x1434   : > { %v8091_v18 = vadd.f32 %v8090_v37, %v7963_v35  ;;  %v8092_v62 = vpop.f32.mrb[43].mxu1  ;;  %v7885_v37 = vadd.f32 %v19285_v57, %v7757_v51  ;;  %v8447_v51 = vld [vmem:[%s14143_s24 + $0x20] sm:$0xff] }
0x1436   : > { %v19357_v6 = vadd.f32 %v8091_v18, %v7850_v42 }
0x1437   : > { %v8095_v31 = vpop.f32.mrb[44].mxu1 }
0x1438   : > { %v8137_v3 = vmax.f32 %v19357_v6, 0.0  ;;  %v8096_v25 = vadd.f32 %v8095_v31, %v7968_v46  ;;  %v8097_v14 = vpop.f32.mrb[45].mxu1 }
0x143a   : > { %v19361_v47 = vadd.f32 %v8096_v25, %v7855_v38  ;;  %11408 = vmatprep.mubr.msk.f32.mxu0 %vm8145_vm15, %v8137_v3 }
0x143b   : > { %v8100_v8 = vpop.f32.mrb[46].mxu1 }
0x143c   : > { %v8138_v32 = vmax.f32 %v19361_v47, 0.0  ;;  %v8101_v11 = vadd.f32 %v8100_v8, %v7973_v58  ;;  %v8102_v56 = vpop.f32.mrb[47].mxu1 }
0x143e   : > { %v8131_v15 = vadd.f32 %v8101_v11, %v7860_v55  ;;  %11409 = vmatmul.mubr.msk.f32.vlgmr.msra.gmra.mrb[54].mxu0 %vm8145_vm15, %v8138_v32 }
0x143f   : > { %v8105_v22 = vpop.f32.mrb[48].mxu1  ;;  %12914 = vmatpush3.bf16.msk.msra.mxu0 %vm21015_vm12, %v20280_v10 }
0x1440   : > { %v8139_v59 = vmax.f32 %v8131_v15, 0.0  ;;  %v8106_v43 = vadd.f32 %v8105_v22, %v7978_v60  ;;  %v8107_v40 = vpop.f32.mrb[49].mxu1  ;;  %12916 = vmatprep.subr.msk.bf16.mxu0 %vm21017_vm13, %v20280_v10 }
0x1442   : > { %v8132_v28 = vadd.f32 %v8106_v43, %v7865_v4  ;;  %11411 = vmatprep.mubr.msk.f32.mxu0 %vm8145_vm15, %v8139_v59 }
0x1443   : > { %v8110_v44 = vpop.f32.mrb[50].mxu1  ;;  %12918 = vmatpush3.bf16.msk.msra.mxu0 %vm21017_vm13, %v20280_v10  ;;  %vm21086_vm13 = vmmov %vm21079_vm1 }
0x1444   : > { %v8140_v52 = vmax.f32 %v8132_v28, 0.0  ;;  %v8111_v7 = vadd.f32 %v8110_v44, %v7983_v30  ;;  %v8112_v53 = vpop.f32.mrb[51].mxu1  ;;  %12920 = vmatprep.subr.msk.bf16.mxu0 %vm21018_vm10, %v20280_v10 }
0x1446   : > { %v8133_v23 = vadd.f32 %v8111_v7, %v7870_v50  ;;  %11412 = vmatmul.mubr.msk.f32.gmra.mrb[56].mxu0 %vm8145_vm15, %v8140_v52 }
0x1447   : > { %v8115_v41 = vpop.f32.mrb[52].mxu1  ;;  %12922 = vmatpush3.bf16.msk.msra.mxu0 %vm21018_vm10, %v20280_v10  ;;  %vm21087_vm10 = vmmov %vm21079_vm1 }
0x1448   : > { %v8141_v9 = vmax.f32 %v8133_v23, 0.0  ;;  %v8116_v13 = vadd.f32 %v8115_v41, %v7988_v36  ;;  %v8117_v16 = vpop.f32.mrb[53].mxu1  ;;  %11432 = vmatprep.subr.msk.mxu0 %vm8170_vm9, %v4343_v61  ;;  %v8413_v41 = vld [vmem:[%s21084_s2 + $0x10] sm:$0xff] }
0x1449   : > { %v8417_v16 = vld [vmem:[%s21084_s2 + $0x30] sm:$0xff] }
0x144a   : > { %v8134_v19 = vadd.f32 %v8116_v13, %v7875_v39  ;;  %11414 = vmatprep.mubr.msk.f32.mxu0 %vm8145_vm15, %v8141_v9  ;;  %v8412_v39 = vld [vmem:[%s21084_s2 + $0x8] sm:$0xff]  ;;  %v8414_v13 = vld [vmem:[%s21084_s2 + $0x18] sm:$0xff] }
0x144b   : > { %v8120_v26 = vpop.f32.mrb[54].mxu1  ;;  %11433 = vmatpush3.msk.msra.mxu0 %vm8170_vm9, %v4343_v61  ;;  %vm19483_vm9 = vmpackc.low %vm8523_vm3, %vm8523_vm3 }
0x144c   : > { %v8142_v35 = vmax.f32 %v8134_v19, 0.0  ;;  %v8121_v24 = vadd.f32 %v8120_v26, %v7993_v2  ;;  %v8122_v27 = vpop.f32.mrb[55].mxu1  ;;  %12923 = vmatprep.subr.bf16.mxu0 %v21001_v48  ;;  %v8416_v2 = vld [vmem:[%s21084_s2 + $0x28] sm:$0xff]  ;;  %v8418_v19 = vld [vmem:[%s21084_s2 + $0x38] sm:$0xff]  ;;  %vm21113_vm3 = vmmov %vm21097_vm0 }
0x144d   : > { %v8396_v26 = vld [vmem:[%s21085_s3 + $0x8] sm:$0xff]  ;;  %v8446_v27 = vld [vmem:[%s14143_s24 + $0x18] sm:$0xff] }
0x144e   : > { %v8135_v46 = vadd.f32 %v8121_v24, %v7880_v49  ;;  %11415 = vmatmul.mubr.msk.f32.gmra.mrb[58].mxu0 %vm8145_vm15, %v8142_v35  ;;  %v8443_v49 = vld [vmem:[%s14143_s24] sm:$0xff]  ;;  %v8445_v24 = vld [vmem:[%s14143_s24 + $0x10] sm:$0xff] }
0x144f   : > { %v8125_v58 = vpop.f32.mrb[56].mxu1  ;;  %11462 = vmatprep.mubr.msk.f32.mxu1 %vm21087_vm10, %v8443_v49  ;;  %vm21099_vm10 = vmmov %vm21097_vm0 }
0x1450   : > { %v8143_v42 = vmax.f32 %v8135_v46, 0.0  ;;  %v8126_v18 = vadd.f32 %v8125_v58, %v7998_v34  ;;  %v8127_v62 = vpop.f32.mrb[57].mxu1  ;;  %v8448_v46 = vld [vmem:[%s14143_s24 + $0x28] sm:$0xff]  ;;  %v8449_v34 = vld [vmem:[%s14143_s24 + $0x30] sm:$0xff]  ;;  %v8450_v58 = vld [vmem:[%s14143_s24 + $0x38] sm:$0xff] }
0x1452   : > { %v8136_v5 = vadd.f32 %v8126_v18, %v7885_v37  ;;  %11417 = vmatprep.mubr.msk.f32.mxu0 %vm8145_vm15, %v8143_v42 }
0x1454   : > { %v8144_v21 = vmax.f32 %v8136_v5, 0.0 }
0x1456   : > { %11418 = vmatmul.mubr.msk.f32.gmra.mrb[60].mxu0 %vm8145_vm15, %v8144_v21 }
0x1457   : > { %11434 = vmatprep.mubr.msk.f32.mxu0 %vm8145_vm15, %v8137_v3 }
0x145a   : > { %11435 = vmatmul.mubr.msk.f32.vlgmr.msra.gmra.mrb[62].mxu0 %vm8145_vm15, %v8138_v32 }
0x145b   : > { %11437 = vmatprep.mubr.msk.f32.mxu0 %vm8145_vm15, %v8139_v59 }
0x145e   : > { %11438 = vmatmul.mubr.msk.f32.gmra.mrb[64].mxu0 %vm8145_vm15, %v8140_v52 }
0x145f   : > { %11440 = vmatprep.mubr.msk.f32.mxu0 %vm8145_vm15, %v8141_v9  ;;  %v8415_v9 = vld [vmem:[%s21084_s2 + $0x20] sm:$0xff]  ;;  %s21104_s2 = smov %s21103_s7 }
0x1462   : > { %11441 = vmatmul.mubr.msk.f32.gmra.mrb[66].mxu0 %vm8145_vm15, %v8142_v35  ;;  %v8444_v35 = vld [vmem:[%s14143_s24 + $0x8] sm:$0xff] }
0x1463   : > { %11443 = vmatprep.mubr.msk.f32.mxu0 %vm8145_vm15, %v8143_v42 }
0x1466   : > { %11444 = vmatmul.mubr.msk.f32.gmra.mrb[68].mxu0 %vm8145_vm15, %v8144_v21  ;;  %vm21096_vm15 = vmmov %vm21079_vm1 }
0x1467   : > { %10946 = vmatprep.mubr.msk.f32.mxu0 %vm21086_vm13, %v8396_v26  ;;  %vm21098_vm13 = vmmov %vm21097_vm0  ;;  %v8409_v26 = vld [vmem:[%s21085_s3 + $0x70] sm:$0xff] }
0x1511   : > { %v11410_v57 = vpop.f32.mrb[54].mxu0 }
0x1512   : > { %v8240_v60 = vpop.f32.mrb[55].mxu0 }
0x1519   : > { %v11413_v31 = vpop.f32.mrb[56].mxu0 }
0x151a   : > { %v8250_v6 = vpop.f32.mrb[57].mxu0 }
0x1521   : > { %v11416_v38 = vpop.f32.mrb[58].mxu0 }
0x1522   : > { %v8260_v3 = vpop.f32.mrb[59].mxu0 }
0x1529   : > { %v11419_v25 = vpop.f32.mrb[60].mxu0 }
0x152a   : > { %v8270_v14 = vpop.f32.mrb[61].mxu0 }
0x152d   : > { %v11436_v47 = vpop.f32.mrb[62].mxu0 }
0x152e   : > { %v8388_v20 = vmax.f32 %v11410_v57, %v11436_v47  ;;  %v8348_v8 = vpop.f32.mrb[63].mxu0 }
0x152f   : > { %v8387_v55 = vmax.f32 %v8240_v60, %v8348_v8 }
0x1531   : > { %v13537_v32 = vpack.i.bf16 %v8388_v20, %v8387_v55  ;;  %v11439_v11 = vpop.f32.mrb[64].mxu0  ;;  %v19412_v56 = vpack.c.bf16 %v8388_v20, %v8387_v55 }
0x1532   : > { %v8390_v30 = vmax.f32 %v11413_v31, %v11439_v11  ;;  %v8358_v15 = vpop.f32.mrb[65].mxu0 }
0x1533   : > { %v8389_v22 = vmax.f32 %v8250_v6, %v8358_v15  ;;  %13518 = vrot.lane.b32.xlu1 %v13537_v32, %s21042_s15  ;;  %12968 = vmatprep.subr.bf16.mxu1 %v19412_v56 }
0x1534   : > { %12970 = vmatpush3.bf16.msra.mxu1 %v19412_v56 }
0x1535   : > { %v13542_v4 = vpack.i.bf16 %v8390_v30, %v8389_v22  ;;  %v11442_v59 = vpop.f32.mrb[66].mxu0  ;;  %v19417_v43 = vpack.c.bf16 %v8390_v30, %v8389_v22 }
0x1536   : > { %v8392_v40 = vmax.f32 %v11416_v38, %v11442_v59  ;;  %v8368_v12 = vpop.f32.mrb[67].mxu0 }
0x1537   : > { %v8391_v28 = vmax.f32 %v8260_v3, %v8368_v12  ;;  %13523 = vrot.lane.b32.xlu0 %v13542_v4, %s21042_s15  ;;  %12972 = vmatprep.subr.bf16.mxu1 %v19417_v43 }
0x1538   : > { %12974 = vmatpush3.bf16.msra.mxu1 %v19417_v43 }
0x1539   : > { %v13547_v36 = vpack.i.bf16 %v8392_v40, %v8391_v28  ;;  %v11445_v44 = vpop.f32.mrb[68].mxu0  ;;  %v19422_v50 = vpack.c.bf16 %v8392_v40, %v8391_v28 }
0x153a   : > { %v8394_v52 = vmax.f32 %v11419_v25, %v11445_v44  ;;  %v8378_v7 = vpop.f32.mrb[69].mxu0 }
0x153b   : > { %v8393_v53 = vmax.f32 %v8270_v14, %v8378_v7  ;;  %13528 = vrot.lane.b32.xlu1 %v13547_v36, %s21042_s15  ;;  %12976 = vmatprep.subr.bf16.mxu1 %v19422_v50  ;;  %v8398_v7 = vld [vmem:[%s21085_s3 + $0x18] sm:$0xff] }
0x153c   : > { %12978 = vmatpush3.bf16.msra.mxu1 %v19422_v50 }
0x153d   : > { %v13552_v61 = vpack.i.bf16 %v8394_v52, %v8393_v53  ;;  %v19427_v23 = vpack.c.bf16 %v8394_v52, %v8393_v53  ;;  %v8395_v52 = vld [vmem:[%s21085_s3] sm:$0xff]  ;;  %v8397_v53 = vld [vmem:[%s21085_s3 + $0x10] sm:$0xff] }
0x153f   : > { %13538 = vrot.lane.b32.xlu1 %v13537_v32, %s21043_s1  ;;  %13533 = vrot.lane.b32.xlu0 %v13552_v61, %s21042_s15 }
0x1540   : > { %12980 = vmatprep.subr.bf16.mxu1 %v19427_v23 }
0x1541   : > { %12982 = vmatpush3.bf16.msra.mxu1 %v19427_v23 }
0x1542   : > { %12983 = vmatprep.subr.bf16.mxu1 %v21001_v48 }
0x1543   : > { %13548 = vrot.lane.b32.xlu1 %v13547_v36, %s21043_s1  ;;  %13543 = vrot.lane.b32.xlu0 %v13542_v4, %s21043_s1 }
0x1544   : > { %11463 = vmatmul.mubr.msk.f32.vlgmr.msra.gmra.mrb[58].mxu1 %vm21088_vm7, %v8444_v35  ;;  %vm21101_vm7 = vmmov %vm21097_vm0 }
0x1545   : > { %11465 = vmatprep.mubr.msk.f32.mxu1 %vm21089_vm4, %v8445_v24  ;;  %vm21102_vm4 = vmmov %vm21097_vm0 }
0x1547   : > { %8534 = vperm.xlu1 %13336, %v8411_v0   ;;  %13553 = vrot.lane.b32.xlu0 %v13552_v61, %s21043_s1  ;;  %v8400_v61 = vld [vmem:[%s21085_s3 + $0x28] sm:$0xff]  ;;  %v8402_v0 = vld [vmem:[%s21085_s3 + $0x38] sm:$0xff] }
0x1548   : > { %11466 = vmatmul.mubr.msk.f32.gmra.mrb[60].mxu1 %vm21090_vm6, %v8446_v27  ;;  %vm21107_vm6 = vmmov %vm21097_vm0 }
0x1549   : > { %11468 = vmatprep.mubr.msk.f32.mxu1 %vm21091_vm5, %v8447_v51  ;;  %vm21109_vm5 = vmmov %vm21097_vm0 }
0x154b   : > { %8544 = vperm.xlu1 %13336, %v8413_v41   ;;  %8539 = vperm.xlu0 %13320, %v8412_v39   ;;  %v8401_v41 = vld [vmem:[%s21085_s3 + $0x30] sm:$0xff]  ;;  %v8404_v39 = vld [vmem:[%s21085_s3 + $0x48] sm:$0xff] }
0x154c   : > { %11469 = vmatmul.mubr.msk.f32.gmra.mrb[62].mxu1 %vm21092_vm14, %v8448_v46  ;;  %vm21110_vm14 = vmmov %vm21097_vm0 }
0x154d   : > { %11471 = vmatprep.mubr.msk.f32.mxu1 %vm21093_vm2, %v8449_v34  ;;  %vm21111_vm2 = vmmov %vm21097_vm0 }
0x154f   : > { %8554 = vperm.xlu1 %13336, %v8415_v9   ;;  %8549 = vperm.xlu0 %13320, %v8414_v13   ;;  %v8406_v9 = vld [vmem:[%s21085_s3 + $0x58] sm:$0xff]  ;;  %v8405_v13 = vld [vmem:[%s21085_s3 + $0x50] sm:$0xff] }
0x1550   : > { %11472 = vmatmul.mubr.msk.f32.gmra.mrb[64].mxu1 %vm21079_vm1, %v8450_v58  ;;  %vm21112_vm1 = vmmov %vm21097_vm0 }
0x1553   : > { %8564 = vperm.xlu1 %13336, %v8417_v16   ;;  %8559 = vperm.xlu0 %13320, %v8416_v2   ;;  %v8408_v16 = vld [vmem:[%s21085_s3 + $0x68] sm:$0xff]  ;;  %v8407_v2 = vld [vmem:[%s21085_s3 + $0x60] sm:$0xff] }
0x1557   : > { %8569 = vperm.xlu0 %13320, %v8418_v19   ;;  %v8410_v19 = vld [vmem:[%s21085_s3 + $0x78] sm:$0xff] }
0x15a5   : > { %v13519_v37 = vpop.permute.xlu1 %13518 }
0x15a6   : > { %v13521_v42 = vunpack.i.h.bf16 %v13519_v37  ;;  %v13520_v18 = vunpack.i.l.bf16 %v13519_v37 }
0x15a8   : > { %v12924_v62 = vpack.c.bf16 %v13521_v42, %v13520_v18 }
0x15a9   : > { %v13524_v5 = vpop.permute.xlu0 %13523 }
0x15aa   : > { %v13526_v21 = vunpack.i.h.bf16 %v13524_v5  ;;  %v13525_v57 = vunpack.i.l.bf16 %v13524_v5  ;;  %12926 = vmatpush1.bf16.msk.msra.mxu0 %vm18480_vm11, %v12924_v62 }
0x15ab   : > { %12927 = vmatprep.subr.bf16.mxu0 %v21001_v48 }
0x15ac   : > { %v12928_v60 = vpack.c.bf16 %v13526_v21, %v13525_v57 }
0x15ad   : > { %v13529_v31 = vpop.permute.xlu1 %13528 }
0x15ae   : > { %v13531_v6 = vunpack.i.h.bf16 %v13529_v31  ;;  %v13530_v38 = vunpack.i.l.bf16 %v13529_v31  ;;  %12930 = vmatpush1.bf16.msk.msra.mxu0 %vm18480_vm11, %v12928_v60 }
0x15af   : > { %12931 = vmatprep.subr.bf16.mxu0 %v21001_v48 }
0x15b0   : > { %v12932_v3 = vpack.c.bf16 %v13531_v6, %v13530_v38 }
0x15b1   : > { %v13534_v25 = vpop.permute.xlu0 %13533  ;;  %v13539_v8 = vpop.permute.xlu1 %13538 }
0x15b2   : > { %v13536_v14 = vunpack.i.h.bf16 %v13534_v25  ;;  %v13535_v47 = vunpack.i.l.bf16 %v13534_v25  ;;  %12934 = vmatpush1.bf16.msk.msra.mxu0 %vm18480_vm11, %v12932_v3  ;;  %v13541_v55 = vunpack.i.h.bf16 %v13539_v8  ;;  %v13540_v32 = vunpack.i.l.bf16 %v13539_v8 }
0x15b3   : > { %12935 = vmatprep.subr.bf16.mxu0 %v21001_v48 }
0x15b4   : > { %v12936_v20 = vpack.c.bf16 %v13536_v14, %v13535_v47  ;;  %v12952_v30 = vpack.c.bf16 %v13541_v55, %v13540_v32 }
0x15b5   : > { %v13544_v11 = vpop.permute.xlu0 %13543  ;;  %v13549_v4 = vpop.permute.xlu1 %13548 }
0x15b6   : > { %12938 = vmatpush1.bf16.msk.msra.mxu0 %vm18480_vm11, %v12936_v20  ;;  %v13546_v15 = vunpack.i.h.bf16 %v13544_v11  ;;  %v13545_v22 = vunpack.i.l.bf16 %v13544_v11  ;;  %v13551_v59 = vunpack.i.h.bf16 %v13549_v4 }
0x15b7   : > { %12939 = vmatprep.subr.bf16.mxu0 %v21001_v48 }
0x15b8   : > { %v12956_v40 = vpack.c.bf16 %v13546_v15, %v13545_v22 }
0x15b9   : > { %v13554_v12 = vpop.permute.xlu0 %13553 }
0x15ba   : > { %12941 = vmatpush1.bf16.msra.mxu0 %v19412_v56  ;;  %v13556_v36 = vunpack.i.h.bf16 %v13554_v12  ;;  %v13555_v44 = vunpack.i.l.bf16 %v13554_v12 }
0x15bb   : > { %12942 = vmatprep.subr.bf16.mxu0 %v21001_v48 }
0x15be   : > { %12944 = vmatpush1.bf16.msra.mxu0 %v19417_v43  ;;  %v13550_v43 = vunpack.i.l.bf16 %v13549_v4 }
0x15bf   : > { %12945 = vmatprep.subr.bf16.mxu0 %v21001_v48 }
0x15c0   : > { %v12960_v28 = vpack.c.bf16 %v13551_v59, %v13550_v43 }
0x15c2   : > { %12947 = vmatpush1.bf16.msra.mxu0 %v19422_v50  ;;  %v12964_v50 = vpack.c.bf16 %v13556_v36, %v13555_v44 }
0x15c3   : > { %12948 = vmatprep.subr.bf16.mxu0 %v21001_v48 }
0x15c6   : > { %12950 = vmatpush1.bf16.msra.mxu0 %v19427_v23  ;;  %v8399_v23 = vld [vmem:[%s21085_s3 + $0x20] sm:$0xff]  ;;  %v8535_v24 = vpop.permute.xlu1 %8534 }
0x15c7   : > { %12951 = vmatprep.subr.bf16.mxu0 %v21001_v48 }
0x15ca   : > { %12954 = vmatpush1.bf16.msk.msra.mxu0 %vm19483_vm9, %v12952_v30  ;;  %v8540_v51 = vpop.permute.xlu0 %8539  ;;  %v8545_v57 = vpop.permute.xlu1 %8544 }
0x15cb   : > { %12955 = vmatprep.subr.bf16.mxu0 %v21001_v48 }
0x15ce   : > { %12958 = vmatpush1.bf16.msk.msra.mxu0 %vm19483_vm9, %v12956_v40  ;;  %v8550_v31 = vpop.permute.xlu0 %8549  ;;  %v8555_v32 = vpop.permute.xlu1 %8554 }
0x15cf   : > { %12959 = vmatprep.subr.bf16.mxu0 %v21001_v48 }
0x15d2   : > { %12962 = vmatpush1.bf16.msk.msra.mxu0 %vm19483_vm9, %v12960_v28  ;;  %v8560_v30 = vpop.permute.xlu0 %8559  ;;  %v8565_v44 = vpop.permute.xlu1 %8564 }
0x15d3   : > { %12963 = vmatprep.subr.bf16.mxu0 %v21001_v48 }
0x15d6   : > { %12966 = vmatpush1.bf16.msk.msra.mxu0 %vm19483_vm9, %v12964_v50 }
0x15d7   : > { %13028 = vmatprep.subr.msk.bf16.mxu0 %vm20816_vm8, %v20280_v10 }
0x15d9   : > { %8661 = vmatmul.mubr.f32.vlgmr.msra.gmra.mrb[70].mxu0 %v8395_v52  ;;  %v8570_v52 = vpop.permute.xlu0 %8569 }
0x15da   : > { %10947 = vmatprep.mubr.msk.f32.mxu0 %vm21096_vm15, %v8398_v7  ;;  %13030 = vmatpush3.bf16.msk.msra.mxu0 %vm20816_vm8, %v20280_v10  ;;  %vm21100_vm8 = vmmov %vm21097_vm0 }
0x15dd   : > { %8666 = vmatmul.mubr.f32.gmra.mrb[72].mxu0 %v8397_v53 }
0x15de   : > { %10948 = vmatprep.mubr.msk.f32.mxu0 %vm21097_vm0, %v8400_v61 }
0x15e1   : > { %8671 = vmatmul.mubr.f32.gmra.mrb[74].mxu0 %v8399_v23 }
0x15e2   : > { %10949 = vmatprep.mubr.msk.f32.mxu0 %vm21098_vm13, %v8402_v0  ;;  %vm21119_vm13 = vcmask 1041408  }
0x15e5   : > { %8676 = vmatmul.mubr.f32.gmra.mrb[76].mxu0 %v8401_v41 }
0x15e6   : > { %10950 = vmatprep.mubr.msk.f32.mxu0 %vm21099_vm10, %v8404_v39 }
0x15e9   : > { %8681 = vmatmul.mubr.f32.gmra.mrb[78].mxu0 %v8403_v45 }
0x15ea   : > { %10951 = vmatprep.mubr.msk.f32.mxu0 %vm21100_vm8, %v8406_v9  ;;  %vm9135_vm8 = vcmask 211968  }
0x15ed   : > { %8686 = vmatmul.mubr.f32.gmra.mrb[80].mxu0 %v8405_v13  ;;  %v8451_v13 = vld [vmem:[%s14148_s27] sm:$0xff] }
0x15ee   : > { %10952 = vmatprep.mubr.msk.f32.mxu0 %vm21101_vm7, %v8408_v16  ;;  %v8452_v16 = vld [vmem:[%s14148_s27 + $0x8] sm:$0xff] }
0x15f1   : > { %8691 = vmatmul.mubr.f32.gmra.mrb[82].mxu0 %v8407_v2 }
0x15f2   : > { %10953 = vmatprep.mubr.msk.f32.mxu0 %vm21102_vm4, %v8410_v19  ;;  %v8435_v19 = vld [vmem:[%s21103_s7] sm:$0xff]  ;;  %s11020_s7 = sshll.u32 %s21129_s18, 6 }
0x15f5   : > { %8696 = vmatmul.mubr.f32.gmra.mrb[84].mxu0 %v8409_v26  ;;  %v8453_v26 = vld [vmem:[%s14148_s27 + $0x10] sm:$0xff] }
0x1617   : > { %v19538_v45 = vpop.f32.mrb[58].mxu1 }
0x1618   : > { %v19542_v9 = vpop.f32.mrb[59].mxu1 }
0x161b   : > { %v19548_v2 = vpop.f32.mrb[60].mxu1 }
0x16ac   : > { %v8662_v49 = vpop.f32.mrb[70].mxu0 }
0x16ad   : > { %v8664_v35 = vpop.f32.mrb[71].mxu0  ;;  %v8663_v27 = vadd.f32 %v8662_v49, %v8535_v24  ;;  %v19552_v49 = vpop.f32.mrb[61].mxu1  ;;  %v8454_v24 = vld [vmem:[%s14148_s27 + $0x18] sm:$0xff] }
0x16ae   : > { %v8436_v35 = vld [vmem:[%s21104_s2 + $0x8] sm:$0xff] }
0x16af   : > { %v8701_v37 = vmax.f32 %v8663_v27, 0.0  ;;  %v19556_v27 = vpop.f32.mrb[62].mxu1 }
0x16b0   : > { %v8667_v46 = vpop.f32.mrb[72].mxu0 }
0x16b1   : > { %v8668_v34 = vadd.f32 %v8667_v46, %v8540_v51  ;;  %v8669_v58 = vpop.f32.mrb[73].mxu0  ;;  %v8437_v51 = vld [vmem:[%s21104_s2 + $0x10] sm:$0xff]  ;;  %v8455_v46 = vld [vmem:[%s14148_s27 + $0x20] sm:$0xff] }
0x16b2   : > { %v8438_v58 = vld [vmem:[%s21104_s2 + $0x18] sm:$0xff] }
0x16b3   : > { %v8702_v42 = vmax.f32 %v8668_v34, 0.0  ;;  %v19560_v34 = vpop.f32.mrb[63].mxu1 }
0x16b4   : > { %v8672_v18 = vpop.f32.mrb[74].mxu0 }
0x16b5   : > { %v13577_v62 = vpack.i.bf16 %v8702_v42, %v8701_v37  ;;  %v19526_v5 = vpack.c.bf16 %v8702_v42, %v8701_v37  ;;  %v8674_v21 = vpop.f32.mrb[75].mxu0  ;;  %v8673_v60 = vadd.f32 %v8672_v18, %v8545_v57  ;;  %v8456_v37 = vld [vmem:[%s14148_s27 + $0x28] sm:$0xff]  ;;  %v19565_v18 = vpop.f32.mrb[64].mxu1 }
0x16b6   : > { %v8457_v21 = vld [vmem:[%s14148_s27 + $0x30] sm:$0xff]  ;;  %v19570_v57 = vpop.f32.mrb[65].mxu1 }
0x16b7   : > { %13558 = vrot.lane.b32.xlu1 %v13577_v62, %s21042_s15  ;;  %v8703_v25 = vmax.f32 %v8673_v60, 0.0  ;;  %v8440_v60 = vld [vmem:[%s21104_s2 + $0x28] sm:$0xff] }
0x16b8   : > { %v8677_v6 = vpop.f32.mrb[76].mxu0 }
0x16b9   : > { %v8678_v38 = vadd.f32 %v8677_v6, %v8550_v31  ;;  %v8679_v3 = vpop.f32.mrb[77].mxu0  ;;  %v8458_v31 = vld [vmem:[%s14148_s27 + $0x38] sm:$0xff]  ;;  %v8441_v6 = vld [vmem:[%s21104_s2 + $0x30] sm:$0xff] }
0x16bb   : > { %v8704_v14 = vmax.f32 %v8678_v38, 0.0  ;;  %v8442_v38 = vld [vmem:[%s21104_s2 + $0x38] sm:$0xff] }
0x16bc   : > { %v8682_v47 = vpop.f32.mrb[78].mxu0 }
0x16bd   : > { %v13582_v20 = vpack.i.bf16 %v8704_v14, %v8703_v25  ;;  %v19529_v8 = vpack.c.bf16 %v8704_v14, %v8703_v25  ;;  %v8684_v55 = vpop.f32.mrb[79].mxu0  ;;  %v8683_v11 = vadd.f32 %v8682_v47, %v8555_v32 }
0x16bf   : > { %13563 = vrot.lane.b32.xlu0 %v13582_v20, %s21042_s15  ;;  %v8705_v59 = vmax.f32 %v8683_v11, 0.0 }
0x16c0   : > { %v8687_v15 = vpop.f32.mrb[80].mxu0 }
0x16c1   : > { %v8688_v22 = vadd.f32 %v8687_v15, %v8560_v30  ;;  %v8689_v4 = vpop.f32.mrb[81].mxu0 }
0x16c3   : > { %v8706_v43 = vmax.f32 %v8688_v22, 0.0 }
0x16c4   : > { %v8692_v40 = vpop.f32.mrb[82].mxu0 }
0x16c5   : > { %v13587_v12 = vpack.i.bf16 %v8706_v43, %v8705_v59  ;;  %v19532_v28 = vpack.c.bf16 %v8706_v43, %v8705_v59  ;;  %v8694_v36 = vpop.f32.mrb[83].mxu0  ;;  %v8693_v50 = vadd.f32 %v8692_v40, %v8565_v44 }
0x16c7   : > { %13568 = vrot.lane.b32.xlu1 %v13587_v12, %s21042_s15  ;;  %v8707_v23 = vmax.f32 %v8693_v50, 0.0 }
0x16c8   : > { %v8697_v7 = vpop.f32.mrb[84].mxu0 }
0x16c9   : > { %v8698_v53 = vadd.f32 %v8697_v7, %v8570_v52  ;;  %v8699_v61 = vpop.f32.mrb[85].mxu0 }
0x16cb   : > { %v8708_v0 = vmax.f32 %v8698_v53, 0.0  ;;  %13578 = vrot.lane.b32.xlu1 %v13577_v62, %s21043_s1  ;;  %v8439_v62 = vld [vmem:[%s21104_s2 + $0x20] sm:$0xff] }
0x16cd   : > { %v13592_v41 = vpack.i.bf16 %v8708_v0, %v8707_v23  ;;  %v19536_v39 = vpack.c.bf16 %v8708_v0, %v8707_v23 }
0x16cf   : > { %13573 = vrot.lane.b32.xlu0 %v13592_v41, %s21042_s15  ;;  %13588 = vrot.lane.b32.xlu1 %v13587_v12, %s21043_s1  ;;  %s21105_s15 = sld [smem:[#allocation44_spill]] }
0x16d3   : > { %13583 = vrot.lane.b32.xlu0 %v13582_v20, %s21043_s1  ;;  %8711 = vperm.xlu1 %13336, %v8451_v13  }
0x16d5   : > { %s21106_s3 = smov %s21105_s15  ;;  %v8420_v42 = vld [vmem:[%s21105_s15 + $0x8] sm:$0xff] }
0x16d6   : > { %10986 = vmatprep.mubr.msk.f32.mxu1 %vm21107_vm6, %v8420_v42  ;;  %v8425_v56 = vld [vmem:[%s21106_s3 + $0x30] sm:$0xff]  ;;  %v8432_v42 = vld [vmem:[%s21106_s3 + $0x68] sm:$0xff]  ;;  %vm21122_vm6 = vmmov %vm21119_vm13 }
0x16d7   : > { %13593 = vrot.lane.b32.xlu0 %v13592_v41, %s21043_s1  ;;  %8716 = vperm.xlu1 %13336, %v8452_v16   ;;  %v8419_v16 = vld [vmem:[%s21106_s3] sm:$0xff]  ;;  %s21123_s1 = sld [smem:[#allocation46_spill]] }
0x16db   : > { %8952 = vperm.xlu0 %13320, %v8435_v19   ;;  %8721 = vperm.xlu1 %13336, %v8453_v26   ;;  %v8422_v19 = vld [vmem:[%s21106_s3 + $0x18] sm:$0xff]  ;;  %v8421_v26 = vld [vmem:[%s21106_s3 + $0x10] sm:$0xff] }
0x16dd   : > { %s1258_s15 = scalar_lea.vmem %s21123_s1, %s11020_s7 }
0x16df   : > { %8957 = vperm.xlu0 %13320, %v8436_v35   ;;  %8726 = vperm.xlu1 %13336, %v8454_v24   ;;  %v8424_v35 = vld [vmem:[%s21106_s3 + $0x28] sm:$0xff]  ;;  %v8426_v24 = vld [vmem:[%s21106_s3 + $0x38] sm:$0xff] }
0x16e3   : > { %8962 = vperm.xlu0 %13320, %v8437_v51   ;;  %8731 = vperm.xlu1 %13336, %v8455_v46   ;;  %v8428_v51 = vld [vmem:[%s21106_s3 + $0x48] sm:$0xff]  ;;  %v8427_v46 = vld [vmem:[%s21106_s3 + $0x40] sm:$0xff] }
0x16e7   : > { %8967 = vperm.xlu0 %13320, %v8438_v58   ;;  %8736 = vperm.xlu1 %13336, %v8456_v37   ;;  %v8430_v58 = vld [vmem:[%s21106_s3 + $0x58] sm:$0xff]  ;;  %v8429_v37 = vld [vmem:[%s21106_s3 + $0x50] sm:$0xff] }
0x16eb   : > { %8972 = vperm.xlu0 %13320, %v8439_v62   ;;  %8741 = vperm.xlu1 %13336, %v8457_v21   ;;  %v8431_v62 = vld [vmem:[%s21106_s3 + $0x60] sm:$0xff]  ;;  %v8434_v21 = vld [vmem:[%s21106_s3 + $0x78] sm:$0xff] }
0x16ef   : > { %8977 = vperm.xlu0 %13320, %v8440_v60   ;;  %8746 = vperm.xlu1 %13336, %v8458_v31   ;;  %v8433_v60 = vld [vmem:[%s21106_s3 + $0x70] sm:$0xff]  ;;  %v21115_v31 = vld [vmem:[#allocation51_spill] sm:$0xff] }
0x16f0   : > { %vm21116_vm15 = vcmp.eq.s32.totalorder %v21115_v31, %v21047_v54  ;;  %vm21120_vm7 = vcmp.eq.s32.totalorder %v21115_v31, %v21051_v63 }
0x16f3   : > { %8982 = vperm.xlu0 %13320, %v8441_v6   ;;  %v2923_v6 = vsel %vm21116_vm15, 1.0, %v20554_v29 }
0x16f7   : > { %8987 = vperm.xlu0 %13320, %v8442_v38   ;;  %v13031_v38 = vpack.c.bf16 %v2923_v6, %v13959_v17 }
0x1729   : > { %v13559_v3 = vpop.permute.xlu1 %13558 }
0x172a   : > { %v13561_v25 = vunpack.i.h.bf16 %v13559_v3  ;;  %v13560_v14 = vunpack.i.l.bf16 %v13559_v3  ;;  %v21117_v3 = vld [vmem:[#allocation50_spill] sm:$0xff] }
0x172b   : > { %vm21121_vm4 = vcmp.eq.s32.totalorder %v21117_v3, %v21051_v63 }
0x172c   : > { %v12984_v47 = vpack.c.bf16 %v13561_v25, %v13560_v14 }
0x172e   : > { %12986 = vmatpush1.bf16.msk.msra.mxu1 %vm18480_vm11, %v12984_v47 }
0x172f   : > { %12987 = vmatprep.subr.bf16.mxu1 %v21001_v48 }
0x1731   : > { %v13564_v20 = vpop.permute.xlu0 %13563 }
0x1732   : > { %v13566_v55 = vunpack.i.h.bf16 %v13564_v20  ;;  %v13565_v32 = vunpack.i.l.bf16 %v13564_v20 }
0x1734   : > { %v12988_v11 = vpack.c.bf16 %v13566_v55, %v13565_v32 }
0x1736   : > { %12990 = vmatpush1.bf16.msk.msra.mxu1 %vm18480_vm11, %v12988_v11 }
0x1737   : > { %12991 = vmatprep.subr.bf16.mxu1 %v21001_v48 }
0x1739   : > { %v13569_v30 = vpop.permute.xlu1 %13568 }
0x173a   : > { %v13571_v15 = vunpack.i.h.bf16 %v13569_v30  ;;  %v13570_v22 = vunpack.i.l.bf16 %v13569_v30 }
0x173c   : > { %v12992_v4 = vpack.c.bf16 %v13571_v15, %v13570_v22 }
0x173d   : > { %v13579_v36 = vpop.permute.xlu1 %13578 }
0x173e   : > { %12994 = vmatpush1.bf16.msk.msra.mxu1 %vm18480_vm11, %v12992_v4  ;;  %v13581_v44 = vunpack.i.h.bf16 %v13579_v36  ;;  %v13580_v50 = vunpack.i.l.bf16 %v13579_v36 }
0x173f   : > { %12995 = vmatprep.subr.bf16.mxu1 %v21001_v48 }
0x1740   : > { %v13012_v1 = vpack.c.bf16 %v13581_v44, %v13580_v50  ;;  %v4331_v50 = vsel %vm21120_vm7, 1.0, %v20554_v29 }
0x1741   : > { %v13574_v59 = vpop.permute.xlu0 %13573  ;;  %v13589_v53 = vpop.permute.xlu1 %13588 }
0x1742   : > { %v13576_v43 = vunpack.i.h.bf16 %v13574_v59  ;;  %v13575_v40 = vunpack.i.l.bf16 %v13574_v59 }
0x1744   : > { %v12996_v12 = vpack.c.bf16 %v13576_v43, %v13575_v40 }
0x1745   : > { %v13584_v52 = vpop.permute.xlu0 %13583 }
0x1746   : > { %12998 = vmatpush1.bf16.msk.msra.mxu1 %vm18480_vm11, %v12996_v12  ;;  %v13585_v7 = vunpack.i.l.bf16 %v13584_v52  ;;  %vm21108_vm11 = vmmov %vm21097_vm0 }
0x1747   : > { %12999 = vmatprep.subr.bf16.mxu1 %v21001_v48 }
0x1749   : > { %v13594_v23 = vpop.permute.xlu0 %13593 }
0x174a   : > { %13001 = vmatpush1.bf16.msra.mxu1 %v19526_v5  ;;  %v13586_v5 = vunpack.i.h.bf16 %v13584_v52  ;;  %v13596_v41 = vunpack.i.h.bf16 %v13594_v23 }
0x174b   : > { %13002 = vmatprep.subr.bf16.mxu1 %v21001_v48 }
0x174c   : > { %v13016_v61 = vpack.c.bf16 %v13586_v5, %v13585_v7 }
0x174e   : > { %13004 = vmatpush1.bf16.msra.mxu1 %v19529_v8  ;;  %v13591_v8 = vunpack.i.h.bf16 %v13589_v53 }
0x174f   : > { %13005 = vmatprep.subr.bf16.mxu1 %v21001_v48 }
0x1752   : > { %13007 = vmatpush1.bf16.msra.mxu1 %v19532_v28  ;;  %v13590_v28 = vunpack.i.l.bf16 %v13589_v53  ;;  %v8712_v25 = vpop.permute.xlu1 %8711 }
0x1753   : > { %13008 = vmatprep.subr.bf16.mxu1 %v21001_v48  ;;  %v8840_v30 = vadd.f32 %v19542_v9, %v8712_v25 }
0x1754   : > { %v13020_v0 = vpack.c.bf16 %v13591_v8, %v13590_v28  ;;  %v13041_v8 = vpack.c.bf16 %v4331_v50, %v13959_v17 }
0x1756   : > { %13010 = vmatpush1.bf16.msra.mxu1 %v19536_v39  ;;  %v13595_v39 = vunpack.i.l.bf16 %v13594_v23  ;;  %v8717_v47 = vpop.permute.xlu1 %8716 }
0x1757   : > { %13011 = vmatprep.subr.bf16.mxu1 %v21001_v48  ;;  %v8845_v40 = vadd.f32 %v19538_v45, %v8717_v47 }
0x1758   : > { %v13024_v13 = vpack.c.bf16 %v13596_v41, %v13595_v39 }
0x175a   : > { %13014 = vmatpush1.bf16.msk.msra.mxu1 %vm19483_vm9, %v13012_v1  ;;  %v8953_v14 = vpop.permute.xlu0 %8952  ;;  %v8722_v55 = vpop.permute.xlu1 %8721 }
0x175b   : > { %13015 = vmatprep.subr.bf16.mxu1 %v21001_v48  ;;  %v8850_v5 = vadd.f32 %v19552_v49, %v8722_v55 }
0x175e   : > { %13018 = vmatpush1.bf16.msk.msra.mxu1 %vm19483_vm9, %v13016_v61  ;;  %v8958_v20 = vpop.permute.xlu0 %8957 }
0x175f   : > { %13019 = vmatprep.subr.bf16.mxu1 %v21001_v48 }
0x1762   : > { %13022 = vmatpush1.bf16.msk.msra.mxu1 %vm19483_vm9, %v13020_v0  ;;  %v8963_v32 = vpop.permute.xlu0 %8962 }
0x1763   : > { %13023 = vmatprep.subr.bf16.mxu1 %v21001_v48  ;;  %v8423_v48 = vld [vmem:[%s21106_s3 + $0x20] sm:$0xff] }
0x1766   : > { %13026 = vmatpush1.bf16.msk.msra.mxu1 %vm19483_vm9, %v13024_v13  ;;  %vm21114_vm9 = vmmov %vm21097_vm0  ;;  %vm21118_vm0 = vcmp.eq.s32.totalorder %v21117_v3, %v21047_v54  ;;  %v8727_v54 = vpop.permute.xlu1 %8726  ;;  %v8968_v59 = vpop.permute.xlu0 %8967 }
0x1767   : > { %vm13032_vm10 = vmpackc.low %vm21119_vm13, %vm21118_vm0  ;;  %v8855_v49 = vadd.f32 %v19548_v2, %v8727_v54 }
0x1768   : > { %13033 = vmatprep.subr.msk.bf16.mxu0 %vm13032_vm10, %v13031_v38 }
0x1769   : > { %9079 = vmatmul.mubr.f32.vlgmr.msra.gmra.mrb[66].mxu1 %v8419_v16  ;;  %13036 = vmatpush3.bf16.msk.msra.mxu0 %vm13032_vm10, %v13031_v38 }
0x176a   : > { %10987 = vmatprep.mubr.msk.f32.mxu1 %vm21108_vm11, %v8422_v19  ;;  %13038 = vmatprep.subr.msk.bf16.mxu0 %vm21015_vm12, %v20280_v10  ;;  %v8732_v52 = vpop.permute.xlu1 %8731  ;;  %v8973_v28 = vpop.permute.xlu0 %8972  ;;  %vm13042_vm11 = vmpackc.low %vm21122_vm6, %vm21121_vm4 }
0x176b   : > { %v8860_v16 = vadd.f32 %v19560_v34, %v8732_v52 }
0x176d   : > { %9084 = vmatmul.mubr.f32.gmra.mrb[68].mxu1 %v8421_v26 }
0x176e   : > { %10988 = vmatprep.mubr.msk.f32.mxu1 %vm21109_vm5, %v8424_v35  ;;  %v8737_v17 = vpop.permute.xlu1 %8736  ;;  %v8978_v63 = vpop.permute.xlu0 %8977 }
0x1771   : > { %9089 = vmatmul.mubr.f32.gmra.mrb[70].mxu1 %v8423_v48  ;;  %v8865_v48 = vadd.f32 %v19556_v27, %v8737_v17 }
0x1772   : > { %10989 = vmatprep.mubr.msk.f32.mxu1 %vm21110_vm14, %v8426_v24 }
0x1775   : > { %9094 = vmatmul.mubr.f32.gmra.mrb[72].mxu1 %v8425_v56 }
0x1776   : > { %10990 = vmatprep.mubr.msk.f32.mxu1 %vm21111_vm2, %v8428_v51 }
0x1779   : > { %9099 = vmatmul.mubr.f32.gmra.mrb[74].mxu1 %v8427_v46  ;;  %v8983_v46 = vpop.permute.xlu0 %8982 }
0x177a   : > { %10991 = vmatprep.mubr.msk.f32.mxu1 %vm21112_vm1, %v8430_v58 }
0x177d   : > { %9104 = vmatmul.mubr.f32.gmra.mrb[76].mxu1 %v8429_v37  ;;  %v8988_v6 = vpop.permute.xlu0 %8987 }
0x177e   : > { %10992 = vmatprep.mubr.msk.f32.mxu1 %vm21113_vm3, %v8432_v42 }
0x1781   : > { %9109 = vmatmul.mubr.f32.gmra.mrb[78].mxu1 %v8431_v62 }
0x1782   : > { %10993 = vmatprep.mubr.msk.f32.mxu1 %vm21114_vm9, %v8434_v21 }
0x1785   : > { %9114 = vmatmul.mubr.f32.gmra.mrb[80].mxu1 %v8433_v60 }
0x183c   : > { %v9080_v11 = vpop.f32.mrb[66].mxu1 }
0x183d   : > { %v9081_v15 = vadd.f32 %v9080_v11, %v8953_v14  ;;  %v9082_v22 = vpop.f32.mrb[67].mxu1 }
0x183f   : > { %v19642_v4 = vadd.f32 %v9081_v15, %v8840_v30 }
0x1840   : > { %v9085_v43 = vpop.f32.mrb[68].mxu1 }
0x1841   : > { %v9127_v12 = vmax.f32 %v19642_v4, 0.0  ;;  %v9086_v36 = vadd.f32 %v9085_v43, %v8958_v20  ;;  %v9087_v44 = vpop.f32.mrb[69].mxu1 }
0x1843   : > { %v9120_v9 = vadd.f32 %v9086_v36, %v8845_v40  ;;  %11482 = vmatprep.mubr.msk.f32.mxu0 %vm9135_vm8, %v9127_v12 }
0x1844   : > { %v9090_v1 = vpop.f32.mrb[70].mxu1 }
0x1845   : > { %v9128_v7 = vmax.f32 %v9120_v9, 0.0  ;;  %v9091_v45 = vadd.f32 %v9090_v1, %v8963_v32  ;;  %v9092_v53 = vpop.f32.mrb[71].mxu1 }
0x1847   : > { %v9121_v29 = vadd.f32 %v9091_v45, %v8850_v5  ;;  %11483 = vmatmul.mubr.msk.f32.vlgmr.msra.gmra.mrb[86].mxu0 %vm9135_vm8, %v9128_v7 }
0x1848   : > { %v9095_v61 = vpop.f32.mrb[72].mxu1  ;;  %13040 = vmatpush3.bf16.msk.msra.mxu0 %vm21015_vm12, %v20280_v10  ;;  %v8742_v10 = vpop.permute.xlu1 %8741  ;;  %vm9384_vm12 = vcmask 105472  }
0x1849   : > { %v9129_v23 = vmax.f32 %v9121_v29, 0.0  ;;  %v9096_v0 = vadd.f32 %v9095_v61, %v8968_v59  ;;  %v9097_v41 = vpop.f32.mrb[73].mxu1  ;;  %13043 = vmatprep.subr.msk.bf16.mxu0 %vm13042_vm11, %v13041_v8  ;;  %v8870_v34 = vadd.f32 %v19570_v57, %v8742_v10 }
0x184b   : > { %v9122_v39 = vadd.f32 %v9096_v0, %v8855_v49  ;;  %11485 = vmatprep.mubr.msk.f32.mxu0 %vm9135_vm8, %v9129_v23 }
0x184c   : > { %v9100_v13 = vpop.f32.mrb[74].mxu1  ;;  %13046 = vmatpush3.bf16.msk.msra.mxu0 %vm13042_vm11, %v13041_v8  ;;  %v8747_v60 = vpop.permute.xlu1 %8746 }
0x184d   : > { %v9130_v19 = vmax.f32 %v9122_v39, 0.0  ;;  %v9101_v26 = vadd.f32 %v9100_v13, %v8973_v28  ;;  %v9102_v35 = vpop.f32.mrb[75].mxu1  ;;  %v8875_v27 = vadd.f32 %v19565_v18, %v8747_v60 }
0x184f   : > { %v9123_v33 = vadd.f32 %v9101_v26, %v8860_v16  ;;  %11486 = vmatmul.mubr.msk.f32.gmra.mrb[88].mxu0 %vm9135_vm8, %v9130_v19 }
0x1850   : > { %v9105_v2 = vpop.f32.mrb[76].mxu1 }
0x1851   : > { %v9131_v24 = vmax.f32 %v9123_v33, 0.0  ;;  %v9106_v56 = vadd.f32 %v9105_v2, %v8978_v63  ;;  %v9107_v51 = vpop.f32.mrb[77].mxu1 }
0x1853   : > { %v9124_v58 = vadd.f32 %v9106_v56, %v8865_v48  ;;  %11488 = vmatprep.mubr.msk.f32.mxu0 %vm9135_vm8, %v9131_v24 }
0x1854   : > { %v9110_v37 = vpop.f32.mrb[78].mxu1 }
0x1855   : > { %v9132_v42 = vmax.f32 %v9124_v58, 0.0  ;;  %v9111_v62 = vadd.f32 %v9110_v37, %v8983_v46  ;;  %v9112_v21 = vpop.f32.mrb[79].mxu1 }
0x1857   : > { %v9125_v31 = vadd.f32 %v9111_v62, %v8870_v34  ;;  %11489 = vmatmul.mubr.msk.f32.gmra.mrb[90].mxu0 %vm9135_vm8, %v9132_v42 }
0x1858   : > { %v9115_v38 = vpop.f32.mrb[80].mxu1 }
0x1859   : > { %v9133_v3 = vmax.f32 %v9125_v31, 0.0  ;;  %v9116_v25 = vadd.f32 %v9115_v38, %v8988_v6  ;;  %v9117_v14 = vpop.f32.mrb[81].mxu1 }
0x185b   : > { %v9126_v47 = vadd.f32 %v9116_v25, %v8875_v27  ;;  %11491 = vmatprep.mubr.msk.f32.mxu0 %vm9135_vm8, %v9133_v3 }
0x185d   : > { %v9134_v20 = vmax.f32 %v9126_v47, 0.0 }
0x185f   : > { %11492 = vmatmul.mubr.msk.f32.gmra.mrb[92].mxu0 %vm9135_vm8, %v9134_v20 }
0x1860   : > { %11502 = vmatprep.mubr.msk.f32.mxu0 %vm9135_vm8, %v9127_v12 }
0x1863   : > { %11503 = vmatmul.mubr.msk.f32.vlgmr.msra.gmra.mrb[94].mxu0 %vm9135_vm8, %v9128_v7 }
0x1864   : > { %11505 = vmatprep.mubr.msk.f32.mxu0 %vm9135_vm8, %v9129_v23 }
0x1867   : > { %11506 = vmatmul.mubr.msk.f32.gmra.mrb[96].mxu0 %vm9135_vm8, %v9130_v19 }
0x1868   : > { %11508 = vmatprep.mubr.msk.f32.mxu0 %vm9135_vm8, %v9131_v24 }
0x186b   : > { %11509 = vmatmul.mubr.msk.f32.gmra.mrb[98].mxu0 %vm9135_vm8, %v9132_v42 }
0x186c   : > { %11511 = vmatprep.mubr.msk.f32.mxu0 %vm9135_vm8, %v9133_v3 }
0x186f   : > { %11512 = vmatmul.mubr.msk.f32.gmra.mrb[100].mxu0 %vm9135_vm8, %v9134_v20 }
0x191a   : > { %v11484_v18 = vpop.f32.mrb[86].mxu0 }
0x191b   : > { %v9229_v57 = vpop.f32.mrb[87].mxu0 }
0x1922   : > { %v11487_v55 = vpop.f32.mrb[88].mxu0 }
0x1923   : > { %v9239_v32 = vpop.f32.mrb[89].mxu0 }
0x192a   : > { %v11490_v11 = vpop.f32.mrb[90].mxu0 }
0x192b   : > { %v9249_v30 = vpop.f32.mrb[91].mxu0 }
0x1932   : > { %v11493_v15 = vpop.f32.mrb[92].mxu0 }
0x1933   : > { %v9259_v22 = vpop.f32.mrb[93].mxu0 }
0x1936   : > { %v11504_v54 = vpop.f32.mrb[94].mxu0 }
0x1937   : > { %v9377_v4 = vmax.f32 %v11484_v18, %v11504_v54  ;;  %v9337_v59 = vpop.f32.mrb[95].mxu0 }
0x1938   : > { %v9376_v43 = vmax.f32 %v9229_v57, %v9337_v59 }
0x1939   : > { %9386 = vst.msk [vmem:[%s1258_s15 + $0x8] sm:$0xff] %vm9384_vm12, %v9377_v4 }
0x193a   : > { %9385 = vst.msk [vmem:[%s1258_s15] sm:$0xff] %vm9384_vm12, %v9376_v43  ;;  %v11507_v40 = vpop.f32.mrb[96].mxu0 }
0x193b   : > { %v9379_v12 = vmax.f32 %v11487_v55, %v11507_v40  ;;  %v9347_v36 = vpop.f32.mrb[97].mxu0 }
0x193c   : > { %v9378_v44 = vmax.f32 %v9239_v32, %v9347_v36 }
0x193d   : > { %9388 = vst.msk [vmem:[%s1258_s15 + $0x18] sm:$0xff] %vm9384_vm12, %v9379_v12 }
0x193e   : > { %9387 = vst.msk [vmem:[%s1258_s15 + $0x10] sm:$0xff] %vm9384_vm12, %v9378_v44  ;;  %v11510_v50 = vpop.f32.mrb[98].mxu0 }
0x193f   : > { %v9381_v9 = vmax.f32 %v11490_v11, %v11510_v50  ;;  %v9357_v52 = vpop.f32.mrb[99].mxu0 }
0x1940   : > { %v9380_v1 = vmax.f32 %v9249_v30, %v9357_v52 }
0x1941   : > { %9390 = vst.msk [vmem:[%s1258_s15 + $0x28] sm:$0xff] %vm9384_vm12, %v9381_v9 }
0x1942   : > { %9389 = vst.msk [vmem:[%s1258_s15 + $0x20] sm:$0xff] %vm9384_vm12, %v9380_v1  ;;  %v11513_v5 = vpop.f32.mrb[100].mxu0 }
0x1943   : > { %v9383_v7 = vmax.f32 %v11493_v15, %v11513_v5  ;;  %v9367_v45 = vpop.f32.mrb[101].mxu0 }
0x1944   : > { %v9382_v53 = vmax.f32 %v9259_v22, %v9367_v45 }
0x1945   : > { %9392 = vst.msk [vmem:[%s1258_s15 + $0x38] sm:$0xff] %vm9384_vm12, %v9383_v7 }
0x1946   : > { %9391 = vst.msk [vmem:[%s1258_s15 + $0x30] sm:$0xff] %vm9384_vm12, %v9382_v53 }
0x1947 PF: > { %p89_p0 = scmp.ge.s32.totalorder %s14315_s8, 4   ;;  %s21124_s7 = smov %s13893_s10 }
0x1948   : > { %s21125_s10 = smov %s13897_s11  ;;  %s21126_s11 = smov %s14327_s0 }
0x1949   : > { %s21127_s15 = smov %s14315_s8  ;;  %91 = sbr.rel (!%p89_p0) target bundleno = 80 (0x50), region = 277 }
0x1950   :  { %9414 = vsyncpa [#allocation3], 1 }
0x1951   :  { %9416 = vsyncpa [#allocation3 + $0x1], 1 }
0x1952   :  { %9417 = vsyncpa [#allocation5], 1 }
0x1953   :  { %9418 = vsyncpa [#allocation8], 1 }
0x1954   :  { %9419 = vsyncpa [#allocation11], 1 }
0x1955   :  { %9420 = vsyncpa [#allocation14], 1 }

</bundles_post_ra>
